<compile_context>
chip_gen: v5e
topology: v5e:2x2
jax: 0.10.0
libtpu: 0.0.40
codegen_flags: <defaults>
</compile_context>

<pallas_src>
import jax
import jax.numpy as jnp
from jax.experimental import pallas as pl
from jax.experimental.pallas import tpu as pltpu

_EPS = 1e-5


# ------------------------------ in-kernel helpers ------------------------------


def _bn_per_half(y, n_half, eps):
    """Training-mode BatchNorm (biased var) computed separately for rows [:n_half]
    and [n_half:] of a stacked (2N, C) activation — matches two separate PyTorch
    forward calls while the matmul ran on the stacked batch."""

    def norm(z):
        mean = jnp.mean(z, axis=0, keepdims=True)
        var = jnp.mean((z - mean) * (z - mean), axis=0, keepdims=True)
        return (z - mean) * jax.lax.rsqrt(var + eps)

    return jnp.concatenate([norm(y[:n_half]), norm(y[n_half:])], axis=0)


def _apply_stack(x, params, flags, eps, n_half):
    """Run stacked x (2N, Cin) f32 through Linear(bias=False)[+BN][+ReLU] layers.

    params: flat list of jnp VALUES per layer -> wt (Cin,Cout) already bf16
            [, gamma (1,Cout), beta (1,Cout) f32 if affine].
    flags:  static tuple of (bn, relu, affine) per layer.
    One matmul per layer for BOTH inputs (bf16 MXU, f32 accumulation); BN/ReLU f32.
    """
    h = x
    idx = 0
    for (bn, relu, affine) in flags:
        wt = params[idx]
        idx += 1
        y = jnp.dot(h.astype(jnp.bfloat16), wt, preferred_element_type=jnp.float32)
        if bn:
            y = _bn_per_half(y, n_half, eps)
            if affine:
                g = params[idx]
                b = params[idx + 1]
                idx += 2
                y = y * g + b
        if relu:
            y = jnp.maximum(y, 0.0)
        h = y
    return h


def _contrastive_pair_stats(q, k, T, topk):
    """loss (CE * 2T) and [mrr, acc@k...] for one (q, k) pair, all f32 math."""
    N = q.shape[0]
    # F.normalize(dim=1, eps=1e-12): exact rsqrt (single EUP op, no approx recip).
    qn = q * jax.lax.rsqrt(jnp.maximum(jnp.sum(q * q, axis=1, keepdims=True), 1e-24))
    kn = k * jax.lax.rsqrt(jnp.maximum(jnp.sum(k * k, axis=1, keepdims=True), 1e-24))

    # einsum('nc,mc->nm') / T   (tiny matmul, kept f32: exact ranking matters)
    logits = jax.lax.dot_general(
        qn, kn, (((1,), (1,)), ((), ())), preferred_element_type=jnp.float32
    ) * (1.0 / T)

    row = jax.lax.broadcasted_iota(jnp.int32, (N, N), 0)
    col = jax.lax.broadcasted_iota(jnp.int32, (N, N), 1)
    tgt = jnp.sum(jnp.where(row == col, logits, 0.0), axis=1, keepdims=True)  # logits[i,i]

    # CrossEntropyLoss(labels=arange(N)), mean reduction, scaled by 2*T.
    mx = jnp.max(logits, axis=1, keepdims=True)
    lse = mx + jnp.log(jnp.sum(jnp.exp(logits - mx), axis=1, keepdims=True))
    loss = jnp.mean(lse - tgt) * (2.0 * T)

    # rank of the correct (diagonal) logit (0 = best); matches torch.topk w/o ties.
    rank = jnp.sum(jnp.where(logits > tgt, 1.0, 0.0), axis=1, keepdims=True)
    maxk = max(topk)
    mrr = jnp.sum(jnp.where(rank < maxk, 1.0 / (rank + 1.0), 0.0)) * (1.0 / N)
    accs = [jnp.sum(jnp.where(rank < kk, 1.0, 0.0)) * (100.0 / N) for kk in topk]
    return loss, [mrr] + accs


def _make_fused_kernel(enc_flags, pred_flags, *, eps, m, n_half, T, topk):
    """One kernel: momentum update + enc_q/predictor + enc_k (stacked inputs) + losses."""
    enc_np = sum(1 + (2 if aff else 0) for (_, _, aff) in enc_flags)
    pred_np = sum(1 + (2 if aff else 0) for (_, _, aff) in pred_flags)
    n_in = 1 + 2 * enc_np + pred_np
    all_flags = tuple(enc_flags) + tuple(pred_flags)

    def kernel(*refs):
        x_ref = refs[0]
        pk_refs = refs[1:1 + enc_np]                       # key-encoder params (f32)
        pq_refs = refs[1 + enc_np:1 + 2 * enc_np]          # query-encoder params (f32)
        pr_refs = refs[1 + 2 * enc_np:n_in]                # predictor params (wt bf16)
        out_ref = refs[n_in]                               # (1, 8) stats
        newk_refs = refs[n_in + 1:]                        # aliased to pk inputs

        # ---- momentum update (f32) + build per-branch value lists.
        # Weights are cast to bf16 exactly ONCE here (hoisted out of the stack).
        k_vals, q_vals = [], []
        idx = 0
        for (_bn, _relu, aff) in enc_flags:
            pq_w = pq_refs[idx][...]
            new_w = pk_refs[idx][...] * m + pq_w * (1.0 - m)
            newk_refs[idx][...] = new_w
            k_vals.append(new_w.astype(jnp.bfloat16))
            q_vals.append(pq_w.astype(jnp.bfloat16))
            idx += 1
            if aff:
                for _ in range(2):                         # BN gamma, beta stay f32
                    pq_p = pq_refs[idx][...]
                    new_p = pk_refs[idx][...] * m + pq_p * (1.0 - m)
                    newk_refs[idx][...] = new_p
                    k_vals.append(new_p)
                    q_vals.append(pq_p)
                    idx += 1
        idx = 0
        for (_bn, _relu, aff) in pred_flags:
            q_vals.append(pr_refs[idx][...].astype(jnp.bfloat16))  # already bf16 -> no-op
            idx += 1
            if aff:
                q_vals.append(pr_refs[idx][...])
                q_vals.append(pr_refs[idx + 1][...])
                idx += 2

        # ---- forwards: both inputs stacked -> ONE matmul per layer, per-half BN.
        x = x_ref[...]
        q_both = _apply_stack(x, q_vals, all_flags, eps, n_half)          # enc_q + pred
        k_both = _apply_stack(x, k_vals, tuple(enc_flags), eps, n_half)   # enc_k (updated)

        q1, q2 = q_both[:n_half], q_both[n_half:]
        k1, k2 = k_both[:n_half], k_both[n_half:]

        # ---- both contrastive losses + metrics (averaged over the two pairs).
        loss1, s1 = _contrastive_pair_stats(q1, k2, T, topk)
        loss2, s2 = _contrastive_pair_stats(q2, k1, T, topk)
        loss = loss1 + loss2
        stats = [(a + b) * 0.5 for a, b in zip(s1, s2)]

        # out = [loss, mrr, acc@1, acc@3, acc@5, acc@10, 0, 0]
        ocol = jax.lax.broadcasted_iota(jnp.int32, (1, 8), 1)
        out = jnp.where(ocol == 0, loss, jnp.zeros((1, 8), jnp.float32))
        for i, s in enumerate(stats):
            out = jnp.where(ocol == (1 + i), s, out)
        out_ref[...] = out

    return kernel


# -------------------------------- host wrappers --------------------------------


def _layer_flags(layer):
    return (layer["bn"], layer["relu"], layer["affine"])


def _layer_params(layer):
    ps = [layer["wt"]]
    if layer["affine"]:
        ps += [layer["gamma"], layer["beta"]]
    return ps


def constraint_model_forward(enc_q, enc_k, predictor, x_q, x_k, T=0.07, m=0.999,
                             topk=(1, 3, 5, 10)):
    """Full ConstraintModel.forward in ONE pallas_call.

    Returns (loss, [mrr, acc@1, acc@3, acc@5, acc@10], updated enc_k layers).
    """
    enc_flags = tuple(_layer_flags(l) for l in enc_k)
    pred_flags = tuple(_layer_flags(l) for l in predictor)

    pk_flat, pq_flat, pr_flat = [], [], []
    for lk in enc_k:
        pk_flat += _layer_params(lk)
    for lq in enc_q:
        pq_flat += _layer_params(lq)
    for lp in predictor:
        ps = _layer_params(lp)
        # Predictor weights have no in-kernel f32 consumer (no momentum update):
        # stream them in bf16 (halved HBM->VMEM bytes / VMEM residency).
        ps[0] = ps[0].astype(jnp.bfloat16)
        pr_flat += ps

    n = x_q.shape[0]
    x_both = jnp.concatenate([x_q, x_k], axis=0)           # (2N, F), one stacked LHS

    in_arrays = [x_both] + pk_flat + pq_flat + pr_flat
    vmem = pl.BlockSpec(memory_space=pltpu.MemorySpace.VMEM)  # whole array, no 2x buffering
    out_shapes = (jax.ShapeDtypeStruct((1, 8), jnp.float32),) + tuple(
        jax.ShapeDtypeStruct(p.shape, jnp.float32) for p in pk_flat)
    # In-place momentum update: each param_k input aliases its new-param output.
    aliases = {1 + i: 1 + i for i in range(len(pk_flat))}

    outs = pl.pallas_call(
        _make_fused_kernel(enc_flags, pred_flags, eps=_EPS, m=m,
                           n_half=n, T=T, topk=topk),
        out_shape=out_shapes,
        in_specs=[vmem] * len(in_arrays),
        out_specs=(vmem,) * len(out_shapes),
        input_output_aliases=aliases,
    )(*in_arrays)

    out = outs[0]
    new_flat = list(outs[1:])

    loss = out[0, 0]
    acc = [out[0, i:i + 1] for i in range(1, 6)]  # [mrr, acc@1, acc@3, acc@5, acc@10]

    new_layers = []
    idx = 0
    for lk in enc_k:
        nl = dict(lk)
        nl["wt"] = new_flat[idx]
        idx += 1
        if lk["affine"]:
            nl["gamma"] = new_flat[idx]
            nl["beta"] = new_flat[idx + 1]
            idx += 2
        new_layers.append(nl)
    return loss, acc, new_layers


# ------------------------------- model definition -------------------------------


def build_mlp_layers(key, num_layers, input_dim, mlp_dim, output_dim, last_bn=True):
    """Mirrors ConstraintModel._build_mlp. Weights pre-transposed ONCE to (in, out)."""
    layers = []
    for l in range(num_layers):
        dim1 = input_dim if l == 0 else mlp_dim
        dim2 = output_dim if l == num_layers - 1 else mlp_dim
        key, sub = jax.random.split(key)
        w = 0.02 * jax.random.normal(sub, (dim2, dim1), jnp.float32)  # torch (out, in)
        wt = jnp.asarray(w.T)                                         # stored (in, out)
        if l < num_layers - 1:
            layers.append(dict(wt=wt,
                               gamma=jnp.ones((1, dim2), jnp.float32),
                               beta=jnp.zeros((1, dim2), jnp.float32),
                               bn=True, relu=True, affine=True))
        else:
            # last layer: BN(affine=False) if last_bn else nothing (no dummy gamma/beta)
            layers.append(dict(wt=wt, bn=last_bn, relu=False, affine=False))
    return layers


def build_encoder_layers(key, input_dim, hidden_dim, mlp_dim, dim):
    k1, k2 = jax.random.split(key)
    # Synthetic backbone (the real encoder is an external module argument in PyTorch):
    # Linear(bias=False) + ReLU producing hidden_dim features, then encoder.fc (3-layer MLP).
    bb_w = 0.02 * jax.random.normal(k1, (hidden_dim, input_dim), jnp.float32)
    backbone = dict(wt=jnp.asarray(bb_w.T), bn=False, relu=True, affine=False)
    return [backbone] + build_mlp_layers(k2, 3, hidden_dim, mlp_dim, dim, last_bn=True)


# --------------------------------------- main ---------------------------------------

if __name__ == "__main__":
    # Small shapes consistent with the module (dim=128 kept; mlp_dim scaled down).
    N = 16          # batch (>= 10 for top-10 accuracy)
    F = 32          # raw input feature dim
    HIDDEN = 64     # backbone output dim (encoder.fc input dim)
    MLP_DIM = 256   # scaled-down from 4096
    DIM = 128       # projection dim
    T, M = 0.07, 0.999

    root = jax.random.PRNGKey(0)
    k_enc, k_pred, k_xq, k_xk = jax.random.split(root, 4)

    enc_q = build_encoder_layers(k_enc, F, HIDDEN, MLP_DIM, DIM)
    # encoder_k initialized as an exact copy of encoder_q (param_k.copy_(param_q)).
    enc_k = [dict(l) for l in enc_q]
    predictor = build_mlp_layers(k_pred, 2, DIM, MLP_DIM, DIM, last_bn=True)

    ng_list_q = jax.random.normal(k_xq, (N, F), jnp.float32)
    ng_list_k = jax.random.normal(k_xk, (N, F), jnp.float32)

    loss, acc, _ = constraint_model_forward(enc_q, enc_k, predictor,
                                            ng_list_q, ng_list_k, T=T, m=M)
    jax.block_until_ready(loss)
    for a in acc:
        jax.block_until_ready(a)

    print("KERNEL_OK")
</pallas_src>

<mosaic_0001>
module attributes {stable_mosaic.version = 11 : i64} {
  func.func @kernel(%arg0: memref<32x32xf32, #tpu.memory_space<vmem>>, %arg1: memref<32x64xf32, #tpu.memory_space<vmem>>, %arg2: memref<64x256xf32, #tpu.memory_space<vmem>>, %arg3: memref<1x256xf32, #tpu.memory_space<vmem>>, %arg4: memref<1x256xf32, #tpu.memory_space<vmem>>, %arg5: memref<256x256xf32, #tpu.memory_space<vmem>>, %arg6: memref<1x256xf32, #tpu.memory_space<vmem>>, %arg7: memref<1x256xf32, #tpu.memory_space<vmem>>, %arg8: memref<256x128xf32, #tpu.memory_space<vmem>>, %arg9: memref<32x64xf32, #tpu.memory_space<vmem>>, %arg10: memref<64x256xf32, #tpu.memory_space<vmem>>, %arg11: memref<1x256xf32, #tpu.memory_space<vmem>>, %arg12: memref<1x256xf32, #tpu.memory_space<vmem>>, %arg13: memref<256x256xf32, #tpu.memory_space<vmem>>, %arg14: memref<1x256xf32, #tpu.memory_space<vmem>>, %arg15: memref<1x256xf32, #tpu.memory_space<vmem>>, %arg16: memref<256x128xf32, #tpu.memory_space<vmem>>, %arg17: memref<128x256xbf16, #tpu.memory_space<vmem>>, %arg18: memref<1x256xf32, #tpu.memory_space<vmem>>, %arg19: memref<1x256xf32, #tpu.memory_space<vmem>>, %arg20: memref<256x128xbf16, #tpu.memory_space<vmem>>, %arg21: memref<1x8xf32, #tpu.memory_space<vmem>>, %arg22: memref<32x64xf32, #tpu.memory_space<vmem>>, %arg23: memref<64x256xf32, #tpu.memory_space<vmem>>, %arg24: memref<1x256xf32, #tpu.memory_space<vmem>>, %arg25: memref<1x256xf32, #tpu.memory_space<vmem>>, %arg26: memref<256x256xf32, #tpu.memory_space<vmem>>, %arg27: memref<1x256xf32, #tpu.memory_space<vmem>>, %arg28: memref<1x256xf32, #tpu.memory_space<vmem>>, %arg29: memref<256x128xf32, #tpu.memory_space<vmem>>) attributes {dimension_semantics = [], scalar_prefetch = 0 : i64, scratch_operands = 0 : i64, tpu.core_type = #tpu.core_type<tc>} {
    %c0 = arith.constant 0 : index
    %c0_0 = arith.constant 0 : index
    %0 = vector.load %arg9[%c0, %c0_0] : memref<32x64xf32, #tpu.memory_space<vmem>>, vector<32x64xf32>
    %c0_1 = arith.constant 0 : index
    %c0_2 = arith.constant 0 : index
    %1 = vector.load %arg1[%c0_1, %c0_2] : memref<32x64xf32, #tpu.memory_space<vmem>>, vector<32x64xf32>
    %cst = arith.constant 9.990000e-01 : f32
    %2 = vector.broadcast %cst : f32 to vector<32x64xf32>
    %3 = arith.mulf %1, %2 : vector<32x64xf32>
    %cst_3 = arith.constant 1.000000e-03 : f32
    %4 = vector.broadcast %cst_3 : f32 to vector<32x64xf32>
    %5 = arith.mulf %0, %4 : vector<32x64xf32>
    %6 = arith.addf %3, %5 : vector<32x64xf32>
    %c0_4 = arith.constant 0 : index
    %c0_5 = arith.constant 0 : index
    %7 = vector.load %arg22[%c0_4, %c0_5] : memref<32x64xf32, #tpu.memory_space<vmem>>, vector<32x64xf32>
    tpu.vector_store %arg22[%c0_4, %c0_5], %6 {strides = array<i32>} : memref<32x64xf32, #tpu.memory_space<vmem>>, vector<32x64xf32>,
    %8 = arith.truncf %6 : vector<32x64xf32> to vector<32x64xbf16>
    %9 = arith.truncf %0 : vector<32x64xf32> to vector<32x64xbf16>
    %c0_6 = arith.constant 0 : index
    %c0_7 = arith.constant 0 : index
    %10 = vector.load %arg10[%c0_6, %c0_7] : memref<64x256xf32, #tpu.memory_space<vmem>>, vector<64x256xf32>
    %c0_8 = arith.constant 0 : index
    %c0_9 = arith.constant 0 : index
    %11 = vector.load %arg2[%c0_8, %c0_9] : memref<64x256xf32, #tpu.memory_space<vmem>>, vector<64x256xf32>
    %cst_10 = arith.constant 9.990000e-01 : f32
    %12 = vector.broadcast %cst_10 : f32 to vector<64x256xf32>
    %13 = arith.mulf %11, %12 : vector<64x256xf32>
    %cst_11 = arith.constant 1.000000e-03 : f32
    %14 = vector.broadcast %cst_11 : f32 to vector<64x256xf32>
    %15 = arith.mulf %10, %14 : vector<64x256xf32>
    %16 = arith.addf %13, %15 : vector<64x256xf32>
    %c0_12 = arith.constant 0 : index
    %c0_13 = arith.constant 0 : index
    %17 = vector.load %arg23[%c0_12, %c0_13] : memref<64x256xf32, #tpu.memory_space<vmem>>, vector<64x256xf32>
    tpu.vector_store %arg23[%c0_12, %c0_13], %16 {strides = array<i32>} : memref<64x256xf32, #tpu.memory_space<vmem>>, vector<64x256xf32>,
    %18 = arith.truncf %16 : vector<64x256xf32> to vector<64x256xbf16>
    %19 = arith.truncf %10 : vector<64x256xf32> to vector<64x256xbf16>
    %c0_14 = arith.constant 0 : index
    %c0_15 = arith.constant 0 : index
    %20 = vector.load %arg11[%c0_14, %c0_15] : memref<1x256xf32, #tpu.memory_space<vmem>>, vector<1x256xf32>
    %c0_16 = arith.constant 0 : index
    %c0_17 = arith.constant 0 : index
    %21 = vector.load %arg3[%c0_16, %c0_17] : memref<1x256xf32, #tpu.memory_space<vmem>>, vector<1x256xf32>
    %cst_18 = arith.constant 9.990000e-01 : f32
    %22 = vector.broadcast %cst_18 : f32 to vector<1x256xf32>
    %23 = arith.mulf %21, %22 : vector<1x256xf32>
    %cst_19 = arith.constant 1.000000e-03 : f32
    %24 = vector.broadcast %cst_19 : f32 to vector<1x256xf32>
    %25 = arith.mulf %20, %24 : vector<1x256xf32>
    %26 = arith.addf %23, %25 : vector<1x256xf32>
    %c0_20 = arith.constant 0 : index
    %c0_21 = arith.constant 0 : index
    %27 = vector.load %arg24[%c0_20, %c0_21] : memref<1x256xf32, #tpu.memory_space<vmem>>, vector<1x256xf32>
    tpu.vector_store %arg24[%c0_20, %c0_21], %26 {strides = array<i32>} : memref<1x256xf32, #tpu.memory_space<vmem>>, vector<1x256xf32>,
    %c0_22 = arith.constant 0 : index
    %c0_23 = arith.constant 0 : index
    %28 = vector.load %arg12[%c0_22, %c0_23] : memref<1x256xf32, #tpu.memory_space<vmem>>, vector<1x256xf32>
    %c0_24 = arith.constant 0 : index
    %c0_25 = arith.constant 0 : index
    %29 = vector.load %arg4[%c0_24, %c0_25] : memref<1x256xf32, #tpu.memory_space<vmem>>, vector<1x256xf32>
    %cst_26 = arith.constant 9.990000e-01 : f32
    %30 = vector.broadcast %cst_26 : f32 to vector<1x256xf32>
    %31 = arith.mulf %29, %30 : vector<1x256xf32>
    %cst_27 = arith.constant 1.000000e-03 : f32
    %32 = vector.broadcast %cst_27 : f32 to vector<1x256xf32>
    %33 = arith.mulf %28, %32 : vector<1x256xf32>
    %34 = arith.addf %31, %33 : vector<1x256xf32>
    %c0_28 = arith.constant 0 : index
    %c0_29 = arith.constant 0 : index
    %35 = vector.load %arg25[%c0_28, %c0_29] : memref<1x256xf32, #tpu.memory_space<vmem>>, vector<1x256xf32>
    tpu.vector_store %arg25[%c0_28, %c0_29], %34 {strides = array<i32>} : memref<1x256xf32, #tpu.memory_space<vmem>>, vector<1x256xf32>,
    %c0_30 = arith.constant 0 : index
    %c0_31 = arith.constant 0 : index
    %36 = vector.load %arg13[%c0_30, %c0_31] : memref<256x256xf32, #tpu.memory_space<vmem>>, vector<256x256xf32>
    %c0_32 = arith.constant 0 : index
    %c0_33 = arith.constant 0 : index
    %37 = vector.load %arg5[%c0_32, %c0_33] : memref<256x256xf32, #tpu.memory_space<vmem>>, vector<256x256xf32>
    %cst_34 = arith.constant 9.990000e-01 : f32
    %38 = vector.broadcast %cst_34 : f32 to vector<256x256xf32>
    %39 = arith.mulf %37, %38 : vector<256x256xf32>
    %cst_35 = arith.constant 1.000000e-03 : f32
    %40 = vector.broadcast %cst_35 : f32 to vector<256x256xf32>
    %41 = arith.mulf %36, %40 : vector<256x256xf32>
    %42 = arith.addf %39, %41 : vector<256x256xf32>
    %c0_36 = arith.constant 0 : index
    %c0_37 = arith.constant 0 : index
    %43 = vector.load %arg26[%c0_36, %c0_37] : memref<256x256xf32, #tpu.memory_space<vmem>>, vector<256x256xf32>
    tpu.vector_store %arg26[%c0_36, %c0_37], %42 {strides = array<i32>} : memref<256x256xf32, #tpu.memory_space<vmem>>, vector<256x256xf32>,
    %44 = arith.truncf %42 : vector<256x256xf32> to vector<256x256xbf16>
    %45 = arith.truncf %36 : vector<256x256xf32> to vector<256x256xbf16>
    %c0_38 = arith.constant 0 : index
    %c0_39 = arith.constant 0 : index
    %46 = vector.load %arg14[%c0_38, %c0_39] : memref<1x256xf32, #tpu.memory_space<vmem>>, vector<1x256xf32>
    %c0_40 = arith.constant 0 : index
    %c0_41 = arith.constant 0 : index
    %47 = vector.load %arg6[%c0_40, %c0_41] : memref<1x256xf32, #tpu.memory_space<vmem>>, vector<1x256xf32>
    %cst_42 = arith.constant 9.990000e-01 : f32
    %48 = vector.broadcast %cst_42 : f32 to vector<1x256xf32>
    %49 = arith.mulf %47, %48 : vector<1x256xf32>
    %cst_43 = arith.constant 1.000000e-03 : f32
    %50 = vector.broadcast %cst_43 : f32 to vector<1x256xf32>
    %51 = arith.mulf %46, %50 : vector<1x256xf32>
    %52 = arith.addf %49, %51 : vector<1x256xf32>
    %c0_44 = arith.constant 0 : index
    %c0_45 = arith.constant 0 : index
    %53 = vector.load %arg27[%c0_44, %c0_45] : memref<1x256xf32, #tpu.memory_space<vmem>>, vector<1x256xf32>
    tpu.vector_store %arg27[%c0_44, %c0_45], %52 {strides = array<i32>} : memref<1x256xf32, #tpu.memory_space<vmem>>, vector<1x256xf32>,
    %c0_46 = arith.constant 0 : index
    %c0_47 = arith.constant 0 : index
    %54 = vector.load %arg15[%c0_46, %c0_47] : memref<1x256xf32, #tpu.memory_space<vmem>>, vector<1x256xf32>
    %c0_48 = arith.constant 0 : index
    %c0_49 = arith.constant 0 : index
    %55 = vector.load %arg7[%c0_48, %c0_49] : memref<1x256xf32, #tpu.memory_space<vmem>>, vector<1x256xf32>
    %cst_50 = arith.constant 9.990000e-01 : f32
    %56 = vector.broadcast %cst_50 : f32 to vector<1x256xf32>
    %57 = arith.mulf %55, %56 : vector<1x256xf32>
    %cst_51 = arith.constant 1.000000e-03 : f32
    %58 = vector.broadcast %cst_51 : f32 to vector<1x256xf32>
    %59 = arith.mulf %54, %58 : vector<1x256xf32>
    %60 = arith.addf %57, %59 : vector<1x256xf32>
    %c0_52 = arith.constant 0 : index
    %c0_53 = arith.constant 0 : index
    %61 = vector.load %arg28[%c0_52, %c0_53] : memref<1x256xf32, #tpu.memory_space<vmem>>, vector<1x256xf32>
    tpu.vector_store %arg28[%c0_52, %c0_53], %60 {strides = array<i32>} : memref<1x256xf32, #tpu.memory_space<vmem>>, vector<1x256xf32>,
    %c0_54 = arith.constant 0 : index
    %c0_55 = arith.constant 0 : index
    %62 = vector.load %arg16[%c0_54, %c0_55] : memref<256x128xf32, #tpu.memory_space<vmem>>, vector<256x128xf32>
    %c0_56 = arith.constant 0 : index
    %c0_57 = arith.constant 0 : index
    %63 = vector.load %arg8[%c0_56, %c0_57] : memref<256x128xf32, #tpu.memory_space<vmem>>, vector<256x128xf32>
    %cst_58 = arith.constant 9.990000e-01 : f32
    %64 = vector.broadcast %cst_58 : f32 to vector<256x128xf32>
    %65 = arith.mulf %63, %64 : vector<256x128xf32>
    %cst_59 = arith.constant 1.000000e-03 : f32
    %66 = vector.broadcast %cst_59 : f32 to vector<256x128xf32>
    %67 = arith.mulf %62, %66 : vector<256x128xf32>
    %68 = arith.addf %65, %67 : vector<256x128xf32>
    %c0_60 = arith.constant 0 : index
    %c0_61 = arith.constant 0 : index
    %69 = vector.load %arg29[%c0_60, %c0_61] : memref<256x128xf32, #tpu.memory_space<vmem>>, vector<256x128xf32>
    tpu.vector_store %arg29[%c0_60, %c0_61], %68 {strides = array<i32>} : memref<256x128xf32, #tpu.memory_space<vmem>>, vector<256x128xf32>,
    %70 = arith.truncf %68 : vector<256x128xf32> to vector<256x128xbf16>
    %71 = arith.truncf %62 : vector<256x128xf32> to vector<256x128xbf16>
    %c0_62 = arith.constant 0 : index
    %c0_63 = arith.constant 0 : index
    %72 = vector.load %arg17[%c0_62, %c0_63] : memref<128x256xbf16, #tpu.memory_space<vmem>>, vector<128x256xbf16>
    %c0_64 = arith.constant 0 : index
    %c0_65 = arith.constant 0 : index
    %73 = vector.load %arg18[%c0_64, %c0_65] : memref<1x256xf32, #tpu.memory_space<vmem>>, vector<1x256xf32>
    %c0_66 = arith.constant 0 : index
    %c0_67 = arith.constant 0 : index
    %74 = vector.load %arg19[%c0_66, %c0_67] : memref<1x256xf32, #tpu.memory_space<vmem>>, vector<1x256xf32>
    %c0_68 = arith.constant 0 : index
    %c0_69 = arith.constant 0 : index
    %75 = vector.load %arg20[%c0_68, %c0_69] : memref<256x128xbf16, #tpu.memory_space<vmem>>, vector<256x128xbf16>
    %c0_70 = arith.constant 0 : index
    %c0_71 = arith.constant 0 : index
    %76 = vector.load %arg0[%c0_70, %c0_71] : memref<32x32xf32, #tpu.memory_space<vmem>>, vector<32x32xf32>
    %77 = arith.truncf %76 : vector<32x32xf32> to vector<32x32xbf16>
    %cst_72 = arith.constant dense<0.000000e+00> : vector<32x64xf32>
    %78 = tpu.matmul %77, %9, %cst_72 {dimension_numbers = #tpu.dot_dimension_numbers<[1], [0], [0], [1], [0, 0, 1, 1], [], []>} : vector<32x32xbf16>, vector<32x64xbf16>, vector<32x64xf32> -> vector<32x64xf32>
    %cst_73 = arith.constant 0.000000e+00 : f32
    %79 = vector.broadcast %cst_73 : f32 to vector<32x64xf32>
    %80 = arith.maximumf %78, %79 : vector<32x64xf32>
    %81 = arith.truncf %80 : vector<32x64xf32> to vector<32x64xbf16>
    %cst_74 = arith.constant dense<0.000000e+00> : vector<32x256xf32>
    %82 = tpu.matmul %81, %19, %cst_74 {dimension_numbers = #tpu.dot_dimension_numbers<[1], [0], [0], [1], [0, 0, 1, 1], [], []>} : vector<32x64xbf16>, vector<64x256xbf16>, vector<32x256xf32> -> vector<32x256xf32>
    %83 = vector.extract_strided_slice %82 {offsets = [0, 0], sizes = [16, 256], strides = [1, 1]} : vector<32x256xf32> to vector<16x256xf32>
    %cst_75 = arith.constant dense<0.000000e+00> : vector<256xf32>
    %84 = vector.multi_reduction <add>, %83, %cst_75 [0] : vector<16x256xf32> to vector<256xf32>
    %85 = vector.shape_cast %84 : vector<256xf32> to vector<1x256xf32>
    %cst_76 = arith.constant 1.600000e+01 : f32
    %86 = vector.broadcast %cst_76 : f32 to vector<1x256xf32>
    %87 = arith.divf %85, %86 : vector<1x256xf32>
    %88 = vector.broadcast %87 : vector<1x256xf32> to vector<16x256xf32>
    %89 = arith.subf %83, %88 : vector<16x256xf32>
    %90 = vector.broadcast %87 : vector<1x256xf32> to vector<16x256xf32>
    %91 = arith.subf %83, %90 : vector<16x256xf32>
    %92 = arith.mulf %89, %91 : vector<16x256xf32>
    %cst_77 = arith.constant dense<0.000000e+00> : vector<256xf32>
    %93 = vector.multi_reduction <add>, %92, %cst_77 [0] : vector<16x256xf32> to vector<256xf32>
    %94 = vector.shape_cast %93 : vector<256xf32> to vector<1x256xf32>
    %cst_78 = arith.constant 1.600000e+01 : f32
    %95 = vector.broadcast %cst_78 : f32 to vector<1x256xf32>
    %96 = arith.divf %94, %95 : vector<1x256xf32>
    %97 = vector.broadcast %87 : vector<1x256xf32> to vector<16x256xf32>
    %98 = arith.subf %83, %97 : vector<16x256xf32>
    %cst_79 = arith.constant 9.99999974E-6 : f32
    %99 = vector.broadcast %cst_79 : f32 to vector<1x256xf32>
    %100 = arith.addf %96, %99 : vector<1x256xf32>
    %101 = math.rsqrt %100 : vector<1x256xf32>
    %102 = vector.broadcast %101 : vector<1x256xf32> to vector<16x256xf32>
    %103 = arith.mulf %98, %102 : vector<16x256xf32>
    %104 = vector.extract_strided_slice %82 {offsets = [16, 0], sizes = [16, 256], strides = [1, 1]} : vector<32x256xf32> to vector<16x256xf32>
    %cst_80 = arith.constant dense<0.000000e+00> : vector<256xf32>
    %105 = vector.multi_reduction <add>, %104, %cst_80 [0] : vector<16x256xf32> to vector<256xf32>
    %106 = vector.shape_cast %105 : vector<256xf32> to vector<1x256xf32>
    %cst_81 = arith.constant 1.600000e+01 : f32
    %107 = vector.broadcast %cst_81 : f32 to vector<1x256xf32>
    %108 = arith.divf %106, %107 : vector<1x256xf32>
    %109 = vector.broadcast %108 : vector<1x256xf32> to vector<16x256xf32>
    %110 = arith.subf %104, %109 : vector<16x256xf32>
    %111 = vector.broadcast %108 : vector<1x256xf32> to vector<16x256xf32>
    %112 = arith.subf %104, %111 : vector<16x256xf32>
    %113 = arith.mulf %110, %112 : vector<16x256xf32>
    %cst_82 = arith.constant dense<0.000000e+00> : vector<256xf32>
    %114 = vector.multi_reduction <add>, %113, %cst_82 [0] : vector<16x256xf32> to vector<256xf32>
    %115 = vector.shape_cast %114 : vector<256xf32> to vector<1x256xf32>
    %cst_83 = arith.constant 1.600000e+01 : f32
    %116 = vector.broadcast %cst_83 : f32 to vector<1x256xf32>
    %117 = arith.divf %115, %116 : vector<1x256xf32>
    %118 = vector.broadcast %108 : vector<1x256xf32> to vector<16x256xf32>
    %119 = arith.subf %104, %118 : vector<16x256xf32>
    %cst_84 = arith.constant 9.99999974E-6 : f32
    %120 = vector.broadcast %cst_84 : f32 to vector<1x256xf32>
    %121 = arith.addf %117, %120 : vector<1x256xf32>
    %122 = math.rsqrt %121 : vector<1x256xf32>
    %123 = vector.broadcast %122 : vector<1x256xf32> to vector<16x256xf32>
    %124 = arith.mulf %119, %123 : vector<16x256xf32>
    %125 = tpu.concatenate %103, %124 in 0 : vector<16x256xf32>, vector<16x256xf32> -> vector<32x256xf32>
    %126 = vector.broadcast %20 : vector<1x256xf32> to vector<32x256xf32>
    %127 = arith.mulf %125, %126 : vector<32x256xf32>
    %128 = vector.broadcast %28 : vector<1x256xf32> to vector<32x256xf32>
    %129 = arith.addf %127, %128 : vector<32x256xf32>
    %cst_85 = arith.constant 0.000000e+00 : f32
    %130 = vector.broadcast %cst_85 : f32 to vector<32x256xf32>
    %131 = arith.maximumf %129, %130 : vector<32x256xf32>
    %132 = arith.truncf %131 : vector<32x256xf32> to vector<32x256xbf16>
    %cst_86 = arith.constant dense<0.000000e+00> : vector<32x256xf32>
    %133 = tpu.matmul %132, %45, %cst_86 {dimension_numbers = #tpu.dot_dimension_numbers<[1], [0], [0], [1], [0, 0, 1, 1], [], []>} : vector<32x256xbf16>, vector<256x256xbf16>, vector<32x256xf32> -> vector<32x256xf32>
    %134 = vector.extract_strided_slice %133 {offsets = [0, 0], sizes = [16, 256], strides = [1, 1]} : vector<32x256xf32> to vector<16x256xf32>
    %cst_87 = arith.constant dense<0.000000e+00> : vector<256xf32>
    %135 = vector.multi_reduction <add>, %134, %cst_87 [0] : vector<16x256xf32> to vector<256xf32>
    %136 = vector.shape_cast %135 : vector<256xf32> to vector<1x256xf32>
    %cst_88 = arith.constant 1.600000e+01 : f32
    %137 = vector.broadcast %cst_88 : f32 to vector<1x256xf32>
    %138 = arith.divf %136, %137 : vector<1x256xf32>
    %139 = vector.broadcast %138 : vector<1x256xf32> to vector<16x256xf32>
    %140 = arith.subf %134, %139 : vector<16x256xf32>
    %141 = vector.broadcast %138 : vector<1x256xf32> to vector<16x256xf32>
    %142 = arith.subf %134, %141 : vector<16x256xf32>
    %143 = arith.mulf %140, %142 : vector<16x256xf32>
    %cst_89 = arith.constant dense<0.000000e+00> : vector<256xf32>
    %144 = vector.multi_reduction <add>, %143, %cst_89 [0] : vector<16x256xf32> to vector<256xf32>
    %145 = vector.shape_cast %144 : vector<256xf32> to vector<1x256xf32>
    %cst_90 = arith.constant 1.600000e+01 : f32
    %146 = vector.broadcast %cst_90 : f32 to vector<1x256xf32>
    %147 = arith.divf %145, %146 : vector<1x256xf32>
    %148 = vector.broadcast %138 : vector<1x256xf32> to vector<16x256xf32>
    %149 = arith.subf %134, %148 : vector<16x256xf32>
    %cst_91 = arith.constant 9.99999974E-6 : f32
    %150 = vector.broadcast %cst_91 : f32 to vector<1x256xf32>
    %151 = arith.addf %147, %150 : vector<1x256xf32>
    %152 = math.rsqrt %151 : vector<1x256xf32>
    %153 = vector.broadcast %152 : vector<1x256xf32> to vector<16x256xf32>
    %154 = arith.mulf %149, %153 : vector<16x256xf32>
    %155 = vector.extract_strided_slice %133 {offsets = [16, 0], sizes = [16, 256], strides = [1, 1]} : vector<32x256xf32> to vector<16x256xf32>
    %cst_92 = arith.constant dense<0.000000e+00> : vector<256xf32>
    %156 = vector.multi_reduction <add>, %155, %cst_92 [0] : vector<16x256xf32> to vector<256xf32>
    %157 = vector.shape_cast %156 : vector<256xf32> to vector<1x256xf32>
    %cst_93 = arith.constant 1.600000e+01 : f32
    %158 = vector.broadcast %cst_93 : f32 to vector<1x256xf32>
    %159 = arith.divf %157, %158 : vector<1x256xf32>
    %160 = vector.broadcast %159 : vector<1x256xf32> to vector<16x256xf32>
    %161 = arith.subf %155, %160 : vector<16x256xf32>
    %162 = vector.broadcast %159 : vector<1x256xf32> to vector<16x256xf32>
    %163 = arith.subf %155, %162 : vector<16x256xf32>
    %164 = arith.mulf %161, %163 : vector<16x256xf32>
    %cst_94 = arith.constant dense<0.000000e+00> : vector<256xf32>
    %165 = vector.multi_reduction <add>, %164, %cst_94 [0] : vector<16x256xf32> to vector<256xf32>
    %166 = vector.shape_cast %165 : vector<256xf32> to vector<1x256xf32>
    %cst_95 = arith.constant 1.600000e+01 : f32
    %167 = vector.broadcast %cst_95 : f32 to vector<1x256xf32>
    %168 = arith.divf %166, %167 : vector<1x256xf32>
    %169 = vector.broadcast %159 : vector<1x256xf32> to vector<16x256xf32>
    %170 = arith.subf %155, %169 : vector<16x256xf32>
    %cst_96 = arith.constant 9.99999974E-6 : f32
    %171 = vector.broadcast %cst_96 : f32 to vector<1x256xf32>
    %172 = arith.addf %168, %171 : vector<1x256xf32>
    %173 = math.rsqrt %172 : vector<1x256xf32>
    %174 = vector.broadcast %173 : vector<1x256xf32> to vector<16x256xf32>
    %175 = arith.mulf %170, %174 : vector<16x256xf32>
    %176 = tpu.concatenate %154, %175 in 0 : vector<16x256xf32>, vector<16x256xf32> -> vector<32x256xf32>
    %177 = vector.broadcast %46 : vector<1x256xf32> to vector<32x256xf32>
    %178 = arith.mulf %176, %177 : vector<32x256xf32>
    %179 = vector.broadcast %54 : vector<1x256xf32> to vector<32x256xf32>
    %180 = arith.addf %178, %179 : vector<32x256xf32>
    %cst_97 = arith.constant 0.000000e+00 : f32
    %181 = vector.broadcast %cst_97 : f32 to vector<32x256xf32>
    %182 = arith.maximumf %180, %181 : vector<32x256xf32>
    %183 = arith.truncf %182 : vector<32x256xf32> to vector<32x256xbf16>
    %cst_98 = arith.constant dense<0.000000e+00> : vector<32x128xf32>
    %184 = tpu.matmul %183, %71, %cst_98 {dimension_numbers = #tpu.dot_dimension_numbers<[1], [0], [0], [1], [0, 0, 1, 1], [], []>} : vector<32x256xbf16>, vector<256x128xbf16>, vector<32x128xf32> -> vector<32x128xf32>
    %185 = vector.extract_strided_slice %184 {offsets = [0, 0], sizes = [16, 128], strides = [1, 1]} : vector<32x128xf32> to vector<16x128xf32>
    %cst_99 = arith.constant dense<0.000000e+00> : vector<128xf32>
    %186 = vector.multi_reduction <add>, %185, %cst_99 [0] : vector<16x128xf32> to vector<128xf32>
    %187 = vector.shape_cast %186 : vector<128xf32> to vector<1x128xf32>
    %cst_100 = arith.constant 1.600000e+01 : f32
    %188 = vector.broadcast %cst_100 : f32 to vector<1x128xf32>
    %189 = arith.divf %187, %188 : vector<1x128xf32>
    %190 = vector.broadcast %189 : vector<1x128xf32> to vector<16x128xf32>
    %191 = arith.subf %185, %190 : vector<16x128xf32>
    %192 = vector.broadcast %189 : vector<1x128xf32> to vector<16x128xf32>
    %193 = arith.subf %185, %192 : vector<16x128xf32>
    %194 = arith.mulf %191, %193 : vector<16x128xf32>
    %cst_101 = arith.constant dense<0.000000e+00> : vector<128xf32>
    %195 = vector.multi_reduction <add>, %194, %cst_101 [0] : vector<16x128xf32> to vector<128xf32>
    %196 = vector.shape_cast %195 : vector<128xf32> to vector<1x128xf32>
    %cst_102 = arith.constant 1.600000e+01 : f32
    %197 = vector.broadcast %cst_102 : f32 to vector<1x128xf32>
    %198 = arith.divf %196, %197 : vector<1x128xf32>
    %199 = vector.broadcast %189 : vector<1x128xf32> to vector<16x128xf32>
    %200 = arith.subf %185, %199 : vector<16x128xf32>
    %cst_103 = arith.constant 9.99999974E-6 : f32
    %201 = vector.broadcast %cst_103 : f32 to vector<1x128xf32>
    %202 = arith.addf %198, %201 : vector<1x128xf32>
    %203 = math.rsqrt %202 : vector<1x128xf32>
    %204 = vector.broadcast %203 : vector<1x128xf32> to vector<16x128xf32>
    %205 = arith.mulf %200, %204 : vector<16x128xf32>
    %206 = vector.extract_strided_slice %184 {offsets = [16, 0], sizes = [16, 128], strides = [1, 1]} : vector<32x128xf32> to vector<16x128xf32>
    %cst_104 = arith.constant dense<0.000000e+00> : vector<128xf32>
    %207 = vector.multi_reduction <add>, %206, %cst_104 [0] : vector<16x128xf32> to vector<128xf32>
    %208 = vector.shape_cast %207 : vector<128xf32> to vector<1x128xf32>
    %cst_105 = arith.constant 1.600000e+01 : f32
    %209 = vector.broadcast %cst_105 : f32 to vector<1x128xf32>
    %210 = arith.divf %208, %209 : vector<1x128xf32>
    %211 = vector.broadcast %210 : vector<1x128xf32> to vector<16x128xf32>
    %212 = arith.subf %206, %211 : vector<16x128xf32>
    %213 = vector.broadcast %210 : vector<1x128xf32> to vector<16x128xf32>
    %214 = arith.subf %206, %213 : vector<16x128xf32>
    %215 = arith.mulf %212, %214 : vector<16x128xf32>
    %cst_106 = arith.constant dense<0.000000e+00> : vector<128xf32>
    %216 = vector.multi_reduction <add>, %215, %cst_106 [0] : vector<16x128xf32> to vector<128xf32>
    %217 = vector.shape_cast %216 : vector<128xf32> to vector<1x128xf32>
    %cst_107 = arith.constant 1.600000e+01 : f32
    %218 = vector.broadcast %cst_107 : f32 to vector<1x128xf32>
    %219 = arith.divf %217, %218 : vector<1x128xf32>
    %220 = vector.broadcast %210 : vector<1x128xf32> to vector<16x128xf32>
    %221 = arith.subf %206, %220 : vector<16x128xf32>
    %cst_108 = arith.constant 9.99999974E-6 : f32
    %222 = vector.broadcast %cst_108 : f32 to vector<1x128xf32>
    %223 = arith.addf %219, %222 : vector<1x128xf32>
    %224 = math.rsqrt %223 : vector<1x128xf32>
    %225 = vector.broadcast %224 : vector<1x128xf32> to vector<16x128xf32>
    %226 = arith.mulf %221, %225 : vector<16x128xf32>
    %227 = tpu.concatenate %205, %226 in 0 : vector<16x128xf32>, vector<16x128xf32> -> vector<32x128xf32>
    %228 = arith.truncf %227 : vector<32x128xf32> to vector<32x128xbf16>
    %cst_109 = arith.constant dense<0.000000e+00> : vector<32x256xf32>
    %229 = tpu.matmul %228, %72, %cst_109 {dimension_numbers = #tpu.dot_dimension_numbers<[1], [0], [0], [1], [0, 0, 1, 1], [], []>} : vector<32x128xbf16>, vector<128x256xbf16>, vector<32x256xf32> -> vector<32x256xf32>
    %230 = vector.extract_strided_slice %229 {offsets = [0, 0], sizes = [16, 256], strides = [1, 1]} : vector<32x256xf32> to vector<16x256xf32>
    %cst_110 = arith.constant dense<0.000000e+00> : vector<256xf32>
    %231 = vector.multi_reduction <add>, %230, %cst_110 [0] : vector<16x256xf32> to vector<256xf32>
    %232 = vector.shape_cast %231 : vector<256xf32> to vector<1x256xf32>
    %cst_111 = arith.constant 1.600000e+01 : f32
    %233 = vector.broadcast %cst_111 : f32 to vector<1x256xf32>
    %234 = arith.divf %232, %233 : vector<1x256xf32>
    %235 = vector.broadcast %234 : vector<1x256xf32> to vector<16x256xf32>
    %236 = arith.subf %230, %235 : vector<16x256xf32>
    %237 = vector.broadcast %234 : vector<1x256xf32> to vector<16x256xf32>
    %238 = arith.subf %230, %237 : vector<16x256xf32>
    %239 = arith.mulf %236, %238 : vector<16x256xf32>
    %cst_112 = arith.constant dense<0.000000e+00> : vector<256xf32>
    %240 = vector.multi_reduction <add>, %239, %cst_112 [0] : vector<16x256xf32> to vector<256xf32>
    %241 = vector.shape_cast %240 : vector<256xf32> to vector<1x256xf32>
    %cst_113 = arith.constant 1.600000e+01 : f32
    %242 = vector.broadcast %cst_113 : f32 to vector<1x256xf32>
    %243 = arith.divf %241, %242 : vector<1x256xf32>
    %244 = vector.broadcast %234 : vector<1x256xf32> to vector<16x256xf32>
    %245 = arith.subf %230, %244 : vector<16x256xf32>
    %cst_114 = arith.constant 9.99999974E-6 : f32
    %246 = vector.broadcast %cst_114 : f32 to vector<1x256xf32>
    %247 = arith.addf %243, %246 : vector<1x256xf32>
    %248 = math.rsqrt %247 : vector<1x256xf32>
    %249 = vector.broadcast %248 : vector<1x256xf32> to vector<16x256xf32>
    %250 = arith.mulf %245, %249 : vector<16x256xf32>
    %251 = vector.extract_strided_slice %229 {offsets = [16, 0], sizes = [16, 256], strides = [1, 1]} : vector<32x256xf32> to vector<16x256xf32>
    %cst_115 = arith.constant dense<0.000000e+00> : vector<256xf32>
    %252 = vector.multi_reduction <add>, %251, %cst_115 [0] : vector<16x256xf32> to vector<256xf32>
    %253 = vector.shape_cast %252 : vector<256xf32> to vector<1x256xf32>
    %cst_116 = arith.constant 1.600000e+01 : f32
    %254 = vector.broadcast %cst_116 : f32 to vector<1x256xf32>
    %255 = arith.divf %253, %254 : vector<1x256xf32>
    %256 = vector.broadcast %255 : vector<1x256xf32> to vector<16x256xf32>
    %257 = arith.subf %251, %256 : vector<16x256xf32>
    %258 = vector.broadcast %255 : vector<1x256xf32> to vector<16x256xf32>
    %259 = arith.subf %251, %258 : vector<16x256xf32>
    %260 = arith.mulf %257, %259 : vector<16x256xf32>
    %cst_117 = arith.constant dense<0.000000e+00> : vector<256xf32>
    %261 = vector.multi_reduction <add>, %260, %cst_117 [0] : vector<16x256xf32> to vector<256xf32>
    %262 = vector.shape_cast %261 : vector<256xf32> to vector<1x256xf32>
    %cst_118 = arith.constant 1.600000e+01 : f32
    %263 = vector.broadcast %cst_118 : f32 to vector<1x256xf32>
    %264 = arith.divf %262, %263 : vector<1x256xf32>
    %265 = vector.broadcast %255 : vector<1x256xf32> to vector<16x256xf32>
    %266 = arith.subf %251, %265 : vector<16x256xf32>
    %cst_119 = arith.constant 9.99999974E-6 : f32
    %267 = vector.broadcast %cst_119 : f32 to vector<1x256xf32>
    %268 = arith.addf %264, %267 : vector<1x256xf32>
    %269 = math.rsqrt %268 : vector<1x256xf32>
    %270 = vector.broadcast %269 : vector<1x256xf32> to vector<16x256xf32>
    %271 = arith.mulf %266, %270 : vector<16x256xf32>
    %272 = tpu.concatenate %250, %271 in 0 : vector<16x256xf32>, vector<16x256xf32> -> vector<32x256xf32>
    %273 = vector.broadcast %73 : vector<1x256xf32> to vector<32x256xf32>
    %274 = arith.mulf %272, %273 : vector<32x256xf32>
    %275 = vector.broadcast %74 : vector<1x256xf32> to vector<32x256xf32>
    %276 = arith.addf %274, %275 : vector<32x256xf32>
    %cst_120 = arith.constant 0.000000e+00 : f32
    %277 = vector.broadcast %cst_120 : f32 to vector<32x256xf32>
    %278 = arith.maximumf %276, %277 : vector<32x256xf32>
    %279 = arith.truncf %278 : vector<32x256xf32> to vector<32x256xbf16>
    %cst_121 = arith.constant dense<0.000000e+00> : vector<32x128xf32>
    %280 = tpu.matmul %279, %75, %cst_121 {dimension_numbers = #tpu.dot_dimension_numbers<[1], [0], [0], [1], [0, 0, 1, 1], [], []>} : vector<32x256xbf16>, vector<256x128xbf16>, vector<32x128xf32> -> vector<32x128xf32>
    %281 = vector.extract_strided_slice %280 {offsets = [0, 0], sizes = [16, 128], strides = [1, 1]} : vector<32x128xf32> to vector<16x128xf32>
    %cst_122 = arith.constant dense<0.000000e+00> : vector<128xf32>
    %282 = vector.multi_reduction <add>, %281, %cst_122 [0] : vector<16x128xf32> to vector<128xf32>
    %283 = vector.shape_cast %282 : vector<128xf32> to vector<1x128xf32>
    %cst_123 = arith.constant 1.600000e+01 : f32
    %284 = vector.broadcast %cst_123 : f32 to vector<1x128xf32>
    %285 = arith.divf %283, %284 : vector<1x128xf32>
    %286 = vector.broadcast %285 : vector<1x128xf32> to vector<16x128xf32>
    %287 = arith.subf %281, %286 : vector<16x128xf32>
    %288 = vector.broadcast %285 : vector<1x128xf32> to vector<16x128xf32>
    %289 = arith.subf %281, %288 : vector<16x128xf32>
    %290 = arith.mulf %287, %289 : vector<16x128xf32>
    %cst_124 = arith.constant dense<0.000000e+00> : vector<128xf32>
    %291 = vector.multi_reduction <add>, %290, %cst_124 [0] : vector<16x128xf32> to vector<128xf32>
    %292 = vector.shape_cast %291 : vector<128xf32> to vector<1x128xf32>
    %cst_125 = arith.constant 1.600000e+01 : f32
    %293 = vector.broadcast %cst_125 : f32 to vector<1x128xf32>
    %294 = arith.divf %292, %293 : vector<1x128xf32>
    %295 = vector.broadcast %285 : vector<1x128xf32> to vector<16x128xf32>
    %296 = arith.subf %281, %295 : vector<16x128xf32>
    %cst_126 = arith.constant 9.99999974E-6 : f32
    %297 = vector.broadcast %cst_126 : f32 to vector<1x128xf32>
    %298 = arith.addf %294, %297 : vector<1x128xf32>
    %299 = math.rsqrt %298 : vector<1x128xf32>
    %300 = vector.broadcast %299 : vector<1x128xf32> to vector<16x128xf32>
    %301 = arith.mulf %296, %300 : vector<16x128xf32>
    %302 = vector.extract_strided_slice %280 {offsets = [16, 0], sizes = [16, 128], strides = [1, 1]} : vector<32x128xf32> to vector<16x128xf32>
    %cst_127 = arith.constant dense<0.000000e+00> : vector<128xf32>
    %303 = vector.multi_reduction <add>, %302, %cst_127 [0] : vector<16x128xf32> to vector<128xf32>
    %304 = vector.shape_cast %303 : vector<128xf32> to vector<1x128xf32>
    %cst_128 = arith.constant 1.600000e+01 : f32
    %305 = vector.broadcast %cst_128 : f32 to vector<1x128xf32>
    %306 = arith.divf %304, %305 : vector<1x128xf32>
    %307 = vector.broadcast %306 : vector<1x128xf32> to vector<16x128xf32>
    %308 = arith.subf %302, %307 : vector<16x128xf32>
    %309 = vector.broadcast %306 : vector<1x128xf32> to vector<16x128xf32>
    %310 = arith.subf %302, %309 : vector<16x128xf32>
    %311 = arith.mulf %308, %310 : vector<16x128xf32>
    %cst_129 = arith.constant dense<0.000000e+00> : vector<128xf32>
    %312 = vector.multi_reduction <add>, %311, %cst_129 [0] : vector<16x128xf32> to vector<128xf32>
    %313 = vector.shape_cast %312 : vector<128xf32> to vector<1x128xf32>
    %cst_130 = arith.constant 1.600000e+01 : f32
    %314 = vector.broadcast %cst_130 : f32 to vector<1x128xf32>
    %315 = arith.divf %313, %314 : vector<1x128xf32>
    %316 = vector.broadcast %306 : vector<1x128xf32> to vector<16x128xf32>
    %317 = arith.subf %302, %316 : vector<16x128xf32>
    %cst_131 = arith.constant 9.99999974E-6 : f32
    %318 = vector.broadcast %cst_131 : f32 to vector<1x128xf32>
    %319 = arith.addf %315, %318 : vector<1x128xf32>
    %320 = math.rsqrt %319 : vector<1x128xf32>
    %321 = vector.broadcast %320 : vector<1x128xf32> to vector<16x128xf32>
    %322 = arith.mulf %317, %321 : vector<16x128xf32>
    %323 = tpu.concatenate %301, %322 in 0 : vector<16x128xf32>, vector<16x128xf32> -> vector<32x128xf32>
    %324 = arith.truncf %76 : vector<32x32xf32> to vector<32x32xbf16>
    %cst_132 = arith.constant dense<0.000000e+00> : vector<32x64xf32>
    %325 = tpu.matmul %324, %8, %cst_132 {dimension_numbers = #tpu.dot_dimension_numbers<[1], [0], [0], [1], [0, 0, 1, 1], [], []>} : vector<32x32xbf16>, vector<32x64xbf16>, vector<32x64xf32> -> vector<32x64xf32>
    %cst_133 = arith.constant 0.000000e+00 : f32
    %326 = vector.broadcast %cst_133 : f32 to vector<32x64xf32>
    %327 = arith.maximumf %325, %326 : vector<32x64xf32>
    %328 = arith.truncf %327 : vector<32x64xf32> to vector<32x64xbf16>
    %cst_134 = arith.constant dense<0.000000e+00> : vector<32x256xf32>
    %329 = tpu.matmul %328, %18, %cst_134 {dimension_numbers = #tpu.dot_dimension_numbers<[1], [0], [0], [1], [0, 0, 1, 1], [], []>} : vector<32x64xbf16>, vector<64x256xbf16>, vector<32x256xf32> -> vector<32x256xf32>
    %330 = vector.extract_strided_slice %329 {offsets = [0, 0], sizes = [16, 256], strides = [1, 1]} : vector<32x256xf32> to vector<16x256xf32>
    %cst_135 = arith.constant dense<0.000000e+00> : vector<256xf32>
    %331 = vector.multi_reduction <add>, %330, %cst_135 [0] : vector<16x256xf32> to vector<256xf32>
    %332 = vector.shape_cast %331 : vector<256xf32> to vector<1x256xf32>
    %cst_136 = arith.constant 1.600000e+01 : f32
    %333 = vector.broadcast %cst_136 : f32 to vector<1x256xf32>
    %334 = arith.divf %332, %333 : vector<1x256xf32>
    %335 = vector.broadcast %334 : vector<1x256xf32> to vector<16x256xf32>
    %336 = arith.subf %330, %335 : vector<16x256xf32>
    %337 = vector.broadcast %334 : vector<1x256xf32> to vector<16x256xf32>
    %338 = arith.subf %330, %337 : vector<16x256xf32>
    %339 = arith.mulf %336, %338 : vector<16x256xf32>
    %cst_137 = arith.constant dense<0.000000e+00> : vector<256xf32>
    %340 = vector.multi_reduction <add>, %339, %cst_137 [0] : vector<16x256xf32> to vector<256xf32>
    %341 = vector.shape_cast %340 : vector<256xf32> to vector<1x256xf32>
    %cst_138 = arith.constant 1.600000e+01 : f32
    %342 = vector.broadcast %cst_138 : f32 to vector<1x256xf32>
    %343 = arith.divf %341, %342 : vector<1x256xf32>
    %344 = vector.broadcast %334 : vector<1x256xf32> to vector<16x256xf32>
    %345 = arith.subf %330, %344 : vector<16x256xf32>
    %cst_139 = arith.constant 9.99999974E-6 : f32
    %346 = vector.broadcast %cst_139 : f32 to vector<1x256xf32>
    %347 = arith.addf %343, %346 : vector<1x256xf32>
    %348 = math.rsqrt %347 : vector<1x256xf32>
    %349 = vector.broadcast %348 : vector<1x256xf32> to vector<16x256xf32>
    %350 = arith.mulf %345, %349 : vector<16x256xf32>
    %351 = vector.extract_strided_slice %329 {offsets = [16, 0], sizes = [16, 256], strides = [1, 1]} : vector<32x256xf32> to vector<16x256xf32>
    %cst_140 = arith.constant dense<0.000000e+00> : vector<256xf32>
    %352 = vector.multi_reduction <add>, %351, %cst_140 [0] : vector<16x256xf32> to vector<256xf32>
    %353 = vector.shape_cast %352 : vector<256xf32> to vector<1x256xf32>
    %cst_141 = arith.constant 1.600000e+01 : f32
    %354 = vector.broadcast %cst_141 : f32 to vector<1x256xf32>
    %355 = arith.divf %353, %354 : vector<1x256xf32>
    %356 = vector.broadcast %355 : vector<1x256xf32> to vector<16x256xf32>
    %357 = arith.subf %351, %356 : vector<16x256xf32>
    %358 = vector.broadcast %355 : vector<1x256xf32> to vector<16x256xf32>
    %359 = arith.subf %351, %358 : vector<16x256xf32>
    %360 = arith.mulf %357, %359 : vector<16x256xf32>
    %cst_142 = arith.constant dense<0.000000e+00> : vector<256xf32>
    %361 = vector.multi_reduction <add>, %360, %cst_142 [0] : vector<16x256xf32> to vector<256xf32>
    %362 = vector.shape_cast %361 : vector<256xf32> to vector<1x256xf32>
    %cst_143 = arith.constant 1.600000e+01 : f32
    %363 = vector.broadcast %cst_143 : f32 to vector<1x256xf32>
    %364 = arith.divf %362, %363 : vector<1x256xf32>
    %365 = vector.broadcast %355 : vector<1x256xf32> to vector<16x256xf32>
    %366 = arith.subf %351, %365 : vector<16x256xf32>
    %cst_144 = arith.constant 9.99999974E-6 : f32
    %367 = vector.broadcast %cst_144 : f32 to vector<1x256xf32>
    %368 = arith.addf %364, %367 : vector<1x256xf32>
    %369 = math.rsqrt %368 : vector<1x256xf32>
    %370 = vector.broadcast %369 : vector<1x256xf32> to vector<16x256xf32>
    %371 = arith.mulf %366, %370 : vector<16x256xf32>
    %372 = tpu.concatenate %350, %371 in 0 : vector<16x256xf32>, vector<16x256xf32> -> vector<32x256xf32>
    %373 = vector.broadcast %26 : vector<1x256xf32> to vector<32x256xf32>
    %374 = arith.mulf %372, %373 : vector<32x256xf32>
    %375 = vector.broadcast %34 : vector<1x256xf32> to vector<32x256xf32>
    %376 = arith.addf %374, %375 : vector<32x256xf32>
    %cst_145 = arith.constant 0.000000e+00 : f32
    %377 = vector.broadcast %cst_145 : f32 to vector<32x256xf32>
    %378 = arith.maximumf %376, %377 : vector<32x256xf32>
    %379 = arith.truncf %378 : vector<32x256xf32> to vector<32x256xbf16>
    %cst_146 = arith.constant dense<0.000000e+00> : vector<32x256xf32>
    %380 = tpu.matmul %379, %44, %cst_146 {dimension_numbers = #tpu.dot_dimension_numbers<[1], [0], [0], [1], [0, 0, 1, 1], [], []>} : vector<32x256xbf16>, vector<256x256xbf16>, vector<32x256xf32> -> vector<32x256xf32>
    %381 = vector.extract_strided_slice %380 {offsets = [0, 0], sizes = [16, 256], strides = [1, 1]} : vector<32x256xf32> to vector<16x256xf32>
    %cst_147 = arith.constant dense<0.000000e+00> : vector<256xf32>
    %382 = vector.multi_reduction <add>, %381, %cst_147 [0] : vector<16x256xf32> to vector<256xf32>
    %383 = vector.shape_cast %382 : vector<256xf32> to vector<1x256xf32>
    %cst_148 = arith.constant 1.600000e+01 : f32
    %384 = vector.broadcast %cst_148 : f32 to vector<1x256xf32>
    %385 = arith.divf %383, %384 : vector<1x256xf32>
    %386 = vector.broadcast %385 : vector<1x256xf32> to vector<16x256xf32>
    %387 = arith.subf %381, %386 : vector<16x256xf32>
    %388 = vector.broadcast %385 : vector<1x256xf32> to vector<16x256xf32>
    %389 = arith.subf %381, %388 : vector<16x256xf32>
    %390 = arith.mulf %387, %389 : vector<16x256xf32>
    %cst_149 = arith.constant dense<0.000000e+00> : vector<256xf32>
    %391 = vector.multi_reduction <add>, %390, %cst_149 [0] : vector<16x256xf32> to vector<256xf32>
    %392 = vector.shape_cast %391 : vector<256xf32> to vector<1x256xf32>
    %cst_150 = arith.constant 1.600000e+01 : f32
    %393 = vector.broadcast %cst_150 : f32 to vector<1x256xf32>
    %394 = arith.divf %392, %393 : vector<1x256xf32>
    %395 = vector.broadcast %385 : vector<1x256xf32> to vector<16x256xf32>
    %396 = arith.subf %381, %395 : vector<16x256xf32>
    %cst_151 = arith.constant 9.99999974E-6 : f32
    %397 = vector.broadcast %cst_151 : f32 to vector<1x256xf32>
    %398 = arith.addf %394, %397 : vector<1x256xf32>
    %399 = math.rsqrt %398 : vector<1x256xf32>
    %400 = vector.broadcast %399 : vector<1x256xf32> to vector<16x256xf32>
    %401 = arith.mulf %396, %400 : vector<16x256xf32>
    %402 = vector.extract_strided_slice %380 {offsets = [16, 0], sizes = [16, 256], strides = [1, 1]} : vector<32x256xf32> to vector<16x256xf32>
    %cst_152 = arith.constant dense<0.000000e+00> : vector<256xf32>
    %403 = vector.multi_reduction <add>, %402, %cst_152 [0] : vector<16x256xf32> to vector<256xf32>
    %404 = vector.shape_cast %403 : vector<256xf32> to vector<1x256xf32>
    %cst_153 = arith.constant 1.600000e+01 : f32
    %405 = vector.broadcast %cst_153 : f32 to vector<1x256xf32>
    %406 = arith.divf %404, %405 : vector<1x256xf32>
    %407 = vector.broadcast %406 : vector<1x256xf32> to vector<16x256xf32>
    %408 = arith.subf %402, %407 : vector<16x256xf32>
    %409 = vector.broadcast %406 : vector<1x256xf32> to vector<16x256xf32>
    %410 = arith.subf %402, %409 : vector<16x256xf32>
    %411 = arith.mulf %408, %410 : vector<16x256xf32>
    %cst_154 = arith.constant dense<0.000000e+00> : vector<256xf32>
    %412 = vector.multi_reduction <add>, %411, %cst_154 [0] : vector<16x256xf32> to vector<256xf32>
    %413 = vector.shape_cast %412 : vector<256xf32> to vector<1x256xf32>
    %cst_155 = arith.constant 1.600000e+01 : f32
    %414 = vector.broadcast %cst_155 : f32 to vector<1x256xf32>
    %415 = arith.divf %413, %414 : vector<1x256xf32>
    %416 = vector.broadcast %406 : vector<1x256xf32> to vector<16x256xf32>
    %417 = arith.subf %402, %416 : vector<16x256xf32>
    %cst_156 = arith.constant 9.99999974E-6 : f32
    %418 = vector.broadcast %cst_156 : f32 to vector<1x256xf32>
    %419 = arith.addf %415, %418 : vector<1x256xf32>
    %420 = math.rsqrt %419 : vector<1x256xf32>
    %421 = vector.broadcast %420 : vector<1x256xf32> to vector<16x256xf32>
    %422 = arith.mulf %417, %421 : vector<16x256xf32>
    %423 = tpu.concatenate %401, %422 in 0 : vector<16x256xf32>, vector<16x256xf32> -> vector<32x256xf32>
    %424 = vector.broadcast %52 : vector<1x256xf32> to vector<32x256xf32>
    %425 = arith.mulf %423, %424 : vector<32x256xf32>
    %426 = vector.broadcast %60 : vector<1x256xf32> to vector<32x256xf32>
    %427 = arith.addf %425, %426 : vector<32x256xf32>
    %cst_157 = arith.constant 0.000000e+00 : f32
    %428 = vector.broadcast %cst_157 : f32 to vector<32x256xf32>
    %429 = arith.maximumf %427, %428 : vector<32x256xf32>
    %430 = arith.truncf %429 : vector<32x256xf32> to vector<32x256xbf16>
    %cst_158 = arith.constant dense<0.000000e+00> : vector<32x128xf32>
    %431 = tpu.matmul %430, %70, %cst_158 {dimension_numbers = #tpu.dot_dimension_numbers<[1], [0], [0], [1], [0, 0, 1, 1], [], []>} : vector<32x256xbf16>, vector<256x128xbf16>, vector<32x128xf32> -> vector<32x128xf32>
    %432 = vector.extract_strided_slice %431 {offsets = [0, 0], sizes = [16, 128], strides = [1, 1]} : vector<32x128xf32> to vector<16x128xf32>
    %cst_159 = arith.constant dense<0.000000e+00> : vector<128xf32>
    %433 = vector.multi_reduction <add>, %432, %cst_159 [0] : vector<16x128xf32> to vector<128xf32>
    %434 = vector.shape_cast %433 : vector<128xf32> to vector<1x128xf32>
    %cst_160 = arith.constant 1.600000e+01 : f32
    %435 = vector.broadcast %cst_160 : f32 to vector<1x128xf32>
    %436 = arith.divf %434, %435 : vector<1x128xf32>
    %437 = vector.broadcast %436 : vector<1x128xf32> to vector<16x128xf32>
    %438 = arith.subf %432, %437 : vector<16x128xf32>
    %439 = vector.broadcast %436 : vector<1x128xf32> to vector<16x128xf32>
    %440 = arith.subf %432, %439 : vector<16x128xf32>
    %441 = arith.mulf %438, %440 : vector<16x128xf32>
    %cst_161 = arith.constant dense<0.000000e+00> : vector<128xf32>
    %442 = vector.multi_reduction <add>, %441, %cst_161 [0] : vector<16x128xf32> to vector<128xf32>
    %443 = vector.shape_cast %442 : vector<128xf32> to vector<1x128xf32>
    %cst_162 = arith.constant 1.600000e+01 : f32
    %444 = vector.broadcast %cst_162 : f32 to vector<1x128xf32>
    %445 = arith.divf %443, %444 : vector<1x128xf32>
    %446 = vector.broadcast %436 : vector<1x128xf32> to vector<16x128xf32>
    %447 = arith.subf %432, %446 : vector<16x128xf32>
    %cst_163 = arith.constant 9.99999974E-6 : f32
    %448 = vector.broadcast %cst_163 : f32 to vector<1x128xf32>
    %449 = arith.addf %445, %448 : vector<1x128xf32>
    %450 = math.rsqrt %449 : vector<1x128xf32>
    %451 = vector.broadcast %450 : vector<1x128xf32> to vector<16x128xf32>
    %452 = arith.mulf %447, %451 : vector<16x128xf32>
    %453 = vector.extract_strided_slice %431 {offsets = [16, 0], sizes = [16, 128], strides = [1, 1]} : vector<32x128xf32> to vector<16x128xf32>
    %cst_164 = arith.constant dense<0.000000e+00> : vector<128xf32>
    %454 = vector.multi_reduction <add>, %453, %cst_164 [0] : vector<16x128xf32> to vector<128xf32>
    %455 = vector.shape_cast %454 : vector<128xf32> to vector<1x128xf32>
    %cst_165 = arith.constant 1.600000e+01 : f32
    %456 = vector.broadcast %cst_165 : f32 to vector<1x128xf32>
    %457 = arith.divf %455, %456 : vector<1x128xf32>
    %458 = vector.broadcast %457 : vector<1x128xf32> to vector<16x128xf32>
    %459 = arith.subf %453, %458 : vector<16x128xf32>
    %460 = vector.broadcast %457 : vector<1x128xf32> to vector<16x128xf32>
    %461 = arith.subf %453, %460 : vector<16x128xf32>
    %462 = arith.mulf %459, %461 : vector<16x128xf32>
    %cst_166 = arith.constant dense<0.000000e+00> : vector<128xf32>
    %463 = vector.multi_reduction <add>, %462, %cst_166 [0] : vector<16x128xf32> to vector<128xf32>
    %464 = vector.shape_cast %463 : vector<128xf32> to vector<1x128xf32>
    %cst_167 = arith.constant 1.600000e+01 : f32
    %465 = vector.broadcast %cst_167 : f32 to vector<1x128xf32>
    %466 = arith.divf %464, %465 : vector<1x128xf32>
    %467 = vector.broadcast %457 : vector<1x128xf32> to vector<16x128xf32>
    %468 = arith.subf %453, %467 : vector<16x128xf32>
    %cst_168 = arith.constant 9.99999974E-6 : f32
    %469 = vector.broadcast %cst_168 : f32 to vector<1x128xf32>
    %470 = arith.addf %466, %469 : vector<1x128xf32>
    %471 = math.rsqrt %470 : vector<1x128xf32>
    %472 = vector.broadcast %471 : vector<1x128xf32> to vector<16x128xf32>
    %473 = arith.mulf %468, %472 : vector<16x128xf32>
    %474 = tpu.concatenate %452, %473 in 0 : vector<16x128xf32>, vector<16x128xf32> -> vector<32x128xf32>
    %475 = vector.extract_strided_slice %323 {offsets = [0, 0], sizes = [16, 128], strides = [1, 1]} : vector<32x128xf32> to vector<16x128xf32>
    %476 = vector.extract_strided_slice %323 {offsets = [16, 0], sizes = [16, 128], strides = [1, 1]} : vector<32x128xf32> to vector<16x128xf32>
    %477 = vector.extract_strided_slice %474 {offsets = [0, 0], sizes = [16, 128], strides = [1, 1]} : vector<32x128xf32> to vector<16x128xf32>
    %478 = vector.extract_strided_slice %474 {offsets = [16, 0], sizes = [16, 128], strides = [1, 1]} : vector<32x128xf32> to vector<16x128xf32>
    %479 = arith.mulf %475, %475 : vector<16x128xf32>
    %cst_169 = arith.constant dense<0.000000e+00> : vector<16xf32>
    %480 = vector.multi_reduction <add>, %479, %cst_169 [1] : vector<16x128xf32> to vector<16xf32>
    %481 = vector.shape_cast %480 : vector<16xf32> to vector<16x1xf32>
    %cst_170 = arith.constant 1.000000e-24 : f32
    %482 = vector.broadcast %cst_170 : f32 to vector<16x1xf32>
    %483 = arith.maximumf %481, %482 : vector<16x1xf32>
    %484 = math.rsqrt %483 : vector<16x1xf32>
    %485 = vector.broadcast %484 : vector<16x1xf32> to vector<16x128xf32>
    %486 = arith.mulf %475, %485 : vector<16x128xf32>
    %487 = arith.mulf %478, %478 : vector<16x128xf32>
    %cst_171 = arith.constant dense<0.000000e+00> : vector<16xf32>
    %488 = vector.multi_reduction <add>, %487, %cst_171 [1] : vector<16x128xf32> to vector<16xf32>
    %489 = vector.shape_cast %488 : vector<16xf32> to vector<16x1xf32>
    %cst_172 = arith.constant 1.000000e-24 : f32
    %490 = vector.broadcast %cst_172 : f32 to vector<16x1xf32>
    %491 = arith.maximumf %489, %490 : vector<16x1xf32>
    %492 = math.rsqrt %491 : vector<16x1xf32>
    %493 = vector.broadcast %492 : vector<16x1xf32> to vector<16x128xf32>
    %494 = arith.mulf %478, %493 : vector<16x128xf32>
    %cst_173 = arith.constant dense<0.000000e+00> : vector<16x16xf32>
    %495 = tpu.matmul %486, %494, %cst_173 {dimension_numbers = #tpu.dot_dimension_numbers<[1], [1], [0], [0], [0, 0, 1, 0], [], []>} : vector<16x128xf32>, vector<16x128xf32>, vector<16x16xf32> -> vector<16x16xf32>
    %cst_174 = arith.constant 14.2857141 : f32
    %496 = vector.broadcast %cst_174 : f32 to vector<16x16xf32>
    %497 = arith.mulf %495, %496 : vector<16x16xf32>
    %498 = tpu.iota {dimensions = array<i32: 0>} : vector<16x16xi32>
    %499 = tpu.iota {dimensions = array<i32: 1>} : vector<16x16xi32>
    %500 = arith.cmpi eq, %498, %499 : vector<16x16xi32>
    %cst_175 = arith.constant 0.000000e+00 : f32
    %501 = vector.broadcast %cst_175 : f32 to vector<16x16xf32>
    %502 = arith.select %500, %497, %501 : vector<16x16xi1>, vector<16x16xf32>
    %cst_176 = arith.constant dense<0.000000e+00> : vector<16xf32>
    %503 = vector.multi_reduction <add>, %502, %cst_176 [1] : vector<16x16xf32> to vector<16xf32>
    %504 = vector.shape_cast %503 : vector<16xf32> to vector<16x1xf32>
    %cst_177 = arith.constant dense<0xFF800000> : vector<16xf32>
    %505 = vector.multi_reduction <maximumf>, %497, %cst_177 [1] : vector<16x16xf32> to vector<16xf32>
    %506 = vector.shape_cast %505 : vector<16xf32> to vector<16x1xf32>
    %507 = vector.broadcast %506 : vector<16x1xf32> to vector<16x16xf32>
    %508 = arith.subf %497, %507 : vector<16x16xf32>
    %509 = math.exp %508 : vector<16x16xf32>
    %cst_178 = arith.constant dense<0.000000e+00> : vector<16xf32>
    %510 = vector.multi_reduction <add>, %509, %cst_178 [1] : vector<16x16xf32> to vector<16xf32>
    %511 = vector.shape_cast %510 : vector<16xf32> to vector<16x1xf32>
    %512 = math.log %511 : vector<16x1xf32>
    %513 = arith.addf %506, %512 : vector<16x1xf32>
    %514 = arith.subf %513, %504 : vector<16x1xf32>
    %515 = vector.shape_cast %514 : vector<16x1xf32> to vector<1x16x1xf32>
    %cst_179 = arith.constant dense<0.000000e+00> : vector<1xf32>
    %516 = vector.multi_reduction <add>, %515, %cst_179 [1, 2] : vector<1x16x1xf32> to vector<1xf32>
    %517 = vector.shape_cast %516 : vector<1xf32> to vector<1x1x1xf32>
    %518 = vector.extract %517[0, 0, 0] : f32 from vector<1x1x1xf32>
    %cst_180 = arith.constant 1.600000e+01 : f32
    %519 = arith.divf %518, %cst_180 : f32
    %cst_181 = arith.constant 1.400000e-01 : f32
    %520 = arith.mulf %519, %cst_181 : f32
    %521 = vector.broadcast %504 : vector<16x1xf32> to vector<16x16xf32>
    %522 = arith.cmpf ogt, %497, %521 : vector<16x16xf32>
    %cst_182 = arith.constant 1.000000e+00 : f32
    %cst_183 = arith.constant 0.000000e+00 : f32
    %523 = vector.broadcast %cst_182 : f32 to vector<16x16xf32>
    %524 = vector.broadcast %cst_183 : f32 to vector<16x16xf32>
    %525 = arith.select %522, %523, %524 : vector<16x16xi1>, vector<16x16xf32>
    %cst_184 = arith.constant dense<0.000000e+00> : vector<16xf32>
    %526 = vector.multi_reduction <add>, %525, %cst_184 [1] : vector<16x16xf32> to vector<16xf32>
    %527 = vector.shape_cast %526 : vector<16xf32> to vector<16x1xf32>
    %cst_185 = arith.constant 1.000000e+01 : f32
    %528 = vector.broadcast %cst_185 : f32 to vector<16x1xf32>
    %529 = arith.cmpf olt, %527, %528 : vector<16x1xf32>
    %cst_186 = arith.constant 1.000000e+00 : f32
    %530 = vector.broadcast %cst_186 : f32 to vector<16x1xf32>
    %531 = arith.addf %527, %530 : vector<16x1xf32>
    %cst_187 = arith.constant 1.000000e+00 : f32
    %532 = vector.broadcast %cst_187 : f32 to vector<16x1xf32>
    %533 = arith.divf %532, %531 : vector<16x1xf32>
    %cst_188 = arith.constant 0.000000e+00 : f32
    %534 = vector.broadcast %cst_188 : f32 to vector<16x1xf32>
    %535 = arith.select %529, %533, %534 : vector<16x1xi1>, vector<16x1xf32>
    %536 = vector.shape_cast %535 : vector<16x1xf32> to vector<1x16x1xf32>
    %cst_189 = arith.constant dense<0.000000e+00> : vector<1xf32>
    %537 = vector.multi_reduction <add>, %536, %cst_189 [1, 2] : vector<1x16x1xf32> to vector<1xf32>
    %538 = vector.shape_cast %537 : vector<1xf32> to vector<1x1x1xf32>
    %539 = vector.extract %538[0, 0, 0] : f32 from vector<1x1x1xf32>
    %cst_190 = arith.constant 6.250000e-02 : f32
    %540 = arith.mulf %539, %cst_190 : f32
    %cst_191 = arith.constant 1.000000e+00 : f32
    %541 = vector.broadcast %cst_191 : f32 to vector<16x1xf32>
    %542 = arith.cmpf olt, %527, %541 : vector<16x1xf32>
    %cst_192 = arith.constant 1.000000e+00 : f32
    %cst_193 = arith.constant 0.000000e+00 : f32
    %543 = vector.broadcast %cst_192 : f32 to vector<16x1xf32>
    %544 = vector.broadcast %cst_193 : f32 to vector<16x1xf32>
    %545 = arith.select %542, %543, %544 : vector<16x1xi1>, vector<16x1xf32>
    %546 = vector.shape_cast %545 : vector<16x1xf32> to vector<1x16x1xf32>
    %cst_194 = arith.constant dense<0.000000e+00> : vector<1xf32>
    %547 = vector.multi_reduction <add>, %546, %cst_194 [1, 2] : vector<1x16x1xf32> to vector<1xf32>
    %548 = vector.shape_cast %547 : vector<1xf32> to vector<1x1x1xf32>
    %549 = vector.extract %548[0, 0, 0] : f32 from vector<1x1x1xf32>
    %cst_195 = arith.constant 6.250000e+00 : f32
    %550 = arith.mulf %549, %cst_195 : f32
    %cst_196 = arith.constant 3.000000e+00 : f32
    %551 = vector.broadcast %cst_196 : f32 to vector<16x1xf32>
    %552 = arith.cmpf olt, %527, %551 : vector<16x1xf32>
    %cst_197 = arith.constant 1.000000e+00 : f32
    %cst_198 = arith.constant 0.000000e+00 : f32
    %553 = vector.broadcast %cst_197 : f32 to vector<16x1xf32>
    %554 = vector.broadcast %cst_198 : f32 to vector<16x1xf32>
    %555 = arith.select %552, %553, %554 : vector<16x1xi1>, vector<16x1xf32>
    %556 = vector.shape_cast %555 : vector<16x1xf32> to vector<1x16x1xf32>
    %cst_199 = arith.constant dense<0.000000e+00> : vector<1xf32>
    %557 = vector.multi_reduction <add>, %556, %cst_199 [1, 2] : vector<1x16x1xf32> to vector<1xf32>
    %558 = vector.shape_cast %557 : vector<1xf32> to vector<1x1x1xf32>
    %559 = vector.extract %558[0, 0, 0] : f32 from vector<1x1x1xf32>
    %cst_200 = arith.constant 6.250000e+00 : f32
    %560 = arith.mulf %559, %cst_200 : f32
    %cst_201 = arith.constant 5.000000e+00 : f32
    %561 = vector.broadcast %cst_201 : f32 to vector<16x1xf32>
    %562 = arith.cmpf olt, %527, %561 : vector<16x1xf32>
    %cst_202 = arith.constant 1.000000e+00 : f32
    %cst_203 = arith.constant 0.000000e+00 : f32
    %563 = vector.broadcast %cst_202 : f32 to vector<16x1xf32>
    %564 = vector.broadcast %cst_203 : f32 to vector<16x1xf32>
    %565 = arith.select %562, %563, %564 : vector<16x1xi1>, vector<16x1xf32>
    %566 = vector.shape_cast %565 : vector<16x1xf32> to vector<1x16x1xf32>
    %cst_204 = arith.constant dense<0.000000e+00> : vector<1xf32>
    %567 = vector.multi_reduction <add>, %566, %cst_204 [1, 2] : vector<1x16x1xf32> to vector<1xf32>
    %568 = vector.shape_cast %567 : vector<1xf32> to vector<1x1x1xf32>
    %569 = vector.extract %568[0, 0, 0] : f32 from vector<1x1x1xf32>
    %cst_205 = arith.constant 6.250000e+00 : f32
    %570 = arith.mulf %569, %cst_205 : f32
    %cst_206 = arith.constant 1.000000e+01 : f32
    %571 = vector.broadcast %cst_206 : f32 to vector<16x1xf32>
    %572 = arith.cmpf olt, %527, %571 : vector<16x1xf32>
    %cst_207 = arith.constant 1.000000e+00 : f32
    %cst_208 = arith.constant 0.000000e+00 : f32
    %573 = vector.broadcast %cst_207 : f32 to vector<16x1xf32>
    %574 = vector.broadcast %cst_208 : f32 to vector<16x1xf32>
    %575 = arith.select %572, %573, %574 : vector<16x1xi1>, vector<16x1xf32>
    %576 = vector.shape_cast %575 : vector<16x1xf32> to vector<1x16x1xf32>
    %cst_209 = arith.constant dense<0.000000e+00> : vector<1xf32>
    %577 = vector.multi_reduction <add>, %576, %cst_209 [1, 2] : vector<1x16x1xf32> to vector<1xf32>
    %578 = vector.shape_cast %577 : vector<1xf32> to vector<1x1x1xf32>
    %579 = vector.extract %578[0, 0, 0] : f32 from vector<1x1x1xf32>
    %cst_210 = arith.constant 6.250000e+00 : f32
    %580 = arith.mulf %579, %cst_210 : f32
    %581 = arith.mulf %476, %476 : vector<16x128xf32>
    %cst_211 = arith.constant dense<0.000000e+00> : vector<16xf32>
    %582 = vector.multi_reduction <add>, %581, %cst_211 [1] : vector<16x128xf32> to vector<16xf32>
    %583 = vector.shape_cast %582 : vector<16xf32> to vector<16x1xf32>
    %cst_212 = arith.constant 1.000000e-24 : f32
    %584 = vector.broadcast %cst_212 : f32 to vector<16x1xf32>
    %585 = arith.maximumf %583, %584 : vector<16x1xf32>
    %586 = math.rsqrt %585 : vector<16x1xf32>
    %587 = vector.broadcast %586 : vector<16x1xf32> to vector<16x128xf32>
    %588 = arith.mulf %476, %587 : vector<16x128xf32>
    %589 = arith.mulf %477, %477 : vector<16x128xf32>
    %cst_213 = arith.constant dense<0.000000e+00> : vector<16xf32>
    %590 = vector.multi_reduction <add>, %589, %cst_213 [1] : vector<16x128xf32> to vector<16xf32>
    %591 = vector.shape_cast %590 : vector<16xf32> to vector<16x1xf32>
    %cst_214 = arith.constant 1.000000e-24 : f32
    %592 = vector.broadcast %cst_214 : f32 to vector<16x1xf32>
    %593 = arith.maximumf %591, %592 : vector<16x1xf32>
    %594 = math.rsqrt %593 : vector<16x1xf32>
    %595 = vector.broadcast %594 : vector<16x1xf32> to vector<16x128xf32>
    %596 = arith.mulf %477, %595 : vector<16x128xf32>
    %cst_215 = arith.constant dense<0.000000e+00> : vector<16x16xf32>
    %597 = tpu.matmul %588, %596, %cst_215 {dimension_numbers = #tpu.dot_dimension_numbers<[1], [1], [0], [0], [0, 0, 1, 0], [], []>} : vector<16x128xf32>, vector<16x128xf32>, vector<16x16xf32> -> vector<16x16xf32>
    %cst_216 = arith.constant 14.2857141 : f32
    %598 = vector.broadcast %cst_216 : f32 to vector<16x16xf32>
    %599 = arith.mulf %597, %598 : vector<16x16xf32>
    %600 = tpu.iota {dimensions = array<i32: 0>} : vector<16x16xi32>
    %601 = tpu.iota {dimensions = array<i32: 1>} : vector<16x16xi32>
    %602 = arith.cmpi eq, %600, %601 : vector<16x16xi32>
    %cst_217 = arith.constant 0.000000e+00 : f32
    %603 = vector.broadcast %cst_217 : f32 to vector<16x16xf32>
    %604 = arith.select %602, %599, %603 : vector<16x16xi1>, vector<16x16xf32>
    %cst_218 = arith.constant dense<0.000000e+00> : vector<16xf32>
    %605 = vector.multi_reduction <add>, %604, %cst_218 [1] : vector<16x16xf32> to vector<16xf32>
    %606 = vector.shape_cast %605 : vector<16xf32> to vector<16x1xf32>
    %cst_219 = arith.constant dense<0xFF800000> : vector<16xf32>
    %607 = vector.multi_reduction <maximumf>, %599, %cst_219 [1] : vector<16x16xf32> to vector<16xf32>
    %608 = vector.shape_cast %607 : vector<16xf32> to vector<16x1xf32>
    %609 = vector.broadcast %608 : vector<16x1xf32> to vector<16x16xf32>
    %610 = arith.subf %599, %609 : vector<16x16xf32>
    %611 = math.exp %610 : vector<16x16xf32>
    %cst_220 = arith.constant dense<0.000000e+00> : vector<16xf32>
    %612 = vector.multi_reduction <add>, %611, %cst_220 [1] : vector<16x16xf32> to vector<16xf32>
    %613 = vector.shape_cast %612 : vector<16xf32> to vector<16x1xf32>
    %614 = math.log %613 : vector<16x1xf32>
    %615 = arith.addf %608, %614 : vector<16x1xf32>
    %616 = arith.subf %615, %606 : vector<16x1xf32>
    %617 = vector.shape_cast %616 : vector<16x1xf32> to vector<1x16x1xf32>
    %cst_221 = arith.constant dense<0.000000e+00> : vector<1xf32>
    %618 = vector.multi_reduction <add>, %617, %cst_221 [1, 2] : vector<1x16x1xf32> to vector<1xf32>
    %619 = vector.shape_cast %618 : vector<1xf32> to vector<1x1x1xf32>
    %620 = vector.extract %619[0, 0, 0] : f32 from vector<1x1x1xf32>
    %cst_222 = arith.constant 1.600000e+01 : f32
    %621 = arith.divf %620, %cst_222 : f32
    %cst_223 = arith.constant 1.400000e-01 : f32
    %622 = arith.mulf %621, %cst_223 : f32
    %623 = vector.broadcast %606 : vector<16x1xf32> to vector<16x16xf32>
    %624 = arith.cmpf ogt, %599, %623 : vector<16x16xf32>
    %cst_224 = arith.constant 1.000000e+00 : f32
    %cst_225 = arith.constant 0.000000e+00 : f32
    %625 = vector.broadcast %cst_224 : f32 to vector<16x16xf32>
    %626 = vector.broadcast %cst_225 : f32 to vector<16x16xf32>
    %627 = arith.select %624, %625, %626 : vector<16x16xi1>, vector<16x16xf32>
    %cst_226 = arith.constant dense<0.000000e+00> : vector<16xf32>
    %628 = vector.multi_reduction <add>, %627, %cst_226 [1] : vector<16x16xf32> to vector<16xf32>
    %629 = vector.shape_cast %628 : vector<16xf32> to vector<16x1xf32>
    %cst_227 = arith.constant 1.000000e+01 : f32
    %630 = vector.broadcast %cst_227 : f32 to vector<16x1xf32>
    %631 = arith.cmpf olt, %629, %630 : vector<16x1xf32>
    %cst_228 = arith.constant 1.000000e+00 : f32
    %632 = vector.broadcast %cst_228 : f32 to vector<16x1xf32>
    %633 = arith.addf %629, %632 : vector<16x1xf32>
    %cst_229 = arith.constant 1.000000e+00 : f32
    %634 = vector.broadcast %cst_229 : f32 to vector<16x1xf32>
    %635 = arith.divf %634, %633 : vector<16x1xf32>
    %cst_230 = arith.constant 0.000000e+00 : f32
    %636 = vector.broadcast %cst_230 : f32 to vector<16x1xf32>
    %637 = arith.select %631, %635, %636 : vector<16x1xi1>, vector<16x1xf32>
    %638 = vector.shape_cast %637 : vector<16x1xf32> to vector<1x16x1xf32>
    %cst_231 = arith.constant dense<0.000000e+00> : vector<1xf32>
    %639 = vector.multi_reduction <add>, %638, %cst_231 [1, 2] : vector<1x16x1xf32> to vector<1xf32>
    %640 = vector.shape_cast %639 : vector<1xf32> to vector<1x1x1xf32>
    %641 = vector.extract %640[0, 0, 0] : f32 from vector<1x1x1xf32>
    %cst_232 = arith.constant 6.250000e-02 : f32
    %642 = arith.mulf %641, %cst_232 : f32
    %cst_233 = arith.constant 1.000000e+00 : f32
    %643 = vector.broadcast %cst_233 : f32 to vector<16x1xf32>
    %644 = arith.cmpf olt, %629, %643 : vector<16x1xf32>
    %cst_234 = arith.constant 1.000000e+00 : f32
    %cst_235 = arith.constant 0.000000e+00 : f32
    %645 = vector.broadcast %cst_234 : f32 to vector<16x1xf32>
    %646 = vector.broadcast %cst_235 : f32 to vector<16x1xf32>
    %647 = arith.select %644, %645, %646 : vector<16x1xi1>, vector<16x1xf32>
    %648 = vector.shape_cast %647 : vector<16x1xf32> to vector<1x16x1xf32>
    %cst_236 = arith.constant dense<0.000000e+00> : vector<1xf32>
    %649 = vector.multi_reduction <add>, %648, %cst_236 [1, 2] : vector<1x16x1xf32> to vector<1xf32>
    %650 = vector.shape_cast %649 : vector<1xf32> to vector<1x1x1xf32>
    %651 = vector.extract %650[0, 0, 0] : f32 from vector<1x1x1xf32>
    %cst_237 = arith.constant 6.250000e+00 : f32
    %652 = arith.mulf %651, %cst_237 : f32
    %cst_238 = arith.constant 3.000000e+00 : f32
    %653 = vector.broadcast %cst_238 : f32 to vector<16x1xf32>
    %654 = arith.cmpf olt, %629, %653 : vector<16x1xf32>
    %cst_239 = arith.constant 1.000000e+00 : f32
    %cst_240 = arith.constant 0.000000e+00 : f32
    %655 = vector.broadcast %cst_239 : f32 to vector<16x1xf32>
    %656 = vector.broadcast %cst_240 : f32 to vector<16x1xf32>
    %657 = arith.select %654, %655, %656 : vector<16x1xi1>, vector<16x1xf32>
    %658 = vector.shape_cast %657 : vector<16x1xf32> to vector<1x16x1xf32>
    %cst_241 = arith.constant dense<0.000000e+00> : vector<1xf32>
    %659 = vector.multi_reduction <add>, %658, %cst_241 [1, 2] : vector<1x16x1xf32> to vector<1xf32>
    %660 = vector.shape_cast %659 : vector<1xf32> to vector<1x1x1xf32>
    %661 = vector.extract %660[0, 0, 0] : f32 from vector<1x1x1xf32>
    %cst_242 = arith.constant 6.250000e+00 : f32
    %662 = arith.mulf %661, %cst_242 : f32
    %cst_243 = arith.constant 5.000000e+00 : f32
    %663 = vector.broadcast %cst_243 : f32 to vector<16x1xf32>
    %664 = arith.cmpf olt, %629, %663 : vector<16x1xf32>
    %cst_244 = arith.constant 1.000000e+00 : f32
    %cst_245 = arith.constant 0.000000e+00 : f32
    %665 = vector.broadcast %cst_244 : f32 to vector<16x1xf32>
    %666 = vector.broadcast %cst_245 : f32 to vector<16x1xf32>
    %667 = arith.select %664, %665, %666 : vector<16x1xi1>, vector<16x1xf32>
    %668 = vector.shape_cast %667 : vector<16x1xf32> to vector<1x16x1xf32>
    %cst_246 = arith.constant dense<0.000000e+00> : vector<1xf32>
    %669 = vector.multi_reduction <add>, %668, %cst_246 [1, 2] : vector<1x16x1xf32> to vector<1xf32>
    %670 = vector.shape_cast %669 : vector<1xf32> to vector<1x1x1xf32>
    %671 = vector.extract %670[0, 0, 0] : f32 from vector<1x1x1xf32>
    %cst_247 = arith.constant 6.250000e+00 : f32
    %672 = arith.mulf %671, %cst_247 : f32
    %cst_248 = arith.constant 1.000000e+01 : f32
    %673 = vector.broadcast %cst_248 : f32 to vector<16x1xf32>
    %674 = arith.cmpf olt, %629, %673 : vector<16x1xf32>
    %cst_249 = arith.constant 1.000000e+00 : f32
    %cst_250 = arith.constant 0.000000e+00 : f32
    %675 = vector.broadcast %cst_249 : f32 to vector<16x1xf32>
    %676 = vector.broadcast %cst_250 : f32 to vector<16x1xf32>
    %677 = arith.select %674, %675, %676 : vector<16x1xi1>, vector<16x1xf32>
    %678 = vector.shape_cast %677 : vector<16x1xf32> to vector<1x16x1xf32>
    %cst_251 = arith.constant dense<0.000000e+00> : vector<1xf32>
    %679 = vector.multi_reduction <add>, %678, %cst_251 [1, 2] : vector<1x16x1xf32> to vector<1xf32>
    %680 = vector.shape_cast %679 : vector<1xf32> to vector<1x1x1xf32>
    %681 = vector.extract %680[0, 0, 0] : f32 from vector<1x1x1xf32>
    %cst_252 = arith.constant 6.250000e+00 : f32
    %682 = arith.mulf %681, %cst_252 : f32
    %683 = arith.addf %520, %622 : f32
    %684 = arith.addf %540, %642 : f32
    %cst_253 = arith.constant 5.000000e-01 : f32
    %685 = arith.mulf %684, %cst_253 : f32
    %686 = arith.addf %550, %652 : f32
    %cst_254 = arith.constant 5.000000e-01 : f32
    %687 = arith.mulf %686, %cst_254 : f32
    %688 = arith.addf %560, %662 : f32
    %cst_255 = arith.constant 5.000000e-01 : f32
    %689 = arith.mulf %688, %cst_255 : f32
    %690 = arith.addf %570, %672 : f32
    %cst_256 = arith.constant 5.000000e-01 : f32
    %691 = arith.mulf %690, %cst_256 : f32
    %692 = arith.addf %580, %682 : f32
    %cst_257 = arith.constant 5.000000e-01 : f32
    %693 = arith.mulf %692, %cst_257 : f32
    %694 = tpu.iota {dimensions = array<i32: 1>} : vector<1x8xi32>
    %c0_i32 = arith.constant 0 : i32
    %695 = vector.broadcast %c0_i32 : i32 to vector<1x8xi32>
    %696 = arith.cmpi eq, %694, %695 : vector<1x8xi32>
    %cst_258 = arith.constant 0.000000e+00 : f32
    %697 = vector.broadcast %cst_258 : f32 to vector<1x8xf32>
    %698 = vector.broadcast %683 : f32 to vector<1x8xf32>
    %699 = arith.select %696, %698, %697 : vector<1x8xi1>, vector<1x8xf32>
    %c1_i32 = arith.constant 1 : i32
    %700 = vector.broadcast %c1_i32 : i32 to vector<1x8xi32>
    %701 = arith.cmpi eq, %694, %700 : vector<1x8xi32>
    %702 = vector.broadcast %685 : f32 to vector<1x8xf32>
    %703 = arith.select %701, %702, %699 : vector<1x8xi1>, vector<1x8xf32>
    %c2_i32 = arith.constant 2 : i32
    %704 = vector.broadcast %c2_i32 : i32 to vector<1x8xi32>
    %705 = arith.cmpi eq, %694, %704 : vector<1x8xi32>
    %706 = vector.broadcast %687 : f32 to vector<1x8xf32>
    %707 = arith.select %705, %706, %703 : vector<1x8xi1>, vector<1x8xf32>
    %c3_i32 = arith.constant 3 : i32
    %708 = vector.broadcast %c3_i32 : i32 to vector<1x8xi32>
    %709 = arith.cmpi eq, %694, %708 : vector<1x8xi32>
    %710 = vector.broadcast %689 : f32 to vector<1x8xf32>
    %711 = arith.select %709, %710, %707 : vector<1x8xi1>, vector<1x8xf32>
    %c4_i32 = arith.constant 4 : i32
    %712 = vector.broadcast %c4_i32 : i32 to vector<1x8xi32>
    %713 = arith.cmpi eq, %694, %712 : vector<1x8xi32>
    %714 = vector.broadcast %691 : f32 to vector<1x8xf32>
    %715 = arith.select %713, %714, %711 : vector<1x8xi1>, vector<1x8xf32>
    %c5_i32 = arith.constant 5 : i32
    %716 = vector.broadcast %c5_i32 : i32 to vector<1x8xi32>
    %717 = arith.cmpi eq, %694, %716 : vector<1x8xi32>
    %718 = vector.broadcast %693 : f32 to vector<1x8xf32>
    %719 = arith.select %717, %718, %715 : vector<1x8xi1>, vector<1x8xf32>
    %c0_259 = arith.constant 0 : index
    %c0_260 = arith.constant 0 : index
    %720 = vector.load %arg21[%c0_259, %c0_260] : memref<1x8xf32, #tpu.memory_space<vmem>>, vector<1x8xf32>
    tpu.vector_store %arg21[%c0_259, %c0_260], %719 {strides = array<i32>} : memref<1x8xf32, #tpu.memory_space<vmem>>, vector<1x8xf32>,
    return
  }
}

</mosaic_0001>

<bundles_post_ra>
// kernel: tpu_custom_call.1
= control target key start
LH: loop header
LB: loop body
LE: loop exit
PB: predicated region body
PF: predicated region fallthrough
CT: control target
= control target key end

     0   :  { %s4485_s6 = smov 1   ;;  %s4486_s10 = smov 2   ;;  %s6381_s0 = inlined_call_operand.smem [shape: u32[30], index: -1, kind: input, shape index: {}] }
   0x1   :  { %s4546_s5 = sld [smem:[%s6381_s0]]   ;;  %s4487_s14 = smov 3  }
   0x2   :  { %s4551_s9 = sld [smem:[%s6381_s0 + %s4485_s6]]   ;;  %s4488_s18 = smov 4  }
   0x3   :  { %s4556_s13 = sld [smem:[%s6381_s0 + %s4486_s10]]   ;;  %s4489_s22 = smov 5  }
   0x4   :  { %s4561_s17 = sld [smem:[%s6381_s0 + %s4487_s14]]   ;;  %s4490_s26 = smov 6  }
   0x5   :  { %s4566_s21 = sld [smem:[%s6381_s0 + %s4488_s18]]   ;;  %s4491_s30 = smov 7  }
   0x6   :  { %s4571_s25 = sld [smem:[%s6381_s0 + %s4489_s22]]   ;;  %s4492_s4 = smov 8  }
   0x7   :  { %s4576_s29 = sld [smem:[%s6381_s0 + %s4490_s26]]   ;;  %s4493_s10 = smov 9  }
   0x8   :  { %s4581_s3 = sld [smem:[%s6381_s0 + %s4491_s30]]   ;;  %s4494_s15 = smov 10  }
   0x9   :  { %s4586_s8 = sld [smem:[%s6381_s0 + %s4492_s4]]   ;;  %s4495_s20 = smov 11  }
   0xa   :  { %s4591_s14 = sld [smem:[%s6381_s0 + %s4493_s10]]   ;;  %s4496_s26 = smov 12  }
   0xb   :  { %s4596_s19 = sld [smem:[%s6381_s0 + %s4494_s15]]   ;;  %s4497_s1 = smov 13  }
   0xc   :  { %s4601_s24 = sld [smem:[%s6381_s0 + %s4495_s20]]   ;;  %s4498_s7 = smov 14  }
   0xd   :  { %s4606_s30 = sld [smem:[%s6381_s0 + %s4496_s26]]   ;;  %s4499_s15 = smov 15  }
   0xe   :  { %s4611_s6 = sld [smem:[%s6381_s0 + %s4497_s1]]   ;;  %s4500_s22 = smov 16  }
   0xf   :  { %s4616_s12 = sld [smem:[%s6381_s0 + %s4498_s7]]   ;;  %s4501_s28 = smov 17  }
  0x10   :  { %s4621_s20 = sld [smem:[%s6381_s0 + %s4499_s15]]   ;;  %s4502_s7 = smov 18  }
  0x11   :  { %s4626_s27 = sld [smem:[%s6381_s0 + %s4500_s22]]   ;;  %s4503_s15 = smov 19  }
  0x12   :  { %s4631_s4 = sld [smem:[%s6381_s0 + %s4501_s28]]   ;;  %s4504_s22 = smov 20  }
  0x13   :  { %s4505_s28 = smov 21  }
  0x15   :  { %6437 = sst [smem:[#allocation40_spill]] %s4616_s12 }
  0x16   :  { %6438 = sst [smem:[#allocation41_spill]] %s4621_s20 }
  0x17   :  { %6439 = sst [smem:[#allocation42_spill]] %s4626_s27 }
  0x18   :  { %6440 = sst [smem:[#allocation43_spill]] %s4631_s4 }
  0x19   :  { %s4636_s12 = sld [smem:[%s6381_s0 + %s4502_s7]]   ;;  %s4506_s7 = smov 22  }
  0x1a   :  { %s4641_s20 = sld [smem:[%s6381_s0 + %s4503_s15]]   ;;  %s4507_s15 = smov 23  }
  0x1b   :  { %s4646_s27 = sld [smem:[%s6381_s0 + %s4504_s22]]   ;;  %s4508_s22 = smov 24  }
  0x1c   :  { %s4651_s4 = sld [smem:[%s6381_s0 + %s4505_s28]]   ;;  %s4509_s28 = smov 25  }
  0x1f   :  { %6441 = sst [smem:[#allocation44_spill]] %s4636_s12 }
  0x20   :  { %6442 = sst [smem:[#allocation45_spill]] %s4641_s20 }
  0x21   :  { %6443 = sst [smem:[#allocation46_spill]] %s4646_s27 }
  0x22   :  { %6444 = sst [smem:[#allocation47_spill]] %s4651_s4 }
  0x23   :  { %s4656_s12 = sld [smem:[%s6381_s0 + %s4506_s7]]   ;;  %s4510_s7 = smov 26  }
  0x24   :  { %s4661_s20 = sld [smem:[%s6381_s0 + %s4507_s15]]   ;;  %s4511_s15 = smov 27  }
  0x25   :  { %s4666_s27 = sld [smem:[%s6381_s0 + %s4508_s22]]   ;;  %s4512_s22 = smov 28  }
  0x26   :  { %s4671_s4 = sld [smem:[%s6381_s0 + %s4509_s28]]   ;;  %s4513_s28 = smov 29  }
  0x29   :  { %6445 = sst [smem:[#allocation48_spill]] %s4656_s12 }
  0x2a   :  { %6446 = sst [smem:[#allocation49_spill]] %s4661_s20 }
  0x2b   :  { %6447 = sst [smem:[#allocation50_spill]] %s4666_s27 }
  0x2c   :  { %6448 = sst [smem:[#allocation51_spill]] %s4671_s4 }
  0x2d   :  { %s4676_s12 = sld [smem:[%s6381_s0 + %s4510_s7]]  }
  0x2e   :  { %s4681_s20 = sld [smem:[%s6381_s0 + %s4511_s15]]  }
  0x2f   :  { %s4686_s27 = sld [smem:[%s6381_s0 + %s4512_s22]]  }
  0x30   :  { %s4691_s4 = sld [smem:[%s6381_s0 + %s4513_s28]]  }
  0x31   :  { %65 = vsyncpa [#allocation3], 0 }
  0x32   :  { %66 = vsyncpa [#allocation6], 0 }
  0x33   :  { %67 = vsyncpa [#allocation9], 0 }
  0x34   :  { %68 = vsyncpa [#allocation12], 0 }
  0x35   :  { %69 = vsyncpa [#allocation15], 0 }
  0x36   :  { %70 = vsyncpa [#allocation4], 0 }
  0x37   :  { %71 = vsyncpa [#allocation19], 0 }
  0x38   :  { %72 = vsyncpa [#allocation22], 0 }
  0x39   :  { %73 = vsyncpa [#allocation25], 0  ;;  %s94_s7 = sshll.u32 %s4556_s13, 4  ;;  %s95_s7 = int_to_ptr.hbm [resolvable:$true] %s94_s7 }
  0x3a   :  { %74 = vsyncpa [#allocation28], 0  ;;  %s4514_s10 = smov [#allocation5]   ;;  %s119_s0 = sshll.u32 %s4566_s21, 4  ;;  %s120_s0 = int_to_ptr.hbm [resolvable:$true] %s119_s0 }
  0x3b   :  { %s96_s11 = sshll.u32 %s4514_s10, 4  ;;  %s4033_s15 = sshra.s32 %s95_s7, 4  ;;  %s97_s11 = int_to_ptr.vmem [resolvable:$true] %s96_s11  ;;  %s4034_s15 = int_to_ptr.hbm [resolvable:$true] %s4033_s15 }
  0x3c   :  { %s4035_s16 = scalar_lea.hbm %s4034_s15, 128  ;;  %s4037_s18 = scalar_lea.hbm %s4556_s13, 128 }
  0x3d   :  { %p4036_p0 = scmp.ne.s32.totalorder %s4034_s15, %s4035_s16  ;;  %p4038_p1 = scmp.lt.s32.totalorder %s4034_s15, %s4556_s13 }
  0x3e   :  { %p4039_p2 = scmp.lt.s32.totalorder %s4037_s18, %s4035_s16 }
  0x40   :  { %p4040_p3 = por %p4039_p2, %p4038_p1 }
  0x42   :  { %p4041_p4 = pnand %p4040_p3, %p4036_p0 }
  0x44   :  { %4044 = shalt.err (!%p4041_p4)
}
  0x45   :  { %s4515_s22 = smov 256   ;;  %s4516_s23 = smov 16  }
  0x46   :  { %102 = dma.hbm_to_vmem [thread:$0]  %s95_s7, 2048, %s97_s11, [#allocation6], %s4515_s22, %s4515_s22, %s4516_s23  }
  0x47   :  { %s4517_s26 = smov [#allocation8]   ;;  %s143_s1 = sshll.u32 %s4576_s29, 4  ;;  %s144_s1 = int_to_ptr.hbm [resolvable:$true] %s143_s1 }
  0x48   :  { %s121_s28 = sshll.u32 %s4517_s26, 4  ;;  %s4057_s13 = sshra.s32 %s120_s0, 4  ;;  %s122_s28 = int_to_ptr.vmem [resolvable:$true] %s121_s28  ;;  %s4058_s13 = int_to_ptr.hbm [resolvable:$true] %s4057_s13 }
  0x49   :  { %s4059_s2 = scalar_lea.hbm %s4058_s13, 2  ;;  %s4061_s10 = scalar_lea.hbm %s4566_s21, 2 }
  0x4a   :  { %p4060_p5 = scmp.ne.s32.totalorder %s4058_s13, %s4059_s2  ;;  %p4062_p6 = scmp.lt.s32.totalorder %s4058_s13, %s4566_s21 }
  0x4b   :  { %p4063_p7 = scmp.lt.s32.totalorder %s4061_s10, %s4059_s2 }
  0x4d   :  { %p4064_p8 = por %p4063_p7, %p4062_p6 }
  0x4f   :  { %p4065_p9 = pnand %p4064_p8, %p4060_p5 }
  0x51   :  { %4068 = shalt.err (!%p4065_p9)
}
  0x52   :  { %124 = dma.hbm_to_vmem [thread:$0]  %s120_s0, 32, %s122_s28, [#allocation9]  }
  0x53   :  { %s4518_s7 = smov [#allocation11]   ;;  %s164_s15 = sshll.u32 %s4586_s8, 4  ;;  %s165_s15 = int_to_ptr.hbm [resolvable:$true] %s164_s15 }
  0x54   :  { %s145_s11 = sshll.u32 %s4518_s7, 4  ;;  %s4081_s16 = sshra.s32 %s144_s1, 4  ;;  %s146_s11 = int_to_ptr.vmem [resolvable:$true] %s145_s11  ;;  %s4082_s16 = int_to_ptr.hbm [resolvable:$true] %s4081_s16 }
  0x55   :  { %s4083_s18 = scalar_lea.hbm %s4082_s16, 2  ;;  %s4085_s26 = scalar_lea.hbm %s4576_s29, 2 }
  0x56   :  { %p4084_p10 = scmp.ne.s32.totalorder %s4082_s16, %s4083_s18  ;;  %p4086_p11 = scmp.lt.s32.totalorder %s4082_s16, %s4576_s29 }
  0x57   :  { %p4087_p12 = scmp.lt.s32.totalorder %s4085_s26, %s4083_s18 }
  0x59   :  { %p4088_p13 = por %p4087_p12, %p4086_p11 }
  0x5b   :  { %p4089_p0 = pnand %p4088_p13, %p4084_p10 }
  0x5d   :  { %4092 = shalt.err (!%p4089_p0)
}
  0x5e   :  { %148 = dma.hbm_to_vmem [thread:$0]  %s144_s1, 32, %s146_s11, [#allocation12]  }
  0x5f   :  { %s4519_s21 = smov [#allocation14]   ;;  %s81_s28 = sshll.u32 %s4551_s9, 4  ;;  %s4707_s28 = int_to_ptr.hbm [resolvable:$true] %s81_s28 }
  0x60   :  { %s166_s0 = sshll.u32 %s4519_s21, 4  ;;  %s4105_s13 = sshra.s32 %s165_s15, 4  ;;  %s167_s0 = int_to_ptr.vmem [resolvable:$true] %s166_s0  ;;  %s4106_s13 = int_to_ptr.hbm [resolvable:$true] %s4105_s13 }
  0x61   :  { %s4107_s2 = scalar_lea.hbm %s4106_s13, 256  ;;  %s4109_s29 = scalar_lea.hbm %s4586_s8, 256 }
  0x62   :  { %p4108_p1 = scmp.ne.s32.totalorder %s4106_s13, %s4107_s2  ;;  %p4110_p2 = scmp.lt.s32.totalorder %s4106_s13, %s4586_s8 }
  0x63   :  { %p4111_p3 = scmp.lt.s32.totalorder %s4109_s29, %s4107_s2 }
  0x65   :  { %p4112_p4 = por %p4111_p3, %p4110_p2 }
  0x67   :  { %p4113_p5 = pnand %p4112_p4, %p4108_p1 }
  0x69   :  { %4116 = shalt.err (!%p4113_p5)
}
  0x6a   :  { %s4520_s1 = smov 128   ;;  %s4521_s10 = smov 8  }
  0x6b   :  { %172 = dma.hbm_to_vmem [thread:$0]  %s165_s15, 4096, %s167_s0, [#allocation15], %s4520_s1, %s4520_s1, %s4521_s10  }
  0x6c   :  { %s108_s7 = sshll.u32 %s4561_s17, 4  ;;  %s4522_s11 = smov [#allocation2]   ;;  %s109_s7 = int_to_ptr.hbm [resolvable:$true] %s108_s7 }
  0x6d   :  { %s83_s16 = sshll.u32 %s4522_s11, 4  ;;  %s4129_s8 = sshra.s32 %s4707_s28, 4  ;;  %s84_s16 = int_to_ptr.vmem [resolvable:$true] %s83_s16  ;;  %s4130_s8 = int_to_ptr.hbm [resolvable:$true] %s4129_s8 }
  0x6e   :  { %s4131_s18 = scalar_lea.hbm %s4130_s8, 32  ;;  %s4133_s26 = scalar_lea.hbm %s4551_s9, 32 }
  0x6f   :  { %p4132_p6 = scmp.ne.s32.totalorder %s4130_s8, %s4131_s18  ;;  %p4134_p7 = scmp.lt.s32.totalorder %s4130_s8, %s4551_s9 }
  0x70   :  { %p4135_p8 = scmp.lt.s32.totalorder %s4133_s26, %s4131_s18 }
  0x72   :  { %p4136_p9 = por %p4135_p8, %p4134_p7 }
  0x74   :  { %p4137_p10 = pnand %p4136_p9, %p4132_p6 }
  0x76   :  { %4140 = shalt.err (!%p4137_p10)
}
  0x77   :  { %89 = dma.hbm_to_vmem [thread:$0]  %s4707_s28, 512, %s84_s16, [#allocation3], %s4520_s1, %s4520_s1, %s4521_s10  }
  0x78   :  { %s4523_s15 = smov [#allocation7]   ;;  %s129_s0 = sshll.u32 %s4571_s25, 4  ;;  %s4723_s0 = int_to_ptr.hbm [resolvable:$true] %s129_s0 }
  0x79   :  { %s110_s21 = sshll.u32 %s4523_s15, 4  ;;  %s4153_s13 = sshra.s32 %s109_s7, 4  ;;  %s111_s21 = int_to_ptr.vmem [resolvable:$true] %s110_s21  ;;  %s4154_s13 = int_to_ptr.hbm [resolvable:$true] %s4153_s13 }
  0x7a   :  { %s4155_s9 = scalar_lea.hbm %s4154_s13, 2  ;;  %s4157_s2 = scalar_lea.hbm %s4561_s17, 2 }
  0x7b   :  { %p4156_p11 = scmp.ne.s32.totalorder %s4154_s13, %s4155_s9  ;;  %p4158_p12 = scmp.lt.s32.totalorder %s4154_s13, %s4561_s17 }
  0x7c   :  { %p4159_p13 = scmp.lt.s32.totalorder %s4157_s2, %s4155_s9 }
  0x7e   :  { %p4160_p0 = por %p4159_p13, %p4158_p12 }
  0x80   :  { %p4161_p1 = pnand %p4160_p0, %p4156_p11 }
  0x82   :  { %4164 = shalt.err (!%p4161_p1)
}
  0x83   :  { %113 = dma.hbm_to_vmem [thread:$0]  %s109_s7, 32, %s111_s21, [#allocation6]  }
  0x84   :  { %s154_s28 = sshll.u32 %s4581_s3, 4  ;;  %s4524_s29 = smov [#allocation10]   ;;  %s155_s28 = int_to_ptr.hbm [resolvable:$true] %s154_s28 }
  0x85   :  { %s131_s11 = sshll.u32 %s4524_s29, 4  ;;  %s4177_s16 = sshra.s32 %s4723_s0, 4  ;;  %s132_s11 = int_to_ptr.vmem [resolvable:$true] %s131_s11  ;;  %s4178_s16 = int_to_ptr.hbm [resolvable:$true] %s4177_s16 }
  0x86   :  { %s4179_s8 = scalar_lea.hbm %s4178_s16, 512  ;;  %s4181_s18 = scalar_lea.hbm %s4571_s25, 512 }
  0x87   :  { %p4180_p2 = scmp.ne.s32.totalorder %s4178_s16, %s4179_s8  ;;  %p4182_p3 = scmp.lt.s32.totalorder %s4178_s16, %s4571_s25 }
  0x88   :  { %p4183_p4 = scmp.lt.s32.totalorder %s4181_s18, %s4179_s8 }
  0x8a   :  { %p4184_p5 = por %p4183_p4, %p4182_p3 }
  0x8c   :  { %p4185_p6 = pnand %p4184_p5, %p4180_p2 }
  0x8e   :  { %4188 = shalt.err (!%p4185_p6)
}
  0x8f   :  { %137 = dma.hbm_to_vmem [thread:$0]  %s4723_s0, 8192, %s132_s11, [#allocation9], %s4515_s22, %s4515_s22, %s4516_s23  }
  0x90   :  { %s4525_s17 = smov [#allocation13]   ;;  %s177_s26 = sshll.u32 %s4591_s14, 4  ;;  %s178_s26 = int_to_ptr.hbm [resolvable:$true] %s177_s26 }
  0x91   :  { %s156_s7 = sshll.u32 %s4525_s17, 4  ;;  %s4201_s15 = sshra.s32 %s155_s28, 4  ;;  %s157_s7 = int_to_ptr.vmem [resolvable:$true] %s156_s7  ;;  %s4202_s15 = int_to_ptr.hbm [resolvable:$true] %s4201_s15 }
  0x92   :  { %s4203_s21 = scalar_lea.hbm %s4202_s15, 2  ;;  %s4205_s25 = scalar_lea.hbm %s4581_s3, 2 }
  0x93   :  { %p4204_p7 = scmp.ne.s32.totalorder %s4202_s15, %s4203_s21  ;;  %p4206_p8 = scmp.lt.s32.totalorder %s4202_s15, %s4581_s3 }
  0x94   :  { %p4207_p9 = scmp.lt.s32.totalorder %s4205_s25, %s4203_s21 }
  0x96   :  { %p4208_p10 = por %p4207_p9, %p4206_p8 }
  0x98   :  { %p4209_p11 = pnand %p4208_p10, %p4204_p7 }
  0x9a   :  { %4212 = shalt.err (!%p4209_p11)
}
  0x9b   :  { %159 = dma.hbm_to_vmem [thread:$0]  %s155_s28, 32, %s157_s7, [#allocation12]  }
  0x9c   :  { %s4526_s13 = smov [#allocation16]   ;;  %s4225_s9 = sshra.s32 %s178_s26, 4  ;;  %s4226_s9 = int_to_ptr.hbm [resolvable:$true] %s4225_s9 }
  0x9d   :  { %s179_s0 = sshll.u32 %s4526_s13, 4  ;;  %s4227_s2 = scalar_lea.hbm %s4226_s9, 32  ;;  %s180_s0 = int_to_ptr.vmem [resolvable:$true] %s179_s0 }
  0x9e   :  { %p4228_p12 = scmp.ne.s32.totalorder %s4226_s9, %s4227_s2  ;;  %s4229_s29 = scalar_lea.hbm %s4591_s14, 32 }
  0x9f   :  { %p4230_p13 = scmp.lt.s32.totalorder %s4226_s9, %s4591_s14  ;;  %p4231_p0 = scmp.lt.s32.totalorder %s4229_s29, %s4227_s2 }
  0xa1   :  { %p4232_p1 = por %p4231_p0, %p4230_p13 }
  0xa3   :  { %p4233_p2 = pnand %p4232_p1, %p4228_p12 }
  0xa5   :  { %4236 = shalt.err (!%p4233_p2)
}
  0xa6   :  { %185 = dma.hbm_to_vmem [thread:$0]  %s178_s26, 512, %s180_s0, [#allocation15], %s4520_s1, %s4520_s1, %s4521_s10  }
  0xa7   :  { %4465 = dma.done.wait [#allocation3], 512  }
  0xa8   :  { %4466 = vsyncadd [#allocation3], 4294966784 }
  0xa9   :  { %4467 = dma.done.wait [#allocation6], 2080  }
  0xaa   :  { %4468 = vsyncadd [#allocation6], 4294965216 }
  0xab   :  { %4469 = dma.done.wait [#allocation9], 8224  }
  0xac   :  { %4470 = vsyncadd [#allocation9], 4294959072 }
  0xad   :  { %4471 = dma.done.wait [#allocation12], 64  }
  0xae   :  { %4472 = vsyncadd [#allocation12], 4294967232 }
  0xaf   :  { %4473 = dma.done.wait [#allocation15], 4608  }
  0xb0   :  { %4474 = vsyncadd [#allocation15], 4294962688  ;;  %v247_v0 = vld [vmem:[#allocation16 + $0x10] sm:$0xff]  ;;  %v248_v1 = vld [vmem:[#allocation16 + $0x18] sm:$0xff]  ;;  %vm265_vm0 = vcmask 523264   ;;  %vm1142_vm1 = vcmask 261120  }
  0xb1   :  { %v251_v2 = vld [vmem:[#allocation2 + $0x10] sm:$0xff]  ;;  %v252_v3 = vld [vmem:[#allocation2 + $0x18] sm:$0xff]  ;;  %v259_v5 = vmul.f32 0.001, %v247_v0  ;;  %v273_v6 = vpack.c.bf16 %v248_v1, %v247_v0  ;;  %v245_v7 = vld [vmem:[#allocation16] sm:$0xff]  ;;  %s6526_s3 = sld [smem:[#allocation40_spill]] }
  0xb2   :  { %v255_v4 = vmul.f32 0.999, %v251_v2  ;;  %v256_v8 = vmul.f32 0.999, %v252_v3  ;;  %v260_v9 = vmul.f32 0.001, %v248_v1 }
  0xb3   :  { %v246_v10 = vld [vmem:[#allocation16 + $0x8] sm:$0xff]  ;;  %v249_v11 = vld [vmem:[#allocation2] sm:$0xff]  ;;  %1155 = vmatpush.bf16.msra.mxu0 %v273_v6  ;;  %v250_v13 = vld [vmem:[#allocation2 + $0x8] sm:$0xff]  ;;  %v257_v15 = vmul.f32 0.001, %v245_v7  ;;  %s6527_s14 = sld [smem:[#allocation41_spill]] }
  0xb4   :  { %v4743_v12 = vadd.f32 %v259_v5, %v255_v4  ;;  %v253_v14 = vmul.f32 0.999, %v249_v11  ;;  %v272_v16 = vpack.c.bf16 %v246_v10, %v245_v7  ;;  %v1136_v17 = vld [vmem:[%s4546_s5] sm:$0xff]  ;;  %v4746_v18 = vadd.f32 %v260_v9, %v256_v8  ;;  %v1137_v21 = vld [vmem:[%s4546_s5 + $0x8] sm:$0xff]  ;;  %v288_v24 = vld [vmem:[%s4596_s19 + $0x70] sm:$0xff]  ;;  %s6546_s28 = sld [smem:[#allocation44_spill]] }
  0xb5   :  { %v254_v19 = vmul.f32 0.999, %v250_v13  ;;  %v258_v20 = vmul.f32 0.001, %v246_v10  ;;  %v286_v23 = vld [vmem:[%s4596_s19 + $0x60] sm:$0xff]  ;;  %v4761_v27 = vpack.c.bf16 %v1137_v21, %v1136_v17  ;;  %v304_v29 = vld [vmem:[#allocation5 + $0x70] sm:$0xff] }
  0xb6   :  { %6449 = vst [vmem:[#allocation52_spill] sm:$0xff] %v4743_v12  ;;  %v4751_v22 = vadd.f32 %v257_v15, %v253_v14  ;;  %v302_v28 = vld [vmem:[#allocation5 + $0x60] sm:$0xff]  ;;  %v334_v30 = vmul.f32 0.001, %v286_v23  ;;  %v287_v31 = vld [vmem:[%s4596_s19 + $0x68] sm:$0xff]  ;;  %v384_v34 = vpack.c.bf16 %v288_v24, %v286_v23  ;;  %v289_v35 = vld [vmem:[%s4596_s19 + $0x78] sm:$0xff] }
  0xb7   :  { %6450 = vst [vmem:[#allocation53_spill] sm:$0xff] %v4746_v18  ;;  %v4759_v26 = vadd.f32 %v258_v20, %v254_v19  ;;  %1156 = vmatpush.bf16.msra.mxu0 %v272_v16  ;;  %v318_v32 = vmul.f32 0.999, %v302_v28  ;;  %v320_v33 = vmul.f32 0.999, %v304_v29  ;;  %v303_v37 = vld [vmem:[#allocation5 + $0x68] sm:$0xff]  ;;  %v385_v39 = vpack.c.bf16 %v289_v35, %v287_v31 }
  0xb8   :  { %268 = vst.msk [vmem:[#allocation18 + $0x10] sm:$0xff] %vm265_vm0, %v4743_v12  ;;  %v336_v36 = vmul.f32 0.001, %v288_v24  ;;  %v305_v38 = vld [vmem:[#allocation5 + $0x78] sm:$0xff]  ;;  %1184 = vmatpush.bf16.msra.mxu1 %v384_v34  ;;  %v319_v41 = vmul.f32 0.999, %v303_v37 }
  0xb9   :  { %6451 = vst [vmem:[#allocation54_spill] sm:$0xff] %v4751_v22  ;;  %v4769_v40 = vadd.f32 %v334_v30, %v318_v32  ;;  %v321_v42 = vmul.f32 0.999, %v305_v38  ;;  %v335_v43 = vmul.f32 0.001, %v287_v31  ;;  %1203 = vmatpush.bf16.msra.mxu2 %v385_v39  ;;  %v1138_v50 = vld [vmem:[%s4546_s5 + $0x10] sm:$0xff] }
  0xba   :  { %269 = vst.msk [vmem:[#allocation18 + $0x18] sm:$0xff] %vm265_vm0, %v4746_v18  ;;  %3578 = vmatmul.msk.bf16.vlgmr.msra.gmra.mxu0 %vm1142_vm1, %v4761_v27  ;;  %v4773_v44 = vadd.f32 %v336_v36, %v320_v33  ;;  %v337_v45 = vmul.f32 0.001, %v289_v35  ;;  %v1139_v51 = vld [vmem:[%s4546_s5 + $0x18] sm:$0xff]  ;;  %v282_v53 = vld [vmem:[%s4596_s19 + $0x40] sm:$0xff]  ;;  %v284_v54 = vld [vmem:[%s4596_s19 + $0x50] sm:$0xff] }
  0xbb   :  { %6452 = vst [vmem:[#allocation55_spill] sm:$0xff] %v4759_v26  ;;  %v4776_v46 = vadd.f32 %v335_v43, %v319_v41  ;;  %v4789_v52 = vpack.c.bf16 %v1139_v51, %v1138_v50  ;;  %v283_v55 = vld [vmem:[%s4596_s19 + $0x48] sm:$0xff]  ;;  %v382_v56 = vpack.c.bf16 %v284_v54, %v282_v53  ;;  %v285_v57 = vld [vmem:[%s4596_s19 + $0x58] sm:$0xff]  ;;  %v298_v58 = vld [vmem:[#allocation5 + $0x40] sm:$0xff]  ;;  %v330_v60 = vmul.f32 0.001, %v282_v53 }
  0xbc   :  { %6453 = vst [vmem:[#allocation56_spill] sm:$0xff] %v4761_v27  ;;  %v4781_v48 = vadd.f32 %v337_v45, %v321_v42  ;;  %v300_v59 = vld [vmem:[#allocation5 + $0x50] sm:$0xff]  ;;  %v332_v61 = vmul.f32 0.001, %v284_v54  ;;  %v383_v62 = vpack.c.bf16 %v285_v57, %v283_v55  ;;  %v314_v63 = vmul.f32 0.999, %v298_v58 }
  0xbd   :  { %266 = vst.msk [vmem:[#allocation18] sm:$0xff] %vm265_vm0, %v4751_v22  ;;  %v316_v0 = vmul.f32 0.999, %v300_v59  ;;  %1185 = vmatpush.bf16.msra.mxu1 %v382_v56  ;;  %v299_v1 = vld [vmem:[#allocation5 + $0x48] sm:$0xff]  ;;  %v301_v2 = vld [vmem:[#allocation5 + $0x58] sm:$0xff]  ;;  %v278_v8 = vld [vmem:[%s4596_s19 + $0x20] sm:$0xff] }
  0xbe   :  { %267 = vst.msk [vmem:[#allocation18 + $0x8] sm:$0xff] %vm265_vm0, %v4759_v26  ;;  %v315_v3 = vmul.f32 0.999, %v299_v1  ;;  %v317_v4 = vmul.f32 0.999, %v301_v2  ;;  %1204 = vmatpush.bf16.msra.mxu2 %v383_v62  ;;  %v346_v6 = vadd.f32 %v330_v60, %v314_v63  ;;  %v280_v9 = vld [vmem:[%s4596_s19 + $0x30] sm:$0xff] }
  0xbf   :  { %6454 = vst [vmem:[#allocation57_spill] sm:$0xff] %v4769_v40  ;;  %v331_v5 = vmul.f32 0.001, %v283_v55  ;;  %v333_v7 = vmul.f32 0.001, %v285_v57  ;;  %v294_v10 = vld [vmem:[#allocation5 + $0x20] sm:$0xff]  ;;  %v348_v11 = vadd.f32 %v332_v61, %v316_v0  ;;  %v380_v16 = vpack.c.bf16 %v280_v9, %v278_v8 }
  0xc0   :  { %6455 = vst [vmem:[#allocation58_spill] sm:$0xff] %v4773_v44  ;;  %v296_v13 = vld [vmem:[#allocation5 + $0x30] sm:$0xff]  ;;  %v310_v14 = vmul.f32 0.999, %v294_v10  ;;  %v326_v15 = vmul.f32 0.001, %v278_v8 }
  0xc1   :  { %366 = vst [vmem:[#allocation20 + $0x60] sm:$0xff] %v4769_v40  ;;  %v279_v17 = vld [vmem:[%s4596_s19 + $0x28] sm:$0xff]  ;;  %v347_v19 = vadd.f32 %v331_v5, %v315_v3  ;;  %v312_v20 = vmul.f32 0.999, %v296_v13  ;;  %v328_v21 = vmul.f32 0.001, %v280_v9  ;;  %v349_v24 = vadd.f32 %v333_v7, %v317_v4  ;;  %1186 = vmatpush.bf16.msra.mxu1 %v380_v16 }
  0xc2   :  { %6456 = vst [vmem:[#allocation59_spill] sm:$0xff] %v4776_v46  ;;  %v281_v23 = vld [vmem:[%s4596_s19 + $0x38] sm:$0xff]  ;;  %v295_v28 = vld [vmem:[#allocation5 + $0x28] sm:$0xff]  ;;  %v327_v30 = vmul.f32 0.001, %v279_v17  ;;  %v274_v32 = vld [vmem:[%s4596_s19] sm:$0xff]  ;;  %v342_v33 = vadd.f32 %v326_v15, %v310_v14 }
  0xc3   :  { %368 = vst [vmem:[#allocation20 + $0x70] sm:$0xff] %v4773_v44  ;;  %v297_v29 = vld [vmem:[#allocation5 + $0x38] sm:$0xff]  ;;  %v381_v31 = vpack.c.bf16 %v281_v23, %v279_v17  ;;  %v311_v34 = vmul.f32 0.999, %v295_v28  ;;  %v276_v36 = vld [vmem:[%s4596_s19 + $0x10] sm:$0xff]  ;;  %v344_v37 = vadd.f32 %v328_v21, %v312_v20  ;;  %v275_v41 = vld [vmem:[%s4596_s19 + $0x8] sm:$0xff] }
  0xc4   :  { %6457 = vst [vmem:[#allocation60_spill] sm:$0xff] %v4781_v48  ;;  %v313_v35 = vmul.f32 0.999, %v297_v29  ;;  %v329_v38 = vmul.f32 0.001, %v281_v23  ;;  %v378_v39 = vpack.c.bf16 %v276_v36, %v274_v32  ;;  %v277_v42 = vld [vmem:[%s4596_s19 + $0x18] sm:$0xff] }
  0xc5   :  { %367 = vst [vmem:[#allocation20 + $0x68] sm:$0xff] %v4776_v46  ;;  %1205 = vmatpush.bf16.msra.mxu2 %v381_v31  ;;  %v343_v43 = vadd.f32 %v327_v30, %v311_v34  ;;  %v379_v45 = vpack.c.bf16 %v277_v42, %v275_v41  ;;  %v290_v51 = vld [vmem:[#allocation5] sm:$0xff]  ;;  %v292_v53 = vld [vmem:[#allocation5 + $0x10] sm:$0xff]  ;;  %v322_v54 = vmul.f32 0.001, %v274_v32  ;;  %v291_v55 = vld [vmem:[#allocation5 + $0x8] sm:$0xff] }
  0xc6   :  { %369 = vst [vmem:[#allocation20 + $0x78] sm:$0xff] %v4781_v48  ;;  %v345_v50 = vadd.f32 %v329_v38, %v313_v35  ;;  %1187 = vmatpush.bf16.msra.mxu1 %v378_v39  ;;  %v306_v56 = vmul.f32 0.999, %v290_v51  ;;  %v308_v57 = vmul.f32 0.999, %v292_v53  ;;  %v293_v58 = vld [vmem:[#allocation5 + $0x18] sm:$0xff] }
  0xc7   :  { %6458 = vst [vmem:[#allocation61_spill] sm:$0xff] %v4789_v52  ;;  %v324_v59 = vmul.f32 0.001, %v276_v36  ;;  %v307_v60 = vmul.f32 0.999, %v291_v55  ;;  %v4527_v15 = vmov 16.0  }
  0xc8   :  { %362 = vst [vmem:[#allocation20 + $0x40] sm:$0xff] %v346_v6  ;;  %v338_v61 = vadd.f32 %v322_v54, %v306_v56  ;;  %v309_v62 = vmul.f32 0.999, %v293_v58  ;;  %v323_v63 = vmul.f32 0.001, %v275_v41  ;;  %3829 = vrcp.f32 %v4527_v15  ;;  %v4818_v30 = vld [vmem:[%s4611_s6 + $0xe0] sm:$0xff] }
  0xc9   :  { %364 = vst [vmem:[#allocation20 + $0x50] sm:$0xff] %v348_v11  ;;  %1206 = vmatpush.bf16.msra.mxu2 %v379_v45  ;;  %v325_v0 = vmul.f32 0.001, %v277_v42  ;;  %v340_v1 = vadd.f32 %v324_v59, %v308_v57  ;;  %v4821_v31 = vld [vmem:[%s4611_s6 + $0xf0] sm:$0xff]  ;;  %v4824_v32 = vld [vmem:[%s4611_s6 + $0xe8] sm:$0xff]  ;;  %v4829_v35 = vld [vmem:[%s4611_s6 + $0xf8] sm:$0xff] }
  0xca   :  { %3579 = vmatmul.msk.bf16.gmra.mxu0 %vm1142_vm1, %v4789_v52  ;;  %363 = vst [vmem:[#allocation20 + $0x48] sm:$0xff] %v347_v19  ;;  %v339_v2 = vadd.f32 %v323_v63, %v307_v60  ;;  %v832_v34 = vpack.c.bf16 %v4821_v31, %v4818_v30  ;;  %v4843_v45 = vld [vmem:[%s4611_s6 + $0xd0] sm:$0xff]  ;;  %v4851_v55 = vld [vmem:[%s4611_s6 + $0xd8] sm:$0xff]  ;;  %v4856_v57 = vld [vmem:[%s4611_s6 + $0x1e0] sm:$0xff]  ;;  %s6524_s5 = sld [smem:[#allocation42_spill]]  ;;  %s4529_s16 = smov [#allocation18]  }
  0xcb   :  { %365 = vst [vmem:[#allocation20 + $0x58] sm:$0xff] %v349_v24  ;;  %v341_v3 = vadd.f32 %v325_v0, %v309_v62  ;;  %v4859_v58 = vld [vmem:[%s4611_s6 + $0x1f0] sm:$0xff]  ;;  %v4862_v59 = vld [vmem:[%s4611_s6 + $0x1e8] sm:$0xff]  ;;  %v4867_v63 = vld [vmem:[%s4611_s6 + $0x1f8] sm:$0xff]  ;;  %s6528_s19 = sld [smem:[#allocation43_spill]]  ;;  %s3411_s8 = sshll.u32 %s4529_s16, 4  ;;  %s3412_s8 = int_to_ptr.vmem [resolvable:$true] %s3411_s8 }
  0xcc   :  { %358 = vst [vmem:[#allocation20 + $0x20] sm:$0xff] %v342_v33  ;;  %1395 = vmatpush.bf16.msra.mxu3 %v832_v34  ;;  %v848_v62 = vpack.c.bf16 %v4859_v58, %v4856_v57  ;;  %v4917_v34 = vld [vmem:[%s4611_s6 + $0x88] sm:$0xff]  ;;  %v4989_v25 = vld [vmem:[%s4611_s6 + $0x198] sm:$0xff]  ;;  %v4998_v52 = vld [vmem:[%s4611_s6 + $0x40] sm:$0xff]  ;;  %s6547_s11 = sld [smem:[#allocation45_spill]] }
  0xcd   :  { %360 = vst [vmem:[#allocation20 + $0x30] sm:$0xff] %v344_v37  ;;  %v833_v37 = vpack.c.bf16 %v4829_v35, %v4824_v32  ;;  %v5011_v26 = vld [vmem:[%s4611_s6 + $0x58] sm:$0xff]  ;;  %v5021_v12 = vld [vmem:[%s4611_s6 + $0x170] sm:$0xff]  ;;  %v5024_v18 = vld [vmem:[%s4611_s6 + $0x168] sm:$0xff] }
  0xce   :  { %359 = vst [vmem:[#allocation20 + $0x28] sm:$0xff] %v343_v43  ;;  %v3830_v17 = vpop.eup %3829  ;;  %v4840_v43 = vld [vmem:[%s4611_s6 + $0xc0] sm:$0xff]  ;;  %1414 = vmatpush.bf16.msrb.mxu0 %v848_v62 }
  0xcf   :  { %361 = vst [vmem:[#allocation20 + $0x38] sm:$0xff] %v345_v50  ;;  %v1233_v19 = vmul.f32 16.0, %v3830_v17  ;;  %1433 = vmatpush.bf16.msrb.mxu1 %v833_v37  ;;  %v4846_v50 = vld [vmem:[%s4611_s6 + $0xc8] sm:$0xff]  ;;  %vm1237_vm2 = vweird.f32 %v3830_v17  ;;  %v830_v54 = vpack.c.bf16 %v4843_v45, %v4840_v43 }
  0xd0   :  { %354 = vst [vmem:[#allocation20] sm:$0xff] %v338_v61  ;;  %v831_v56 = vpack.c.bf16 %v4851_v55, %v4846_v50 }
  0xd1   :  { %356 = vst [vmem:[#allocation20 + $0x10] sm:$0xff] %v340_v1  ;;  %v1234_v23 = vsub.f32 1.0, %v1233_v19  ;;  %1396 = vmatpush.bf16.msra.mxu3 %v830_v54  ;;  %v849_v1 = vpack.c.bf16 %v4867_v63, %v4862_v59  ;;  %v4935_v54 = vld [vmem:[%s4611_s6 + $0x1a0] sm:$0xff] }
  0xd2   :  { %355 = vst [vmem:[#allocation20 + $0x8] sm:$0xff] %v339_v2  ;;  %v4874_v2 = vld [vmem:[%s4611_s6 + $0xa0] sm:$0xff] }
  0xd3   :  { %357 = vst [vmem:[#allocation20 + $0x18] sm:$0xff] %v341_v3  ;;  %v1235_v29 = vmul.f32 %v3830_v17, %v1234_v23  ;;  %1434 = vmatpush.bf16.msrb.mxu1 %v831_v56  ;;  %v4877_v3 = vld [vmem:[%s4611_s6 + $0xb0] sm:$0xff]  ;;  %1452 = vmatpush.bf16.msrb.mxu2 %v849_v1  ;;  %v4904_v23 = vld [vmem:[%s4611_s6 + $0x1d8] sm:$0xff]  ;;  %v4941_v56 = vld [vmem:[%s4611_s6 + $0x1a8] sm:$0xff] }
  0xd4   :  { %6463 = vst [vmem:[#allocation66_spill] sm:$0xff] %v4989_v25 }
  0xd5   :  { %v1236_v41 = vadd.f32 %v3830_v17, %v1235_v29  ;;  %v4911_v29 = vld [vmem:[%s4611_s6 + $0x80] sm:$0xff]  ;;  %6464 = vst [vmem:[#allocation67_spill] sm:$0xff] %v4998_v52 }
  0xd6   :  { %6467 = vst [vmem:[#allocation70_spill] sm:$0xff] %v5011_v26 }
  0xd7   :  { %v4869_v0 = vsel %vm1237_vm2, %v3830_v17, %v1236_v41  ;;  %6469 = vst [vmem:[#allocation72_spill] sm:$0xff] %v5021_v12 }
  0xd8   :  { %6459 = vst [vmem:[#allocation62_spill] sm:$0xff] %v4869_v0 }
  0xd9   :  { %6470 = vst [vmem:[#allocation73_spill] sm:$0xff] %v5024_v18 }
 0x137   :  { %v1158_v4 = vpop.f32.mrf.mxu0 }
 0x138   :  { %v1168_v6 = vmax.f32 %v1158_v4, 0.0  ;;  %v4880_v4 = vld [vmem:[%s4611_s6 + $0xa8] sm:$0xff] }
 0x13f   :  { %v1160_v5 = vpop.f32.mrf.mxu0 }
 0x140   :  { %v1169_v7 = vmax.f32 %v1160_v5, 0.0 }
 0x142   :  { %v1172_v8 = vpack.c.bf16 %v1169_v7, %v1168_v6  ;;  %v828_v7 = vpack.c.bf16 %v4877_v3, %v4874_v2 }
 0x144   :  { %3580 = vmatmul.msk.bf16.vlgmr.msra.gmra.mxu1 %vm265_vm0, %v1172_v8  ;;  %3582 = vmatmul.msk.bf16.vlgmr.msra.gmra.mxu2 %vm265_vm0, %v1172_v8  ;;  %v4885_v8 = vld [vmem:[%s4611_s6 + $0xb8] sm:$0xff] }
 0x145   :  { %1397 = vmatpush.bf16.msra.mxu3 %v828_v7 }
 0x147   :  { %v1163_v9 = vpop.f32.mrf.mxu0 }
 0x148   :  { %v1170_v11 = vmax.f32 %v1163_v9, 0.0 }
 0x14f   :  { %v1165_v10 = vpop.f32.mrf.mxu0 }
 0x150   :  { %v1171_v13 = vmax.f32 %v1165_v10, 0.0  ;;  %v829_v10 = vpack.c.bf16 %v4885_v8, %v4880_v4 }
 0x152   :  { %v1173_v14 = vpack.c.bf16 %v1171_v13, %v1170_v11  ;;  %v4892_v11 = vld [vmem:[%s4611_s6 + $0x1c0] sm:$0xff]  ;;  %v4895_v13 = vld [vmem:[%s4611_s6 + $0x1d0] sm:$0xff]  ;;  %1435 = vmatpush.bf16.msrb.mxu1 %v829_v10 }
 0x153   :  { %v846_v19 = vpack.c.bf16 %v4895_v13, %v4892_v11  ;;  %v4955_v10 = vld [vmem:[%s4611_s6 + $0x60] sm:$0xff] }
 0x154   :  { %3581 = vmatmul.msk.bf16.gmra.mxu1 %vm265_vm0, %v1173_v14  ;;  %3583 = vmatmul.msk.bf16.gmra.mxu2 %vm265_vm0, %v1173_v14  ;;  %v4898_v14 = vld [vmem:[%s4611_s6 + $0x1c8] sm:$0xff] }
 0x155   :  { %1415 = vmatpush.bf16.msrb.mxu0 %v846_v19  ;;  %v4961_v19 = vld [vmem:[%s4611_s6 + $0x68] sm:$0xff] }
 0x1c1   :  { %v4809_v16 = vpop.f32.mrf.mxu1 }
 0x1c7   :  { %v4811_v20 = vpop.f32.mrf.mxu2 }
 0x1c9   :  { %v4813_v21 = vpop.f32.mrf.mxu1 }
 0x1ca   :  { %v1218_v24 = vadd.f32 %v4813_v21, %v4809_v16 }
 0x1cc   :  { %v1219_v28 = vrot.slane %v1218_v24, 4 }
 0x1ce   :  { %v1220_v33 = vadd.f32 %v1219_v28, %v1218_v24  ;;  %v847_v28 = vpack.c.bf16 %v4904_v23, %v4898_v14 }
 0x1cf   :  { %v4831_v36 = vpop.f32.mrf.mxu2 }
 0x1d0   :  { %v1221_v38 = vrot.slane %v1220_v33, 2  ;;  %v1225_v39 = vadd.f32 %v4831_v36, %v4811_v20  ;;  %1453 = vmatpush.bf16.msrb.mxu2 %v847_v28 }
 0x1d1   :  { %v4837_v42 = vpop.f32.mrf.mxu1 }
 0x1d2   :  { %v1222_v51 = vadd.f32 %v1221_v38, %v1220_v33  ;;  %v1226_v53 = vrot.slane %v1225_v39, 4  ;;  %v4914_v33 = vld [vmem:[%s4611_s6 + $0x90] sm:$0xff] }
 0x1d4   :  { %v1223_v60 = vrot.slane %v1222_v51, 1  ;;  %v1227_v61 = vadd.f32 %v1226_v53, %v1225_v39  ;;  %v826_v53 = vpack.c.bf16 %v4914_v33, %v4911_v29 }
 0x1d6   :  { %v1224_v5 = vadd.f32 %v1223_v60, %v1222_v51  ;;  %v1228_v6 = vrot.slane %v1227_v61, 2  ;;  %v4928_v51 = vld [vmem:[%s4611_s6 + $0x98] sm:$0xff]  ;;  %1398 = vmatpush.bf16.msra.mxu3 %v826_v53 }
 0x1d7   :  { %v4887_v9 = vpop.f32.mrf.mxu2 }
 0x1d8   :  { %v1239_v15 = vmul.f32 %v4869_v0, %v1224_v5  ;;  %v1229_v17 = vadd.f32 %v1228_v6, %v1227_v61  ;;  %v4948_v5 = vld [vmem:[%s4611_s6 + $0x1b8] sm:$0xff] }
 0x1d9   :  { %v4906_v24 = vpop.f32.mrf.mxu1  ;;  %v845_v7 = vpack.c.bf16 %v4948_v5, %v4941_v56 }
 0x1da   :  { %v4920_v37 = vsub.f32 %v4809_v16, %v1239_v15  ;;  %v4923_v38 = vsub.f32 %v4813_v21, %v1239_v15  ;;  %v1230_v39 = vrot.slane %v1229_v17, 1  ;;  %v1291_v41 = vadd.f32 %v4906_v24, %v4837_v42  ;;  %v4938_v21 = vld [vmem:[%s4611_s6 + $0x1b0] sm:$0xff] }
 0x1db   :  { %v827_v16 = vpack.c.bf16 %v4928_v51, %v4917_v34  ;;  %v844_v6 = vpack.c.bf16 %v4938_v21, %v4935_v54  ;;  %v4958_v15 = vld [vmem:[%s4611_s6 + $0x70] sm:$0xff]  ;;  %1454 = vmatpush.bf16.msrb.mxu2 %v845_v7 }
 0x1dc   :  { %v1245_v60 = vmul.f32 %v4920_v37, %v4920_v37  ;;  %v1247_v61 = vmul.f32 %v4923_v38, %v4923_v38  ;;  %v1231_v62 = vadd.f32 %v1230_v39, %v1229_v17  ;;  %v1292_v1 = vrot.slane %v1291_v41, 4 }
 0x1dd   :  { %1436 = vmatpush.bf16.msrb.mxu1 %v827_v16  ;;  %v824_v53 = vpack.c.bf16 %v4958_v15, %v4955_v10  ;;  %v4967_v16 = vld [vmem:[%s4611_s6 + $0x78] sm:$0xff]  ;;  %1416 = vmatpush.bf16.msrb.mxu0 %v844_v6 }
 0x1de   :  { %v1249_v17 = vadd.f32 %v1247_v61, %v1245_v60  ;;  %v1240_v28 = vmul.f32 %v4869_v0, %v1231_v62  ;;  %v1293_v39 = vadd.f32 %v1292_v1, %v1291_v41  ;;  %v825_v47 = vpack.c.bf16 %v4967_v16, %v4961_v19  ;;  %v4974_v60 = vld [vmem:[%s4611_s6 + $0x180] sm:$0xff]  ;;  %v4977_v61 = vld [vmem:[%s4611_s6 + $0x190] sm:$0xff]  ;;  %v4980_v41 = vld [vmem:[%s4611_s6 + $0x188] sm:$0xff] }
 0x1df   :  { %v4969_v49 = vpop.f32.mrf.mxu2  ;;  %6460 = vst [vmem:[#allocation63_spill] sm:$0xff] %v4974_v60  ;;  %1399 = vmatpush.bf16.msra.mxu3 %v824_v53  ;;  %v842_v48 = vpack.c.bf16 %v4977_v61, %v4974_v60 }
 0x1e0   :  { %6461 = vst [vmem:[#allocation64_spill] sm:$0xff] %v4977_v61  ;;  %v1250_v62 = vrot.slane %v1249_v17, 4  ;;  %v4983_v1 = vsub.f32 %v4811_v20, %v1240_v28  ;;  %v4986_v6 = vsub.f32 %v4831_v36, %v1240_v28  ;;  %v1294_v7 = vrot.slane %v1293_v39, 2  ;;  %v5001_v36 = vld [vmem:[%s4611_s6 + $0x50] sm:$0xff]  ;;  %v5004_v28 = vld [vmem:[%s4611_s6 + $0x48] sm:$0xff] }
 0x1e1   :  { %6462 = vst [vmem:[#allocation65_spill] sm:$0xff] %v4980_v41  ;;  %v1298_v46 = vadd.f32 %v4969_v49, %v4887_v9  ;;  %1437 = vmatpush.bf16.msrb.mxu1 %v825_v47  ;;  %v843_v20 = vpack.c.bf16 %v4989_v25, %v4980_v41  ;;  %1417 = vmatpush.bf16.msrb.mxu0 %v842_v48 }
 0x1e2   :  { %6465 = vst [vmem:[#allocation68_spill] sm:$0xff] %v5001_v36  ;;  %v1251_v27 = vadd.f32 %v1250_v62, %v1249_v17  ;;  %v1246_v47 = vmul.f32 %v4983_v1, %v4983_v1  ;;  %v1248_v53 = vmul.f32 %v4986_v6, %v4986_v6  ;;  %v1295_v22 = vadd.f32 %v1294_v7, %v1293_v39  ;;  %v5018_v62 = vld [vmem:[%s4611_s6 + $0x160] sm:$0xff] }
 0x1e3   :  { %6466 = vst [vmem:[#allocation69_spill] sm:$0xff] %v5004_v28  ;;  %v1299_v40 = vrot.slane %v1298_v46, 4  ;;  %1455 = vmatpush.bf16.msrb.mxu2 %v843_v20  ;;  %v822_v44 = vpack.c.bf16 %v5001_v36, %v4998_v52  ;;  %v823_v17 = vpack.c.bf16 %v5011_v26, %v5004_v28  ;;  %v840_v48 = vpack.c.bf16 %v5021_v12, %v5018_v62  ;;  %v5029_v20 = vld [vmem:[%s4611_s6 + $0x178] sm:$0xff]  ;;  %v5034_v28 = vld [vmem:[%s4611_s6 + $0x20] sm:$0xff]  ;;  %v5037_v52 = vld [vmem:[%s4611_s6 + $0x30] sm:$0xff] }
 0x1e4   :  { %6468 = vst [vmem:[#allocation71_spill] sm:$0xff] %v5018_v62  ;;  %v1252_v39 = vrot.slane %v1251_v27, 2  ;;  %v1256_v7 = vadd.f32 %v1248_v53, %v1246_v47  ;;  %v1296_v25 = vrot.slane %v1295_v22, 1  ;;  %v841_v26 = vpack.c.bf16 %v5029_v20, %v5024_v18  ;;  %v5040_v47 = vld [vmem:[%s4611_s6 + $0x28] sm:$0xff]  ;;  %v5050_v18 = vld [vmem:[%s4611_s6 + $0x140] sm:$0xff]  ;;  %v5053_v62 = vld [vmem:[%s4611_s6 + $0x150] sm:$0xff] }
 0x1e5   :  { %6471 = vst [vmem:[#allocation74_spill] sm:$0xff] %v5029_v20  ;;  %v1300_v36 = vadd.f32 %v1299_v40, %v1298_v46  ;;  %1400 = vmatpush.bf16.msra.mxu3 %v822_v44  ;;  %1438 = vmatpush.bf16.msrb.mxu1 %v823_v17  ;;  %v820_v40 = vpack.c.bf16 %v5037_v52, %v5034_v28  ;;  %v5045_v46 = vld [vmem:[%s4611_s6 + $0x38] sm:$0xff] }
 0x1e6   :  { %6472 = vst [vmem:[#allocation75_spill] sm:$0xff] %v5034_v28  ;;  %v1253_v53 = vadd.f32 %v1252_v39, %v1251_v27  ;;  %v1257_v12 = vrot.slane %v1256_v7, 4  ;;  %v1297_v44 = vadd.f32 %v1296_v25, %v1295_v22  ;;  %1418 = vmatpush.bf16.msrb.mxu0 %v840_v48  ;;  %v821_v20 = vpack.c.bf16 %v5045_v46, %v5040_v47  ;;  %v5056_v27 = vld [vmem:[%s4611_s6 + $0x148] sm:$0xff]  ;;  %v5061_v25 = vld [vmem:[%s4611_s6 + $0x158] sm:$0xff]  ;;  %v5070_v28 = vld [vmem:[%s4611_s6 + $0x10] sm:$0xff] }
 0x1e7   :  { %6473 = vst [vmem:[#allocation76_spill] sm:$0xff] %v5037_v52  ;;  %v1301_v17 = vrot.slane %v1300_v36, 2  ;;  %1456 = vmatpush.bf16.msrb.mxu2 %v841_v26  ;;  %v838_v22 = vpack.c.bf16 %v5053_v62, %v5050_v18 }
 0x1e8   :  { %6474 = vst [vmem:[#allocation77_spill] sm:$0xff] %v5040_v47  ;;  %v1254_v39 = vrot.slane %v1253_v53, 1  ;;  %v1258_v52 = vadd.f32 %v1257_v12, %v1256_v7  ;;  %v1305_v26 = vmul.f32 %v1297_v44, %v4869_v0  ;;  %v5067_v47 = vld [vmem:[%s4611_s6] sm:$0xff]  ;;  %v5073_v12 = vld [vmem:[%s4611_s6 + $0x8] sm:$0xff] }
 0x1e9   :  { %6475 = vst [vmem:[#allocation78_spill] sm:$0xff] %v5045_v46  ;;  %v1302_v48 = vadd.f32 %v1301_v17, %v1300_v36  ;;  %1401 = vmatpush.bf16.msra.mxu3 %v820_v40  ;;  %1439 = vmatpush.bf16.msrb.mxu1 %v821_v20  ;;  %v839_v46 = vpack.c.bf16 %v5061_v25, %v5056_v27  ;;  %v5078_v40 = vld [vmem:[%s4611_s6 + $0x18] sm:$0xff] }
 0x1ea   :  { %6476 = vst [vmem:[#allocation79_spill] sm:$0xff] %v5050_v18  ;;  %v1255_v7 = vadd.f32 %v1254_v39, %v1253_v53  ;;  %v818_v36 = vpack.c.bf16 %v5070_v28, %v5067_v47  ;;  %v5081_v20 = vsub.f32 %v4837_v42, %v1305_v26  ;;  %v5084_v44 = vsub.f32 %v4906_v24, %v1305_v26  ;;  %v5089_v53 = vld [vmem:[%s4611_s6 + $0x120] sm:$0xff]  ;;  %v5092_v39 = vld [vmem:[%s4611_s6 + $0x130] sm:$0xff]  ;;  %v5101_v24 = vld [vmem:[%s4611_s6 + $0x138] sm:$0xff] }
 0x1eb   :  { %6477 = vst [vmem:[#allocation80_spill] sm:$0xff] %v5053_v62  ;;  %v1259_v62 = vrot.slane %v1258_v52, 2  ;;  %v1303_v17 = vrot.slane %v1302_v48, 1  ;;  %1419 = vmatpush.bf16.msrb.mxu0 %v838_v22  ;;  %1457 = vmatpush.bf16.msrb.mxu2 %v839_v46  ;;  %v836_v42 = vpack.c.bf16 %v5092_v39, %v5089_v53 }
 0x1ec   :  { %6478 = vst [vmem:[#allocation81_spill] sm:$0xff] %v5056_v27  ;;  %v5095_v27 = vld [vmem:[%s4611_s6 + $0x128] sm:$0xff]  ;;  %v1311_v46 = vmul.f32 %v5081_v20, %v5081_v20  ;;  %v1313_v22 = vmul.f32 %v5084_v44, %v5084_v44 }
 0x1ed   :  { %6479 = vst [vmem:[#allocation82_spill] sm:$0xff] %v5061_v25  ;;  %v819_v25 = vpack.c.bf16 %v5078_v40, %v5073_v12  ;;  %v1304_v26 = vadd.f32 %v1303_v17, %v1302_v48  ;;  %1402 = vmatpush.bf16.msra.mxu3 %v818_v36 }
 0x1ee   :  { %6480 = vst [vmem:[#allocation83_spill] sm:$0xff] %v5067_v47  ;;  %v1260_v47 = vadd.f32 %v1259_v62, %v1258_v52  ;;  %v837_v52 = vpack.c.bf16 %v5101_v24, %v5095_v27  ;;  %v1315_v62 = vadd.f32 %v1313_v22, %v1311_v46 }
 0x1ef   :  { %6481 = vst [vmem:[#allocation84_spill] sm:$0xff] %v5070_v28  ;;  %v1263_v28 = vmul.f32 %v1255_v7, %v4869_v0  ;;  %1440 = vmatpush.bf16.msrb.mxu1 %v819_v25  ;;  %v1306_v7 = vmul.f32 %v1304_v26, %v4869_v0  ;;  %1420 = vmatpush.bf16.msrb.mxu0 %v836_v42 }
 0x1f0   :  { %6482 = vst [vmem:[#allocation85_spill] sm:$0xff] %v5073_v12  ;;  %v1261_v12 = vrot.slane %v1260_v47, 1  ;;  %1458 = vmatpush.bf16.msrb.mxu2 %v837_v52 }
 0x1f1   :  { %6483 = vst [vmem:[#allocation86_spill] sm:$0xff] %v5078_v40  ;;  %v5107_v40 = vadd.f32 1e-05, %v1263_v28  ;;  %v5114_v18 = vsub.f32 %v4887_v9, %v1306_v7  ;;  %v5117_v25 = vsub.f32 %v4969_v49, %v1306_v7 }
 0x1f2   :  { %6484 = vst [vmem:[#allocation87_spill] sm:$0xff] %v5089_v53  ;;  %v1316_v53 = vrot.slane %v1315_v62, 4 }
 0x1f3   :  { %6485 = vst [vmem:[#allocation88_spill] sm:$0xff] %v5092_v39  ;;  %3831 = vrsqrt.f32 %v5107_v40  ;;  %v1262_v39 = vadd.f32 %v1261_v12, %v1260_v47  ;;  %v1312_v36 = vmul.f32 %v5114_v18, %v5114_v18  ;;  %v1314_v17 = vmul.f32 %v5117_v25, %v5117_v25 }
 0x1f4   :  { %6486 = vst [vmem:[#allocation89_spill] sm:$0xff] %v5095_v27  ;;  %v1317_v48 = vadd.f32 %v1316_v53, %v1315_v62  ;;  %v496_v27 = vld [vmem:[#allocation10 + $0xf0] sm:$0xff]  ;;  %vm1273_vm4 = vweird.f32 %v5107_v40 }
 0x1f5   :  { %6487 = vst [vmem:[#allocation90_spill] sm:$0xff] %v5101_v24  ;;  %v1264_v28 = vmul.f32 %v1262_v39, %v4869_v0  ;;  %v1322_v12 = vadd.f32 %v1314_v17, %v1312_v36  ;;  %v494_v24 = vld [vmem:[#allocation10 + $0xe0] sm:$0xff] }
 0x1f6   :  { %6488 = vst [vmem:[#allocation91_spill] sm:$0xff] %v5114_v18  ;;  %v1318_v47 = vrot.slane %v1317_v48, 2  ;;  %v5151_v18 = vld [vmem:[%s4601_s24] sm:$0x3] }
 0x1f7   :  { %6489 = vst [vmem:[#allocation92_spill] sm:$0xff] %v5117_v25  ;;  %v5124_v42 = vadd.f32 1e-05, %v1264_v28  ;;  %v1323_v39 = vrot.slane %v1322_v12, 4  ;;  %v495_v25 = vld [vmem:[#allocation10 + $0xe8] sm:$0xff] }
 0x1f8   :  { %v1319_v9 = vadd.f32 %v1318_v47, %v1317_v48  ;;  %v558_v48 = vmul.f32 0.999, %v494_v24  ;;  %v560_v47 = vmul.f32 0.999, %v496_v27 }
 0x1f9   :  { %v5126_v46 = vpop.eup %3831  ;;  %3833 = vrsqrt.f32 %v5124_v42  ;;  %v1324_v26 = vadd.f32 %v1323_v39, %v1322_v12  ;;  %v624_v12 = vmul.f32 0.001, %v4821_v31  ;;  %v492_v31 = vld [vmem:[#allocation10 + $0xd0] sm:$0xff]  ;;  %vm1283_vm6 = vweird.f32 %v5124_v42 }
 0x1fa   :  { %v1268_v49 = vmul.f32 %v5126_v46, %v5107_v40  ;;  %v1320_v22 = vrot.slane %v1319_v9, 1  ;;  %vm1274_vm3 = vweird.f32 %v5126_v46  ;;  %v528_v40 = vld [vmem:[#allocation10 + $0x1f0] sm:$0xff] }
 0x1fb   :  { %v1325_v62 = vrot.slane %v1324_v26, 2  ;;  %v5145_v27 = vadd.f32 %v624_v12, %v560_v47  ;;  %v556_v12 = vmul.f32 0.999, %v492_v31  ;;  %vm1275_vm5 = vmor %vm1273_vm4, %vm1274_vm3 }
 0x1fc   :  { %v1269_v53 = vmul.f32 %v5126_v46, %v1268_v49  ;;  %v1321_v52 = vadd.f32 %v1320_v22, %v1319_v9  ;;  %v622_v49 = vmul.f32 0.001, %v4818_v30  ;;  %v497_v9 = vld [vmem:[#allocation10 + $0xf8] sm:$0xff] }
 0x1fd   :  { %v1326_v41 = vadd.f32 %v1325_v62, %v1324_v26  ;;  %v559_v26 = vmul.f32 0.999, %v495_v25  ;;  %6491 = vst [vmem:[#allocation94_spill] sm:$0xff] %v5145_v27  ;;  %v561_v30 = vmul.f32 0.999, %v497_v9  ;;  %v490_v62 = vld [vmem:[#allocation10 + $0xc0] sm:$0xff] }
 0x1fe   :  { %v1270_v28 = vmul.f32 0.5, %v1269_v53  ;;  %v1329_v17 = vmul.f32 %v1321_v52, %v4869_v0  ;;  %v5142_v22 = vadd.f32 %v622_v49, %v558_v48  ;;  %752 = vst [vmem:[#allocation24 + $0xf0] sm:$0xff] %v5145_v27  ;;  %v5159_v25 = vld [vmem:[%s4606_s30] sm:$0x3] }
 0x1ff   :  { %v5132_v7 = vpop.eup %3833  ;;  %v1327_v53 = vrot.slane %v1326_v41, 1  ;;  %6492 = vst [vmem:[#allocation95_spill] sm:$0xff] %v5159_v25  ;;  %v493_v9 = vld [vmem:[#allocation10 + $0xd8] sm:$0xff] }
 0x200   :  { %v1278_v36 = vmul.f32 %v5132_v7, %v5124_v42  ;;  %v5138_v61 = vadd.f32 1e-05, %v1329_v17  ;;  %6490 = vst [vmem:[#allocation93_spill] sm:$0xff] %v5142_v22  ;;  %v1271_v52 = vsub.f32 1.5, %v1270_v28  ;;  %v623_v17 = vmul.f32 0.001, %v4824_v32 }
 0x201   :  { %v1328_v24 = vadd.f32 %v1327_v53, %v1326_v41  ;;  %750 = vst [vmem:[#allocation24 + $0xe0] sm:$0xff] %v5142_v22  ;;  %v554_v32 = vmul.f32 0.999, %v490_v62  ;;  %v526_v62 = vld [vmem:[#allocation10 + $0x1e0] sm:$0xff]  ;;  %v557_v31 = vmul.f32 0.999, %v493_v9  ;;  %vm1284_vm7 = vweird.f32 %v5132_v7 }
 0x202   :  { %v1279_v39 = vmul.f32 %v5132_v7, %v1278_v36  ;;  %3835 = vrsqrt.f32 %v5138_v61  ;;  %v625_v36 = vmul.f32 0.001, %v4829_v35  ;;  %v1272_v47 = vmul.f32 %v5126_v46, %v1271_v52  ;;  %v491_v35 = vld [vmem:[#allocation10 + $0xc8] sm:$0xff]  ;;  %v488_v22 = vld [vmem:[#allocation10 + $0xb0] sm:$0xff]  ;;  %vm1285_vm8 = vmor %vm1283_vm6, %vm1284_vm7 }
 0x203   :  { %v1330_v48 = vmul.f32 %v1328_v24, %v4869_v0  ;;  %v687_v49 = vadd.f32 %v623_v17, %v559_v26  ;;  %v620_v24 = vmul.f32 0.001, %v4843_v45  ;;  %v5172_v52 = vperm.slane %v5151_v18, 0 }
 0x204   :  { %v1280_v28 = vmul.f32 0.5, %v1279_v39  ;;  %v689_v60 = vadd.f32 %v625_v36, %v561_v30  ;;  %v618_v39 = vmul.f32 0.001, %v4840_v43  ;;  %v555_v26 = vmul.f32 0.999, %v491_v35  ;;  %v529_v35 = vld [vmem:[#allocation10 + $0x1f8] sm:$0xff] }
 0x205   :  { %v5162_v53 = vadd.f32 1e-05, %v1330_v48  ;;  %751 = vst [vmem:[#allocation24 + $0xe8] sm:$0xff] %v687_v49  ;;  %v5175_v30 = vperm.slane %v5159_v25, 0  ;;  %v1276_v43 = vsel %vm1275_vm5, %v5126_v46, %v1272_v47  ;;  %v684_v48 = vadd.f32 %v620_v24, %v556_v12  ;;  %v486_v47 = vld [vmem:[#allocation10 + $0xa0] sm:$0xff] }
 0x206   :  { %753 = vst [vmem:[#allocation24 + $0xf8] sm:$0xff] %v689_v60  ;;  %v682_v45 = vadd.f32 %v618_v39, %v554_v32  ;;  %v1281_v17 = vsub.f32 1.5, %v1280_v28  ;;  %v619_v49 = vmul.f32 0.001, %v4846_v50  ;;  %v527_v60 = vld [vmem:[#allocation10 + $0x1e8] sm:$0xff]  ;;  %v1289_v32 = vmul.f32 %v1276_v43, %v4923_v38 }
 0x207   :  { %3837 = vrsqrt.f32 %v5162_v53  ;;  %v621_v41 = vmul.f32 0.001, %v4851_v55  ;;  %v590_v46 = vmul.f32 0.999, %v526_v62  ;;  %748 = vst [vmem:[#allocation24 + $0xd0] sm:$0xff] %v684_v48  ;;  %v489_v48 = vld [vmem:[#allocation10 + $0xb8] sm:$0xff]  ;;  %vm1339_vm9 = vweird.f32 %v5138_v61 }
 0x208   :  { %v5166_v0 = vpop.eup %3835  ;;  %746 = vst [vmem:[#allocation24 + $0xc0] sm:$0xff] %v682_v45  ;;  %v683_v9 = vadd.f32 %v619_v49, %v555_v26  ;;  %v592_v28 = vmul.f32 0.999, %v528_v40  ;;  %v654_v39 = vmul.f32 0.001, %v4856_v57  ;;  %v1282_v26 = vmul.f32 %v5132_v7, %v1281_v17 }
 0x209   :  { %v1334_v36 = vmul.f32 %v5166_v0, %v5138_v61  ;;  %v685_v12 = vadd.f32 %v621_v41, %v557_v31  ;;  %v656_v50 = vmul.f32 0.001, %v4859_v58  ;;  %v591_v24 = vmul.f32 0.999, %v527_v60  ;;  %v487_v58 = vld [vmem:[#allocation10 + $0xa8] sm:$0xff] }
 0x20a   :  { %v593_v27 = vmul.f32 0.999, %v529_v35  ;;  %747 = vst [vmem:[#allocation24 + $0xc8] sm:$0xff] %v683_v9  ;;  %v718_v45 = vadd.f32 %v654_v39, %v590_v46  ;;  %v655_v55 = vmul.f32 0.001, %v4862_v59  ;;  %v1287_v31 = vmul.f32 %v1276_v43, %v4920_v37  ;;  %v522_v35 = vld [vmem:[#allocation10 + $0x1c0] sm:$0xff] }
 0x20b   :  { %v1335_v25 = vmul.f32 %v5166_v0, %v1334_v36  ;;  %v657_v62 = vmul.f32 0.001, %v4867_v63  ;;  %749 = vst [vmem:[#allocation24 + $0xd8] sm:$0xff] %v685_v12  ;;  %v720_v57 = vadd.f32 %v656_v50, %v592_v28  ;;  %v550_v41 = vmul.f32 0.999, %v486_v47  ;;  %v524_v46 = vld [vmem:[#allocation10 + $0x1d0] sm:$0xff] }
 0x20c   :  { %782 = vst [vmem:[#allocation24 + $0x1e0] sm:$0xff] %v718_v45  ;;  %v719_v36 = vadd.f32 %v655_v55, %v591_v24  ;;  %v552_v59 = vmul.f32 0.999, %v488_v22  ;;  %v1364_v63 = vmul.f32 %v5172_v52, %v1289_v32  ;;  %v614_v17 = vmul.f32 0.001, %v4874_v2  ;;  %v525_v28 = vld [vmem:[#allocation10 + $0x1d8] sm:$0xff] }
 0x20d   :  { %v5190_v38 = vpop.eup %3837  ;;  %784 = vst [vmem:[#allocation24 + $0x1f0] sm:$0xff] %v720_v57  ;;  %v721_v49 = vadd.f32 %v657_v62, %v593_v27  ;;  %v616_v60 = vmul.f32 0.001, %v4877_v3  ;;  %v1336_v37 = vmul.f32 0.5, %v1335_v25  ;;  %v551_v43 = vmul.f32 0.999, %v487_v58 }
 0x20e   :  { %v1344_v40 = vmul.f32 %v5190_v38, %v5162_v53  ;;  %783 = vst [vmem:[#allocation24 + $0x1e8] sm:$0xff] %v719_v36  ;;  %v1286_v22 = vsel %vm1285_vm8, %v5132_v7, %v1282_v26  ;;  %v5206_v47 = vperm.slane %v5151_v18, 1  ;;  %v678_v27 = vadd.f32 %v614_v17, %v550_v41  ;;  %v523_v25 = vld [vmem:[#allocation10 + $0x1c8] sm:$0xff]  ;;  %v482_v12 = vld [vmem:[#allocation10 + $0x80] sm:$0xff]  ;;  %v484_v55 = vld [vmem:[#allocation10 + $0x90] sm:$0xff] }
 0x20f   :  { %785 = vst [vmem:[#allocation24 + $0x1f8] sm:$0xff] %v721_v49  ;;  %v553_v2 = vmul.f32 0.999, %v489_v48  ;;  %v680_v32 = vadd.f32 %v616_v60, %v552_v59  ;;  %v615_v9 = vmul.f32 0.001, %v4880_v4  ;;  %v5213_v18 = vmul.f32 %v5172_v52, %v1287_v31  ;;  %v483_v62 = vld [vmem:[#allocation10 + $0x88] sm:$0xff] }
 0x210   :  { %v1345_v3 = vmul.f32 %v5190_v38, %v1344_v40  ;;  %v617_v42 = vmul.f32 0.001, %v4885_v8  ;;  %742 = vst [vmem:[#allocation24 + $0xa0] sm:$0xff] %v678_v27  ;;  %v586_v39 = vmul.f32 0.999, %v522_v35  ;;  %v5216_v50 = vadd.f32 %v5175_v30, %v1364_v63  ;;  %v485_v49 = vld [vmem:[#allocation10 + $0x98] sm:$0xff] }
 0x211   :  { %v588_v7 = vmul.f32 0.999, %v524_v46  ;;  %v1288_v24 = vmul.f32 %v1286_v22, %v4983_v1  ;;  %v1337_v45 = vsub.f32 1.5, %v1336_v37  ;;  %744 = vst [vmem:[#allocation24 + $0xb0] sm:$0xff] %v680_v32  ;;  %v679_v4 = vadd.f32 %v615_v9, %v551_v43  ;;  %v518_v60 = vld [vmem:[#allocation10 + $0x1a0] sm:$0xff]  ;;  %v520_v37 = vld [vmem:[#allocation10 + $0x1b0] sm:$0xff] }
 0x212   :  { %v650_v8 = vmul.f32 0.001, %v4892_v11  ;;  %v681_v26 = vadd.f32 %v617_v42, %v553_v2  ;;  %v652_v57 = vmul.f32 0.001, %v4895_v13  ;;  %v587_v41 = vmul.f32 0.999, %v523_v25 }
 0x213   :  { %v589_v58 = vmul.f32 0.999, %v525_v28  ;;  %v1346_v40 = vmul.f32 0.5, %v1345_v3  ;;  %743 = vst [vmem:[#allocation24 + $0xa8] sm:$0xff] %v679_v4  ;;  %v651_v36 = vmul.f32 0.001, %v4898_v14  ;;  %v1290_v1 = vmul.f32 %v1286_v22, %v4986_v6 }
 0x214   :  { %v714_v31 = vadd.f32 %v650_v8, %v586_v39  ;;  %v653_v59 = vmul.f32 0.001, %v4904_v23  ;;  %745 = vst [vmem:[#allocation24 + $0xb8] sm:$0xff] %v681_v26  ;;  %v716_v48 = vadd.f32 %v652_v57, %v588_v7  ;;  %v546_v63 = vmul.f32 0.999, %v482_v12  ;;  %v519_v14 = vld [vmem:[#allocation10 + $0x1a8] sm:$0xff] }
 0x215   :  { %v548_v11 = vmul.f32 0.999, %v484_v55  ;;  %vm1340_vm10 = vweird.f32 %v5166_v0  ;;  %vm1349_vm11 = vweird.f32 %v5162_v53  ;;  %v715_v13 = vadd.f32 %v651_v36, %v587_v41  ;;  %v521_v46 = vld [vmem:[#allocation10 + $0x1b8] sm:$0xff]  ;;  %v478_v32 = vld [vmem:[#allocation10 + $0x60] sm:$0xff]  ;;  %v480_v28 = vld [vmem:[#allocation10 + $0x70] sm:$0xff] }
 0x216   :  { %778 = vst [vmem:[#allocation24 + $0x1c0] sm:$0xff] %v714_v31  ;;  %v610_v17 = vmul.f32 0.001, %v4911_v29  ;;  %v1338_v23 = vmul.f32 %v5166_v0, %v1337_v45  ;;  %v717_v6 = vadd.f32 %v653_v59, %v589_v58  ;;  %v612_v43 = vmul.f32 0.001, %v4914_v33  ;;  %vm1341_vm12 = vmor %vm1339_vm9, %vm1340_vm10  ;;  %v479_v7 = vld [vmem:[#allocation10 + $0x68] sm:$0xff] }
 0x217   :  { %780 = vst [vmem:[#allocation24 + $0x1d0] sm:$0xff] %v716_v48  ;;  %v547_v35 = vmul.f32 0.999, %v483_v62  ;;  %v1347_v22 = vsub.f32 1.5, %v1346_v40  ;;  %v549_v2 = vmul.f32 0.999, %v485_v49  ;;  %v5231_v29 = vmul.f32 %v5206_v47, %v1288_v24 }
 0x218   :  { %779 = vst [vmem:[#allocation24 + $0x1c8] sm:$0xff] %v715_v13  ;;  %v674_v27 = vadd.f32 %v610_v17, %v546_v63  ;;  %v611_v3 = vmul.f32 0.001, %v4917_v34  ;;  %v676_v9 = vadd.f32 %v612_v43, %v548_v11  ;;  %v613_v42 = vmul.f32 0.001, %v4928_v51  ;;  %v481_v4 = vld [vmem:[#allocation10 + $0x78] sm:$0xff] }
 0x219   :  { %781 = vst [vmem:[#allocation24 + $0x1d8] sm:$0xff] %v717_v6  ;;  %v582_v25 = vmul.f32 0.999, %v518_v60  ;;  %vm1350_vm13 = vweird.f32 %v5190_v38  ;;  %v584_v34 = vmul.f32 0.999, %v520_v37  ;;  %v1342_v12 = vsel %vm1341_vm12, %v5166_v0, %v1338_v23  ;;  %v514_v26 = vld [vmem:[#allocation10 + $0x180] sm:$0xff] }
 0x21a   :  { %738 = vst [vmem:[#allocation24 + $0x80] sm:$0xff] %v674_v27  ;;  %v675_v33 = vadd.f32 %v611_v3, %v547_v35  ;;  %v646_v39 = vmul.f32 0.001, %v4935_v54  ;;  %v677_v24 = vadd.f32 %v613_v42, %v549_v2  ;;  %v648_v51 = vmul.f32 0.001, %v4938_v21  ;;  %v516_v58 = vld [vmem:[#allocation10 + $0x190] sm:$0xff]  ;;  %vm1351_vm14 = vmor %vm1349_vm11, %vm1350_vm13 }
 0x21b   :  { %740 = vst [vmem:[#allocation24 + $0x90] sm:$0xff] %v676_v9  ;;  %v583_v45 = vmul.f32 0.999, %v519_v14  ;;  %v1348_v8 = vmul.f32 %v5190_v38, %v1347_v22  ;;  %v585_v55 = vmul.f32 0.999, %v521_v46  ;;  %v5245_v57 = vmul.f32 %v5206_v47, %v1290_v1  ;;  %v515_v59 = vld [vmem:[#allocation10 + $0x188] sm:$0xff] }
 0x21c   :  { %739 = vst [vmem:[#allocation24 + $0x88] sm:$0xff] %v675_v33  ;;  %v710_v61 = vadd.f32 %v646_v39, %v582_v25  ;;  %v647_v62 = vmul.f32 0.001, %v4941_v56  ;;  %v712_v54 = vadd.f32 %v648_v51, %v584_v34  ;;  %v649_v0 = vmul.f32 0.001, %v4948_v5  ;;  %v517_v48 = vld [vmem:[#allocation10 + $0x198] sm:$0xff] }
 0x21d   :  { %741 = vst [vmem:[#allocation24 + $0x98] sm:$0xff] %v677_v24  ;;  %v542_v41 = vmul.f32 0.999, %v478_v32  ;;  %v1355_v21 = vmul.f32 %v1342_v12, %v5084_v44  ;;  %v544_v31 = vmul.f32 0.999, %v480_v28  ;;  %v1375_v44 = vadd.f32 %v5175_v30, %v5213_v18  ;;  %v474_v13 = vld [vmem:[#allocation10 + $0x40] sm:$0xff] }
 0x21e   :  { %774 = vst [vmem:[#allocation24 + $0x1a0] sm:$0xff] %v710_v61  ;;  %v711_v40 = vadd.f32 %v647_v62, %v583_v45  ;;  %v606_v36 = vmul.f32 0.001, %v4955_v10  ;;  %v713_v56 = vadd.f32 %v649_v0, %v585_v55  ;;  %v608_v1 = vmul.f32 0.001, %v4958_v15  ;;  %v476_v37 = vld [vmem:[#allocation10 + $0x50] sm:$0xff] }
 0x21f   :  { %776 = vst [vmem:[#allocation24 + $0x1b0] sm:$0xff] %v712_v54  ;;  %v543_v5 = vmul.f32 0.999, %v479_v7  ;;  %v1352_v63 = vsel %vm1351_vm14, %v5190_v38, %v1348_v8  ;;  %v545_v10 = vmul.f32 0.999, %v481_v4  ;;  %v1353_v53 = vmul.f32 %v1342_v12, %v5081_v20  ;;  %v6493_v38 = vld [vmem:[#allocation63_spill] sm:$0xff] }
 0x220   :  { %775 = vst [vmem:[#allocation24 + $0x1a8] sm:$0xff] %v711_v40  ;;  %v670_v11 = vadd.f32 %v606_v36, %v542_v41  ;;  %v607_v49 = vmul.f32 0.001, %v4961_v19  ;;  %v672_v17 = vadd.f32 %v608_v1, %v544_v31  ;;  %v609_v60 = vmul.f32 0.001, %v4967_v16  ;;  %v475_v43 = vld [vmem:[#allocation10 + $0x48] sm:$0xff] }
 0x221   :  { %777 = vst [vmem:[#allocation24 + $0x1b8] sm:$0xff] %v713_v56  ;;  %v578_v15 = vmul.f32 0.999, %v514_v26  ;;  %v1368_v14 = vmul.f32 %v5172_v52, %v1355_v21  ;;  %v580_v23 = vmul.f32 0.999, %v516_v58  ;;  %v6494_v35 = vld [vmem:[#allocation91_spill] sm:$0xff]  ;;  %v1366_v55 = vmul.f32 %v5172_v52, %v1353_v53 }
 0x222   :  { %734 = vst [vmem:[#allocation24 + $0x60] sm:$0xff] %v670_v11  ;;  %v671_v18 = vadd.f32 %v607_v49, %v543_v5  ;;  %v642_v6 = vmul.f32 0.001, %v6493_v38  ;;  %v5264_v46 = vmul.f32 %v1352_v63, %v6494_v35  ;;  %v673_v19 = vadd.f32 %v609_v60, %v545_v10  ;;  %v6495_v20 = vld [vmem:[#allocation64_spill] sm:$0xff]  ;;  %v477_v2 = vld [vmem:[#allocation10 + $0x58] sm:$0xff]  ;;  %v510_v42 = vld [vmem:[#allocation10 + $0x160] sm:$0xff] }
 0x223   :  { %736 = vst [vmem:[#allocation24 + $0x70] sm:$0xff] %v672_v17  ;;  %v644_v22 = vmul.f32 0.001, %v6495_v20  ;;  %v579_v27 = vmul.f32 0.999, %v515_v59  ;;  %v6496_v32 = vld [vmem:[#allocation65_spill] sm:$0xff]  ;;  %v5298_v35 = vadd.f32 %v5175_v30, %v1366_v55 }
 0x224   :  { %735 = vst [vmem:[#allocation24 + $0x68] sm:$0xff] %v671_v18  ;;  %v706_v16 = vadd.f32 %v642_v6, %v578_v15  ;;  %v581_v3 = vmul.f32 0.999, %v517_v48  ;;  %v643_v9 = vmul.f32 0.001, %v6496_v32  ;;  %v1383_v25 = vmax.f32 %v1375_v44, 0.0 }
 0x225   :  { %737 = vst [vmem:[#allocation24 + $0x78] sm:$0xff] %v673_v19  ;;  %v708_v28 = vadd.f32 %v644_v22, %v580_v23  ;;  %v6497_v33 = vld [vmem:[#allocation66_spill] sm:$0xff]  ;;  %v538_v39 = vmul.f32 0.999, %v474_v13  ;;  %v512_v7 = vld [vmem:[#allocation10 + $0x170] sm:$0xff]  ;;  %v1385_v12 = vmax.f32 %v5216_v50, 0.0 }
 0x226   :  { %v645_v34 = vmul.f32 0.001, %v6497_v33  ;;  %770 = vst [vmem:[#allocation24 + $0x180] sm:$0xff] %v706_v16  ;;  %v707_v24 = vadd.f32 %v643_v9, %v579_v27  ;;  %v540_v51 = vmul.f32 0.999, %v476_v37  ;;  %v6498_v45 = vld [vmem:[#allocation67_spill] sm:$0xff] }
 0x227   :  { %v602_v4 = vmul.f32 0.001, %v6498_v45  ;;  %v511_v8 = vld [vmem:[#allocation10 + $0x168] sm:$0xff]  ;;  %v5272_v61 = vld [vmem:[%s4611_s6 + $0x100] sm:$0xff]  ;;  %772 = vst [vmem:[#allocation24 + $0x190] sm:$0xff] %v708_v28  ;;  %v1391_v58 = vpack.c.bf16 %v1385_v12, %v1383_v25  ;;  %v472_v10 = vld [vmem:[#allocation10 + $0x30] sm:$0xff]  ;;  %v5306_v25 = vmul.f32 %v5206_v47, %v5264_v46 }
 0x228   :  { %v709_v62 = vadd.f32 %v645_v34, %v581_v3  ;;  %v6499_v26 = vld [vmem:[#allocation68_spill] sm:$0xff]  ;;  %v539_v0 = vmul.f32 0.999, %v475_v43  ;;  %v513_v41 = vld [vmem:[#allocation10 + $0x178] sm:$0xff]  ;;  %771 = vst [vmem:[#allocation24 + $0x188] sm:$0xff] %v707_v24  ;;  %v470_v59 = vld [vmem:[#allocation10 + $0x20] sm:$0xff] }
 0x229   :  { %v604_v54 = vmul.f32 0.001, %v6499_v26  ;;  %v5277_v21 = vld [vmem:[%s4611_s6 + $0x110] sm:$0xff]  ;;  %v666_v50 = vadd.f32 %v602_v4, %v538_v39  ;;  %v541_v40 = vmul.f32 0.999, %v477_v2  ;;  %v6500_v31 = vld [vmem:[#allocation69_spill] sm:$0xff]  ;;  %1403 = vmatmul.bf16.vlgmr.msra.gmra.mxu3 %v1391_v58  ;;  %1441 = vmatmul.bf16.vlgmr.msrb.gmra.mxu1 %v1391_v58 }
 0x22a   :  { %v603_v36 = vmul.f32 0.001, %v6500_v31  ;;  %v834_v56 = vpack.c.bf16 %v5277_v21, %v5272_v61  ;;  %v6501_v52 = vld [vmem:[#allocation92_spill] sm:$0xff]  ;;  %773 = vst [vmem:[#allocation24 + $0x198] sm:$0xff] %v709_v62  ;;  %v6502_v48 = vld [vmem:[#allocation70_spill] sm:$0xff]  ;;  %v6503_v53 = vld [vmem:[#allocation71_spill] sm:$0xff] }
 0x22b   :  { %v5283_v1 = vmul.f32 %v1352_v63, %v6501_v52  ;;  %v668_v5 = vadd.f32 %v604_v54, %v540_v51  ;;  %v605_v44 = vmul.f32 0.001, %v6502_v48  ;;  %v574_v11 = vmul.f32 0.999, %v510_v42  ;;  %730 = vst [vmem:[#allocation24 + $0x40] sm:$0xff] %v666_v50  ;;  %v471_v60 = vld [vmem:[#allocation10 + $0x28] sm:$0xff] }
 0x22c   :  { %v667_v49 = vadd.f32 %v603_v36, %v539_v0  ;;  %v576_v13 = vmul.f32 0.999, %v512_v7  ;;  %v638_v17 = vmul.f32 0.001, %v6503_v53  ;;  %1421 = vmatpush.bf16.msrb.mxu0 %v834_v56  ;;  %v5288_v15 = vld [vmem:[%s4611_s6 + $0x108] sm:$0xff]  ;;  %v5291_v63 = vadd.f32 %v5175_v30, %v1368_v14  ;;  %v6504_v18 = vld [vmem:[#allocation72_spill] sm:$0xff] }
 0x22d   :  { %732 = vst [vmem:[#allocation24 + $0x50] sm:$0xff] %v668_v5  ;;  %v669_v37 = vadd.f32 %v605_v44, %v541_v40  ;;  %v640_v23 = vmul.f32 0.001, %v6504_v18  ;;  %v575_v38 = vmul.f32 0.999, %v511_v8  ;;  %v473_v6 = vld [vmem:[#allocation10 + $0x38] sm:$0xff] }
 0x22e   :  { %v5295_v43 = vld [vmem:[%s4611_s6 + $0x118] sm:$0xff]  ;;  %731 = vst [vmem:[#allocation24 + $0x48] sm:$0xff] %v667_v49  ;;  %v702_v19 = vadd.f32 %v638_v17, %v574_v11  ;;  %v577_v20 = vmul.f32 0.999, %v513_v41  ;;  %v506_v2 = vld [vmem:[#allocation10 + $0x140] sm:$0xff]  ;;  %v507_v39 = vld [vmem:[#allocation10 + $0x148] sm:$0xff] }
 0x22f   :  { %v6505_v22 = vld [vmem:[#allocation73_spill] sm:$0xff]  ;;  %v835_v14 = vpack.c.bf16 %v5295_v43, %v5288_v15  ;;  %733 = vst [vmem:[#allocation24 + $0x58] sm:$0xff] %v669_v37  ;;  %v704_v16 = vadd.f32 %v640_v23, %v576_v13  ;;  %v6506_v3 = vld [vmem:[#allocation74_spill] sm:$0xff]  ;;  %v534_v9 = vmul.f32 0.999, %v470_v59  ;;  %v6507_v33 = vld [vmem:[#allocation75_spill] sm:$0xff] }
 0x230   :  { %v639_v27 = vmul.f32 0.001, %v6505_v22  ;;  %v641_v32 = vmul.f32 0.001, %v6506_v3  ;;  %v508_v42 = vld [vmem:[#allocation10 + $0x150] sm:$0xff]  ;;  %766 = vst [vmem:[#allocation24 + $0x160] sm:$0xff] %v702_v19 }
 0x231   :  { %v536_v28 = vmul.f32 0.999, %v472_v10  ;;  %v598_v34 = vmul.f32 0.001, %v6507_v33  ;;  %1459 = vmatpush.bf16.msrb.mxu2 %v835_v14  ;;  %v6508_v7 = vld [vmem:[#allocation95_spill] sm:$0xff]  ;;  %768 = vst [vmem:[#allocation24 + $0x170] sm:$0xff] %v704_v16 }
 0x232   :  { %v703_v30 = vadd.f32 %v639_v27, %v575_v38  ;;  %v5310_v12 = vperm.slane %v6508_v7, 1  ;;  %v705_v24 = vadd.f32 %v641_v32, %v577_v20  ;;  %v6509_v51 = vld [vmem:[#allocation76_spill] sm:$0xff]  ;;  %v535_v4 = vmul.f32 0.999, %v471_v60  ;;  %v509_v8 = vld [vmem:[#allocation10 + $0x158] sm:$0xff]  ;;  %v466_v0 = vld [vmem:[#allocation10] sm:$0xff] }
 0x233   :  { %v600_v45 = vmul.f32 0.001, %v6509_v51  ;;  %v1387_v55 = vmax.f32 %v5298_v35, 0.0  ;;  %v662_v46 = vadd.f32 %v598_v34, %v534_v9  ;;  %v537_v62 = vmul.f32 0.999, %v473_v6  ;;  %v6510_v26 = vld [vmem:[#allocation77_spill] sm:$0xff] }
 0x234   :  { %767 = vst [vmem:[#allocation24 + $0x168] sm:$0xff] %v703_v30  ;;  %v599_v54 = vmul.f32 0.001, %v6510_v26  ;;  %v1376_v41 = vadd.f32 %v5310_v12, %v5231_v29  ;;  %v6511_v50 = vld [vmem:[#allocation78_spill] sm:$0xff]  ;;  %v570_v31 = vmul.f32 0.999, %v506_v2  ;;  %v1378_v59 = vadd.f32 %v5310_v12, %v5245_v57 }
 0x235   :  { %769 = vst [vmem:[#allocation24 + $0x178] sm:$0xff] %v705_v24  ;;  %v664_v58 = vadd.f32 %v600_v45, %v536_v28  ;;  %v601_v40 = vmul.f32 0.001, %v6511_v50  ;;  %v468_v36 = vld [vmem:[#allocation10 + $0x10] sm:$0xff]  ;;  %v572_v52 = vmul.f32 0.999, %v508_v42  ;;  %v1369_v32 = vmul.f32 %v5206_v47, %v5283_v1 }
 0x236   :  { %726 = vst [vmem:[#allocation24 + $0x20] sm:$0xff] %v662_v46  ;;  %v663_v56 = vadd.f32 %v599_v54, %v535_v4  ;;  %v6512_v5 = vld [vmem:[#allocation79_spill] sm:$0xff]  ;;  %v1384_v11 = vmax.f32 %v1376_v41, 0.0  ;;  %v6513_v49 = vld [vmem:[#allocation80_spill] sm:$0xff]  ;;  %v571_v13 = vmul.f32 0.999, %v507_v39  ;;  %v1380_v26 = vadd.f32 %v5310_v12, %v5306_v25 }
 0x237   :  { %v634_v48 = vmul.f32 0.001, %v6512_v5  ;;  %v467_v44 = vld [vmem:[#allocation10 + $0x8] sm:$0xff]  ;;  %728 = vst [vmem:[#allocation24 + $0x30] sm:$0xff] %v664_v58  ;;  %v665_v10 = vadd.f32 %v601_v40, %v537_v62  ;;  %v636_v29 = vmul.f32 0.001, %v6513_v49  ;;  %v1382_v40 = vadd.f32 %v5310_v12, %v1369_v32 }
 0x238   :  { %v1386_v53 = vmax.f32 %v1378_v59, 0.0  ;;  %727 = vst [vmem:[#allocation24 + $0x28] sm:$0xff] %v663_v56  ;;  %v573_v60 = vmul.f32 0.999, %v509_v8  ;;  %v6514_v37 = vld [vmem:[#allocation81_spill] sm:$0xff]  ;;  %v1389_v57 = vmax.f32 %v5291_v63, 0.0 }
 0x239   :  { %v698_v17 = vadd.f32 %v634_v48, %v570_v31  ;;  %v635_v18 = vmul.f32 0.001, %v6514_v37  ;;  %729 = vst [vmem:[#allocation24 + $0x38] sm:$0xff] %v665_v10  ;;  %v700_v23 = vadd.f32 %v636_v29, %v572_v52  ;;  %v6515_v38 = vld [vmem:[#allocation82_spill] sm:$0xff]  ;;  %v530_v35 = vmul.f32 0.999, %v466_v0 }
 0x23a   :  { %v637_v6 = vmul.f32 0.001, %v6515_v38  ;;  %v469_v19 = vld [vmem:[#allocation10 + $0x18] sm:$0xff]  ;;  %v1392_v20 = vpack.c.bf16 %v1386_v53, %v1384_v11  ;;  %v532_v27 = vmul.f32 0.999, %v468_v36  ;;  %v6516_v2 = vld [vmem:[#allocation83_spill] sm:$0xff]  ;;  %v1393_v3 = vpack.c.bf16 %v1389_v57, %v1387_v55 }
 0x23b   :  { %762 = vst [vmem:[#allocation24 + $0x140] sm:$0xff] %v698_v17  ;;  %v699_v22 = vadd.f32 %v635_v18, %v571_v13  ;;  %v594_v14 = vmul.f32 0.001, %v6516_v2  ;;  %v502_v16 = vld [vmem:[#allocation10 + $0x120] sm:$0xff]  ;;  %v6517_v63 = vld [vmem:[#allocation84_spill] sm:$0xff]  ;;  %v6518_v39 = vld [vmem:[#allocation85_spill] sm:$0xff] }
 0x23c   :  { %764 = vst [vmem:[#allocation24 + $0x150] sm:$0xff] %v700_v23  ;;  %v701_v9 = vadd.f32 %v637_v6, %v573_v60  ;;  %v596_v42 = vmul.f32 0.001, %v6517_v63  ;;  %v531_v30 = vmul.f32 0.999, %v467_v44  ;;  %v504_v28 = vld [vmem:[#allocation10 + $0x130] sm:$0xff]  ;;  %1422 = vmatmul.bf16.vlgmr.msrb.gmra.mxu0 %v1392_v20  ;;  %1460 = vmatmul.bf16.vlgmr.msrb.gmra.mxu2 %v1392_v20 }
 0x23d   :  { %763 = vst [vmem:[#allocation24 + $0x148] sm:$0xff] %v699_v22  ;;  %v658_v33 = vadd.f32 %v594_v14, %v530_v35  ;;  %v533_v34 = vmul.f32 0.999, %v469_v19  ;;  %v595_v7 = vmul.f32 0.001, %v6518_v39  ;;  %v503_v24 = vld [vmem:[#allocation10 + $0x128] sm:$0xff]  ;;  %1408 = vmatmul.bf16.gmra.mxu3 %v1393_v3  ;;  %1446 = vmatmul.bf16.gmra.mxu1 %v1393_v3 }
 0x23e   :  { %765 = vst [vmem:[#allocation24 + $0x158] sm:$0xff] %v701_v9  ;;  %v660_v51 = vadd.f32 %v596_v42, %v532_v27  ;;  %v6519_v45 = vld [vmem:[#allocation86_spill] sm:$0xff]  ;;  %v566_v8 = vmul.f32 0.999, %v502_v16  ;;  %v568_v55 = vmul.f32 0.999, %v504_v28 }
 0x23f   :  { %v597_v4 = vmul.f32 0.001, %v6519_v45  ;;  %v505_v47 = vld [vmem:[#allocation10 + $0x138] sm:$0xff]  ;;  %722 = vst [vmem:[#allocation24] sm:$0xff] %v658_v33  ;;  %v659_v1 = vadd.f32 %v595_v7, %v531_v30  ;;  %v6520_v46 = vld [vmem:[#allocation87_spill] sm:$0xff]  ;;  %v6521_v0 = vld [vmem:[#allocation88_spill] sm:$0xff] }
 0x240   :  { %v630_v62 = vmul.f32 0.001, %v6520_v46  ;;  %724 = vst [vmem:[#allocation24 + $0x10] sm:$0xff] %v660_v51  ;;  %v632_v41 = vmul.f32 0.001, %v6521_v0  ;;  %v498_v50 = vld [vmem:[#allocation10 + $0x100] sm:$0xff] }
 0x241   :  { %v661_v54 = vadd.f32 %v597_v4, %v533_v34  ;;  %v567_v58 = vmul.f32 0.999, %v503_v24  ;;  %723 = vst [vmem:[#allocation24 + $0x8] sm:$0xff] %v659_v1  ;;  %v569_v36 = vmul.f32 0.999, %v505_v47  ;;  %v6522_v59 = vld [vmem:[#allocation89_spill] sm:$0xff] }
 0x242   :  { %v694_v31 = vadd.f32 %v630_v62, %v566_v8  ;;  %v631_v56 = vmul.f32 0.001, %v6522_v59  ;;  %v500_v52 = vld [vmem:[#allocation10 + $0x110] sm:$0xff]  ;;  %v696_v5 = vadd.f32 %v632_v41, %v568_v55  ;;  %v6523_v48 = vld [vmem:[#allocation90_spill] sm:$0xff]  ;;  %v499_v11 = vld [vmem:[#allocation10 + $0x108] sm:$0xff]  ;;  %v1388_v49 = vmax.f32 %v1380_v26, 0.0 }
 0x243   :  { %725 = vst [vmem:[#allocation24 + $0x18] sm:$0xff] %v661_v54  ;;  %v633_v44 = vmul.f32 0.001, %v6523_v48  ;;  %v501_v10 = vld [vmem:[#allocation10 + $0x118] sm:$0xff]  ;;  %v562_v13 = vmul.f32 0.999, %v498_v50 }
 0x244   :  { %758 = vst [vmem:[#allocation24 + $0x120] sm:$0xff] %v694_v31  ;;  %v695_v25 = vadd.f32 %v631_v56, %v567_v58  ;;  %v564_v53 = vmul.f32 0.999, %v500_v52  ;;  %v1390_v12 = vmax.f32 %v1382_v40, 0.0  ;;  %v626_v17 = vmul.f32 0.001, %v5272_v61 }
 0x245   :  { %760 = vst [vmem:[#allocation24 + $0x130] sm:$0xff] %v696_v5  ;;  %v697_v29 = vadd.f32 %v633_v44, %v569_v36  ;;  %v628_v60 = vmul.f32 0.001, %v5277_v21  ;;  %v563_v37 = vmul.f32 0.999, %v499_v11  ;;  %v5343_v42 = vld [vmem:[%s6524_s5 + $0x70] sm:$0xff] }
 0x246   :  { %759 = vst [vmem:[#allocation24 + $0x128] sm:$0xff] %v695_v25  ;;  %v565_v18 = vmul.f32 0.999, %v501_v10  ;;  %v690_v57 = vadd.f32 %v626_v17, %v562_v13  ;;  %v627_v23 = vmul.f32 0.001, %v5288_v15  ;;  %v1394_v35 = vpack.c.bf16 %v1390_v12, %v1388_v49  ;;  %v5346_v30 = vld [vmem:[%s6524_s5 + $0x78] sm:$0xff] }
 0x247   :  { %761 = vst [vmem:[#allocation24 + $0x138] sm:$0xff] %v697_v29  ;;  %v629_v38 = vmul.f32 0.001, %v5295_v43  ;;  %v692_v6 = vadd.f32 %v628_v60, %v564_v53  ;;  %v1077_v39 = vpack.c.bf16 %v5346_v30, %v5343_v42  ;;  %v5357_v45 = vld [vmem:[%s6524_s5 + $0x60] sm:$0xff]  ;;  %v5360_v4 = vld [vmem:[%s6524_s5 + $0x68] sm:$0xff]  ;;  %v892_v46 = vld [vmem:[%s6524_s5 + $0xf0] sm:$0xff] }
 0x248   :  { %754 = vst [vmem:[#allocation24 + $0x100] sm:$0xff] %v690_v57  ;;  %v691_v19 = vadd.f32 %v627_v23, %v563_v37  ;;  %v1076_v1 = vpack.c.bf16 %v5360_v4, %v5357_v45  ;;  %v893_v62 = vld [vmem:[%s6524_s5 + $0xf8] sm:$0xff]  ;;  %v5367_v50 = vld [vmem:[%s6524_s5 + $0x50] sm:$0xff]  ;;  %v890_v5 = vld [vmem:[%s6524_s5 + $0xe0] sm:$0xff]  ;;  %s6539_s6 = sld [smem:[#allocation46_spill]] }
 0x249   :  { %756 = vst [vmem:[#allocation24 + $0x110] sm:$0xff] %v692_v6  ;;  %v693_v20 = vadd.f32 %v629_v38, %v565_v18  ;;  %1641 = vmatpush.bf16.msrb.mxu3 %v1077_v39  ;;  %v1085_v0 = vpack.c.bf16 %v893_v62, %v892_v46  ;;  %v5370_v40 = vld [vmem:[%s6524_s5 + $0x58] sm:$0xff]  ;;  %v891_v48 = vld [vmem:[%s6524_s5 + $0xe8] sm:$0xff]  ;;  %v5382_v29 = vld [vmem:[%s6524_s5 + $0x40] sm:$0xff] }
 0x24a   :  { %755 = vst [vmem:[#allocation24 + $0x108] sm:$0xff] %v691_v19  ;;  %v1075_v59 = vpack.c.bf16 %v5370_v40, %v5367_v50  ;;  %v6525_v44 = vld [vmem:[#allocation62_spill] sm:$0xff]  ;;  %v1084_v49 = vpack.c.bf16 %v891_v48, %v890_v5  ;;  %v888_v18 = vld [vmem:[%s6524_s5 + $0xd0] sm:$0xff]  ;;  %v889_v57 = vld [vmem:[%s6524_s5 + $0xd8] sm:$0xff] }
 0x24b   :  { %757 = vst [vmem:[#allocation24 + $0x118] sm:$0xff] %v693_v20  ;;  %1660 = vmatpush.bf16.msra.mxu0 %v1085_v0  ;;  %v5385_v13 = vld [vmem:[%s6524_s5 + $0x48] sm:$0xff]  ;;  %v884_v62 = vld [vmem:[%s6524_s5 + $0xb0] sm:$0xff] }
 0x24c   :  { %1427 = vmatmul.bf16.gmra.mxu0 %v1394_v35  ;;  %1465 = vmatmul.bf16.gmra.mxu2 %v1394_v35  ;;  %v1074_v37 = vpack.c.bf16 %v5385_v13, %v5382_v29 }
 0x24d   :  { %1642 = vmatpush.bf16.msrb.mxu3 %v1076_v1 }
 0x24f   :  { %1661 = vmatpush.bf16.msra.mxu0 %v1084_v49  ;;  %v882_v49 = vld [vmem:[%s6524_s5 + $0xa0] sm:$0xff] }
 0x251   :  { %1643 = vmatpush.bf16.msrb.mxu3 %v1075_v59  ;;  %v5442_v59 = vld [vmem:[%s6524_s5 + $0x18] sm:$0xff] }
 0x255   :  { %1644 = vmatpush.bf16.msrb.mxu3 %v1074_v37 }
 0x2a6   :  { %v1442_v21 = vpop.f32.mrf.mxu1 }
 0x2ac   :  { %v1404_v61 = vpop.f32.mrf.mxu3 }
 0x2ae   :  { %v1444_v16 = vpop.f32.mrf.mxu1 }
 0x2b4   :  { %v1406_v27 = vpop.f32.mrf.mxu3 }
 0x2b9   :  { %v1423_v22 = vpop.f32.mrf.mxu0 }
 0x2ba   :  { %v1424_v14 = vadd.f32 %v1423_v22, %v1404_v61  ;;  %v1447_v55 = vpop.f32.mrf.mxu1  ;;  %v1083_v61 = vpack.c.bf16 %v889_v57, %v888_v18  ;;  %v5405_v22 = vld [vmem:[%s6524_s5 + $0x38] sm:$0xff] }
 0x2bc   :  { %1662 = vmatpush.bf16.msra.mxu0 %v1083_v61 }
 0x2bf   :  { %v1461_v2 = vpop.f32.mrf.mxu2 }
 0x2c0   :  { %v1409_v32 = vpop.f32.mrf.mxu3  ;;  %v5348_v28 = vadd.f32 %v1461_v2, %v1442_v21  ;;  %v5402_v21 = vld [vmem:[%s6524_s5 + $0x30] sm:$0xff] }
 0x2c1   :  { %v1425_v15 = vpop.f32.mrf.mxu0 }
 0x2c2   :  { %v1426_v43 = vadd.f32 %v1425_v15, %v1406_v27  ;;  %v1449_v19 = vpop.f32.mrf.mxu1 }
 0x2c4   :  { %v1471_v3 = vadd.f32 %v1426_v43, %v1424_v14 }
 0x2c6   :  { %v1472_v9 = vrot.slane %v1471_v3, 4 }
 0x2c7   :  { %v1463_v63 = vpop.f32.mrf.mxu2 }
 0x2c8   :  { %v1473_v33 = vadd.f32 %v1472_v9, %v1471_v3  ;;  %v5350_v34 = vadd.f32 %v1463_v63, %v1444_v16  ;;  %v1411_v58 = vpop.f32.mrf.mxu3  ;;  %v1073_v16 = vpack.c.bf16 %v5405_v22, %v5402_v21  ;;  %v886_v3 = vld [vmem:[%s6524_s5 + $0xc0] sm:$0xff] }
 0x2c9   :  { %v1428_v7 = vpop.f32.mrf.mxu0 }
 0x2ca   :  { %v1474_v24 = vrot.slane %v1473_v33, 2  ;;  %v1478_v51 = vadd.f32 %v5350_v34, %v5348_v28  ;;  %v5374_v56 = vadd.f32 %v1428_v7, %v1409_v32  ;;  %v887_v32 = vld [vmem:[%s6524_s5 + $0xc8] sm:$0xff]  ;;  %1645 = vmatpush.bf16.msrb.mxu3 %v1073_v16  ;;  %v881_v16 = vld [vmem:[%s6524_s5 + $0x98] sm:$0xff] }
 0x2cc   :  { %v1475_v8 = vadd.f32 %v1474_v24, %v1473_v33  ;;  %v1479_v47 = vrot.slane %v1478_v51, 4  ;;  %v1082_v24 = vpack.c.bf16 %v887_v32, %v886_v3 }
 0x2ce   :  { %v1476_v26 = vrot.slane %v1475_v8, 1  ;;  %v1480_v54 = vadd.f32 %v1479_v47, %v1478_v51  ;;  %v5425_v51 = vld [vmem:[%s6524_s5 + $0x20] sm:$0xff]  ;;  %1663 = vmatpush.bf16.msra.mxu0 %v1082_v24 }
 0x2cf   :  { %v1466_v41 = vpop.f32.mrf.mxu2 }
 0x2d0   :  { %v1477_v31 = vadd.f32 %v1476_v26, %v1475_v8  ;;  %v1481_v36 = vrot.slane %v1480_v54, 2  ;;  %v5428_v8 = vld [vmem:[%s6524_s5 + $0x28] sm:$0xff]  ;;  %v885_v26 = vld [vmem:[%s6524_s5 + $0xb8] sm:$0xff] }
 0x2d1   :  { %v1430_v52 = vpop.f32.mrf.mxu0  ;;  %v1072_v46 = vpack.c.bf16 %v5428_v8, %v5425_v51 }
 0x2d2   :  { %v1485_v25 = vmul.f32 %v1477_v31, %v6525_v44  ;;  %v1482_v11 = vadd.f32 %v1481_v36, %v1480_v54  ;;  %v5379_v10 = vadd.f32 %v1430_v52, %v1411_v58  ;;  %v5439_v36 = vld [vmem:[%s6524_s5 + $0x10] sm:$0xff] }
 0x2d3   :  { %1646 = vmatpush.bf16.msrb.mxu3 %v1072_v46  ;;  %v1071_v48 = vpack.c.bf16 %v5442_v59, %v5439_v36 }
 0x2d4   :  { %v5387_v53 = vsub.f32 %v1424_v14, %v1485_v25  ;;  %v5389_v12 = vsub.f32 %v1426_v43, %v1485_v25  ;;  %v1483_v17 = vrot.slane %v1482_v11, 1  ;;  %v1537_v60 = vadd.f32 %v5379_v10, %v5374_v56 }
 0x2d5   :  { %v5410_v43 = vadd.f32 %v1466_v41, %v1447_v55  ;;  %v1081_v41 = vpack.c.bf16 %v885_v26, %v884_v62 }
 0x2d6   :  { %v1491_v23 = vmul.f32 %v5387_v53, %v5387_v53  ;;  %v1493_v38 = vmul.f32 %v5389_v12, %v5389_v12  ;;  %v1484_v6 = vadd.f32 %v1483_v17, %v1482_v11  ;;  %v1538_v35 = vrot.slane %v1537_v60, 4  ;;  %v883_v17 = vld [vmem:[%s6524_s5 + $0xa8] sm:$0xff] }
 0x2d7   :  { %v1468_v20 = vpop.f32.mrf.mxu2  ;;  %1664 = vmatpush.bf16.msra.mxu0 %v1081_v41  ;;  %v1080_v18 = vpack.c.bf16 %v883_v17, %v882_v49  ;;  %1647 = vmatpush.bf16.msrb.mxu3 %v1071_v48 }
 0x2d8   :  { %v1495_v27 = vadd.f32 %v1493_v38, %v1491_v23  ;;  %v1486_v2 = vmul.f32 %v1484_v6, %v6525_v44  ;;  %v1539_v15 = vadd.f32 %v1538_v35, %v1537_v60  ;;  %v5408_v14 = vadd.f32 %v1468_v20, %v1449_v19  ;;  %v5450_v38 = vld [vmem:[%s6524_s5] sm:$0xff]  ;;  %v5453_v6 = vld [vmem:[%s6524_s5 + $0x8] sm:$0xff] }
 0x2d9   :  { %v1070_v20 = vpack.c.bf16 %v5453_v6, %v5450_v38 }
 0x2da   :  { %v1496_v9 = vrot.slane %v1495_v27, 4  ;;  %v5417_v63 = vsub.f32 %v5348_v28, %v1486_v2  ;;  %v5420_v33 = vsub.f32 %v5350_v34, %v1486_v2  ;;  %v1540_v39 = vrot.slane %v1539_v15, 2 }
 0x2db   :  { %v1544_v7 = vadd.f32 %v5408_v14, %v5410_v43  ;;  %1665 = vmatpush.bf16.msra.mxu0 %v1080_v18  ;;  %1648 = vmatpush.bf16.msrb.mxu3 %v1070_v20 }
 0x2dc   :  { %v1497_v47 = vadd.f32 %v1496_v9, %v1495_v27  ;;  %v1492_v28 = vmul.f32 %v5417_v63, %v5417_v63  ;;  %v1494_v34 = vmul.f32 %v5420_v33, %v5420_v33  ;;  %v1541_v1 = vadd.f32 %v1540_v39, %v1539_v15  ;;  %v880_v15 = vld [vmem:[%s6524_s5 + $0x90] sm:$0xff] }
 0x2dd   :  { %v1545_v55 = vrot.slane %v1544_v7, 4  ;;  %v1079_v9 = vpack.c.bf16 %v881_v16, %v880_v15  ;;  %v973_v16 = vmul.f32 0.001, %v5346_v30 }
 0x2de   :  { %v1498_v54 = vrot.slane %v1497_v47, 2  ;;  %v1502_v0 = vadd.f32 %v1494_v34, %v1492_v28  ;;  %v1542_v58 = vrot.slane %v1541_v1, 1 }
 0x2df   :  { %v1546_v31 = vadd.f32 %v1545_v55, %v1544_v7  ;;  %1666 = vmatpush.bf16.msra.mxu0 %v1079_v9 }
 0x2e0   :  { %v1499_v52 = vadd.f32 %v1498_v54, %v1497_v47  ;;  %v1503_v5 = vrot.slane %v1502_v0, 4  ;;  %v1543_v25 = vadd.f32 %v1542_v58, %v1541_v1 }
 0x2e1   :  { %v1547_v11 = vrot.slane %v1546_v31, 2 }
 0x2e2   :  { %v1500_v60 = vrot.slane %v1499_v52, 1  ;;  %v1504_v37 = vadd.f32 %v1503_v5, %v1502_v0  ;;  %v1551_v57 = vmul.f32 %v1543_v25, %v6525_v44  ;;  %v879_v5 = vld [vmem:[%s6524_s5 + $0x88] sm:$0xff] }
 0x2e3   :  { %v1548_v23 = vadd.f32 %v1547_v11, %v1546_v31 }
 0x2e4   :  { %v1501_v35 = vadd.f32 %v1500_v60, %v1499_v52  ;;  %v1505_v19 = vrot.slane %v1504_v37, 2  ;;  %v5458_v61 = vsub.f32 %v5374_v56, %v1551_v57  ;;  %v5461_v27 = vsub.f32 %v5379_v10, %v1551_v57 }
 0x2e5   :  { %v1549_v2 = vrot.slane %v1548_v23, 1 }
 0x2e6   :  { %v1509_v3 = vmul.f32 %v1501_v35, %v6525_v44  ;;  %v1506_v32 = vadd.f32 %v1505_v19, %v1504_v37  ;;  %v1557_v39 = vmul.f32 %v5458_v61, %v5458_v61  ;;  %v1559_v7 = vmul.f32 %v5461_v27, %v5461_v27  ;;  %v909_v35 = vld [vmem:[#allocation14 + $0x78] sm:$0xff] }
 0x2e7   :  { %v1550_v24 = vadd.f32 %v1549_v2, %v1548_v23  ;;  %v908_v23 = vld [vmem:[#allocation14 + $0x70] sm:$0xff]  ;;  %v972_v19 = vmul.f32 0.001, %v5343_v42  ;;  %v941_v15 = vmul.f32 0.999, %v909_v35 }
 0x2e8   :  { %v1511_v56 = vadd.f32 1e-05, %v1509_v3  ;;  %v1507_v47 = vrot.slane %v1506_v32, 1  ;;  %v1561_v10 = vadd.f32 %v1559_v7, %v1557_v39  ;;  %v940_v2 = vmul.f32 0.999, %v908_v23  ;;  %v906_v39 = vld [vmem:[#allocation14 + $0x60] sm:$0xff] }
 0x2e9   :  { %v1552_v28 = vmul.f32 %v1550_v24, %v6525_v44  ;;  %v907_v7 = vld [vmem:[#allocation14 + $0x68] sm:$0xff]  ;;  %v850_v42 = vld [vmem:[%s6526_s3] sm:$0x3] }
 0x2ea   :  { %3839 = vrsqrt.f32 %v1511_v56  ;;  %v1508_v34 = vadd.f32 %v1507_v47, %v1506_v32  ;;  %v1562_v1 = vrot.slane %v1561_v10, 4  ;;  %vm1519_vm15 = vweird.f32 %v1511_v56 }
 0x2eb   :  { %v5472_v55 = vsub.f32 %v5410_v43, %v1552_v28  ;;  %v5475_v46 = vsub.f32 %v5408_v14, %v1552_v28  ;;  %v878_v43 = vld [vmem:[%s6524_s5 + $0x80] sm:$0xff]  ;;  %v1004_v47 = vadd.f32 %v972_v19, %v940_v2  ;;  %v938_v28 = vmul.f32 0.999, %v906_v39 }
 0x2ec   :  { %v1510_v62 = vmul.f32 %v1508_v34, %v6525_v44  ;;  %v1563_v26 = vadd.f32 %v1562_v1, %v1561_v10  ;;  %v1078_v11 = vpack.c.bf16 %v879_v5, %v878_v43  ;;  %v1005_v10 = vadd.f32 %v973_v16, %v941_v15  ;;  %v904_v43 = vld [vmem:[#allocation14 + $0x50] sm:$0xff]  ;;  %v905_v5 = vld [vmem:[#allocation14 + $0x58] sm:$0xff] }
 0x2ed   :  { %v1558_v54 = vmul.f32 %v5472_v55, %v5472_v55  ;;  %v1560_v0 = vmul.f32 %v5475_v46, %v5475_v46  ;;  %1036 = vst [vmem:[#allocation29 + $0x70] sm:$0xff] %v1004_v47  ;;  %v5507_v23 = vperm.slane %v850_v42, 1  ;;  %v966_v47 = vmul.f32 0.001, %v5382_v29 }
 0x2ee   :  { %v5482_v41 = vadd.f32 1e-05, %v1510_v62  ;;  %v1564_v58 = vrot.slane %v1563_v26, 2  ;;  %1667 = vmatpush.bf16.msra.mxu0 %v1078_v11  ;;  %1037 = vst [vmem:[#allocation29 + $0x78] sm:$0xff] %v1005_v10  ;;  %v856_v11 = vld [vmem:[%s6527_s14] sm:$0x3] }
 0x2ef   :  { %v1568_v31 = vadd.f32 %v1560_v0, %v1558_v54  ;;  %v970_v54 = vmul.f32 0.001, %v5357_v45  ;;  %v971_v0 = vmul.f32 0.001, %v5360_v4  ;;  %v5511_v19 = vperm.slane %v856_v11, 0  ;;  %v901_v10 = vld [vmem:[#allocation14 + $0x38] sm:$0xff] }
 0x2f0   :  { %v3840_v52 = vpop.eup %3839  ;;  %3841 = vrsqrt.f32 %v5482_v41  ;;  %v1565_v48 = vadd.f32 %v1564_v58, %v1563_v26  ;;  %v939_v26 = vmul.f32 0.999, %v907_v7  ;;  %vm1529_vm5 = vweird.f32 %v5482_v41 }
 0x2f1   :  { %v1514_v14 = vmul.f32 %v3840_v52, %v1511_v56  ;;  %v1569_v25 = vrot.slane %v1568_v31, 4  ;;  %vm1520_vm2 = vweird.f32 %v3840_v52  ;;  %v964_v29 = vmul.f32 0.001, %v5402_v21 }
 0x2f2   :  { %v1566_v17 = vrot.slane %v1565_v48, 1  ;;  %vm1521_vm3 = vmor %vm1519_vm15, %vm1520_vm2 }
 0x2f3   :  { %v1515_v49 = vmul.f32 %v3840_v52, %v1514_v14  ;;  %v1570_v60 = vadd.f32 %v1569_v25, %v1568_v31  ;;  %v5498_v14 = vperm.slane %v850_v42, 0  ;;  %v1002_v25 = vadd.f32 %v970_v54, %v938_v28 }
 0x2f4   :  { %v1567_v18 = vadd.f32 %v1566_v17, %v1565_v48  ;;  %v1003_v17 = vadd.f32 %v971_v0, %v939_v26  ;;  %v5521_v28 = vperm.slane %v856_v11, 1  ;;  %v967_v42 = vmul.f32 0.001, %v5385_v13  ;;  %v898_v0 = vld [vmem:[#allocation14 + $0x20] sm:$0xff] }
 0x2f5   :  { %v1516_v37 = vmul.f32 0.5, %v1515_v49  ;;  %v1571_v57 = vrot.slane %v1570_v60, 2  ;;  %1034 = vst [vmem:[#allocation29 + $0x60] sm:$0xff] %v1002_v25  ;;  %v933_v54 = vmul.f32 0.999, %v901_v10 }
 0x2f6   :  { %v3842_v20 = vpop.eup %3841  ;;  %v1575_v9 = vmul.f32 %v1567_v18, %v6525_v44  ;;  %1035 = vst [vmem:[#allocation29 + $0x68] sm:$0xff] %v1003_v17  ;;  %v930_v11 = vmul.f32 0.999, %v898_v0 }
 0x2f7   :  { %v1517_v3 = vsub.f32 1.5, %v1516_v37  ;;  %v1524_v32 = vmul.f32 %v3842_v20, %v5482_v41  ;;  %v1572_v24 = vadd.f32 %v1571_v57, %v1570_v60  ;;  %vm1530_vm4 = vweird.f32 %v3842_v20  ;;  %v902_v37 = vld [vmem:[#allocation14 + $0x40] sm:$0xff] }
 0x2f8   :  { %v5492_v62 = vadd.f32 1e-05, %v1575_v9  ;;  %v937_v60 = vmul.f32 0.999, %v905_v5  ;;  %v968_v57 = vmul.f32 0.001, %v5367_v50  ;;  %vm1531_vm6 = vmor %vm1529_vm5, %vm1530_vm4 }
 0x2f9   :  { %v1518_v34 = vmul.f32 %v3840_v52, %v1517_v3  ;;  %v1525_v1 = vmul.f32 %v3842_v20, %v1524_v32  ;;  %v1573_v30 = vrot.slane %v1572_v24, 1  ;;  %v934_v32 = vmul.f32 0.999, %v902_v37 }
 0x2fa   :  { %3843 = vrsqrt.f32 %v5492_v62  ;;  %vm1585_vm8 = vweird.f32 %v5492_v62  ;;  %v963_v37 = vmul.f32 0.001, %v5428_v8  ;;  %v960_v8 = vmul.f32 0.001, %v5439_v36 }
 0x2fb   :  { %v1522_v58 = vsel %vm1521_vm3, %v3840_v52, %v1518_v34  ;;  %v1526_v31 = vmul.f32 0.5, %v1525_v1  ;;  %v1574_v48 = vadd.f32 %v1573_v30, %v1572_v24  ;;  %v936_v52 = vmul.f32 0.999, %v904_v43  ;;  %v899_v43 = vld [vmem:[#allocation14 + $0x28] sm:$0xff] }
 0x2fc   :  { %v1535_v56 = vmul.f32 %v1522_v58, %v5389_v12  ;;  %v1533_v45 = vmul.f32 %v1522_v58, %v5387_v53  ;;  %v969_v12 = vmul.f32 0.001, %v5370_v40  ;;  %v903_v53 = vld [vmem:[#allocation14 + $0x48] sm:$0xff]  ;;  %v900_v40 = vld [vmem:[#allocation14 + $0x30] sm:$0xff]  ;;  %v998_v34 = vadd.f32 %v966_v47, %v934_v32 }
 0x2fd   :  { %v1527_v49 = vsub.f32 1.5, %v1526_v31  ;;  %v1576_v4 = vmul.f32 %v1574_v48, %v6525_v44  ;;  %v1000_v3 = vadd.f32 %v968_v57, %v936_v52  ;;  %v935_v24 = vmul.f32 0.999, %v903_v53  ;;  %v897_v52 = vld [vmem:[#allocation14 + $0x18] sm:$0xff] }
 0x2fe   :  { %v1610_v15 = vmul.f32 %v5498_v14, %v1535_v56  ;;  %v1001_v9 = vadd.f32 %v969_v12, %v937_v60  ;;  %v1608_v39 = vmul.f32 %v5498_v14, %v1533_v45  ;;  %v932_v1 = vmul.f32 0.999, %v900_v40  ;;  %1030 = vst [vmem:[#allocation29 + $0x40] sm:$0xff] %v998_v34 }
 0x2ff   :  { %v1528_v18 = vmul.f32 %v3842_v20, %v1527_v49  ;;  %v5509_v35 = vadd.f32 1e-05, %v1576_v4  ;;  %1032 = vst [vmem:[#allocation29 + $0x50] sm:$0xff] %v1000_v3  ;;  %v999_v30 = vadd.f32 %v967_v42, %v935_v24  ;;  %v965_v31 = vmul.f32 0.001, %v5405_v22  ;;  %v896_v22 = vld [vmem:[#allocation14 + $0x10] sm:$0xff] }
 0x300   :  { %v3844_v2 = vpop.eup %3843  ;;  %1033 = vst [vmem:[#allocation29 + $0x58] sm:$0xff] %v1001_v9  ;;  %v1623_v26 = vadd.f32 %v5511_v19, %v1610_v15  ;;  %v1621_v5 = vadd.f32 %v5511_v19, %v1608_v39  ;;  %v996_v56 = vadd.f32 %v964_v29, %v932_v1  ;;  %v931_v4 = vmul.f32 0.999, %v899_v43 }
 0x301   :  { %v1532_v16 = vsel %vm1531_vm6, %v3842_v20, %v1528_v18  ;;  %v1580_v50 = vmul.f32 %v3844_v2, %v5492_v62  ;;  %3845 = vrsqrt.f32 %v5509_v35  ;;  %vm1586_vm7 = vweird.f32 %v3844_v2  ;;  %1031 = vst [vmem:[#allocation29 + $0x48] sm:$0xff] %v999_v30 }
 0x302   :  { %v1536_v41 = vmul.f32 %v1532_v16, %v5420_v33  ;;  %v1534_v7 = vmul.f32 %v1532_v16, %v5417_v63  ;;  %v1631_v49 = vmax.f32 %v1623_v26, 0.0  ;;  %v997_v21 = vadd.f32 %v965_v31, %v933_v54  ;;  %vm1587_vm9 = vmor %vm1585_vm8, %vm1586_vm7  ;;  %1028 = vst [vmem:[#allocation29 + $0x30] sm:$0xff] %v996_v56 }
 0x303   :  { %v1581_v33 = vmul.f32 %v3844_v2, %v1580_v50  ;;  %v962_v60 = vmul.f32 0.001, %v5425_v51  ;;  %v1629_v18 = vmax.f32 %v1621_v5, 0.0  ;;  %v995_v32 = vadd.f32 %v963_v37, %v931_v4  ;;  %v895_v51 = vld [vmem:[#allocation14 + $0x8] sm:$0xff]  ;;  %v3634_v4 = vld [vmem:[%s6528_s19 + $0x60] sm:$0xf] }
 0x304   :  { %v1611_v20 = vmul.f32 %v5507_v23, %v1536_v41  ;;  %v1609_v58 = vmul.f32 %v5507_v23, %v1534_v7  ;;  %1029 = vst [vmem:[#allocation29 + $0x38] sm:$0xff] %v997_v21  ;;  %v894_v41 = vld [vmem:[#allocation14] sm:$0xff]  ;;  %v928_v9 = vmul.f32 0.999, %v896_v22  ;;  %v929_v40 = vmul.f32 0.999, %v897_v52 }
 0x305   :  { %v1582_v63 = vmul.f32 0.5, %v1581_v33  ;;  %v994_v3 = vadd.f32 %v962_v60, %v930_v11  ;;  %v1637_v39 = vpack.c.bf16 %v1631_v49, %v1629_v18  ;;  %v961_v7 = vmul.f32 0.001, %v5442_v59  ;;  %1027 = vst [vmem:[#allocation29 + $0x28] sm:$0xff] %v995_v32  ;;  %v3644_v11 = vld [vmem:[%s6528_s19 + $0x78] sm:$0xf0] }
 0x306   :  { %v1624_v13 = vadd.f32 %v5521_v28, %v1611_v20  ;;  %v1622_v57 = vadd.f32 %v5521_v28, %v1609_v58  ;;  %vm1595_vm10 = vweird.f32 %v5509_v35  ;;  %v926_v47 = vmul.f32 0.999, %v894_v41  ;;  %v3731_v22 = vld [vmem:[%s6528_s19 + $0x64] sm:$0xf0]  ;;  %v3730_v52 = vld [vmem:[%s6528_s19 + $0x64] sm:$0xf] }
 0x307   :  { %v1583_v48 = vsub.f32 1.5, %v1582_v63  ;;  %v3846_v25 = vpop.eup %3845  ;;  %1026 = vst [vmem:[#allocation29 + $0x20] sm:$0xff] %v994_v3  ;;  %1649 = vmatmul.bf16.vlgmr.msrb.gmra.mxu3 %v1637_v39  ;;  %v927_v10 = vmul.f32 0.999, %v895_v51  ;;  %v993_v42 = vadd.f32 %v961_v7, %v929_v40  ;;  %v958_v36 = vmul.f32 0.001, %v5450_v38 }
 0x308   :  { %v1590_v45 = vmul.f32 %v3846_v25, %v5509_v35  ;;  %v1632_v62 = vmax.f32 %v1624_v13, 0.0  ;;  %vm1596_vm11 = vweird.f32 %v3846_v25  ;;  %v959_v59 = vmul.f32 0.001, %v5453_v6  ;;  %v3636_v37 = vld [vmem:[%s6528_s19 + $0x68] sm:$0xf0] }
 0x309   :  { %v1584_v17 = vmul.f32 %v3844_v2, %v1583_v48  ;;  %vm1597_vm12 = vmor %vm1595_vm10, %vm1596_vm11  ;;  %1025 = vst [vmem:[#allocation29 + $0x18] sm:$0xff] %v993_v42  ;;  %v990_v1 = vadd.f32 %v958_v36, %v926_v47  ;;  %v3642_v48 = vld [vmem:[%s6528_s19 + $0x70] sm:$0xf]  ;;  %v3635_v60 = vor.u32 %v3731_v22, %v3634_v4  ;;  %v3628_v3 = vld [vmem:[%s6528_s19 + $0x58] sm:$0xf0] }
 0x30a   :  { %v1591_v53 = vmul.f32 %v3846_v25, %v1590_v45  ;;  %v991_v54 = vadd.f32 %v959_v59, %v927_v10  ;;  %v3618_v51 = vld [vmem:[%s6528_s19 + $0x40] sm:$0xf]  ;;  %v3727_v39 = vld [vmem:[%s6528_s19 + $0x44] sm:$0xf0]  ;;  %v3726_v7 = vld [vmem:[%s6528_s19 + $0x44] sm:$0xf] }
 0x30b   :  { %v1588_v12 = vsel %vm1587_vm9, %v3844_v2, %v1584_v17  ;;  %v1630_v2 = vmax.f32 %v1622_v57, 0.0  ;;  %1022 = vst [vmem:[#allocation29] sm:$0xff] %v990_v1  ;;  %v3639_v57 = vor.u32 %v3730_v52, %v3636_v37  ;;  %v3610_v47 = vld [vmem:[%s6528_s19 + $0x30] sm:$0xf]  ;;  %v3725_v10 = vld [vmem:[%s6528_s19 + $0x34] sm:$0xf0] }
 0x30c   :  { %v1599_v15 = vmul.f32 %v1588_v12, %v5458_v61  ;;  %v1601_v16 = vmul.f32 %v1588_v12, %v5461_v27  ;;  %v1592_v50 = vmul.f32 0.5, %v1591_v53  ;;  %v992_v27 = vadd.f32 %v960_v8, %v928_v9  ;;  %1023 = vst [vmem:[#allocation29 + $0x8] sm:$0xff] %v991_v54  ;;  %v3626_v12 = vld [vmem:[%s6528_s19 + $0x50] sm:$0xf]  ;;  %v3729_v53 = vld [vmem:[%s6528_s19 + $0x54] sm:$0xf0] }
 0x30d   :  { %v1638_v34 = vpack.c.bf16 %v1632_v62, %v1630_v2  ;;  %v3619_v8 = vor.u32 %v3727_v39, %v3618_v51  ;;  %v3620_v2 = vld [vmem:[%s6528_s19 + $0x48] sm:$0xf0]  ;;  %v3612_v42 = vld [vmem:[%s6528_s19 + $0x38] sm:$0xf0]  ;;  %v3723_v54 = vld [vmem:[%s6528_s19 + $0x24] sm:$0xf0] }
 0x30e   :  { %v1593_v24 = vsub.f32 1.5, %v1592_v50  ;;  %v1612_v61 = vmul.f32 %v5498_v14, %v1599_v15  ;;  %v1614_v20 = vmul.f32 %v5498_v14, %v1601_v16  ;;  %1024 = vst [vmem:[#allocation29 + $0x10] sm:$0xff] %v992_v27  ;;  %v3627_v15 = vor.u32 %v3729_v53, %v3626_v12  ;;  %v3728_v16 = vld [vmem:[%s6528_s19 + $0x54] sm:$0xf]  ;;  %v3718_v4 = vld [vmem:[%s6528_s19 + $0x4] sm:$0xf] }
 0x30f   :  { %1668 = vmatmul.bf16.vlgmr.msra.gmra.mxu0 %v1638_v34  ;;  %v3631_v50 = vor.u32 %v3728_v16, %v3628_v3  ;;  %v3588_v22 = vld [vmem:[%s6528_s19 + $0x8] sm:$0xf0]  ;;  %v6530_v12 = vld [vmem:[#allocation52_spill] sm:$0xff]  ;;  %v6533_v16 = vld [vmem:[#allocation57_spill] sm:$0xff] }
 0x310   :  { %v1594_v33 = vmul.f32 %v3846_v25, %v1593_v24  ;;  %v1625_v26 = vadd.f32 %v5511_v19, %v1612_v61  ;;  %v1627_v14 = vadd.f32 %v5511_v19, %v1614_v20  ;;  %v3623_v61 = vor.u32 %v3726_v7, %v3620_v2 }
 0x311   :  { %v3611_v20 = vor.u32 %v3725_v10, %v3610_v47  ;;  %v3591_v37 = vor.u32 %v3718_v4, %v3588_v22  ;;  %v3925_v4 = vld [vmem:[#allocation20 + $0x20] sm:$0xff]  ;;  %v3926_v22 = vld [vmem:[#allocation20 + $0x30] sm:$0xff] }
 0x312   :  { %v1598_v35 = vsel %vm1597_vm12, %v3846_v25, %v1594_v33  ;;  %v1633_v0 = vmax.f32 %v1625_v26, 0.0  ;;  %v1635_v58 = vmax.f32 %v1627_v14, 0.0  ;;  %v3732_v25 = vld [vmem:[%s6528_s19 + $0x74] sm:$0xf]  ;;  %v3722_v14 = vld [vmem:[%s6528_s19 + $0x24] sm:$0xf] }
 0x313   :  { %v1600_v63 = vmul.f32 %v1598_v35, %v5472_v55  ;;  %v1602_v30 = vmul.f32 %v1598_v35, %v5475_v46  ;;  %v3647_v17 = vor.u32 %v3732_v25, %v3644_v11  ;;  %v3724_v33 = vld [vmem:[%s6528_s19 + $0x34] sm:$0xf] }
 0x314   :  { %v1639_v29 = vpack.c.bf16 %v1635_v58, %v1633_v0  ;;  %v3615_v34 = vor.u32 %v3724_v33, %v3612_v42  ;;  %v6535_v42 = vld [vmem:[#allocation54_spill] sm:$0xff] }
 0x315   :  { %v1613_v38 = vmul.f32 %v5507_v23, %v1600_v63  ;;  %v1615_v6 = vmul.f32 %v5507_v23, %v1602_v30  ;;  %v3733_v23 = vld [vmem:[%s6528_s19 + $0x74] sm:$0xf0]  ;;  %1846 = vmatpush.bf16.msra.mxu2 %v3647_v17  ;;  %v3602_v30 = vld [vmem:[%s6528_s19 + $0x20] sm:$0xf] }
 0x316   :  { %v3643_v56 = vor.u32 %v3733_v23, %v3642_v48  ;;  %v3720_v48 = vld [vmem:[%s6528_s19 + $0x14] sm:$0xf]  ;;  %v3596_v23 = vld [vmem:[%s6528_s19 + $0x18] sm:$0xf0] }
 0x317   :  { %v1626_v55 = vadd.f32 %v5521_v28, %v1613_v38  ;;  %v1628_v46 = vadd.f32 %v5521_v28, %v1615_v6  ;;  %1654 = vmatmul.bf16.gmra.mxu3 %v1639_v29  ;;  %v3603_v38 = vor.u32 %v3723_v54, %v3602_v30  ;;  %v3604_v6 = vld [vmem:[%s6528_s19 + $0x28] sm:$0xf0]  ;;  %v3599_v11 = vor.u32 %v3720_v48, %v3596_v23 }
 0x318   :  { %1827 = vmatpush.bf16.msra.mxu1 %v3643_v56 }
 0x319   :  { %v1634_v31 = vmax.f32 %v1626_v55, 0.0  ;;  %v1636_v43 = vmax.f32 %v1628_v46, 0.0  ;;  %1847 = vmatpush.bf16.msra.mxu2 %v3639_v57  ;;  %v3607_v46 = vor.u32 %v3722_v14, %v3604_v6 }
 0x31b   :  { %v1640_v19 = vpack.c.bf16 %v1636_v43, %v1634_v31 }
 0x31c   :  { %1828 = vmatpush.bf16.msra.mxu1 %v3635_v60 }
 0x31d   :  { %1848 = vmatpush.bf16.msra.mxu2 %v3631_v50 }
 0x31f   :  { %1673 = vmatmul.bf16.gmra.mxu0 %v1640_v19  ;;  %v3594_v19 = vld [vmem:[%s6528_s19 + $0x10] sm:$0xf] }
 0x320   :  { %1829 = vmatpush.bf16.msra.mxu1 %v3627_v15  ;;  %v6532_v15 = vld [vmem:[#allocation58_spill] sm:$0xff] }
 0x321   :  { %1849 = vmatpush.bf16.msra.mxu2 %v3623_v61  ;;  %v6534_v3 = vpack.c.bf16 %v6532_v15, %v6533_v16  ;;  %v3741_v15 = vld [vmem:[%s6539_s6 + $0x38] sm:$0xff] }
 0x322   :  { %2131 = vmatpush.bf16.msra.mxu3 %v3741_v15 }
 0x324   :  { %1830 = vmatpush.bf16.msra.mxu1 %v3619_v8 }
 0x325   :  { %1850 = vmatpush.bf16.msra.mxu2 %v3615_v34 }
 0x328   :  { %1831 = vmatpush.bf16.msra.mxu1 %v3611_v20 }
 0x329   :  { %1851 = vmatpush.bf16.msra.mxu2 %v3607_v46 }
 0x32c   :  { %1832 = vmatpush.bf16.msra.mxu1 %v3603_v38 }
 0x32d   :  { %1852 = vmatpush.bf16.msra.mxu2 %v3599_v11 }
 0x331   :  { %1853 = vmatpush.bf16.msra.mxu2 %v3591_v37 }
 0x335   :  { %2270 = vmatpush.bf16.msrb.mxu2 %v6534_v3 }
 0x38a   :  { %v1650_v13 = vpop.f32.mrf.mxu3 }
 0x38c   :  { %v1669_v5 = vpop.f32.mrf.mxu0 }
 0x38d   :  { %v1670_v45 = vadd.f32 %v1669_v5, %v1650_v13  ;;  %v3721_v5 = vld [vmem:[%s6528_s19 + $0x14] sm:$0xf0] }
 0x38e   :  { %v3595_v13 = vor.u32 %v3721_v5, %v3594_v19 }
 0x390   :  { %1833 = vmatpush.bf16.msra.mxu1 %v3595_v13 }
 0x392   :  { %v1652_v28 = vpop.f32.mrf.mxu3 }
 0x394   :  { %v1671_v49 = vpop.f32.mrf.mxu0 }
 0x395   :  { %v1672_v21 = vadd.f32 %v1671_v49, %v1652_v28  ;;  %v3586_v28 = vld [vmem:[%s6528_s19] sm:$0xf] }
 0x397   :  { %v1679_v18 = vadd.f32 %v1672_v21, %v1670_v45 }
 0x399   :  { %v1680_v62 = vrot.slane %v1679_v18, 4 }
 0x39a   :  { %v1655_v9 = vpop.f32.mrf.mxu3 }
 0x39b   :  { %v1681_v32 = vadd.f32 %v1680_v62, %v1679_v18  ;;  %v6529_v62 = vld [vmem:[#allocation53_spill] sm:$0xff] }
 0x39c   :  { %v1674_v41 = vpop.f32.mrf.mxu0  ;;  %v6531_v53 = vpack.c.bf16 %v6529_v62, %v6530_v12  ;;  %v3928_v62 = vld [vmem:[#allocation20 + $0x10] sm:$0xff] }
 0x39d   :  { %v1682_v40 = vrot.slane %v1681_v32, 2  ;;  %v1675_v26 = vadd.f32 %v1674_v41, %v1655_v9 }
 0x39f   :  { %v1683_v24 = vadd.f32 %v1682_v40, %v1681_v32 }
 0x3a1   :  { %v1684_v27 = vrot.slane %v1683_v24, 1 }
 0x3a2   :  { %v1657_v35 = vpop.f32.mrf.mxu3 }
 0x3a3   :  { %v1685_v36 = vadd.f32 %v1684_v27, %v1683_v24 }
 0x3a4   :  { %v1676_v59 = vpop.f32.mrf.mxu0 }
 0x3a5   :  { %v1686_v1 = vmul.f32 %v1685_v36, %v6525_v44  ;;  %v1677_v63 = vadd.f32 %v1676_v59, %v1657_v35  ;;  %v6536_v36 = vld [vmem:[#allocation55_spill] sm:$0xff] }
 0x3a6   :  { %v270_v59 = vpack.c.bf16 %v6536_v36, %v6535_v42 }
 0x3a7   :  { %v5577_v0 = vsub.f32 %v1670_v45, %v1686_v1  ;;  %v5579_v58 = vsub.f32 %v1672_v21, %v1686_v1  ;;  %v1712_v55 = vadd.f32 %v1677_v63, %v1675_v26  ;;  %v3719_v45 = vld [vmem:[%s6528_s19 + $0x4] sm:$0xf0] }
 0x3a8   :  { %v3587_v21 = vor.u32 %v3719_v45, %v3586_v28  ;;  %v3924_v28 = vld [vmem:[#allocation20 + $0x50] sm:$0xff] }
 0x3a9   :  { %v1689_v29 = vmul.f32 %v5577_v0, %v5577_v0  ;;  %v1690_v31 = vmul.f32 %v5579_v58, %v5579_v58  ;;  %v1713_v43 = vrot.slane %v1712_v55, 4 }
 0x3aa   :  { %1834 = vmatpush.bf16.msra.mxu1 %v3587_v21 }
 0x3ab   :  { %v1691_v25 = vadd.f32 %v1690_v31, %v1689_v29  ;;  %v1714_v56 = vadd.f32 %v1713_v43, %v1712_v55 }
 0x3ad   :  { %v1692_v49 = vrot.slane %v1691_v25, 4  ;;  %v1715_v17 = vrot.slane %v1714_v56, 2 }
 0x3ae   :  { %2241 = vmatpush.bf16.msrb.mxu1 %v6531_v53 }
 0x3af   :  { %v1693_v52 = vadd.f32 %v1692_v49, %v1691_v25  ;;  %v1716_v60 = vadd.f32 %v1715_v17, %v1714_v56  ;;  %v3923_v17 = vld [vmem:[#allocation20 + $0x40] sm:$0xff] }
 0x3b0   :  { %v374_v45 = vpack.c.bf16 %v3924_v28, %v3923_v17  ;;  %v3745_v17 = vld [vmem:[%s6539_s6 + $0x58] sm:$0xff] }
 0x3b1   :  { %v1694_v18 = vrot.slane %v1693_v52, 2  ;;  %v1717_v57 = vrot.slane %v1716_v60, 1 }
 0x3b2   :  { %2242 = vmatpush.bf16.msrb.mxu1 %v270_v59  ;;  %2271 = vmatpush.bf16.msrb.mxu2 %v374_v45 }
 0x3b3   :  { %v1695_v32 = vadd.f32 %v1694_v18, %v1693_v52  ;;  %v1718_v41 = vadd.f32 %v1717_v57, %v1716_v60  ;;  %v372_v52 = vpack.c.bf16 %v3926_v22, %v3925_v4  ;;  %v3927_v57 = vld [vmem:[#allocation20] sm:$0xff] }
 0x3b4   :  { %v370_v12 = vpack.c.bf16 %v3928_v62, %v3927_v57  ;;  %v3735_v22 = vld [vmem:[%s6539_s6 + $0x8] sm:$0xff]  ;;  %v3744_v62 = vld [vmem:[%s6539_s6 + $0x50] sm:$0xff] }
 0x3b5   :  { %v1696_v50 = vrot.slane %v1695_v32, 1  ;;  %v1719_v9 = vmul.f32 %v1718_v41, %v6525_v44 }
 0x3b6   :  { %2272 = vmatpush.bf16.msrb.mxu2 %v372_v52 }
 0x3b7   :  { %v1697_v40 = vadd.f32 %v1696_v50, %v1695_v32  ;;  %v1721_v51 = vsub.f32 %v1677_v63, %v1719_v9  ;;  %v1720_v39 = vsub.f32 %v1675_v26, %v1719_v9 }
 0x3b9   :  { %v1698_v8 = vmul.f32 %v1697_v40, %v6525_v44  ;;  %v1723_v7 = vmul.f32 %v1721_v51, %v1721_v51  ;;  %v1722_v2 = vmul.f32 %v1720_v39, %v1720_v39  ;;  %v3740_v40 = vld [vmem:[%s6539_s6 + $0x30] sm:$0xff] }
 0x3ba   :  { %2273 = vmatpush.bf16.msrb.mxu2 %v370_v12  ;;  %2132 = vmatpush.bf16.msra.mxu3 %v3740_v40 }
 0x3bb   :  { %v1699_v24 = vadd.f32 1e-05, %v1698_v8  ;;  %v1724_v61 = vadd.f32 %v1723_v7, %v1722_v2  ;;  %v3749_v8 = vld [vmem:[%s6539_s6 + $0x78] sm:$0xff] }
 0x3bc   :  { %2150 = vmatpush.bf16.msrb.mxu0 %v3749_v8 }
 0x3bd   :  { %3847 = vrsqrt.f32 %v1699_v24  ;;  %v1725_v27 = vrot.slane %v1724_v61, 4  ;;  %vm1706_vm14 = vweird.f32 %v1699_v24 }
 0x3bf   :  { %v1726_v47 = vadd.f32 %v1725_v27, %v1724_v61 }
 0x3c1   :  { %v1727_v10 = vrot.slane %v1726_v47, 2 }
 0x3c3   :  { %v3848_v20 = vpop.eup %3847  ;;  %v1728_v33 = vadd.f32 %v1727_v10, %v1726_v47  ;;  %v3748_v10 = vld [vmem:[%s6539_s6 + $0x70] sm:$0xff] }
 0x3c4   :  { %v1701_v34 = vmul.f32 %v3848_v20, %v1699_v24  ;;  %vm1707_vm13 = vweird.f32 %v3848_v20  ;;  %v3739_v24 = vld [vmem:[%s6539_s6 + $0x28] sm:$0xff]  ;;  %2151 = vmatpush.bf16.msrb.mxu0 %v3748_v10 }
 0x3c5   :  { %v1729_v35 = vrot.slane %v1728_v33, 1  ;;  %vm1708_vm15 = vmor %vm1706_vm14, %vm1707_vm13  ;;  %2133 = vmatpush.bf16.msra.mxu3 %v3739_v24  ;;  %v6541_v10 = vld [vmem:[#allocation59_spill] sm:$0xff] }
 0x3c6   :  { %v1702_v1 = vmul.f32 %v3848_v20, %v1701_v34  ;;  %v3738_v34 = vld [vmem:[%s6539_s6 + $0x20] sm:$0xff] }
 0x3c7   :  { %v1730_v26 = vadd.f32 %v1729_v35, %v1728_v33 }
 0x3c8   :  { %v1703_v63 = vmul.f32 0.5, %v1702_v1 }
 0x3c9   :  { %v1731_v30 = vmul.f32 %v1730_v26, %v6525_v44  ;;  %2134 = vmatpush.bf16.msra.mxu3 %v3738_v34 }
 0x3ca   :  { %v1704_v54 = vsub.f32 1.5, %v1703_v63 }
 0x3cb   :  { %v1732_v14 = vadd.f32 1e-05, %v1731_v30  ;;  %v3747_v30 = vld [vmem:[%s6539_s6 + $0x68] sm:$0xff] }
 0x3cc   :  { %v1705_v38 = vmul.f32 %v3848_v20, %v1704_v54  ;;  %2152 = vmatpush.bf16.msrb.mxu0 %v3747_v30 }
 0x3cd   :  { %3849 = vrsqrt.f32 %v1732_v14  ;;  %vm1739_vm3 = vweird.f32 %v1732_v14 }
 0x3ce   :  { %v1709_v6 = vsel %vm1708_vm15, %v3848_v20, %v1705_v38 }
 0x3cf   :  { %v1710_v55 = vmul.f32 %v1709_v6, %v5577_v0  ;;  %v1711_v46 = vmul.f32 %v1709_v6, %v5579_v58  ;;  %v6537_v0 = vld [vmem:[#allocation56_spill] sm:$0xff]  ;;  %v6538_v58 = vld [vmem:[#allocation61_spill] sm:$0xff] }
 0x3d0   :  { %v3737_v6 = vld [vmem:[%s6539_s6 + $0x18] sm:$0xff] }
 0x3d1   :  { %v1745_v29 = vpack.c.bf16 %v1711_v46, %v1710_v55  ;;  %2135 = vmatpush.bf16.msra.mxu3 %v3737_v6 }
 0x3d3   :  { %v3850_v31 = vpop.eup %3849  ;;  %1835 = vmatmul.bf16.vlgmr.msra.gmra.mxu1 %v1745_v29  ;;  %1854 = vmatmul.bf16.vlgmr.msra.gmra.mxu2 %v1745_v29 }
 0x3d4   :  { %v1734_v43 = vmul.f32 %v3850_v31, %v1732_v14  ;;  %vm1740_vm2 = vweird.f32 %v3850_v31 }
 0x3d5   :  { %vm1741_vm4 = vmor %vm1739_vm3, %vm1740_vm2 }
 0x3d6   :  { %v1735_v19 = vmul.f32 %v3850_v31, %v1734_v43 }
 0x3d8   :  { %v1736_v5 = vmul.f32 0.5, %v1735_v19  ;;  %v3746_v19 = vld [vmem:[%s6539_s6 + $0x60] sm:$0xff] }
 0x3d9   :  { %2153 = vmatpush.bf16.msrb.mxu0 %v3746_v19  ;;  %v6543_v19 = vld [vmem:[#allocation94_spill] sm:$0xff] }
 0x3da   :  { %v1737_v13 = vsub.f32 1.5, %v1736_v5 }
 0x3dc   :  { %v1738_v48 = vmul.f32 %v3850_v31, %v1737_v13 }
 0x3dd   :  { %2154 = vmatpush.bf16.msrb.mxu0 %v3745_v17 }
 0x3de   :  { %v1742_v23 = vsel %vm1741_vm4, %v3850_v31, %v1738_v48 }
 0x3df   :  { %v1743_v25 = vmul.f32 %v1742_v23, %v1720_v39  ;;  %v1744_v56 = vmul.f32 %v1742_v23, %v1721_v51 }
 0x3e1   :  { %v1746_v11 = vpack.c.bf16 %v1744_v56, %v1743_v25  ;;  %v3736_v56 = vld [vmem:[%s6539_s6 + $0x10] sm:$0xff]  ;;  %2155 = vmatpush.bf16.msrb.mxu0 %v3744_v62 }
 0x3e2   :  { %2136 = vmatpush.bf16.msra.mxu3 %v3736_v56 }
 0x3e3   :  { %1840 = vmatmul.bf16.gmra.mxu1 %v1746_v11  ;;  %1859 = vmatmul.bf16.gmra.mxu2 %v1746_v11 }
 0x3e6   :  { %2137 = vmatpush.bf16.msra.mxu3 %v3735_v22 }
 0x3f3   :  { %3712 = vmatmul.msk.bf16.vlgmr.msrb.gmra.mxu1 %vm1142_vm1, %v6537_v0 }
 0x403   :  { %3713 = vmatmul.msk.bf16.gmra.mxu1 %vm1142_vm1, %v6538_v58 }
 0x450   :  { %v1836_v49 = vpop.f32.mrf.mxu1 }
 0x456   :  { %v1855_v21 = vpop.f32.mrf.mxu2 }
 0x458   :  { %v1838_v60 = vpop.f32.mrf.mxu1 }
 0x459   :  { %v1865_v37 = vadd.f32 %v1838_v60, %v1836_v49 }
 0x45b   :  { %v1866_v18 = vrot.slane %v1865_v37, 4 }
 0x45d   :  { %v1867_v53 = vadd.f32 %v1866_v18, %v1865_v37 }
 0x45e   :  { %v1857_v16 = vpop.f32.mrf.mxu2 }
 0x45f   :  { %v1868_v3 = vrot.slane %v1867_v53, 2  ;;  %v1872_v32 = vadd.f32 %v1857_v16, %v1855_v21 }
 0x460   :  { %v5611_v41 = vpop.f32.mrf.mxu1 }
 0x461   :  { %v1869_v50 = vadd.f32 %v1868_v3, %v1867_v53  ;;  %v1873_v9 = vrot.slane %v1872_v32, 4 }
 0x463   :  { %v1870_v51 = vrot.slane %v1869_v50, 1  ;;  %v1874_v39 = vadd.f32 %v1873_v9, %v1872_v32 }
 0x465   :  { %v1871_v7 = vadd.f32 %v1870_v51, %v1869_v50  ;;  %v1875_v2 = vrot.slane %v1874_v39, 2  ;;  %v3734_v50 = vld [vmem:[%s6539_s6] sm:$0xff] }
 0x466   :  { %v5616_v61 = vpop.f32.mrf.mxu2  ;;  %2138 = vmatpush.bf16.msra.mxu3 %v3734_v50 }
 0x467   :  { %v1879_v27 = vmul.f32 %v1871_v7, %v6525_v44  ;;  %v1876_v47 = vadd.f32 %v1875_v2, %v1874_v39  ;;  %v3743_v2 = vld [vmem:[%s6539_s6 + $0x48] sm:$0xff] }
 0x468   :  { %v1843_v20 = vpop.f32.mrf.mxu1  ;;  %2156 = vmatpush.bf16.msrb.mxu0 %v3743_v2 }
 0x469   :  { %v5620_v33 = vsub.f32 %v1836_v49, %v1879_v27  ;;  %v5622_v42 = vsub.f32 %v1838_v60, %v1879_v27  ;;  %v1877_v36 = vrot.slane %v1876_v47, 1  ;;  %v1931_v59 = vadd.f32 %v1843_v20, %v5611_v41 }
 0x46b   :  { %v1885_v35 = vmul.f32 %v5620_v33, %v5620_v33  ;;  %v1887_v1 = vmul.f32 %v5622_v42, %v5622_v42  ;;  %v1878_v26 = vadd.f32 %v1877_v36, %v1876_v47  ;;  %v1932_v63 = vrot.slane %v1931_v59, 4 }
 0x46d   :  { %v1889_v54 = vadd.f32 %v1887_v1, %v1885_v35  ;;  %v1880_v14 = vmul.f32 %v1878_v26, %v6525_v44  ;;  %v1933_v38 = vadd.f32 %v1932_v63, %v1931_v59  ;;  %v3742_v26 = vld [vmem:[%s6539_s6 + $0x40] sm:$0xff] }
 0x46e   :  { %v5633_v55 = vpop.f32.mrf.mxu2  ;;  %2157 = vmatpush.bf16.msrb.mxu0 %v3742_v26  ;;  %v3932_v26 = vld [vmem:[#allocation20 + $0x38] sm:$0xff] }
 0x46f   :  { %v1890_v46 = vrot.slane %v1889_v54, 4  ;;  %v5635_v29 = vsub.f32 %v1855_v21, %v1880_v14  ;;  %v5637_v31 = vsub.f32 %v1857_v16, %v1880_v14  ;;  %v1934_v43 = vrot.slane %v1933_v38, 2 }
 0x470   :  { %v1938_v5 = vadd.f32 %v5633_v55, %v5616_v61  ;;  %v2244_v13 = vpop.f32.mrf.mxu1 }
 0x471   :  { %v1891_v48 = vadd.f32 %v1890_v46, %v1889_v54  ;;  %v1886_v23 = vmul.f32 %v5635_v29, %v5635_v29  ;;  %v1888_v25 = vmul.f32 %v5637_v31, %v5637_v31  ;;  %v1935_v11 = vadd.f32 %v1934_v43, %v1933_v38 }
 0x472   :  { %v1939_v0 = vrot.slane %v1938_v5, 4  ;;  %v2254_v57 = vmax.f32 %v2244_v13, 0.0 }
 0x473   :  { %v1892_v58 = vrot.slane %v1891_v48, 2  ;;  %v1896_v49 = vadd.f32 %v1888_v25, %v1886_v23  ;;  %v1936_v28 = vrot.slane %v1935_v11, 1 }
 0x474   :  { %v1940_v45 = vadd.f32 %v1939_v0, %v1938_v5  ;;  %v6544_v5 = vld [vmem:[#allocation93_spill] sm:$0xff] }
 0x475   :  { %v1893_v21 = vadd.f32 %v1892_v58, %v1891_v48  ;;  %v1897_v4 = vrot.slane %v1896_v49, 4  ;;  %v1937_v52 = vadd.f32 %v1936_v28, %v1935_v11  ;;  %v6545_v13 = vpack.c.bf16 %v6543_v19, %v6544_v5  ;;  %v3933_v19 = vld [vmem:[#allocation20 + $0x8] sm:$0xff]  ;;  %v3934_v5 = vld [vmem:[#allocation20 + $0x18] sm:$0xff] }
 0x476   :  { %v1941_v60 = vrot.slane %v1940_v45, 2 }
 0x477   :  { %v1894_v37 = vrot.slane %v1893_v21, 1  ;;  %v1898_v18 = vadd.f32 %v1897_v4, %v1896_v49  ;;  %v1945_v12 = vmul.f32 %v1937_v52, %v6525_v44  ;;  %2474 = vmatpush.bf16.msra.mxu0 %v6545_v13  ;;  %v371_v13 = vpack.c.bf16 %v3934_v5, %v3933_v19 }
 0x478   :  { %v1942_v53 = vadd.f32 %v1941_v60, %v1940_v45  ;;  %v2246_v15 = vpop.f32.mrf.mxu1 }
 0x479   :  { %v1895_v16 = vadd.f32 %v1894_v37, %v1893_v21  ;;  %v1899_v3 = vrot.slane %v1898_v18, 2  ;;  %v2255_v32 = vmax.f32 %v2246_v15, 0.0  ;;  %v5653_v9 = vsub.f32 %v5611_v41, %v1945_v12  ;;  %v6540_v41 = vld [vmem:[#allocation60_spill] sm:$0xff]  ;;  %v1102_v37 = vld [vmem:[%s6546_s28] sm:$0x3]  ;;  %v3930_v15 = vld [vmem:[#allocation20 + $0x58] sm:$0xff] }
 0x47a   :  { %v5655_v40 = vsub.f32 %v1843_v20, %v1945_v12  ;;  %v1943_v51 = vrot.slane %v1942_v53, 1  ;;  %v6542_v20 = vpack.c.bf16 %v6540_v41, %v6541_v10 }
 0x47b   :  { %v1903_v39 = vmul.f32 %v1895_v16, %v6525_v44  ;;  %v1900_v8 = vadd.f32 %v1899_v3, %v1898_v18  ;;  %v5658_v7 = vpack.c.bf16 %v2255_v32, %v2254_v57  ;;  %v1951_v24 = vmul.f32 %v5653_v9, %v5653_v9  ;;  %v1103_v3 = vld [vmem:[%s6547_s11] sm:$0x3] }
 0x47c   :  { %v1953_v27 = vmul.f32 %v5655_v40, %v5655_v40  ;;  %v1944_v47 = vadd.f32 %v1943_v51, %v1942_v53  ;;  %2289 = vmatpush.bf16.msrb.mxu3 %v6542_v20  ;;  %v3929_v53 = vld [vmem:[#allocation20 + $0x48] sm:$0xff]  ;;  %v2011_v41 = vperm.slane %v1103_v3, 0 }
 0x47d   :  { %v1905_v36 = vadd.f32 1e-05, %v1903_v39  ;;  %v1901_v59 = vrot.slane %v1900_v8, 1  ;;  %3714 = vmatmul.msk.bf16.vlgmr.msrb.gmra.mxu2 %vm265_vm0, %v5658_v7  ;;  %v375_v16 = vpack.c.bf16 %v3930_v15, %v3929_v53  ;;  %v5693_v39 = vperm.slane %v1102_v37, 0 }
 0x47e   :  { %v1955_v34 = vadd.f32 %v1953_v27, %v1951_v24  ;;  %v1946_v35 = vmul.f32 %v1944_v47, %v6525_v44 }
 0x47f   :  { %3851 = vrsqrt.f32 %v1905_v36  ;;  %v1902_v1 = vadd.f32 %v1901_v59, %v1900_v8  ;;  %vm1913_vm5 = vweird.f32 %v1905_v36 }
 0x480   :  { %v1956_v63 = vrot.slane %v1955_v34, 4  ;;  %v5673_v30 = vsub.f32 %v5616_v61, %v1946_v35  ;;  %v5676_v54 = vsub.f32 %v5633_v55, %v1946_v35  ;;  %v2249_v14 = vpop.f32.mrf.mxu1  ;;  %2290 = vmatpush.bf16.msrb.mxu3 %v375_v16 }
 0x481   :  { %v1904_v38 = vmul.f32 %v1902_v1, %v6525_v44  ;;  %v2256_v0 = vmax.f32 %v2249_v14, 0.0  ;;  %v3931_v1 = vld [vmem:[#allocation20 + $0x28] sm:$0xff] }
 0x482   :  { %v1957_v6 = vadd.f32 %v1956_v63, %v1955_v34  ;;  %v1952_v46 = vmul.f32 %v5673_v30, %v5673_v30  ;;  %v1954_v43 = vmul.f32 %v5676_v54, %v5676_v54  ;;  %v373_v63 = vpack.c.bf16 %v3932_v26, %v3931_v1  ;;  %v3935_v1 = vld [vmem:[#allocation24 + $0xe8] sm:$0xff]  ;;  %v3936_v26 = vld [vmem:[#allocation24 + $0xf8] sm:$0xff] }
 0x483   :  { %v1906_v61 = vadd.f32 1e-05, %v1904_v38 }
 0x484   :  { %v1958_v48 = vrot.slane %v1957_v6, 2  ;;  %v1962_v23 = vadd.f32 %v1954_v43, %v1952_v46  ;;  %v2012_v43 = vperm.slane %v1103_v3, 1  ;;  %2291 = vmatpush.bf16.msrb.mxu3 %v373_v63  ;;  %v801_v63 = vpack.c.bf16 %v3936_v26, %v3935_v1 }
 0x485   :  { %v3852_v55 = vpop.eup %3851  ;;  %3853 = vrsqrt.f32 %v1906_v61  ;;  %vm1923_vm8 = vweird.f32 %v1906_v61 }
 0x486   :  { %v1908_v25 = vmul.f32 %v3852_v55, %v1905_v36  ;;  %v1959_v56 = vadd.f32 %v1958_v48, %v1957_v6  ;;  %v1963_v11 = vrot.slane %v1962_v23, 4  ;;  %vm1914_vm1 = vweird.f32 %v3852_v55  ;;  %2512 = vmatpush.bf16.msra.mxu2 %v801_v63 }
 0x487   :  { %vm1915_vm6 = vmor %vm1913_vm5, %vm1914_vm1 }
 0x488   :  { %v1909_v58 = vmul.f32 %v3852_v55, %v1908_v25  ;;  %v1960_v49 = vrot.slane %v1959_v56, 1  ;;  %v1964_v17 = vadd.f32 %v1963_v11, %v1962_v23  ;;  %v2251_v28 = vpop.f32.mrf.mxu1  ;;  %2292 = vmatpush.bf16.msrb.mxu3 %v371_v13  ;;  %v3941_v13 = vld [vmem:[#allocation24 + $0xa0] sm:$0xff] }
 0x489   :  { %v2257_v45 = vmax.f32 %v2251_v28, 0.0 }
 0x48a   :  { %v1910_v21 = vmul.f32 0.5, %v1909_v58  ;;  %v1961_v4 = vadd.f32 %v1960_v49, %v1959_v56  ;;  %v1965_v22 = vrot.slane %v1964_v17, 2 }
 0x48b   :  { %v3854_v52 = vpop.eup %3853  ;;  %v5686_v60 = vpack.c.bf16 %v2257_v45, %v2256_v0 }
 0x48c   :  { %v1911_v18 = vsub.f32 1.5, %v1910_v21  ;;  %v1918_v57 = vmul.f32 %v3854_v52, %v1906_v61  ;;  %v1969_v62 = vmul.f32 %v1961_v4, %v6525_v44  ;;  %v1966_v12 = vadd.f32 %v1965_v22, %v1964_v17 }
 0x48d   :  { %3715 = vmatmul.msk.bf16.gmra.mxu2 %vm265_vm0, %v5686_v60  ;;  %vm1924_vm7 = vweird.f32 %v3854_v52 }
 0x48e   :  { %v1912_v32 = vmul.f32 %v3852_v55, %v1911_v18  ;;  %v1919_v50 = vmul.f32 %v3854_v52, %v1918_v57  ;;  %v1971_v51 = vadd.f32 1e-05, %v1969_v62  ;;  %v1967_v8 = vrot.slane %v1966_v12, 1  ;;  %vm1925_vm9 = vmor %vm1923_vm8, %vm1924_vm7 }
 0x490   :  { %v1916_v2 = vsel %vm1915_vm6, %v3852_v55, %v1912_v32  ;;  %v1920_v24 = vmul.f32 0.5, %v1919_v50  ;;  %3855 = vrsqrt.f32 %v1971_v51  ;;  %v1968_v10 = vadd.f32 %v1967_v8, %v1966_v12 }
 0x491   :  { %v1927_v27 = vmul.f32 %v1916_v2, %v5620_v33  ;;  %v1929_v47 = vmul.f32 %v1916_v2, %v5622_v42  ;;  %v1999_v33 = vperm.slane %v1102_v37, 1  ;;  %vm1979_vm11 = vweird.f32 %v1971_v51 }
 0x492   :  { %v1921_v20 = vsub.f32 1.5, %v1920_v24  ;;  %v1970_v34 = vmul.f32 %v1968_v10, %v6525_v44 }
 0x493   :  { %v2002_v36 = vmul.f32 %v5693_v39, %v1927_v27  ;;  %v2004_v59 = vmul.f32 %v5693_v39, %v1929_v47 }
 0x494   :  { %v1922_v35 = vmul.f32 %v3854_v52, %v1921_v20  ;;  %v1972_v42 = vadd.f32 1e-05, %v1970_v34 }
 0x495   :  { %v2015_v14 = vadd.f32 %v2011_v41, %v2002_v36  ;;  %v2017_v38 = vadd.f32 %v2011_v41, %v2004_v59 }
 0x496   :  { %v3856_v6 = vpop.eup %3855  ;;  %v1926_v46 = vsel %vm1925_vm9, %v3854_v52, %v1922_v35  ;;  %3857 = vrsqrt.f32 %v1972_v42  ;;  %vm1989_vm14 = vweird.f32 %v1972_v42 }
 0x497   :  { %v2025_v48 = vmax.f32 %v2017_v38, 0.0  ;;  %v1928_v23 = vmul.f32 %v1926_v46, %v5635_v29  ;;  %v1930_v61 = vmul.f32 %v1926_v46, %v5637_v31  ;;  %v1974_v55 = vmul.f32 %v3856_v6, %v1971_v51 }
 0x498   :  { %v2023_v25 = vmax.f32 %v2015_v14, 0.0  ;;  %vm1980_vm10 = vweird.f32 %v3856_v6 }
 0x499   :  { %v2003_v56 = vmul.f32 %v1999_v33, %v1928_v23  ;;  %v2005_v11 = vmul.f32 %v1999_v33, %v1930_v61  ;;  %v1975_v0 = vmul.f32 %v3856_v6, %v1974_v55  ;;  %vm1981_vm12 = vmor %vm1979_vm11, %vm1980_vm10  ;;  %v3943_v61 = vld [vmem:[#allocation24 + $0xa8] sm:$0xff]  ;;  %v3944_v55 = vld [vmem:[#allocation24 + $0xb8] sm:$0xff] }
 0x49a   :  { %v2031_v58 = vpack.c.bf16 %v2025_v48, %v2023_v25  ;;  %v3942_v48 = vld [vmem:[#allocation24 + $0xb0] sm:$0xff]  ;;  %v797_v25 = vpack.c.bf16 %v3944_v55, %v3943_v61 }
 0x49b   :  { %v2016_v49 = vadd.f32 %v2012_v43, %v2003_v56  ;;  %v2018_v17 = vadd.f32 %v2012_v43, %v2005_v11  ;;  %v1976_v28 = vmul.f32 0.5, %v1975_v0  ;;  %v796_v23 = vpack.c.bf16 %v3942_v48, %v3941_v13  ;;  %v3963_v48 = vld [vmem:[#allocation24 + $0x8] sm:$0xff] }
 0x49c   :  { %2139 = vmatmul.bf16.vlgmr.msra.gmra.mxu3 %v2031_v58  ;;  %v3858_v22 = vpop.eup %3857 }
 0x49d   :  { %v2026_v45 = vmax.f32 %v2018_v17, 0.0  ;;  %v1977_v21 = vsub.f32 1.5, %v1976_v28  ;;  %v2024_v4 = vmax.f32 %v2016_v49, 0.0  ;;  %v1984_v31 = vmul.f32 %v3858_v22, %v1972_v42  ;;  %v3937_v42 = vld [vmem:[#allocation24 + $0xc0] sm:$0xff]  ;;  %v3946_v28 = vld [vmem:[#allocation24 + $0x90] sm:$0xff] }
 0x49e   :  { %vm1990_vm13 = vweird.f32 %v3858_v22  ;;  %v3945_v17 = vld [vmem:[#allocation24 + $0x80] sm:$0xff] }
 0x49f   :  { %v1978_v29 = vmul.f32 %v3856_v6, %v1977_v21  ;;  %v2032_v52 = vpack.c.bf16 %v2026_v45, %v2024_v4  ;;  %v1985_v18 = vmul.f32 %v3858_v22, %v1984_v31  ;;  %vm1991_vm15 = vmor %vm1989_vm14, %vm1990_vm13  ;;  %v794_v45 = vpack.c.bf16 %v3946_v28, %v3945_v17  ;;  %v3947_v21 = vld [vmem:[#allocation24 + $0x88] sm:$0xff]  ;;  %v3948_v4 = vld [vmem:[#allocation24 + $0x98] sm:$0xff] }
 0x4a1   :  { %v1982_v37 = vsel %vm1981_vm12, %v3856_v6, %v1978_v29  ;;  %2158 = vmatmul.bf16.vlgmr.msrb.gmra.mxu0 %v2032_v52  ;;  %v1986_v12 = vmul.f32 0.5, %v1985_v18  ;;  %v3938_v6 = vld [vmem:[#allocation24 + $0xd0] sm:$0xff] }
 0x4a2   :  { %v1993_v57 = vmul.f32 %v1982_v37, %v5653_v9  ;;  %v1995_v62 = vmul.f32 %v1982_v37, %v5655_v40  ;;  %v798_v46 = vpack.c.bf16 %v3938_v6, %v3937_v42 }
 0x4a3   :  { %v1987_v16 = vsub.f32 1.5, %v1986_v12 }
 0x4a4   :  { %v2008_v53 = vmul.f32 %v5693_v39, %v1995_v62  ;;  %v2006_v15 = vmul.f32 %v5693_v39, %v1993_v57  ;;  %2475 = vmatpush.bf16.msra.mxu0 %v798_v46  ;;  %v3949_v57 = vld [vmem:[#allocation24 + $0x60] sm:$0xff]  ;;  %v3950_v62 = vld [vmem:[#allocation24 + $0x70] sm:$0xff] }
 0x4a5   :  { %v1988_v50 = vmul.f32 %v3858_v22, %v1987_v16  ;;  %v792_v12 = vpack.c.bf16 %v3950_v62, %v3949_v57  ;;  %v397_v57 = vld [vmem:[#allocation8] sm:$0x3] }
 0x4a6   :  { %v2019_v3 = vadd.f32 %v2011_v41, %v2006_v15  ;;  %v2021_v32 = vadd.f32 %v2011_v41, %v2008_v53  ;;  %v3951_v53 = vld [vmem:[#allocation24 + $0x68] sm:$0xff]  ;;  %v3952_v15 = vld [vmem:[#allocation24 + $0x78] sm:$0xff] }
 0x4a7   :  { %v1992_v2 = vsel %vm1991_vm15, %v3858_v22, %v1988_v50  ;;  %v795_v22 = vpack.c.bf16 %v3948_v4, %v3947_v21  ;;  %v793_v16 = vpack.c.bf16 %v3952_v15, %v3951_v53  ;;  %v3965_v15 = vld [vmem:[%s4601_s24] sm:$0x3]  ;;  %s6558_s24 = sld [smem:[#allocation48_spill]] }
 0x4a8   :  { %v2027_v51 = vmax.f32 %v2019_v3, 0.0  ;;  %v2029_v8 = vmax.f32 %v2021_v32, 0.0  ;;  %v1994_v24 = vmul.f32 %v1992_v2, %v5673_v30  ;;  %v1996_v9 = vmul.f32 %v1992_v2, %v5676_v54  ;;  %2476 = vmatpush.bf16.msra.mxu0 %v796_v23  ;;  %v3964_v23 = vld [vmem:[#allocation24 + $0x18] sm:$0xff] }
 0x4a9   :  { %v787_v61 = vpack.c.bf16 %v3964_v23, %v3963_v48 }
 0x4aa   :  { %v2033_v40 = vpack.c.bf16 %v2029_v8, %v2027_v51  ;;  %v2009_v27 = vmul.f32 %v1999_v33, %v1996_v9  ;;  %v2007_v47 = vmul.f32 %v1999_v33, %v1994_v24  ;;  %v3953_v24 = vld [vmem:[#allocation24 + $0x40] sm:$0xff]  ;;  %v3954_v9 = vld [vmem:[#allocation24 + $0x50] sm:$0xff] }
 0x4ac   :  { %2144 = vmatmul.bf16.gmra.mxu3 %v2033_v40  ;;  %v2020_v10 = vadd.f32 %v2012_v43, %v2007_v47  ;;  %v2022_v39 = vadd.f32 %v2012_v43, %v2009_v27  ;;  %v3940_v43 = vld [vmem:[#allocation24 + $0xd8] sm:$0xff]  ;;  %2477 = vmatpush.bf16.msra.mxu0 %v794_v45  ;;  %v790_v40 = vpack.c.bf16 %v3954_v9, %v3953_v24  ;;  %v3955_v27 = vld [vmem:[#allocation24 + $0x48] sm:$0xff] }
 0x4ad   :  { %v3956_v47 = vld [vmem:[#allocation24 + $0x58] sm:$0xff]  ;;  %s4265_s7 = scalar_lea.hbm %s6558_s24, 32 }
 0x4ae   :  { %v2028_v20 = vmax.f32 %v2020_v10, 0.0  ;;  %v2030_v36 = vmax.f32 %v2022_v39, 0.0  ;;  %v791_v10 = vpack.c.bf16 %v3956_v47, %v3955_v27 }
 0x4b0   :  { %v2034_v59 = vpack.c.bf16 %v2030_v36, %v2028_v20  ;;  %2478 = vmatpush.bf16.msra.mxu0 %v792_v12 }
 0x4b2   :  { %2163 = vmatmul.bf16.gmra.mxu0 %v2034_v59 }
 0x4b4   :  { %2479 = vmatpush.bf16.msra.mxu0 %v790_v40 }
 0x4bc   :  { %3716 = vmatmul.msk.bf16.vlgmr.msrb.gmra.mxu3 %vm265_vm0, %v5658_v7  ;;  %v3939_v7 = vld [vmem:[#allocation24 + $0xc8] sm:$0xff] }
 0x4bd   :  { %v799_v19 = vpack.c.bf16 %v3940_v43, %v3939_v7 }
 0x4bf   :  { %2513 = vmatpush.bf16.msra.mxu2 %v799_v19  ;;  %v3961_v19 = vld [vmem:[#allocation24] sm:$0xff] }
 0x4c3   :  { %2514 = vmatpush.bf16.msra.mxu2 %v797_v25 }
 0x4c7   :  { %2515 = vmatpush.bf16.msra.mxu2 %v795_v22 }
 0x4cb   :  { %2516 = vmatpush.bf16.msra.mxu2 %v793_v16  ;;  %v389_v16 = vmul.f32 0.001, %v3965_v15  ;;  %v3968_v15 = vld [vmem:[#allocation24 + $0x1f0] sm:$0xff] }
 0x4cc   :  { %3717 = vmatmul.msk.bf16.gmra.mxu3 %vm265_vm0, %v5686_v60 }
 0x4cf   :  { %2517 = vmatpush.bf16.msra.mxu2 %v791_v10 }
 0x500   :  { %v2275_v41 = vpop.f32.mrf.mxu2 }
 0x508   :  { %v2277_v30 = vpop.f32.mrf.mxu2 }
 0x509   :  { %v2304_v34 = vadd.f32 %v2277_v30, %v2275_v41 }
 0x50b   :  { %v2305_v54 = vrot.slane %v2304_v34, 4 }
 0x50d   :  { %v2306_v35 = vadd.f32 %v2305_v54, %v2304_v34  ;;  %v3959_v54 = vld [vmem:[#allocation24 + $0x28] sm:$0xff] }
 0x50f   :  { %v2307_v14 = vrot.slane %v2306_v35, 2 }
 0x510   :  { %v5712_v38 = vpop.f32.mrf.mxu2 }
 0x511   :  { %v2308_v33 = vadd.f32 %v2307_v14, %v2306_v35  ;;  %v3960_v35 = vld [vmem:[#allocation24 + $0x38] sm:$0xff] }
 0x512   :  { %v789_v1 = vpack.c.bf16 %v3960_v35, %v3959_v54 }
 0x513   :  { %v2309_v60 = vrot.slane %v2308_v33, 1 }
 0x514   :  { %2518 = vmatpush.bf16.msra.mxu2 %v789_v1 }
 0x515   :  { %v2310_v5 = vadd.f32 %v2309_v60, %v2308_v33  ;;  %v3962_v60 = vld [vmem:[#allocation24 + $0x10] sm:$0xff] }
 0x517   :  { %v2318_v56 = vmul.f32 %v2310_v5, %v6525_v44  ;;  %v786_v5 = vpack.c.bf16 %v3962_v60, %v3961_v19 }
 0x518   :  { %v2282_v11 = vpop.f32.mrf.mxu2  ;;  %2519 = vmatpush.bf16.msra.mxu2 %v787_v61 }
 0x519   :  { %v5715_v0 = vsub.f32 %v2275_v41, %v2318_v56  ;;  %v5717_v58 = vsub.f32 %v2277_v30, %v2318_v56  ;;  %v2370_v49 = vadd.f32 %v2282_v11, %v5712_v38  ;;  %v3957_v41 = vld [vmem:[#allocation24 + $0x20] sm:$0xff]  ;;  %v3958_v30 = vld [vmem:[#allocation24 + $0x30] sm:$0xff] }
 0x51a   :  { %v788_v34 = vpack.c.bf16 %v3958_v30, %v3957_v41 }
 0x51b   :  { %v2324_v29 = vmul.f32 %v5715_v0, %v5715_v0  ;;  %v2326_v31 = vmul.f32 %v5717_v58, %v5717_v58  ;;  %v2371_v52 = vrot.slane %v2370_v49, 4 }
 0x51c   :  { %2480 = vmatpush.bf16.msra.mxu0 %v788_v34 }
 0x51d   :  { %v2328_v37 = vadd.f32 %v2326_v31, %v2324_v29  ;;  %v2372_v18 = vadd.f32 %v2371_v52, %v2370_v49  ;;  %v387_v52 = vld [vmem:[#allocation7] sm:$0x3] }
 0x51e   :  { %v2159_v3 = vpop.f32.mrf.mxu0 }
 0x51f   :  { %v2329_v32 = vrot.slane %v2328_v37, 4  ;;  %v2373_v50 = vrot.slane %v2372_v18, 2  ;;  %v2140_v51 = vpop.f32.mrf.mxu3 }
 0x520   :  { %v2160_v42 = vadd.f32 %v2159_v3, %v2140_v51  ;;  %2481 = vmatpush.bf16.msra.mxu0 %v786_v5  ;;  %v388_v3 = vmul.f32 0.999, %v387_v52  ;;  %v398_v51 = vmul.f32 0.999, %v397_v57 }
 0x521   :  { %v2330_v8 = vadd.f32 %v2329_v32, %v2328_v37  ;;  %v2374_v2 = vadd.f32 %v2373_v50, %v2372_v18 }
 0x523   :  { %v2331_v39 = vrot.slane %v2330_v8, 2  ;;  %v2375_v20 = vrot.slane %v2374_v2, 1 }
 0x525   :  { %v2332_v36 = vadd.f32 %v2331_v39, %v2330_v8  ;;  %v2376_v59 = vadd.f32 %v2375_v20, %v2374_v2  ;;  %v3966_v8 = vld [vmem:[%s4606_s30] sm:$0x3]  ;;  %s3413_s30 = sshll.u32 %s6558_s24, 4  ;;  %s3414_s30 = int_to_ptr.hbm [resolvable:$true] %s3413_s30 }
 0x526   :  { %v2161_v26 = vpop.f32.mrf.mxu0  ;;  %v399_v2 = vmul.f32 0.001, %v3966_v8  ;;  %s4261_s18 = sshra.s32 %s3414_s30, 4  ;;  %s4262_s18 = int_to_ptr.hbm [resolvable:$true] %s4261_s18 }
 0x527   :  { %v2333_v63 = vrot.slane %v2332_v36, 1  ;;  %v2384_v14 = vmul.f32 %v2376_v59, %v6525_v44  ;;  %v2142_v33 = vpop.f32.mrf.mxu3  ;;  %v5742_v59 = vadd.f32 %v389_v16, %v388_v3  ;;  %v3969_v3 = vld [vmem:[#allocation24 + $0x1e8] sm:$0xff]  ;;  %s4263_s17 = scalar_lea.hbm %s4262_s18, 32  ;;  %p4266_p4 = scmp.lt.s32.totalorder %s4262_s18, %s6558_s24 }
 0x528   :  { %v2162_v6 = vadd.f32 %v2161_v26, %v2142_v33  ;;  %v5749_v1 = vadd.f32 %v399_v2, %v398_v51  ;;  %p4264_p3 = scmp.ne.s32.totalorder %s4262_s18, %s4263_s17  ;;  %p4267_p5 = scmp.lt.s32.totalorder %s4265_s7, %s4263_s17 }
 0x529   :  { %v2334_v46 = vadd.f32 %v2333_v63, %v2332_v36  ;;  %v5726_v7 = vsub.f32 %v5712_v38, %v2384_v14  ;;  %v5728_v43 = vsub.f32 %v2282_v11, %v2384_v14 }
 0x52a   :  { %v2169_v13 = vadd.f32 %v2162_v6, %v2160_v42  ;;  %v5761_v48 = vperm.slane %v5749_v1, 0  ;;  %p4268_p6 = por %p4267_p5, %p4266_p4 }
 0x52b   :  { %v2342_v55 = vmul.f32 %v2334_v46, %v6525_v44  ;;  %v2390_v25 = vmul.f32 %v5726_v7, %v5726_v7  ;;  %v2392_v56 = vmul.f32 %v5728_v43, %v5728_v43 }
 0x52c   :  { %v2170_v38 = vrot.slane %v2169_v13, 4  ;;  %p4269_p7 = pnand %p4268_p6, %p4264_p3 }
 0x52d   :  { %v2344_v11 = vadd.f32 1e-05, %v2342_v55  ;;  %v2394_v49 = vadd.f32 %v2392_v56, %v2390_v25 }
 0x52e   :  { %v2171_v17 = vadd.f32 %v2170_v38, %v2169_v13 }
 0x52f   :  { %3859 = vrsqrt.f32 %v2344_v11  ;;  %v2395_v28 = vrot.slane %v2394_v49, 4  ;;  %v2145_v45 = vpop.f32.mrf.mxu3  ;;  %v2164_v22 = vpop.f32.mrf.mxu0  ;;  %vm2352_vm0 = vweird.f32 %v2344_v11 }
 0x530   :  { %v2172_v21 = vrot.slane %v2171_v17, 2  ;;  %v2165_v27 = vadd.f32 %v2164_v22, %v2145_v45 }
 0x531   :  { %v2396_v4 = vadd.f32 %v2395_v28, %v2394_v49 }
 0x532   :  { %v2173_v29 = vadd.f32 %v2172_v21, %v2171_v17 }
 0x533   :  { %v2397_v31 = vrot.slane %v2396_v4, 2 }
 0x534   :  { %v2174_v37 = vrot.slane %v2173_v29, 1 }
 0x535   :  { %v3860_v18 = vpop.eup %3859  ;;  %v2398_v62 = vadd.f32 %v2397_v31, %v2396_v4 }
 0x536   :  { %v2347_v12 = vmul.f32 %v3860_v18, %v2344_v11  ;;  %v2175_v53 = vadd.f32 %v2174_v37, %v2173_v29  ;;  %vm2353_vm2 = vweird.f32 %v3860_v18 }
 0x537   :  { %v2399_v32 = vrot.slane %v2398_v62, 1  ;;  %v2147_v50 = vpop.f32.mrf.mxu3  ;;  %v2166_v47 = vpop.f32.mrf.mxu0  ;;  %vm2354_vm3 = vmor %vm2352_vm0, %vm2353_vm2 }
 0x538   :  { %v2348_v24 = vmul.f32 %v3860_v18, %v2347_v12  ;;  %v2176_v9 = vmul.f32 %v2175_v53, %v6525_v44  ;;  %v2167_v20 = vadd.f32 %v2166_v47, %v2147_v50  ;;  %v3967_v53 = vld [vmem:[#allocation24 + $0x1e0] sm:$0xff] }
 0x539   :  { %v2400_v40 = vadd.f32 %v2399_v32, %v2398_v62  ;;  %v816_v16 = vpack.c.bf16 %v3968_v15, %v3967_v53  ;;  %v3970_v32 = vld [vmem:[#allocation24 + $0x1f8] sm:$0xff] }
 0x53a   :  { %v2349_v10 = vmul.f32 0.5, %v2348_v24  ;;  %v5738_v39 = vsub.f32 %v2162_v6, %v2176_v9  ;;  %v5740_v36 = vsub.f32 %v2160_v42, %v2176_v9  ;;  %v2202_v54 = vadd.f32 %v2167_v20, %v2165_v27 }
 0x53b   :  { %v2408_v41 = vmul.f32 %v2400_v40, %v6525_v44  ;;  %v5754_v42 = vperm.slane %v5742_v59, 0  ;;  %v817_v50 = vpack.c.bf16 %v3970_v32, %v3969_v3  ;;  %2493 = vmatpush.bf16.msra.mxu1 %v816_v16  ;;  %v3981_v32 = vld [vmem:[#allocation24 + $0x188] sm:$0xff] }
 0x53c   :  { %v2350_v30 = vsub.f32 1.5, %v2349_v10  ;;  %v2180_v34 = vmul.f32 %v5738_v39, %v5738_v39  ;;  %v2179_v35 = vmul.f32 %v5740_v36, %v5740_v36  ;;  %v2203_v14 = vrot.slane %v2202_v54, 4 }
 0x53d   :  { %v2410_v26 = vadd.f32 1e-05, %v2408_v41  ;;  %2531 = vmatpush.bf16.msra.mxu3 %v817_v50  ;;  %v3982_v50 = vld [vmem:[#allocation24 + $0x198] sm:$0xff] }
 0x53e   :  { %v2351_v63 = vmul.f32 %v3860_v18, %v2350_v30  ;;  %v2181_v33 = vadd.f32 %v2180_v34, %v2179_v35  ;;  %v2204_v19 = vadd.f32 %v2203_v14, %v2202_v54  ;;  %v3971_v34 = vld [vmem:[#allocation24 + $0x1c0] sm:$0xff]  ;;  %v3972_v54 = vld [vmem:[#allocation24 + $0x1d0] sm:$0xff] }
 0x53f   :  { %3861 = vrsqrt.f32 %v2410_v26  ;;  %v5756_v6 = vpop.f32.mrf.mxu3  ;;  %vm2418_vm4 = vweird.f32 %v2410_v26  ;;  %v814_v35 = vpack.c.bf16 %v3972_v54, %v3971_v34  ;;  %v3985_v34 = vld [vmem:[#allocation24 + $0x168] sm:$0xff]  ;;  %v3986_v54 = vld [vmem:[#allocation24 + $0x178] sm:$0xff] }
 0x540   :  { %v2355_v46 = vsel %vm2354_vm3, %v3860_v18, %v2351_v63  ;;  %v2182_v60 = vrot.slane %v2181_v33, 4  ;;  %v2205_v23 = vrot.slane %v2204_v19, 2  ;;  %v3974_v63 = vld [vmem:[#allocation24 + $0x1d8] sm:$0xff] }
 0x541   :  { %v2366_v5 = vmul.f32 %v2355_v46, %v5715_v0  ;;  %v2368_v13 = vmul.f32 %v2355_v46, %v5717_v58  ;;  %2494 = vmatpush.bf16.msra.mxu1 %v814_v35  ;;  %v809_v35 = vpack.c.bf16 %v3986_v54, %v3985_v34 }
 0x542   :  { %v2183_v61 = vadd.f32 %v2182_v60, %v2181_v33  ;;  %v2206_v56 = vadd.f32 %v2205_v23, %v2204_v19 }
 0x543   :  { %v2441_v55 = vmul.f32 %v5754_v42, %v2366_v5  ;;  %v2443_v25 = vmul.f32 %v5754_v42, %v2368_v13 }
 0x544   :  { %v2184_v38 = vrot.slane %v2183_v61, 2  ;;  %v2207_v0 = vrot.slane %v2206_v56, 1 }
 0x545   :  { %v3862_v11 = vpop.eup %3861  ;;  %v2454_v49 = vadd.f32 %v5761_v48, %v2441_v55  ;;  %v2456_v17 = vadd.f32 %v5761_v48, %v2443_v25  ;;  %v3975_v25 = vld [vmem:[#allocation24 + $0x1a0] sm:$0xff] }
 0x546   :  { %v2413_v28 = vmul.f32 %v3862_v11, %v2410_v26  ;;  %v2185_v45 = vadd.f32 %v2184_v38, %v2183_v61  ;;  %v2208_v29 = vadd.f32 %v2207_v0, %v2206_v56  ;;  %vm2419_vm1 = vweird.f32 %v3862_v11  ;;  %v3973_v26 = vld [vmem:[#allocation24 + $0x1c8] sm:$0xff]  ;;  %v3976_v56 = vld [vmem:[#allocation24 + $0x1b0] sm:$0xff] }
 0x547   :  { %v2464_v58 = vmax.f32 %v2456_v17, 0.0  ;;  %v5767_v21 = vpop.f32.mrf.mxu3  ;;  %v2462_v4 = vmax.f32 %v2454_v49, 0.0  ;;  %vm5778_vm5 = vmor %vm2418_vm4, %vm2419_vm1  ;;  %v815_v14 = vpack.c.bf16 %v3974_v63, %v3973_v26  ;;  %v812_v38 = vpack.c.bf16 %v3976_v56, %v3975_v25  ;;  %v3978_v49 = vld [vmem:[#allocation24 + $0x1b8] sm:$0xff] }
 0x548   :  { %v2414_v22 = vmul.f32 %v3862_v11, %v2413_v28  ;;  %v2311_v31 = vadd.f32 %v5767_v21, %v5756_v6  ;;  %v2186_v52 = vrot.slane %v2185_v45, 1  ;;  %v2209_v57 = vmul.f32 %v2208_v29, %v6525_v44  ;;  %v3990_v25 = vld [vmem:[#allocation24 + $0x158] sm:$0xff] }
 0x549   :  { %v2470_v37 = vpack.c.bf16 %v2464_v58, %v2462_v4  ;;  %2532 = vmatpush.bf16.msra.mxu3 %v815_v14  ;;  %2495 = vmatpush.bf16.msra.mxu1 %v812_v38 }
 0x54a   :  { %v2415_v18 = vmul.f32 0.5, %v2414_v22  ;;  %v2312_v62 = vrot.slane %v2311_v31, 4  ;;  %v2187_v12 = vadd.f32 %v2186_v52, %v2185_v45  ;;  %v5772_v8 = vsub.f32 %v2165_v27, %v2209_v57 }
 0x54b   :  { %2482 = vmatmul.bf16.vlgmr.msra.gmra.mxu0 %v2470_v37  ;;  %2520 = vmatmul.bf16.vlgmr.msra.gmra.mxu2 %v2470_v37  ;;  %v5774_v2 = vsub.f32 %v2167_v20, %v2209_v57 }
 0x54c   :  { %v2416_v51 = vsub.f32 1.5, %v2415_v18  ;;  %v2313_v24 = vadd.f32 %v2312_v62, %v2311_v31  ;;  %v2188_v40 = vmul.f32 %v2187_v12, %v6525_v44  ;;  %v2212_v10 = vmul.f32 %v5772_v8, %v5772_v8  ;;  %v3979_v62 = vld [vmem:[#allocation24 + $0x180] sm:$0xff]  ;;  %v3980_v12 = vld [vmem:[#allocation24 + $0x190] sm:$0xff] }
 0x54d   :  { %v2213_v27 = vmul.f32 %v5774_v2, %v5774_v2  ;;  %v810_v53 = vpack.c.bf16 %v3980_v12, %v3979_v62  ;;  %v3995_v12 = vld [vmem:[#allocation24 + $0x100] sm:$0xff] }
 0x54e   :  { %v2417_v47 = vmul.f32 %v3862_v11, %v2416_v51  ;;  %v2314_v20 = vrot.slane %v2313_v24, 2  ;;  %v5789_v30 = vadd.f32 1e-05, %v2188_v40  ;;  %v811_v51 = vpack.c.bf16 %v3982_v50, %v3981_v32 }
 0x54f   :  { %v5787_v41 = vpop.f32.mrf.mxu3  ;;  %v2214_v46 = vadd.f32 %v2213_v27, %v2212_v10  ;;  %2496 = vmatpush.bf16.msra.mxu1 %v810_v53  ;;  %v3984_v10 = vld [vmem:[#allocation24 + $0x170] sm:$0xff] }
 0x550   :  { %v2421_v33 = vsel %vm5778_vm5, %v3862_v11, %v2417_v47  ;;  %v2315_v19 = vadd.f32 %v2314_v20, %v2313_v24  ;;  %3863 = vrsqrt.f32 %v5789_v30  ;;  %v3977_v11 = vld [vmem:[#allocation24 + $0x1a8] sm:$0xff]  ;;  %v3983_v47 = vld [vmem:[#allocation24 + $0x160] sm:$0xff]  ;;  %vm2196_vm7 = vweird.f32 %v5789_v30  ;;  %v3996_v53 = vld [vmem:[#allocation24 + $0x110] sm:$0xff] }
 0x551   :  { %v2432_v60 = vmul.f32 %v2421_v33, %v5726_v7  ;;  %v2434_v5 = vmul.f32 %v2421_v33, %v5728_v43  ;;  %v2215_v13 = vrot.slane %v2214_v46, 4  ;;  %v813_v17 = vpack.c.bf16 %v3978_v49, %v3977_v11 }
 0x552   :  { %v2316_v23 = vrot.slane %v2315_v19, 1  ;;  %v808_v27 = vpack.c.bf16 %v3984_v10, %v3983_v47 }
 0x553   :  { %v2447_v61 = vmul.f32 %v5754_v42, %v2434_v5  ;;  %v2445_v55 = vmul.f32 %v5754_v42, %v2432_v60  ;;  %v2216_v28 = vadd.f32 %v2215_v13, %v2214_v46  ;;  %2533 = vmatpush.bf16.msra.mxu3 %v813_v17  ;;  %v3987_v13 = vld [vmem:[#allocation24 + $0x140] sm:$0xff] }
 0x554   :  { %v2317_v7 = vadd.f32 %v2316_v23, %v2315_v19  ;;  %2497 = vmatpush.bf16.msra.mxu1 %v808_v27  ;;  %v3988_v23 = vld [vmem:[#allocation24 + $0x150] sm:$0xff] }
 0x555   :  { %v2458_v43 = vadd.f32 %v5761_v48, %v2445_v55  ;;  %v2460_v0 = vadd.f32 %v5761_v48, %v2447_v61  ;;  %v2217_v45 = vrot.slane %v2216_v28, 2  ;;  %v806_v61 = vpack.c.bf16 %v3988_v23, %v3987_v13  ;;  %v3989_v55 = vld [vmem:[#allocation24 + $0x148] sm:$0xff] }
 0x556   :  { %v2319_v58 = vmul.f32 %v2317_v7, %v6525_v44  ;;  %v3864_v4 = vpop.eup %3863  ;;  %v807_v56 = vpack.c.bf16 %v3990_v25, %v3989_v55 }
 0x557   :  { %v5801_v22 = vpop.f32.mrf.mxu3  ;;  %v2466_v42 = vmax.f32 %v2458_v43, 0.0  ;;  %v2468_v29 = vmax.f32 %v2460_v0, 0.0  ;;  %v2218_v31 = vadd.f32 %v2217_v45, %v2216_v28  ;;  %v2191_v57 = vmul.f32 %v3864_v4, %v5789_v30  ;;  %2534 = vmatpush.bf16.msra.mxu3 %v811_v51  ;;  %v3991_v30 = vld [vmem:[#allocation24 + $0x120] sm:$0xff]  ;;  %v3992_v43 = vld [vmem:[#allocation24 + $0x130] sm:$0xff]  ;;  %v3993_v45 = vld [vmem:[#allocation24 + $0x128] sm:$0xff] }
 0x558   :  { %v5804_v52 = vsub.f32 %v5756_v6, %v2319_v58  ;;  %v5807_v37 = vsub.f32 %v5767_v21, %v2319_v58  ;;  %v2377_v48 = vadd.f32 %v5801_v22, %v5787_v41  ;;  %vm2197_vm6 = vweird.f32 %v3864_v4  ;;  %2498 = vmatpush.bf16.msra.mxu1 %v806_v61  ;;  %v3994_v58 = vld [vmem:[#allocation24 + $0x138] sm:$0xff] }
 0x559   :  { %v2472_v18 = vpack.c.bf16 %v2468_v29, %v2466_v42  ;;  %v2219_v15 = vrot.slane %v2218_v31, 1  ;;  %v2192_v21 = vmul.f32 %v3864_v4, %v2191_v57  ;;  %vm2198_vm8 = vmor %vm2196_vm7, %vm2197_vm6  ;;  %v804_v0 = vpack.c.bf16 %v3992_v43, %v3991_v30 }
 0x55a   :  { %v2325_v16 = vmul.f32 %v5804_v52, %v5804_v52  ;;  %v2327_v6 = vmul.f32 %v5807_v37, %v5807_v37  ;;  %v2378_v3 = vrot.slane %v2377_v48, 4  ;;  %v805_v42 = vpack.c.bf16 %v3994_v58, %v3993_v45 }
 0x55b   :  { %2487 = vmatmul.bf16.gmra.mxu0 %v2472_v18  ;;  %2525 = vmatmul.bf16.gmra.mxu2 %v2472_v18  ;;  %v2220_v24 = vadd.f32 %v2219_v15, %v2218_v31  ;;  %v2193_v20 = vmul.f32 0.5, %v2192_v21  ;;  %v802_v15 = vpack.c.bf16 %v3996_v53, %v3995_v12 }
 0x55c   :  { %v2335_v9 = vadd.f32 %v2327_v6, %v2325_v16  ;;  %v2379_v40 = vadd.f32 %v2378_v3, %v2377_v48  ;;  %2535 = vmatpush.bf16.msra.mxu3 %v809_v35  ;;  %2499 = vmatpush.bf16.msra.mxu1 %v804_v0  ;;  %v3997_v16 = vld [vmem:[#allocation24 + $0x108] sm:$0xff]  ;;  %v3998_v6 = vld [vmem:[#allocation24 + $0x118] sm:$0xff] }
 0x55d   :  { %v2221_v14 = vmul.f32 %v2220_v24, %v6525_v44  ;;  %v2194_v33 = vsub.f32 1.5, %v2193_v20  ;;  %v803_v3 = vpack.c.bf16 %v3998_v6, %v3997_v16 }
 0x55e   :  { %v2336_v26 = vrot.slane %v2335_v9, 4  ;;  %v2380_v63 = vrot.slane %v2379_v40, 2 }
 0x55f   :  { %v5817_v60 = vadd.f32 1e-05, %v2221_v14  ;;  %v2195_v5 = vmul.f32 %v3864_v4, %v2194_v33 }
 0x560   :  { %v2337_v46 = vadd.f32 %v2336_v26, %v2335_v9  ;;  %v2381_v19 = vadd.f32 %v2380_v63, %v2379_v40  ;;  %2536 = vmatpush.bf16.msra.mxu3 %v807_v56  ;;  %2500 = vmatpush.bf16.msra.mxu1 %v802_v15 }
 0x561   :  { %3865 = vrsqrt.f32 %v5817_v60  ;;  %v2199_v49 = vsel %vm2198_vm8, %v3864_v4, %v2195_v5  ;;  %vm2229_vm10 = vweird.f32 %v5817_v60 }
 0x562   :  { %v2338_v38 = vrot.slane %v2337_v46, 2  ;;  %v2382_v11 = vrot.slane %v2381_v19, 1  ;;  %v5823_v7 = vmul.f32 %v2199_v49, %v5740_v36  ;;  %v5841_v32 = vmul.f32 %v2199_v49, %v5738_v39 }
 0x564   :  { %v2339_v17 = vadd.f32 %v2338_v38, %v2337_v46  ;;  %v2383_v28 = vadd.f32 %v2382_v11, %v2381_v19  ;;  %v2824_v48 = vmul.f32 %v5823_v7, %v5823_v7  ;;  %2537 = vmatpush.bf16.msra.mxu3 %v805_v42  ;;  %v2825_v47 = vmul.f32 %v5841_v32, %v5841_v32 }
 0x565   :  { %v2451_v38 = vperm.slane %v5749_v1, 1 }
 0x566   :  { %v2340_v29 = vrot.slane %v2339_v17, 1  ;;  %v2385_v31 = vmul.f32 %v2383_v28, %v6525_v44  ;;  %2826 = vadd.xlane.f32.xlu1 %v2824_v48 }
 0x567   :  { %v3866_v4 = vpop.eup %3865 }
 0x568   :  { %v2341_v18 = vadd.f32 %v2340_v29, %v2339_v17  ;;  %v5829_v57 = vsub.f32 %v5787_v41, %v2385_v31  ;;  %v5832_v36 = vsub.f32 %v5801_v22, %v2385_v31  ;;  %v2224_v62 = vmul.f32 %v3866_v4, %v5817_v60  ;;  %2538 = vmatpush.bf16.msra.mxu3 %v803_v3 }
 0x569   :  { %vm2230_vm9 = vweird.f32 %v3866_v4 }
 0x56a   :  { %v2343_v21 = vmul.f32 %v2341_v18, %v6525_v44  ;;  %v2391_v41 = vmul.f32 %v5829_v57, %v5829_v57  ;;  %v2393_v22 = vmul.f32 %v5832_v36, %v5832_v36  ;;  %v2225_v50 = vmul.f32 %v3866_v4, %v2224_v62  ;;  %vm2231_vm11 = vmor %vm2229_vm10, %vm2230_vm9 }
 0x56c   :  { %v2345_v51 = vadd.f32 1e-05, %v2343_v21  ;;  %v2401_v24 = vadd.f32 %v2393_v22, %v2391_v41  ;;  %v2226_v9 = vmul.f32 0.5, %v2225_v50 }
 0x56e   :  { %3867 = vrsqrt.f32 %v2345_v51  ;;  %v2402_v40 = vrot.slane %v2401_v24, 4  ;;  %v2227_v10 = vsub.f32 1.5, %v2226_v9  ;;  %2828 = vadd.xlane.f32.xlu1 %v2825_v47  ;;  %vm2362_vm13 = vweird.f32 %v2345_v51  ;;  %v3999_v47 = vld [vmem:[%s6524_s5 + $0xf0] sm:$0xff] }
 0x570   :  { %v2403_v27 = vadd.f32 %v2402_v40, %v2401_v24  ;;  %v2228_v20 = vmul.f32 %v3866_v4, %v2227_v10  ;;  %v988_v10 = vmul.f32 0.001, %v3999_v47 }
 0x572   :  { %v2404_v39 = vrot.slane %v2403_v27, 2  ;;  %v2232_v34 = vsel %vm2231_vm11, %v3866_v4, %v2228_v20 }
 0x573   :  { %v5847_v26 = vmul.f32 %v2232_v34, %v5774_v2  ;;  %v5850_v63 = vmul.f32 %v2232_v34, %v5772_v8  ;;  %v2438_v8 = vperm.slane %v5742_v59, 1 }
 0x574   :  { %v3868_v54 = vpop.eup %3867  ;;  %v2405_v35 = vadd.f32 %v2404_v39, %v2403_v27 }
 0x575   :  { %v2357_v14 = vmul.f32 %v3868_v54, %v2345_v51  ;;  %v3100_v46 = vmul.f32 %v5847_v26, %v5847_v26  ;;  %vm2363_vm12 = vweird.f32 %v3868_v54 }
 0x576   :  { %v2406_v33 = vrot.slane %v2405_v35, 1  ;;  %vm2364_vm14 = vmor %vm2362_vm13, %vm2363_vm12 }
 0x577   :  { %v2358_v19 = vmul.f32 %v3868_v54, %v2357_v14  ;;  %3103 = vadd.xlane.f32.xlu1 %v3100_v46  ;;  %v4001_v14 = vld [vmem:[#allocation29 + $0x78] sm:$0xff]  ;;  %v4002_v46 = vld [vmem:[%s6524_s5 + $0xf8] sm:$0xff] }
 0x578   :  { %v2407_v5 = vadd.f32 %v2406_v33, %v2405_v35  ;;  %v4000_v35 = vld [vmem:[#allocation29 + $0x70] sm:$0xff] }
 0x579   :  { %v2359_v60 = vmul.f32 0.5, %v2358_v19  ;;  %v1061_v33 = vpack.c.bf16 %v4001_v14, %v4000_v35  ;;  %v989_v19 = vmul.f32 0.001, %v4002_v46  ;;  %v921_v46 = vld [vmem:[#allocation14 + $0xd8] sm:$0xff] }
 0x57a   :  { %v2409_v13 = vmul.f32 %v2407_v5, %v6525_v44 }
 0x57b   :  { %v2360_v23 = vsub.f32 1.5, %v2359_v60  ;;  %v924_v60 = vld [vmem:[#allocation14 + $0xf0] sm:$0xff]  ;;  %2720 = vmatpush.bf16.msrb.mxu0 %v1061_v33 }
 0x57c   :  { %v2411_v61 = vadd.f32 1e-05, %v2409_v13  ;;  %v925_v13 = vld [vmem:[#allocation14 + $0xf8] sm:$0xff]  ;;  %v920_v33 = vld [vmem:[#allocation14 + $0xd0] sm:$0xff] }
 0x57d   :  { %v2361_v55 = vmul.f32 %v3868_v54, %v2360_v23 }
 0x57e   :  { %3869 = vrsqrt.f32 %v2411_v61  ;;  %vm2428_vm0 = vweird.f32 %v2411_v61 }
 0x57f   :  { %v2365_v2 = vsel %vm2364_vm14, %v3868_v54, %v2361_v55  ;;  %v956_v55 = vmul.f32 0.999, %v924_v60 }
 0x580   :  { %v2367_v25 = vmul.f32 %v2365_v2, %v5804_v52  ;;  %v2369_v56 = vmul.f32 %v2365_v2, %v5807_v37 }
 0x582   :  { %v2442_v11 = vmul.f32 %v2438_v8, %v2367_v25  ;;  %v2444_v49 = vmul.f32 %v2438_v8, %v2369_v56  ;;  %v4004_v25 = vld [vmem:[%s6524_s5 + $0xe8] sm:$0xff] }
 0x583   :  { %v987_v56 = vmul.f32 0.001, %v4004_v25 }
 0x584   :  { %v3870_v17 = vpop.eup %3869  ;;  %v2455_v28 = vadd.f32 %v2451_v38, %v2442_v11  ;;  %v2457_v30 = vadd.f32 %v2451_v38, %v2444_v49 }
 0x585   :  { %v2423_v43 = vmul.f32 %v3870_v17, %v2411_v61  ;;  %vm2429_vm15 = vweird.f32 %v3870_v17 }
 0x586   :  { %v2465_v0 = vmax.f32 %v2457_v30, 0.0  ;;  %v2463_v45 = vmax.f32 %v2455_v28, 0.0  ;;  %vm2430_vm2 = vmor %vm2428_vm0, %vm2429_vm15  ;;  %v4006_v28 = vld [vmem:[#allocation29 + $0x68] sm:$0xff] }
 0x587   :  { %v2424_v58 = vmul.f32 %v3870_v17, %v2423_v43  ;;  %v1020_v43 = vadd.f32 %v988_v10, %v956_v55 }
 0x588   :  { %v2471_v42 = vpack.c.bf16 %v2465_v0, %v2463_v45  ;;  %v4007_v0 = vld [vmem:[%s6524_s5 + $0xd0] sm:$0xff] }
 0x589   :  { %v2425_v29 = vmul.f32 0.5, %v2424_v58  ;;  %v984_v45 = vmul.f32 0.001, %v4007_v0  ;;  %v4008_v58 = vld [vmem:[%s6524_s5 + $0xd8] sm:$0xff]  ;;  %1052 = vst [vmem:[#allocation29 + $0xf0] sm:$0xff] %v1020_v43  ;;  %v918_v0 = vld [vmem:[#allocation14 + $0xc0] sm:$0xff] }
 0x58a   :  { %2501 = vmatmul.bf16.vlgmr.msra.gmra.mxu1 %v2471_v42  ;;  %2539 = vmatmul.bf16.vlgmr.msra.gmra.mxu3 %v2471_v42  ;;  %v985_v42 = vmul.f32 0.001, %v4008_v58 }
 0x58b   :  { %v2426_v31 = vsub.f32 1.5, %v2425_v29 }
 0x58d   :  { %v2427_v52 = vmul.f32 %v3870_v17, %v2426_v31 }
 0x58f   :  { %v2431_v37 = vsel %vm2430_vm2, %v3870_v17, %v2427_v52  ;;  %v4005_v17 = vld [vmem:[#allocation29 + $0x60] sm:$0xff]  ;;  %v922_v52 = vld [vmem:[#allocation14 + $0xe0] sm:$0xff] }
 0x590   :  { %v2433_v48 = vmul.f32 %v2431_v37, %v5829_v57  ;;  %v2435_v4 = vmul.f32 %v2431_v37, %v5832_v36  ;;  %v1060_v30 = vpack.c.bf16 %v4006_v28, %v4005_v17  ;;  %v923_v37 = vld [vmem:[#allocation14 + $0xe8] sm:$0xff]  ;;  %v4018_v17 = vld [vmem:[#allocation29 + $0x48] sm:$0xff] }
 0x592   :  { %v2448_v18 = vmul.f32 %v2438_v8, %v2435_v4  ;;  %v2446_v62 = vmul.f32 %v2438_v8, %v2433_v48  ;;  %v4003_v8 = vld [vmem:[%s6524_s5 + $0xe0] sm:$0xff]  ;;  %2721 = vmatpush.bf16.msrb.mxu0 %v1060_v30 }
 0x593   :  { %v986_v2 = vmul.f32 0.001, %v4003_v8 }
 0x594   :  { %v2459_v12 = vadd.f32 %v2451_v38, %v2446_v62  ;;  %v2461_v53 = vadd.f32 %v2451_v38, %v2448_v18  ;;  %v957_v38 = vmul.f32 0.999, %v925_v13  ;;  %v954_v18 = vmul.f32 0.999, %v922_v52 }
 0x595   :  { %v955_v62 = vmul.f32 0.999, %v923_v37 }
 0x596   :  { %v2467_v15 = vmax.f32 %v2459_v12, 0.0  ;;  %v2469_v16 = vmax.f32 %v2461_v53, 0.0  ;;  %v1021_v31 = vadd.f32 %v989_v19, %v957_v38  ;;  %v4009_v12 = vld [vmem:[%s6524_s5 + $0xc0] sm:$0xff]  ;;  %v1018_v35 = vadd.f32 %v986_v2, %v954_v18  ;;  %v4016_v38 = vld [vmem:[%s6524_s5 + $0xa8] sm:$0xff] }
 0x597   :  { %v5882_v53 = vmul.f32 0.001, %v4009_v12  ;;  %v1019_v14 = vadd.f32 %v987_v56, %v955_v62  ;;  %v950_v18 = vmul.f32 0.999, %v918_v0 }
 0x598   :  { %v2473_v6 = vpack.c.bf16 %v2469_v16, %v2467_v15  ;;  %v4010_v15 = vld [vmem:[%s6524_s5 + $0xc8] sm:$0xff]  ;;  %1053 = vst [vmem:[#allocation29 + $0xf8] sm:$0xff] %v1021_v31 }
 0x599   :  { %v5885_v16 = vmul.f32 0.001, %v4010_v15  ;;  %1050 = vst [vmem:[#allocation29 + $0xe0] sm:$0xff] %v1018_v35 }
 0x59a   :  { %2506 = vmatmul.bf16.gmra.mxu1 %v2473_v6  ;;  %2544 = vmatmul.bf16.gmra.mxu3 %v2473_v6  ;;  %1051 = vst [vmem:[#allocation29 + $0xe8] sm:$0xff] %v1019_v14 }
 0x5c8   :  { %v2483_v3 = vpop.f32.mrf.mxu0 }
 0x5ce   :  { %v2521_v21 = vpop.f32.mrf.mxu2 }
 0x5d0   :  { %v2485_v22 = vpop.f32.mrf.mxu0 }
 0x5d6   :  { %v2523_v24 = vpop.f32.mrf.mxu2 }
 0x5d8   :  { %v2488_v27 = vpop.f32.mrf.mxu0 }
 0x5de   :  { %v5879_v29 = vpop.f32.mrf.mxu2 }
 0x5e0   :  { %v2490_v10 = vpop.f32.mrf.mxu0 }
 0x5e6   :  { %v2528_v37 = vpop.f32.mrf.mxu2 }
 0x607   :  { %v2502_v41 = vpop.f32.mrf.mxu1 }
 0x608   :  { %v5861_v57 = vadd.f32 %v2502_v41, %v2483_v3  ;;  %v1069_v3 = vpack.c.bf16 %v1021_v31, %v1020_v43 }
 0x60a   :  { %2739 = vmatpush.bf16.msrb.mxu1 %v1069_v3 }
 0x60d   :  { %v2540_v50 = vpop.f32.mrf.mxu3 }
 0x60e   :  { %v5868_v39 = vadd.f32 %v2540_v50, %v2521_v21  ;;  %v4011_v21 = vld [vmem:[%s6524_s5 + $0xb0] sm:$0xff] }
 0x60f   :  { %v2504_v51 = vpop.f32.mrf.mxu1  ;;  %v5888_v41 = vmul.f32 0.001, %v4011_v21  ;;  %v4019_v21 = vld [vmem:[#allocation29 + $0x30] sm:$0xff] }
 0x610   :  { %v5863_v36 = vadd.f32 %v2504_v51, %v2485_v22  ;;  %v4012_v51 = vld [vmem:[#allocation29 + $0x50] sm:$0xff] }
 0x612   :  { %v2550_v9 = vadd.f32 %v5863_v36, %v5861_v57 }
 0x614   :  { %v2551_v40 = vrot.slane %v2550_v9, 4 }
 0x615   :  { %v2542_v20 = vpop.f32.mrf.mxu3 }
 0x616   :  { %v2552_v34 = vadd.f32 %v2551_v40, %v2550_v9  ;;  %v5870_v54 = vadd.f32 %v2542_v20, %v2523_v24  ;;  %v4013_v24 = vld [vmem:[#allocation29 + $0x58] sm:$0xff]  ;;  %v4014_v40 = vld [vmem:[%s6524_s5 + $0xb8] sm:$0xff] }
 0x617   :  { %v2507_v5 = vpop.f32.mrf.mxu1  ;;  %v1059_v9 = vpack.c.bf16 %v4013_v24, %v4012_v51  ;;  %v5891_v47 = vmul.f32 0.001, %v4014_v40  ;;  %v1014_v51 = vadd.f32 %v5882_v53, %v950_v18  ;;  %v917_v40 = vld [vmem:[#allocation14 + $0xb8] sm:$0xff] }
 0x618   :  { %v2553_v23 = vrot.slane %v2552_v34, 2  ;;  %v2557_v61 = vadd.f32 %v5870_v54, %v5868_v39  ;;  %v5893_v20 = vadd.f32 %v2507_v5, %v2488_v27  ;;  %v1068_v27 = vpack.c.bf16 %v1019_v14, %v1018_v35 }
 0x619   :  { %2722 = vmatpush.bf16.msrb.mxu0 %v1059_v9  ;;  %v953_v5 = vmul.f32 0.999, %v921_v46  ;;  %v916_v9 = vld [vmem:[#allocation14 + $0xb0] sm:$0xff]  ;;  %1046 = vst [vmem:[#allocation29 + $0xc0] sm:$0xff] %v1014_v51  ;;  %v949_v53 = vmul.f32 0.999, %v917_v40 }
 0x61a   :  { %v2554_v11 = vadd.f32 %v2553_v23, %v2552_v34  ;;  %v2558_v49 = vrot.slane %v2557_v61, 4  ;;  %v952_v23 = vmul.f32 0.999, %v920_v33  ;;  %2740 = vmatpush.bf16.msrb.mxu1 %v1068_v27  ;;  %v948_v33 = vmul.f32 0.999, %v916_v9  ;;  %v4023_v27 = vld [vmem:[#allocation29 + $0x28] sm:$0xff] }
 0x61b   :  { %v1017_v43 = vadd.f32 %v985_v42, %v953_v5 }
 0x61c   :  { %v2555_v48 = vrot.slane %v2554_v11, 1  ;;  %v2559_v4 = vadd.f32 %v2558_v49, %v2557_v61  ;;  %v4015_v61 = vld [vmem:[%s6524_s5 + $0xa0] sm:$0xff]  ;;  %v4017_v49 = vld [vmem:[#allocation29 + $0x40] sm:$0xff]  ;;  %v1016_v30 = vadd.f32 %v984_v45, %v952_v23 }
 0x61d   :  { %v2545_v6 = vpop.f32.mrf.mxu3  ;;  %v5899_v55 = vmul.f32 0.001, %v4015_v61  ;;  %v1058_v28 = vpack.c.bf16 %v4018_v17, %v4017_v49  ;;  %1049 = vst [vmem:[#allocation29 + $0xd8] sm:$0xff] %v1017_v43  ;;  %v4022_v61 = vld [vmem:[#allocation29 + $0x20] sm:$0xff] }
 0x61e   :  { %v2556_v22 = vadd.f32 %v2555_v48, %v2554_v11  ;;  %v2560_v50 = vrot.slane %v2559_v4, 2  ;;  %v5910_v11 = vmul.f32 0.001, %v4016_v38  ;;  %1048 = vst [vmem:[#allocation29 + $0xd0] sm:$0xff] %v1016_v30  ;;  %v5920_v3 = vadd.f32 %v2545_v6, %v5879_v29  ;;  %v915_v38 = vld [vmem:[#allocation14 + $0xa8] sm:$0xff]  ;;  %v4024_v49 = vld [vmem:[%s6524_s5 + $0x98] sm:$0xff] }
 0x61f   :  { %v2509_v34 = vpop.f32.mrf.mxu1  ;;  %2723 = vmatpush.bf16.msrb.mxu0 %v1058_v28  ;;  %v1056_v5 = vpack.c.bf16 %v4023_v27, %v4022_v61  ;;  %v977_v17 = vmul.f32 0.001, %v4024_v49  ;;  %v911_v61 = vld [vmem:[#allocation14 + $0x88] sm:$0xff] }
 0x620   :  { %v2564_v19 = vmul.f32 %v2556_v22, %v6525_v44  ;;  %v2561_v60 = vadd.f32 %v2560_v50, %v2559_v4  ;;  %v5896_v13 = vadd.f32 %v2509_v34, %v2490_v10  ;;  %v1067_v4 = vpack.c.bf16 %v1017_v43, %v1016_v30  ;;  %v4020_v22 = vld [vmem:[#allocation29 + $0x38] sm:$0xff] }
 0x621   :  { %v1057_v50 = vpack.c.bf16 %v4020_v22, %v4019_v21  ;;  %v1013_v43 = vadd.f32 %v5891_v47, %v949_v53  ;;  %v4027_v21 = vld [vmem:[%s6524_s5 + $0x80] sm:$0xff] }
 0x622   :  { %v5902_v8 = vsub.f32 %v5861_v57, %v2564_v19  ;;  %v5905_v2 = vsub.f32 %v5863_v36, %v2564_v19  ;;  %v2562_v25 = vrot.slane %v2561_v60, 1  ;;  %v2616_v56 = vadd.f32 %v5896_v13, %v5893_v20  ;;  %v919_v57 = vld [vmem:[#allocation14 + $0xc8] sm:$0xff]  ;;  %2741 = vmatpush.bf16.msrb.mxu1 %v1067_v4  ;;  %v4030_v53 = vld [vmem:[#allocation29 + $0x8] sm:$0xff] }
 0x623   :  { %v951_v62 = vmul.f32 0.999, %v919_v57  ;;  %2724 = vmatpush.bf16.msrb.mxu0 %v1057_v50  ;;  %1045 = vst [vmem:[#allocation29 + $0xb8] sm:$0xff] %v1013_v43  ;;  %v974_v22 = vmul.f32 0.001, %v4027_v21 }
 0x624   :  { %v2570_v36 = vmul.f32 %v5902_v8, %v5902_v8  ;;  %v2572_v58 = vmul.f32 %v5905_v2, %v5905_v2  ;;  %v2563_v31 = vadd.f32 %v2562_v25, %v2561_v60  ;;  %v2617_v52 = vrot.slane %v2616_v56, 4 }
 0x625   :  { %v2547_v48 = vpop.f32.mrf.mxu3  ;;  %v1015_v24 = vadd.f32 %v5885_v16, %v951_v62  ;;  %v4021_v16 = vld [vmem:[%s6524_s5 + $0x90] sm:$0xff]  ;;  %v1012_v25 = vadd.f32 %v5888_v41, %v948_v33  ;;  %v4025_v41 = vld [vmem:[#allocation29 + $0x10] sm:$0xff] }
 0x626   :  { %v2574_v12 = vadd.f32 %v2572_v58, %v2570_v36  ;;  %v2565_v45 = vmul.f32 %v2563_v31, %v6525_v44  ;;  %v2618_v42 = vadd.f32 %v2617_v52, %v2616_v56  ;;  %v5917_v15 = vadd.f32 %v2547_v48, %v2528_v37  ;;  %v914_v56 = vld [vmem:[#allocation14 + $0xa0] sm:$0xff] }
 0x627   :  { %v1066_v14 = vpack.c.bf16 %v1015_v24, %v1014_v51  ;;  %v976_v46 = vmul.f32 0.001, %v4021_v16  ;;  %1047 = vst [vmem:[#allocation29 + $0xc8] sm:$0xff] %v1015_v24  ;;  %2725 = vmatpush.bf16.msrb.mxu0 %v1056_v5  ;;  %v946_v36 = vmul.f32 0.999, %v914_v56  ;;  %v1065_v37 = vpack.c.bf16 %v1013_v43, %v1012_v25  ;;  %v4026_v48 = vld [vmem:[#allocation29 + $0x18] sm:$0xff] }
 0x628   :  { %v2575_v10 = vrot.slane %v2574_v12, 4  ;;  %v5925_v34 = vsub.f32 %v5868_v39, %v2565_v45  ;;  %v5928_v35 = vsub.f32 %v5870_v54, %v2565_v45  ;;  %v2619_v29 = vrot.slane %v2618_v42, 2  ;;  %1044 = vst [vmem:[#allocation29 + $0xb0] sm:$0xff] %v1012_v25  ;;  %v912_v45 = vld [vmem:[#allocation14 + $0x90] sm:$0xff] }
 0x629   :  { %v2623_v6 = vadd.f32 %v5917_v15, %v5920_v3  ;;  %2742 = vmatpush.bf16.msrb.mxu1 %v1066_v14  ;;  %v947_v58 = vmul.f32 0.999, %v915_v38  ;;  %v1055_v4 = vpack.c.bf16 %v4026_v48, %v4025_v41  ;;  %v944_v24 = vmul.f32 0.999, %v912_v45  ;;  %v857_v45 = vld [vmem:[#allocation13] sm:$0x3] }
 0x62a   :  { %v2576_v19 = vadd.f32 %v2575_v10, %v2574_v12  ;;  %v2571_v39 = vmul.f32 %v5925_v34, %v5925_v34  ;;  %v2573_v54 = vmul.f32 %v5928_v35, %v5928_v35  ;;  %v2620_v60 = vadd.f32 %v2619_v29, %v2618_v42  ;;  %v913_v42 = vld [vmem:[#allocation14 + $0x98] sm:$0xff] }
 0x62b   :  { %v2624_v23 = vrot.slane %v2623_v6, 4  ;;  %v1010_v12 = vadd.f32 %v5899_v55, %v946_v36  ;;  %v1011_v47 = vadd.f32 %v5910_v11, %v947_v58  ;;  %2726 = vmatpush.bf16.msrb.mxu0 %v1055_v4  ;;  %v945_v29 = vmul.f32 0.999, %v913_v42  ;;  %v4029_v11 = vld [vmem:[#allocation29] sm:$0xff] }
 0x62c   :  { %v2577_v28 = vrot.slane %v2576_v19, 2  ;;  %v2581_v30 = vadd.f32 %v2573_v54, %v2571_v39  ;;  %v2621_v0 = vrot.slane %v2620_v60, 1  ;;  %v1054_v16 = vpack.c.bf16 %v4030_v53, %v4029_v11 }
 0x62d   :  { %v2625_v57 = vadd.f32 %v2624_v23, %v2623_v6  ;;  %2743 = vmatpush.bf16.msrb.mxu1 %v1065_v37  ;;  %1042 = vst [vmem:[#allocation29 + $0xa0] sm:$0xff] %v1010_v12  ;;  %v1064_v10 = vpack.c.bf16 %v1011_v47, %v1010_v12  ;;  %v4028_v6 = vld [vmem:[%s6524_s5 + $0x88] sm:$0xff]  ;;  %v1009_v25 = vadd.f32 %v977_v17, %v945_v29  ;;  %v4032_v29 = vld [vmem:[%s6527_s14] sm:$0x3] }
 0x62e   :  { %v2578_v31 = vadd.f32 %v2577_v28, %v2576_v19  ;;  %v2582_v52 = vrot.slane %v2581_v30, 4  ;;  %v2622_v18 = vadd.f32 %v2621_v0, %v2620_v60  ;;  %v975_v55 = vmul.f32 0.001, %v4028_v6  ;;  %1043 = vst [vmem:[#allocation29 + $0xa8] sm:$0xff] %v1011_v47  ;;  %v910_v23 = vld [vmem:[#allocation14 + $0x80] sm:$0xff] }
 0x62f   :  { %v2626_v62 = vrot.slane %v2625_v57, 2  ;;  %v1008_v60 = vadd.f32 %v976_v46, %v944_v24  ;;  %v942_v56 = vmul.f32 0.999, %v910_v23  ;;  %2727 = vmatpush.bf16.msrb.mxu0 %v1054_v16  ;;  %1041 = vst [vmem:[#allocation29 + $0x98] sm:$0xff] %v1009_v25  ;;  %v859_v6 = vmul.f32 0.001, %v4032_v29 }
 0x630   :  { %v2579_v50 = vrot.slane %v2578_v31, 1  ;;  %v2583_v51 = vadd.f32 %v2582_v52, %v2581_v30  ;;  %v2630_v9 = vmul.f32 %v2622_v18, %v6525_v44 }
 0x631   :  { %v2627_v40 = vadd.f32 %v2626_v62, %v2625_v57  ;;  %2744 = vmatpush.bf16.msrb.mxu1 %v1064_v10  ;;  %1040 = vst [vmem:[#allocation29 + $0x90] sm:$0xff] %v1008_v60  ;;  %v1063_v30 = vpack.c.bf16 %v1009_v25, %v1008_v60  ;;  %v1006_v43 = vadd.f32 %v974_v22, %v942_v56 }
 0x632   :  { %v2580_v14 = vadd.f32 %v2579_v50, %v2578_v31  ;;  %v2584_v33 = vrot.slane %v2583_v51, 2  ;;  %v5946_v19 = vsub.f32 %v5893_v20, %v2630_v9  ;;  %v5949_v39 = vsub.f32 %v5896_v13, %v2630_v9  ;;  %v4031_v50 = vld [vmem:[%s6526_s3] sm:$0x3] }
 0x633   :  { %v2628_v54 = vrot.slane %v2627_v40, 1  ;;  %v943_v13 = vmul.f32 0.999, %v911_v61  ;;  %1038 = vst [vmem:[#allocation29 + $0x80] sm:$0xff] %v1006_v43 }
 0x634   :  { %v2588_v27 = vmul.f32 %v2580_v14, %v6525_v44  ;;  %v2585_v5 = vadd.f32 %v2584_v33, %v2583_v51  ;;  %v2636_v38 = vmul.f32 %v5946_v19, %v5946_v19  ;;  %v2638_v20 = vmul.f32 %v5949_v39, %v5949_v39 }
 0x635   :  { %v2629_v49 = vadd.f32 %v2628_v54, %v2627_v40  ;;  %v1007_v17 = vadd.f32 %v975_v55, %v943_v13  ;;  %2745 = vmatpush.bf16.msrb.mxu1 %v1063_v30  ;;  %v853_v51 = vmul.f32 0.001, %v4031_v50  ;;  %v858_v55 = vmul.f32 0.999, %v857_v45 }
 0x636   :  { %v2590_v28 = vadd.f32 1e-05, %v2588_v27  ;;  %v2586_v46 = vrot.slane %v2585_v5, 1  ;;  %v2640_v0 = vadd.f32 %v2638_v20, %v2636_v38 }
 0x637   :  { %v2631_v57 = vmul.f32 %v2629_v49, %v6525_v44  ;;  %1039 = vst [vmem:[#allocation29 + $0x88] sm:$0xff] %v1007_v17  ;;  %v1062_v37 = vpack.c.bf16 %v1007_v17, %v1006_v43  ;;  %v5973_v61 = vadd.f32 %v859_v6, %v858_v55 }
 0x638   :  { %3871 = vrsqrt.f32 %v2590_v28  ;;  %v2587_v36 = vadd.f32 %v2586_v46, %v2585_v5  ;;  %v2641_v58 = vrot.slane %v2640_v0, 4  ;;  %vm2598_vm4 = vweird.f32 %v2590_v28 }
 0x639   :  { %v5958_v31 = vsub.f32 %v5920_v3, %v2631_v57  ;;  %v5961_v52 = vsub.f32 %v5917_v15, %v2631_v57  ;;  %2746 = vmatpush.bf16.msrb.mxu1 %v1062_v37  ;;  %v851_v3 = vld [vmem:[#allocation11] sm:$0x3]  ;;  %v2696_v43 = vperm.slane %v5973_v61, 0 }
 0x63a   :  { %v2589_v41 = vmul.f32 %v2587_v36, %v6525_v44  ;;  %v2642_v48 = vadd.f32 %v2641_v58, %v2640_v0  ;;  %v852_v24 = vmul.f32 0.999, %v851_v3 }
 0x63b   :  { %v2637_v4 = vmul.f32 %v5958_v31, %v5958_v31  ;;  %v2639_v18 = vmul.f32 %v5961_v52, %v5961_v52 }
 0x63c   :  { %v2591_v62 = vadd.f32 1e-05, %v2589_v41  ;;  %v2643_v12 = vrot.slane %v2642_v48, 2  ;;  %v5970_v16 = vadd.f32 %v853_v51, %v852_v24 }
 0x63d   :  { %v2647_v47 = vadd.f32 %v2639_v18, %v2637_v4 }
 0x63e   :  { %v3872_v15 = vpop.eup %3871  ;;  %3873 = vrsqrt.f32 %v2591_v62  ;;  %v2644_v21 = vadd.f32 %v2643_v12, %v2642_v48  ;;  %v2683_v38 = vperm.slane %v5970_v16, 0  ;;  %vm2608_vm6 = vweird.f32 %v2591_v62 }
 0x63f   :  { %v2593_v42 = vmul.f32 %v3872_v15, %v2590_v28  ;;  %v2648_v22 = vrot.slane %v2647_v47, 4  ;;  %vm2599_vm3 = vweird.f32 %v3872_v15  ;;  %v2684_v41 = vperm.slane %v5970_v16, 1 }
 0x640   :  { %v2645_v40 = vrot.slane %v2644_v21, 1  ;;  %vm2600_vm1 = vmor %vm2598_vm4, %vm2599_vm3 }
 0x641   :  { %v2594_v9 = vmul.f32 %v3872_v15, %v2593_v42  ;;  %v2649_v10 = vadd.f32 %v2648_v22, %v2647_v47 }
 0x642   :  { %v2646_v33 = vadd.f32 %v2645_v40, %v2644_v21 }
 0x643   :  { %v2595_v14 = vmul.f32 0.5, %v2594_v9  ;;  %v2650_v11 = vrot.slane %v2649_v10, 2 }
 0x644   :  { %v3874_v53 = vpop.eup %3873  ;;  %v2654_v23 = vmul.f32 %v2646_v33, %v6525_v44 }
 0x645   :  { %v2596_v54 = vsub.f32 1.5, %v2595_v14  ;;  %v2603_v60 = vmul.f32 %v3874_v53, %v2591_v62  ;;  %v2651_v27 = vadd.f32 %v2650_v11, %v2649_v10  ;;  %vm2609_vm5 = vweird.f32 %v3874_v53 }
 0x646   :  { %v2656_v56 = vadd.f32 1e-05, %v2654_v23  ;;  %vm2610_vm7 = vmor %vm2608_vm6, %vm2609_vm5 }
 0x647   :  { %v2597_v5 = vmul.f32 %v3872_v15, %v2596_v54  ;;  %v2604_v25 = vmul.f32 %v3874_v53, %v2603_v60  ;;  %v2652_v20 = vrot.slane %v2651_v27, 1 }
 0x648   :  { %3875 = vrsqrt.f32 %v2656_v56  ;;  %vm2664_vm9 = vweird.f32 %v2656_v56 }
 0x649   :  { %v2601_v49 = vsel %vm2600_vm1, %v3872_v15, %v2597_v5  ;;  %v2605_v13 = vmul.f32 0.5, %v2604_v25  ;;  %v2653_v0 = vadd.f32 %v2652_v20, %v2651_v27 }
 0x64a   :  { %v2612_v46 = vmul.f32 %v2601_v49, %v5902_v8  ;;  %v2614_v30 = vmul.f32 %v2601_v49, %v5905_v2  ;;  %v2697_v2 = vperm.slane %v5973_v61, 1 }
 0x64b   :  { %v2606_v57 = vsub.f32 1.5, %v2605_v13  ;;  %v2655_v36 = vmul.f32 %v2653_v0, %v6525_v44 }
 0x64c   :  { %v2687_v17 = vmul.f32 %v2683_v38, %v2612_v46  ;;  %v2689_v28 = vmul.f32 %v2683_v38, %v2614_v30 }
 0x64d   :  { %v2607_v58 = vmul.f32 %v3874_v53, %v2606_v57  ;;  %v2657_v48 = vadd.f32 1e-05, %v2655_v36 }
 0x64e   :  { %v2702_v37 = vadd.f32 %v2696_v43, %v2689_v28  ;;  %v2700_v4 = vadd.f32 %v2696_v43, %v2687_v17  ;;  %v3876_v8 = vpop.eup %3875 }
 0x64f   :  { %v2611_v18 = vsel %vm2610_vm7, %v3874_v53, %v2607_v58  ;;  %v2659_v15 = vmul.f32 %v3876_v8, %v2656_v56  ;;  %3877 = vrsqrt.f32 %v2657_v48  ;;  %vm2665_vm8 = vweird.f32 %v3876_v8 }
 0x650   :  { %v2710_v3 = vmax.f32 %v2702_v37, 0.0  ;;  %v2613_v12 = vmul.f32 %v2611_v18, %v5925_v34  ;;  %v2615_v47 = vmul.f32 %v2611_v18, %v5928_v35  ;;  %v2708_v45 = vmax.f32 %v2700_v4, 0.0  ;;  %vm2666_vm10 = vmor %vm2664_vm9, %vm2665_vm8 }
 0x651   :  { %v2660_v21 = vmul.f32 %v3876_v8, %v2659_v15  ;;  %vm2674_vm12 = vweird.f32 %v2657_v48 }
 0x652   :  { %v2688_v42 = vmul.f32 %v2684_v41, %v2613_v12  ;;  %v2690_v62 = vmul.f32 %v2684_v41, %v2615_v47  ;;  %v2716_v22 = vpack.c.bf16 %v2710_v3, %v2708_v45 }
 0x653   :  { %v2661_v51 = vmul.f32 0.5, %v2660_v21 }
 0x654   :  { %v2703_v50 = vadd.f32 %v2697_v2, %v2690_v62  ;;  %v2701_v24 = vadd.f32 %v2697_v2, %v2688_v42  ;;  %2728 = vmatmul.bf16.vlgmr.msrb.gmra.mxu0 %v2716_v22 }
 0x655   :  { %v2662_v40 = vsub.f32 1.5, %v2661_v51  ;;  %v3878_v29 = vpop.eup %3877 }
 0x656   :  { %v2711_v9 = vmax.f32 %v2703_v50, 0.0  ;;  %v2709_v10 = vmax.f32 %v2701_v24, 0.0  ;;  %v2669_v34 = vmul.f32 %v3878_v29, %v2657_v48  ;;  %vm2675_vm11 = vweird.f32 %v3878_v29 }
 0x657   :  { %v2663_v6 = vmul.f32 %v3876_v8, %v2662_v40  ;;  %vm2676_vm13 = vmor %vm2674_vm12, %vm2675_vm11 }
 0x658   :  { %v2717_v35 = vpack.c.bf16 %v2711_v9, %v2709_v10  ;;  %v2670_v14 = vmul.f32 %v3878_v29, %v2669_v34 }
 0x659   :  { %v2667_v55 = vsel %vm2666_vm10, %v3876_v8, %v2663_v6 }
 0x65a   :  { %2747 = vmatmul.bf16.vlgmr.msrb.gmra.mxu1 %v2717_v35  ;;  %v2678_v33 = vmul.f32 %v2667_v55, %v5946_v19  ;;  %v2680_v11 = vmul.f32 %v2667_v55, %v5949_v39  ;;  %v2671_v53 = vmul.f32 0.5, %v2670_v14 }
 0x65c   :  { %v2691_v54 = vmul.f32 %v2683_v38, %v2678_v33  ;;  %v2693_v60 = vmul.f32 %v2683_v38, %v2680_v11  ;;  %v2672_v23 = vsub.f32 1.5, %v2671_v53 }
 0x65e   :  { %v2704_v27 = vadd.f32 %v2696_v43, %v2691_v54  ;;  %v2706_v5 = vadd.f32 %v2696_v43, %v2693_v60  ;;  %v2673_v25 = vmul.f32 %v3878_v29, %v2672_v23 }
 0x660   :  { %v2712_v56 = vmax.f32 %v2704_v27, 0.0  ;;  %v2714_v20 = vmax.f32 %v2706_v5, 0.0  ;;  %v2677_v49 = vsel %vm2676_vm13, %v3878_v29, %v2673_v25 }
 0x661   :  { %v2679_v13 = vmul.f32 %v2677_v49, %v5958_v31  ;;  %v2681_v46 = vmul.f32 %v2677_v49, %v5961_v52 }
 0x662   :  { %v2718_v19 = vpack.c.bf16 %v2714_v20, %v2712_v56 }
 0x663   :  { %v2692_v39 = vmul.f32 %v2684_v41, %v2679_v13  ;;  %v2694_v30 = vmul.f32 %v2684_v41, %v2681_v46 }
 0x664   :  { %2733 = vmatmul.bf16.gmra.mxu0 %v2718_v19 }
 0x665   :  { %v2705_v0 = vadd.f32 %v2697_v2, %v2692_v39  ;;  %v2707_v38 = vadd.f32 %v2697_v2, %v2694_v30 }
 0x667   :  { %v2713_v57 = vmax.f32 %v2705_v0, 0.0  ;;  %v2715_v17 = vmax.f32 %v2707_v38, 0.0 }
 0x669   :  { %v2719_v28 = vpack.c.bf16 %v2715_v17, %v2713_v57 }
 0x66b   :  { %2752 = vmatmul.bf16.gmra.mxu1 %v2719_v28 }
 0x6d1   :  { %v2729_v43 = vpop.f32.mrf.mxu0 }
 0x6d7   :  { %v2748_v36 = vpop.f32.mrf.mxu1 }
 0x6d8   :  { %v2749_v48 = vadd.f32 %v2748_v36, %v2729_v43 }
 0x6d9   :  { %v2731_v58 = vpop.f32.mrf.mxu0 }
 0x6df   :  { %v2750_v37 = vpop.f32.mrf.mxu1 }
 0x6e0   :  { %v2751_v4 = vadd.f32 %v2750_v37, %v2731_v58 }
 0x6e1   :  { %v2734_v3 = vpop.f32.mrf.mxu0 }
 0x6e2   :  { %v2758_v8 = vadd.f32 %v2751_v4, %v2749_v48 }
 0x6e4   :  { %v2759_v31 = vrot.slane %v2758_v8, 4 }
 0x6e6   :  { %v2760_v18 = vadd.f32 %v2759_v31, %v2758_v8 }
 0x6e8   :  { %v2761_v52 = vrot.slane %v2760_v18, 2  ;;  %v2753_v47 = vpop.f32.mrf.mxu1 }
 0x6e9   :  { %v2736_v62 = vpop.f32.mrf.mxu0  ;;  %v2754_v22 = vadd.f32 %v2753_v47, %v2734_v3 }
 0x6ea   :  { %v2762_v12 = vadd.f32 %v2761_v52, %v2760_v18 }
 0x6ec   :  { %v2763_v41 = vrot.slane %v2762_v12, 1 }
 0x6ee   :  { %v2764_v15 = vadd.f32 %v2763_v41, %v2762_v12 }
 0x6f0   :  { %v2765_v2 = vmul.f32 %v2764_v15, %v6525_v44  ;;  %v2755_v21 = vpop.f32.mrf.mxu1 }
 0x6f1   :  { %v2756_v50 = vadd.f32 %v2755_v21, %v2736_v62 }
 0x6f2   :  { %v2766_v45 = vsub.f32 %v2749_v48, %v2765_v2  ;;  %v2767_v42 = vsub.f32 %v2751_v4, %v2765_v2 }
 0x6f3   :  { %v2791_v9 = vadd.f32 %v2756_v50, %v2754_v22 }
 0x6f4   :  { %v2768_v51 = vmul.f32 %v2766_v45, %v2766_v45  ;;  %v2769_v24 = vmul.f32 %v2767_v42, %v2767_v42 }
 0x6f5   :  { %v2792_v10 = vrot.slane %v2791_v9, 4 }
 0x6f6   :  { %v2770_v40 = vadd.f32 %v2769_v24, %v2768_v51  ;;  %v2827_v24 = vpop.xlane.xlu1 %2826 }
 0x6f7   :  { %v2793_v6 = vadd.f32 %v2792_v10, %v2791_v9 }
 0x6f8   :  { %v2771_v29 = vrot.slane %v2770_v40, 4 }
 0x6f9   :  { %v2794_v35 = vrot.slane %v2793_v6, 2 }
 0x6fa   :  { %v2772_v34 = vadd.f32 %v2771_v29, %v2770_v40  ;;  %v6008_v40 = vmax.f32 %v2827_v24, 1e-24 }
 0x6fb   :  { %v2795_v14 = vadd.f32 %v2794_v35, %v2793_v6 }
 0x6fc   :  { %v2773_v55 = vrot.slane %v2772_v34, 2  ;;  %vm2838_vm8 = vweird.f32 %v6008_v40 }
 0x6fd   :  { %v2796_v11 = vrot.slane %v2795_v14, 1 }
 0x6fe   :  { %v2774_v33 = vadd.f32 %v2773_v55, %v2772_v34  ;;  %v2829_v34 = vpop.xlane.xlu1 %2828 }
 0x6ff   :  { %v2797_v54 = vadd.f32 %v2796_v11, %v2795_v14  ;;  %v6017_v14 = vmax.f32 %v2829_v34, 1e-24 }
 0x700   :  { %v2775_v53 = vrot.slane %v2774_v33, 1 }
 0x701   :  { %v2798_v23 = vmul.f32 %v2797_v54, %v6525_v44 }
 0x702   :  { %v2776_v60 = vadd.f32 %v2775_v53, %v2774_v33 }
 0x703   :  { %v2799_v5 = vsub.f32 %v2754_v22, %v2798_v23  ;;  %v2800_v25 = vsub.f32 %v2756_v50, %v2798_v23  ;;  %v3099_v50 = vmul.f32 %v5850_v63, %v5850_v63 }
 0x704   :  { %v2777_v27 = vmul.f32 %v2776_v60, %v6525_v44 }
 0x705   :  { %v2801_v20 = vmul.f32 %v2799_v5, %v2799_v5  ;;  %v2802_v49 = vmul.f32 %v2800_v25, %v2800_v25 }
 0x706   :  { %v2778_v56 = vadd.f32 1e-05, %v2777_v27 }
 0x707   :  { %v2803_v13 = vadd.f32 %v2802_v49, %v2801_v20 }
 0x708   :  { %3879 = vrsqrt.f32 %v2778_v56  ;;  %vm2785_vm15 = vweird.f32 %v2778_v56 }
 0x709   :  { %v2804_v46 = vrot.slane %v2803_v13, 4 }
 0x70b   :  { %v2805_v19 = vadd.f32 %v2804_v46, %v2803_v13 }
 0x70d   :  { %v2806_v30 = vrot.slane %v2805_v19, 2 }
 0x70e   :  { %v3880_v39 = vpop.eup %3879 }
 0x70f   :  { %v2780_v0 = vmul.f32 %v3880_v39, %v2778_v56  ;;  %v2807_v38 = vadd.f32 %v2806_v30, %v2805_v19  ;;  %vm2786_vm14 = vweird.f32 %v3880_v39 }
 0x710   :  { %vm2787_vm0 = vmor %vm2785_vm15, %vm2786_vm14 }
 0x711   :  { %v2781_v57 = vmul.f32 %v3880_v39, %v2780_v0  ;;  %v2808_v17 = vrot.slane %v2807_v38, 1 }
 0x713   :  { %v2782_v28 = vmul.f32 0.5, %v2781_v57  ;;  %v2809_v43 = vadd.f32 %v2808_v17, %v2807_v38 }
 0x715   :  { %v2783_v36 = vsub.f32 1.5, %v2782_v28  ;;  %v2810_v37 = vmul.f32 %v2809_v43, %v6525_v44  ;;  %v3104_v28 = vpop.xlane.xlu1 %3103 }
 0x717   :  { %v2784_v58 = vmul.f32 %v3880_v39, %v2783_v36  ;;  %v2811_v4 = vadd.f32 1e-05, %v2810_v37 }
 0x719   :  { %v2788_v48 = vsel %vm2787_vm0, %v3880_v39, %v2784_v58  ;;  %3881 = vrsqrt.f32 %v2811_v4  ;;  %vm2818_vm3 = vweird.f32 %v2811_v4 }
 0x71a   :  { %v5992_v8 = vmul.f32 %v2788_v48, %v2767_v42  ;;  %v5996_v18 = vmul.f32 %v2788_v48, %v2766_v45 }
 0x71c   :  { %v3130_v31 = vmul.f32 %v5992_v8, %v5992_v8  ;;  %v3129_v12 = vmul.f32 %v5996_v18, %v5996_v18 }
 0x71e   :  { %3133 = vadd.xlane.f32.xlu2 %v3130_v31  ;;  %v6040_v31 = vmax.f32 %v3104_v28, 1e-24 }
 0x71f   :  { %v3882_v52 = vpop.eup %3881 }
 0x720   :  { %v2813_v3 = vmul.f32 %v3882_v52, %v2811_v4  ;;  %vm2819_vm2 = vweird.f32 %v3882_v52 }
 0x721   :  { %vm2820_vm4 = vmor %vm2818_vm3, %vm2819_vm2 }
 0x722   :  { %v2814_v47 = vmul.f32 %v3882_v52, %v2813_v3 }
 0x724   :  { %v2815_v41 = vmul.f32 0.5, %v2814_v47 }
 0x726   :  { %3131 = vadd.xlane.f32.xlu2 %v3129_v12  ;;  %v2816_v15 = vsub.f32 1.5, %v2815_v41 }
 0x728   :  { %v2817_v2 = vmul.f32 %v3882_v52, %v2816_v15 }
 0x72a   :  { %v2821_v42 = vsel %vm2820_vm4, %v3882_v52, %v2817_v2 }
 0x72b   :  { %v2823_v62 = vmul.f32 %v2821_v42, %v2800_v25  ;;  %v6000_v22 = vmul.f32 %v2821_v42, %v2799_v5 }
 0x72d   :  { %v2855_v21 = vmul.f32 %v2823_v62, %v2823_v62  ;;  %v2854_v45 = vmul.f32 %v6000_v22, %v6000_v22 }
 0x72f   :  { %2858 = vadd.xlane.f32.xlu0 %v2855_v21 }
 0x737   :  { %2856 = vadd.xlane.f32.xlu0 %v2854_v45 }
 0x73f   :  { %3101 = vadd.xlane.f32.xlu0 %v3099_v50 }
 0x791   :  { %v3134_v51 = vpop.xlane.xlu2 %3133 }
 0x792   :  { %v6006_v9 = vmax.f32 %v3134_v51, 1e-24 }
 0x794   :  { %3883 = vrsqrt.f32 %v6006_v9  ;;  %vm3153_vm12 = vweird.f32 %v6006_v9 }
 0x795   :  { %3885 = vrsqrt.f32 %v6008_v40 }
 0x799   :  { %v3132_v10 = vpop.xlane.xlu2 %3131 }
 0x79a   :  { %v6011_v29 = vmax.f32 %v3132_v10, 1e-24  ;;  %v6015_v55 = vpop.eup %3883 }
 0x79b   :  { %v6019_v33 = vpop.eup %3885  ;;  %v3148_v11 = vmul.f32 %v6015_v55, %v6006_v9  ;;  %vm3154_vm9 = vweird.f32 %v6015_v55 }
 0x79c   :  { %3887 = vrsqrt.f32 %v6011_v29  ;;  %v2833_v54 = vmul.f32 %v6019_v33, %v6008_v40  ;;  %vm2839_vm7 = vweird.f32 %v6019_v33  ;;  %vm6054_vm13 = vmor %vm3153_vm12, %vm3154_vm9  ;;  %vm3143_vm2 = vweird.f32 %v6011_v29 }
 0x79d   :  { %v3149_v25 = vmul.f32 %v6015_v55, %v3148_v11  ;;  %vm6049_vm11 = vmor %vm2838_vm8, %vm2839_vm7  ;;  %vm2918_vm12 = vcmask 130048  }
 0x79e   :  { %v2834_v20 = vmul.f32 %v6019_v33, %v2833_v54 }
 0x79f   :  { %v3150_v19 = vmul.f32 0.5, %v3149_v25 }
 0x7a0   :  { %v2835_v30 = vmul.f32 0.5, %v2834_v20 }
 0x7a1   :  { %v3151_v37 = vsub.f32 1.5, %v3150_v19  ;;  %v391_v19 = vlaneseq }
 0x7a2   :  { %v2859_v6 = vpop.xlane.xlu0 %2858  ;;  %v6023_v53 = vpop.eup %3887  ;;  %v2836_v4 = vsub.f32 1.5, %v2835_v30 }
 0x7a3   :  { %v2861_v35 = vmax.f32 %v2859_v6, 1e-24  ;;  %v3138_v56 = vmul.f32 %v6023_v53, %v6011_v29  ;;  %v3152_v15 = vmul.f32 %v6015_v55, %v3151_v37  ;;  %vm3144_vm15 = vweird.f32 %v6023_v53 }
 0x7a4   :  { %v2837_v42 = vmul.f32 %v6019_v33, %v2836_v4  ;;  %vm3145_vm3 = vmor %vm3143_vm2, %vm3144_vm15  ;;  %v6085_v30 = vand.u32 127, %v391_v19 }
 0x7a5   :  { %3889 = vrsqrt.f32 %v2861_v35  ;;  %v3139_v39 = vmul.f32 %v6023_v53, %v3138_v56  ;;  %vm2878_vm5 = vweird.f32 %v2861_v35  ;;  %v3156_v10 = vsel %vm6054_vm13, %v6015_v55, %v3152_v15 }
 0x7a6   :  { %3891 = vrsqrt.f32 %v6017_v14  ;;  %v2841_v9 = vsel %vm6049_vm11, %v6019_v33, %v2837_v42  ;;  %v3158_v55 = vmul.f32 %v3156_v10, %v5992_v8 }
 0x7a7   :  { %v3140_v48 = vmul.f32 0.5, %v3139_v39  ;;  %v2910_v39 = vshrl.u32 %v391_v19, 7 }
 0x7a9   :  { %v3141_v2 = vsub.f32 1.5, %v3140_v48  ;;  %vm2914_vm13 = vcmp.eq.s32.totalorder %v2910_v39, %v6085_v30  ;;  %v2911_v37 = vadd.s32 8, %v2910_v39 }
 0x7aa   :  { %v2857_v60 = vpop.xlane.xlu0 %2856 }
 0x7ab   :  { %v3890_v23 = vpop.eup %3889  ;;  %v2860_v27 = vmax.f32 %v2857_v60, 1e-24  ;;  %v3142_v6 = vmul.f32 %v6023_v53, %v3141_v2 }
 0x7ac   :  { %v2873_v5 = vmul.f32 %v3890_v23, %v2861_v35  ;;  %v6032_v13 = vpop.eup %3891  ;;  %vm2879_vm1 = vweird.f32 %v3890_v23 }
 0x7ad   :  { %3893 = vrsqrt.f32 %v2860_v27  ;;  %v2843_v17 = vmul.f32 %v6032_v13, %v6017_v14  ;;  %vm2880_vm6 = vmor %vm2878_vm5, %vm2879_vm1  ;;  %vm2868_vm14 = vweird.f32 %v2860_v27  ;;  %vm2849_vm4 = vweird.f32 %v6032_v13 }
 0x7ae   :  { %v2874_v49 = vmul.f32 %v3890_v23, %v2873_v5  ;;  %vm2848_vm1 = vweird.f32 %v6017_v14 }
 0x7af   :  { %v2844_v12 = vmul.f32 %v6032_v13, %v2843_v17  ;;  %vm2850_vm5 = vmor %vm2848_vm1, %vm2849_vm4 }
 0x7b0   :  { %v2875_v46 = vmul.f32 0.5, %v2874_v49 }
 0x7b1   :  { %v2845_v50 = vmul.f32 0.5, %v2844_v12 }
 0x7b2   :  { %v2876_v0 = vsub.f32 1.5, %v2875_v46  ;;  %v3102_v38 = vpop.xlane.xlu0 %3101 }
 0x7b3   :  { %v3894_v57 = vpop.eup %3893  ;;  %v6037_v43 = vmax.f32 %v3102_v38, 1e-24  ;;  %v2846_v35 = vsub.f32 1.5, %v2845_v50 }
 0x7b4   :  { %v2877_v36 = vmul.f32 %v3890_v23, %v2876_v0  ;;  %v2863_v58 = vmul.f32 %v3894_v57, %v2860_v27  ;;  %vm2869_vm10 = vweird.f32 %v3894_v57  ;;  %v2852_v27 = vmul.f32 %v2841_v9, %v5823_v7 }
 0x7b5   :  { %3895 = vrsqrt.f32 %v6037_v43  ;;  %vm2870_vm0 = vmor %vm2868_vm14, %vm2869_vm10  ;;  %v2847_v25 = vmul.f32 %v6032_v13, %v2846_v35  ;;  %vm3113_vm7 = vweird.f32 %v6037_v43  ;;  %vm3123_vm10 = vweird.f32 %v6040_v31 }
 0x7b6   :  { %v2881_v52 = vsel %vm2880_vm6, %v3890_v23, %v2877_v36  ;;  %v2864_v3 = vmul.f32 %v3894_v57, %v2863_v58  ;;  %3897 = vrsqrt.f32 %v6040_v31  ;;  %v3146_v23 = vsel %vm3145_vm3, %v6023_v53, %v3142_v6 }
 0x7b7   :  { %v2883_v47 = vmul.f32 %v2881_v52, %v2823_v62  ;;  %v2851_v53 = vsel %vm2850_vm5, %v6032_v13, %v2847_v25  ;;  %vm2915_vm14 = vcmp.eq.s32.totalorder %v2911_v37, %v6085_v30 }
 0x7b8   :  { %v2865_v41 = vmul.f32 0.5, %v2864_v3  ;;  %v2853_v7 = vmul.f32 %v2851_v53, %v5841_v32 }
 0x7b9   :  { %2898 = vmatpush.xpose.msrb.mxu2 %v2883_v47 }
 0x7ba   :  { %v2866_v21 = vsub.f32 1.5, %v2865_v41 }
 0x7bb   :  { %v3896_v45 = vpop.eup %3895 }
 0x7bc   :  { %v3108_v24 = vmul.f32 %v3896_v45, %v6037_v43  ;;  %v2867_v40 = vmul.f32 %v3894_v57, %v2866_v21  ;;  %v3898_v60 = vpop.eup %3897  ;;  %vm3114_vm6 = vweird.f32 %v3896_v45  ;;  %v4528_v21 = vmov 0.0  }
 0x7bd   :  { %v3118_v5 = vmul.f32 %v3898_v60, %v6040_v31  ;;  %vm3115_vm8 = vmor %vm3113_vm7, %vm3114_vm6  ;;  %vm3124_vm9 = vweird.f32 %v3898_v60  ;;  %vm2951_vm6 = vcmask 7168  }
 0x7be   :  { %v2871_v34 = vsel %vm2870_vm0, %v3894_v57, %v2867_v40  ;;  %v3109_v11 = vmul.f32 %v3896_v45, %v3108_v24  ;;  %vm3125_vm11 = vmor %vm3123_vm10, %vm3124_vm9 }
 0x7bf   :  { %v2882_v54 = vmul.f32 %v2871_v34, %v6000_v22  ;;  %v3157_v22 = vmul.f32 %v3146_v23, %v5996_v18  ;;  %v3119_v8 = vmul.f32 %v3898_v60, %v3118_v5 }
 0x7c0   :  { %v3110_v33 = vmul.f32 0.5, %v3109_v11 }
 0x7c1   :  { %2899 = vmatpush.xpose.msrb.mxu2 %v2882_v54  ;;  %v3120_v56 = vmul.f32 0.5, %v3119_v8 }
 0x7c2   :  { %v3111_v29 = vsub.f32 1.5, %v3110_v33 }
 0x7c3   :  { %v3121_v49 = vsub.f32 1.5, %v3120_v56 }
 0x7c4   :  { %2900 = vmatmul.f32.vlgmr.msrb.gmra.mxu2 %v2852_v27  ;;  %v3112_v20 = vmul.f32 %v3896_v45, %v3111_v29 }
 0x7c5   :  { %3173 = vmatpush.xpose.msra.mxu2 %v3158_v55  ;;  %v3122_v14 = vmul.f32 %v3898_v60, %v3121_v49 }
 0x7c6   :  { %v3116_v46 = vsel %vm3115_vm8, %v3896_v45, %v3112_v20 }
 0x7c7   :  { %v3127_v18 = vmul.f32 %v3116_v46, %v5850_v63  ;;  %v3126_v13 = vsel %vm3125_vm11, %v3898_v60, %v3122_v14 }
 0x7c8   :  { %v3128_v32 = vmul.f32 %v3126_v13, %v5847_v26 }
 0x7c9   :  { %3174 = vmatpush.xpose.msra.mxu2 %v3157_v22 }
 0x7cc   :  { %2903 = vmatmul.f32.gmra.mxu2 %v2853_v7 }
 0x7d4   :  { %3175 = vmatmul.f32.vlgmr.msra.gmra.mxu2 %v3127_v18 }
 0x7dc   :  { %3178 = vmatmul.f32.gmra.mxu2 %v3128_v32 }
 0x847   :  { %v2901_v0 = vpop.f32.mrf.mxu2 }
 0x848   :  { %v2907_v63 = vmul.f32 14.285714, %v2901_v0 }
 0x84a   :  { %v2925_v38 = vsel %vm2918_vm12, %v2907_v63, -inf  ;;  %v2916_v57 = vsel %vm2914_vm13, %v2907_v63, 0.0 }
 0x84b   :  { %2926 = vmax.xlane.f32.xlu2 %v2925_v38  ;;  %v2919_v26 = vsel %vm2918_vm12, %v2916_v57, 0.0 }
 0x84c   :  { %2920 = vadd.xlane.f32.xlu0 %v2919_v26 }
 0x84f   :  { %v2904_v17 = vpop.f32.mrf.mxu2 }
 0x850   :  { %v2908_v28 = vmul.f32 14.285714, %v2904_v17 }
 0x852   :  { %v2928_v43 = vsel %vm2918_vm12, %v2908_v28, -inf  ;;  %v2917_v31 = vsel %vm2915_vm14, %v2908_v28, 0.0 }
 0x853   :  { %v2922_v3 = vsel %vm2918_vm12, %v2917_v31, 0.0 }
 0x854   :  { %2929 = vmax.xlane.f32.xlu0 %v2928_v43 }
 0x857   :  { %v3176_v36 = vpop.f32.mrf.mxu2 }
 0x858   :  { %v3182_v58 = vmul.f32 14.285714, %v3176_v36 }
 0x85a   :  { %v3192_v48 = vsel %vm2918_vm12, %v3182_v58, -inf  ;;  %v3184_v15 = vsel %vm2914_vm13, %v3182_v58, 0.0 }
 0x85b   :  { %3193 = vmax.xlane.f32.xlu1 %v3192_v48  ;;  %v3186_v2 = vsel %vm2918_vm12, %v3184_v15, 0.0 }
 0x85f   :  { %v3179_v4 = vpop.f32.mrf.mxu2 }
 0x860   :  { %v3183_v52 = vmul.f32 14.285714, %v3179_v4 }
 0x862   :  { %v3195_v12 = vsel %vm2918_vm12, %v3183_v52, -inf  ;;  %v3185_v47 = vsel %vm2915_vm14, %v3183_v52, 0.0 }
 0x863   :  { %2923 = vadd.xlane.f32.xlu1 %v2922_v3  ;;  %3196 = vmax.xlane.f32.xlu2 %v3195_v12  ;;  %v3189_v41 = vsel %vm2918_vm12, %v3185_v47, 0.0 }
 0x864   :  { %3190 = vadd.xlane.f32.xlu0 %v3189_v41 }
 0x86b   :  { %3187 = vadd.xlane.f32.xlu2 %v3186_v2 }
 0x8be   :  { %v6106_v50 = vpop.xlane.xlu2 %2926 }
 0x8bf   :  { %v6101_v42 = vpop.xlane.xlu0 %2920  ;;  %v2931_v40 = vsub.f32 %v2907_v63, %v6106_v50 }
 0x8c0   :  { %vm2974_vm15 = vcmp.gt.f32.partialorder %v2907_v63, %v6101_v42 }
 0x8c1   :  { %v2976_v45 = vsel %vm2974_vm15, 1.0, %v4528_v21  ;;  %v2933_v6 = vmul.f32 1.442695, %v2931_v40 }
 0x8c2   :  { %v2978_v62 = vsel %vm2918_vm12, %v2976_v45, 0.0 }
 0x8c3   :  { %2979 = vadd.xlane.f32.xlu1 %v2978_v62  ;;  %3899 = vpow2.f32 %v2933_v6 }
 0x8c7   :  { %v6110_v24 = vpop.xlane.xlu0 %2929 }
 0x8c8   :  { %v2932_v11 = vsub.f32 %v2908_v28, %v6110_v24 }
 0x8c9   :  { %v3900_v22 = vpop.eup %3899 }
 0x8ca   :  { %v2935_v33 = vmul.f32 1.442695, %v2932_v11  ;;  %v2937_v7 = vsel %vm2918_vm12, %v3900_v22, 0.0 }
 0x8ce   :  { %v6108_v51 = vpop.xlane.xlu1 %3193 }
 0x8cf   :  { %v3198_v10 = vsub.f32 %v3182_v58, %v6108_v51 }
 0x8d1   :  { %v3200_v9 = vmul.f32 1.442695, %v3198_v10 }
 0x8d3   :  { %3901 = vpow2.f32 %v3200_v9 }
 0x8d4   :  { %3903 = vpow2.f32 %v2935_v33 }
 0x8d6   :  { %v6114_v34 = vpop.xlane.xlu1 %2923  ;;  %v6116_v35 = vpop.xlane.xlu2 %3196 }
 0x8d7   :  { %vm2975_vm0 = vcmp.gt.f32.partialorder %v2908_v28, %v6114_v34  ;;  %v6120_v54 = vpop.xlane.xlu0 %3190  ;;  %v3199_v60 = vsub.f32 %v3183_v52, %v6116_v35 }
 0x8d8   :  { %vm3241_vm2 = vcmp.gt.f32.partialorder %v3183_v52, %v6120_v54  ;;  %v2977_v55 = vsel %vm2975_vm0, 1.0, %v4528_v21 }
 0x8d9   :  { %v2981_v23 = vsel %vm2918_vm12, %v2977_v55, 0.0  ;;  %v3243_v27 = vsel %vm3241_vm2, 1.0, %v4528_v21  ;;  %v3202_v25 = vmul.f32 1.442695, %v3199_v60  ;;  %v3902_v29 = vpop.eup %3901 }
 0x8da   :  { %2982 = vadd.xlane.f32.xlu2 %v2981_v23  ;;  %v3247_v5 = vsel %vm2918_vm12, %v3243_v27, 0.0  ;;  %v3204_v20 = vsel %vm2918_vm12, %v3902_v29, 0.0  ;;  %v3904_v49 = vpop.eup %3903 }
 0x8db   :  { %3248 = vadd.xlane.f32.xlu1 %v3247_v5  ;;  %3905 = vpow2.f32 %v3202_v25  ;;  %v2940_v14 = vsel %vm2918_vm12, %v3904_v49, 0.0 }
 0x8de   :  { %v6128_v8 = vpop.xlane.xlu2 %3187 }
 0x8df   :  { %vm3240_vm3 = vcmp.gt.f32.partialorder %v3182_v58, %v6128_v8 }
 0x8e0   :  { %v3242_v53 = vsel %vm3240_vm3, 1.0, %v4528_v21 }
 0x8e1   :  { %v3244_v56 = vsel %vm2918_vm12, %v3242_v53, 0.0  ;;  %v3906_v46 = vpop.eup %3905 }
 0x8e2   :  { %2938 = vadd.xlane.f32.xlu2 %v2937_v7  ;;  %3245 = vadd.xlane.f32.xlu0 %v3244_v56  ;;  %v3207_v18 = vsel %vm2918_vm12, %v3906_v46, 0.0 }
 0x8e3   :  { %3205 = vadd.xlane.f32.xlu1 %v3204_v20 }
 0x8ea   :  { %3208 = vadd.xlane.f32.xlu2 %v3207_v18  ;;  %2941 = vadd.xlane.f32.xlu0 %v2940_v14 }
 0x936   :  { %v6137_v13 = vpop.xlane.xlu1 %2979 }
 0x937   :  { %v2986_v32 = vadd.f32 1.0, %v6137_v13  ;;  %vm3033_vm4 = vcmp.lt.f32.partialorder %v6137_v13, 1.0  ;;  %vm3050_vm1 = vcmp.lt.f32.partialorder %v6137_v13, 3.0  ;;  %vm3067_vm5 = vcmp.lt.f32.partialorder %v6137_v13, 5.0 }
 0x938   :  { %v3035_v57 = vsel %vm3033_vm4, 1.0, %v4528_v21  ;;  %v3052_v26 = vsel %vm3050_vm1, 1.0, %v4528_v21  ;;  %v3069_v28 = vsel %vm3067_vm5, 1.0, %v4528_v21  ;;  %vm2984_vm9 = vcmp.lt.f32.partialorder %v6137_v13, 10.0 }
 0x939   :  { %3907 = vrcp.f32 %v2986_v32  ;;  %vm2993_vm8 = vweird.f32 %v2986_v32  ;;  %v3037_v43 = vsel %vm2951_vm6, %v3035_v57, 0.0  ;;  %v3054_v36 = vsel %vm2951_vm6, %v3052_v26, 0.0 }
 0x93a   :  { %v3071_v48 = vsel %vm2951_vm6, %v3069_v28, 0.0  ;;  %v2997_v31 = vand.u32 2147483647, %v2986_v32  ;;  %v2999_v52 = vand.u32 2147483648, %v2986_v32  ;;  %v3084_v60 = vsel %vm2984_vm9, 1.0, %v4528_v21 }
 0x93b   :  { %v3086_v22 = vsel %vm2951_vm6, %v3084_v60, 0.0 }
 0x93c   :  { %v3000_v11 = vor.u32 1.1754944e-38, %v2999_v52  ;;  %vm2998_vm15 = vcmp.eq.f32.partialorder %v2997_v31, 8.507059e+37 }
 0x93f   :  { %v3908_v39 = vpop.eup %3907 }
 0x940   :  { %v2989_v0 = vmul.f32 %v3908_v39, %v2986_v32  ;;  %vm2994_vm7 = vweird.f32 %v3908_v39 }
 0x941   :  { %vm6149_vm10 = vmor %vm2993_vm8, %vm2994_vm7 }
 0x942   :  { %v2990_v63 = vsub.f32 1.0, %v2989_v0 }
 0x944   :  { %v2991_v38 = vmul.f32 %v3908_v39, %v2990_v63 }
 0x946   :  { %v2992_v17 = vadd.f32 %v3908_v39, %v2991_v38 }
 0x948   :  { %v2996_v4 = vsel %vm6149_vm10, %v3908_v39, %v2992_v17 }
 0x949   :  { %v3001_v23 = vsel %vm2998_vm15, %v3000_v11, %v2996_v4 }
 0x94a   :  { %v3018_v56 = vsel %vm2984_vm9, %v3001_v23, 0.0 }
 0x94b   :  { %v3020_v0 = vsel %vm2951_vm6, %v3018_v56, 0.0 }
 0x94d   :  { %v6153_v37 = vpop.xlane.xlu2 %2982 }
 0x94e   :  { %v6159_v3 = vadd.f32 1.0, %v6153_v37  ;;  %v6161_v12 = vpop.xlane.xlu1 %3248  ;;  %vm3034_vm11 = vcmp.lt.f32.partialorder %v6153_v37, 1.0  ;;  %vm3051_vm12 = vcmp.lt.f32.partialorder %v6153_v37, 3.0  ;;  %vm3068_vm13 = vcmp.lt.f32.partialorder %v6153_v37, 5.0 }
 0x94f   :  { %v6167_v47 = vadd.f32 1.0, %v6161_v12  ;;  %v3036_v41 = vsel %vm3034_vm11, 1.0, %v4528_v21  ;;  %v3053_v15 = vsel %vm3051_vm12, 1.0, %v4528_v21  ;;  %v3070_v2 = vsel %vm3068_vm13, 1.0, %v4528_v21 }
 0x950   :  { %3909 = vrcp.f32 %v6159_v3  ;;  %v3038_v45 = vsel %vm2951_vm6, %v3036_v41, 0.0  ;;  %v3055_v62 = vsel %vm2951_vm6, %v3053_v15, 0.0  ;;  %v3072_v40 = vsel %vm2951_vm6, %v3070_v2, 0.0 }
 0x951   :  { %3911 = vrcp.f32 %v6167_v47  ;;  %v3039_v10 = vadd.f32 %v3038_v45, %v3037_v43  ;;  %v3056_v6 = vadd.f32 %v3055_v62, %v3054_v36  ;;  %v3073_v9 = vadd.f32 %v3072_v40, %v3071_v48 }
 0x952   :  { %vm2985_vm14 = vcmp.lt.f32.partialorder %v6153_v37, 10.0  ;;  %vm3300_vm0 = vcmp.lt.f32.partialorder %v6161_v12, 1.0  ;;  %v3012_v49 = vand.u32 2147483647, %v6159_v3  ;;  %v3014_v46 = vand.u32 2147483648, %v6159_v3 }
 0x953   :  { %3040 = vadd.xlane.f32.xlu2 %v3039_v10  ;;  %3057 = vadd.xlane.f32.xlu0 %v3056_v6  ;;  %v3085_v55 = vsel %vm2985_vm14, 1.0, %v4528_v21  ;;  %v3302_v20 = vsel %vm3300_vm0, 1.0, %v4528_v21  ;;  %vm3008_vm3 = vweird.f32 %v6159_v3  ;;  %vm3251_vm1 = vcmp.lt.f32.partialorder %v6161_v12, 10.0 }
 0x954   :  { %3074 = vadd.xlane.f32.xlu1 %v3073_v9  ;;  %v3087_v29 = vsel %vm2951_vm6, %v3085_v55, 0.0  ;;  %v3304_v63 = vsel %vm2951_vm6, %v3302_v20, 0.0  ;;  %vm6209_vm5 = vcmp.eq.f32.partialorder %v3012_v49, 8.507059e+37  ;;  %v3015_v26 = vor.u32 1.1754944e-38, %v3014_v46 }
 0x955   :  { %v2939_v27 = vpop.xlane.xlu2 %2938  ;;  %v6184_v5 = vpop.xlane.xlu0 %3245  ;;  %v3088_v18 = vadd.f32 %v3087_v29, %v3086_v22  ;;  %vm3274_vm7 = vweird.f32 %v6167_v47  ;;  %v3280_v52 = vand.u32 2147483648, %v6167_v47  ;;  %v3278_v2 = vand.u32 2147483647, %v6167_v47 }
 0x956   :  { %v3910_v33 = vpop.eup %3909  ;;  %v6188_v25 = vadd.f32 1.0, %v6184_v5  ;;  %3913 = vlog2.f32 %v2939_v27  ;;  %vm3299_vm2 = vcmp.lt.f32.partialorder %v6184_v5, 1.0  ;;  %v3206_v32 = vpop.xlane.xlu1 %3205  ;;  %vm3250_vm8 = vcmp.lt.f32.partialorder %v6184_v5, 10.0 }
 0x957   :  { %v6192_v53 = vpop.eup %3911  ;;  %v3004_v7 = vmul.f32 %v3910_v33, %v6159_v3  ;;  %v3301_v39 = vsel %vm3299_vm2, 1.0, %v4528_v21  ;;  %vm3009_vm4 = vweird.f32 %v3910_v33  ;;  %v3350_v3 = vsel %vm3250_vm8, 1.0, %v4528_v21 }
 0x958   :  { %3915 = vrcp.f32 %v6188_v25  ;;  %v3270_v13 = vmul.f32 %v6192_v53, %v6167_v47  ;;  %v3303_v58 = vsel %vm2951_vm6, %v3301_v39, 0.0  ;;  %vm3010_vm9 = vmor %vm3008_vm3, %vm3009_vm4  ;;  %vm3275_vm10 = vweird.f32 %v6192_v53 }
 0x959   :  { %v3005_v14 = vsub.f32 1.0, %v3004_v7  ;;  %3917 = vlog2.f32 %v3206_v32  ;;  %v3305_v10 = vadd.f32 %v3304_v63, %v3303_v58  ;;  %v3263_v11 = vand.u32 2147483647, %v6188_v25  ;;  %vm3276_vm11 = vmor %vm3274_vm7, %vm3275_vm10 }
 0x95a   :  { %v3271_v17 = vsub.f32 1.0, %v3270_v13  ;;  %v3265_v55 = vand.u32 2147483648, %v6188_v25  ;;  %v3281_v27 = vor.u32 1.1754944e-38, %v3280_v52  ;;  %vm3279_vm13 = vcmp.eq.f32.partialorder %v3278_v2, 8.507059e+37 }
 0x95b   :  { %3089 = vadd.xlane.f32.xlu2 %v3088_v18  ;;  %v3006_v38 = vmul.f32 %v3910_v33, %v3005_v14  ;;  %v3351_v47 = vsel %vm3251_vm1, 1.0, %v4528_v21  ;;  %v3352_v18 = vsel %vm2951_vm6, %v3350_v3, 0.0  ;;  %vm3264_vm0 = vcmp.eq.f32.partialorder %v3263_v11, 8.507059e+37 }
 0x95c   :  { %v3914_v28 = vpop.eup %3913  ;;  %v3272_v31 = vmul.f32 %v6192_v53, %v3271_v17  ;;  %v3266_v14 = vor.u32 1.1754944e-38, %v3265_v55  ;;  %v3353_v32 = vsel %vm2951_vm6, %v3351_v47, 0.0  ;;  %vm3333_vm2 = vcmp.lt.f32.partialorder %v6184_v5, 5.0 }
 0x95d   :  { %v3209_v43 = vpop.xlane.xlu2 %3208  ;;  %v2942_v36 = vpop.xlane.xlu0 %2941  ;;  %v3007_v48 = vadd.f32 %v3910_v33, %v3006_v38  ;;  %v2944_v45 = vmul.f32 0.6931472, %v3914_v28  ;;  %vm3334_vm3 = vcmp.lt.f32.partialorder %v6161_v12, 5.0  ;;  %vm3316_vm4 = vcmp.lt.f32.partialorder %v6184_v5, 3.0 }
 0x95e   :  { %v3916_v4 = vpop.eup %3915  ;;  %3919 = vlog2.f32 %v3209_v43  ;;  %v3273_v40 = vadd.f32 %v6192_v53, %v3272_v31  ;;  %v3336_v31 = vsel %vm3334_vm3, 1.0, %v4528_v21 }
 0x95f   :  { %3921 = vlog2.f32 %v2942_v36  ;;  %v3011_v41 = vsel %vm3010_vm9, %v3910_v33, %v3007_v48  ;;  %v3255_v15 = vmul.f32 %v3916_v4, %v6188_v25  ;;  %v3918_v33 = vpop.eup %3917  ;;  %vm3260_vm12 = vweird.f32 %v3916_v4 }
 0x960   :  { %v3016_v62 = vsel %vm6209_vm5, %v3015_v26, %v3011_v41  ;;  %v3277_v23 = vsel %vm3276_vm11, %v6192_v53, %v3273_v40  ;;  %v2947_v7 = vadd.f32 %v2944_v45, %v6106_v50 }
 0x961   :  { %v3019_v6 = vsel %vm2985_vm14, %v3016_v62, 0.0  ;;  %v3256_v9 = vsub.f32 1.0, %v3255_v15  ;;  %v3282_v56 = vsel %vm3279_vm13, %v3281_v27, %v3277_v23  ;;  %vm3259_vm14 = vweird.f32 %v6188_v25 }
 0x962   :  { %v3021_v60 = vsel %vm2951_vm6, %v3019_v6, 0.0  ;;  %vm3261_vm15 = vmor %vm3259_vm14, %vm3260_vm12  ;;  %v3285_v50 = vsel %vm3251_vm1, %v3282_v56, 0.0  ;;  %v2949_v38 = vsub.f32 %v2947_v7, %v6101_v42  ;;  %v3354_v25 = vadd.f32 %v3353_v32, %v3352_v18 }
 0x963   :  { %3306 = vadd.xlane.f32.xlu2 %v3305_v10  ;;  %v3022_v22 = vadd.f32 %v3021_v60, %v3020_v0  ;;  %v3257_v29 = vmul.f32 %v3916_v4, %v3256_v9  ;;  %v3211_v0 = vmul.f32 0.6931472, %v3918_v33  ;;  %v3287_v28 = vsel %vm2951_vm6, %v3285_v50, 0.0 }
 0x964   :  { %v3920_v37 = vpop.eup %3919  ;;  %v2952_v42 = vsel %vm2951_vm6, %v2949_v38, 0.0  ;;  %vm3317_vm1 = vcmp.lt.f32.partialorder %v6161_v12, 3.0 }
 0x965   :  { %v3922_v20 = vpop.eup %3921  ;;  %3023 = vadd.xlane.f32.xlu1 %v3022_v22  ;;  %v3258_v49 = vadd.f32 %v3916_v4, %v3257_v29  ;;  %v3213_v53 = vmul.f32 0.6931472, %v3920_v37 }
 0x966   :  { %v2946_v46 = vmul.f32 0.6931472, %v3922_v20 }
 0x967   :  { %v3262_v39 = vsel %vm3261_vm15, %v3916_v4, %v3258_v49  ;;  %v3215_v26 = vadd.f32 %v3213_v53, %v6116_v35  ;;  %v3335_v35 = vsel %vm3333_vm2, 1.0, %v4528_v21 }
 0x968   :  { %v2948_v13 = vadd.f32 %v2946_v46, %v6110_v24  ;;  %v3267_v63 = vsel %vm3264_vm0, %v3266_v14, %v3262_v39  ;;  %v3214_v24 = vadd.f32 %v3211_v0, %v6108_v51  ;;  %v3338_v51 = vsel %vm2951_vm6, %v3336_v31, 0.0 }
 0x969   :  { %v3284_v57 = vsel %vm3250_vm8, %v3267_v63, 0.0  ;;  %v3217_v4 = vsub.f32 %v3215_v26, %v6120_v54  ;;  %v3318_v54 = vsel %vm3316_vm4, 1.0, %v4528_v21 }
 0x96a   :  { %v3286_v17 = vsel %vm2951_vm6, %v3284_v57, 0.0  ;;  %v2950_v43 = vsub.f32 %v2948_v13, %v6114_v34  ;;  %v3337_v34 = vsel %vm2951_vm6, %v3335_v35, 0.0  ;;  %v3216_v52 = vsub.f32 %v3214_v24, %v6128_v8 }
 0x96b   :  { %3355 = vadd.xlane.f32.xlu2 %v3354_v25  ;;  %v3288_v36 = vadd.f32 %v3287_v28, %v3286_v17  ;;  %v3219_v41 = vsel %vm2951_vm6, %v3217_v4, 0.0  ;;  %v3339_v15 = vadd.f32 %v3338_v51, %v3337_v34  ;;  %v3319_v8 = vsel %vm3317_vm1, 1.0, %v4528_v21 }
 0x96c   :  { %v2953_v58 = vsel %vm2951_vm6, %v2950_v43, 0.0  ;;  %v3218_v2 = vsel %vm2951_vm6, %v3216_v52, 0.0  ;;  %v3320_v62 = vsel %vm2951_vm6, %v3318_v54, 0.0  ;;  %v3321_v3 = vsel %vm2951_vm6, %v3319_v8, 0.0 }
 0x96d   :  { %3289 = vadd.xlane.f32.xlu1 %v3288_v36  ;;  %v2954_v48 = vadd.f32 %v2953_v58, %v2952_v42  ;;  %v3220_v45 = vadd.f32 %v3219_v41, %v3218_v2  ;;  %v3322_v40 = vadd.f32 %v3321_v3, %v3320_v62 }
 0x96f   :  { %2955 = vadd.xlane.f32.xlu0 %v2954_v48 }
 0x975   :  { %3340 = vadd.xlane.f32.xlu1 %v3339_v15 }
 0x977   :  { %3221 = vadd.xlane.f32.xlu0 %v3220_v45 }
 0x97f   :  { %3323 = vadd.xlane.f32.xlu0 %v3322_v40 }
 0x980   :  { %4272 = shalt.err (!%p4269_p7)
}
 0x981   :  { %3419 = dma.vmem_to_hbm [thread:$0]  %s3412_s8, 512, %s3414_s30, [#allocation19], %s4520_s1, %s4520_s1, %s4521_s10  }
 0x982   :  { %s3461_s26 = sshll.u32 %s4676_s12, 4  ;;  %s4530_s15 = smov [#allocation24]   ;;  %s3462_s26 = int_to_ptr.hbm [resolvable:$true] %s3461_s26 }
 0x983   :  { %s3459_s21 = sshll.u32 %s4530_s15, 4  ;;  %s4285_s25 = sshra.s32 %s3462_s26, 4  ;;  %s3460_s21 = int_to_ptr.vmem [resolvable:$true] %s3459_s21  ;;  %s4286_s25 = int_to_ptr.hbm [resolvable:$true] %s4285_s25 }
 0x984   :  { %s4287_s13 = scalar_lea.hbm %s4286_s25, 512  ;;  %s4289_s0 = scalar_lea.hbm %s4676_s12, 512 }
 0x985   :  { %p4288_p8 = scmp.ne.s32.totalorder %s4286_s25, %s4287_s13  ;;  %p4290_p9 = scmp.lt.s32.totalorder %s4286_s25, %s4676_s12 }
 0x986   :  { %p4291_p10 = scmp.lt.s32.totalorder %s4289_s0, %s4287_s13 }
 0x988   :  { %p4292_p11 = por %p4291_p10, %p4290_p9 }
 0x98a   :  { %p4293_p12 = pnand %p4292_p11, %p4288_p8 }
 0x98c   :  { %4296 = shalt.err (!%p4293_p12)
}
 0x98d   :  { %s6559_s9 = sld [smem:[#allocation49_spill]]  ;;  %s4531_s2 = smov [#allocation20]  }
 0x98e   :  { %3467 = dma.vmem_to_hbm [thread:$0]  %s3460_s21, 8192, %s3462_s26, [#allocation25], %s4515_s22, %s4515_s22, %s4516_s23  }
 0x98f   :  { %s3424_s29 = sshll.u32 %s4531_s2, 4  ;;  %s3425_s29 = int_to_ptr.vmem [resolvable:$true] %s3424_s29 }
 0x993   :  { %s3426_s5 = sshll.u32 %s6559_s9, 4  ;;  %s4313_s14 = scalar_lea.hbm %s6559_s9, 128  ;;  %s3427_s5 = int_to_ptr.hbm [resolvable:$true] %s3426_s5 }
 0x994   :  { %s4309_s3 = sshra.s32 %s3427_s5, 4  ;;  %s4310_s3 = int_to_ptr.hbm [resolvable:$true] %s4309_s3 }
 0x995   :  { %s4311_s12 = scalar_lea.hbm %s4310_s3, 128  ;;  %p4314_p0 = scmp.lt.s32.totalorder %s4310_s3, %s6559_s9 }
 0x996   :  { %p4312_p13 = scmp.ne.s32.totalorder %s4310_s3, %s4311_s12  ;;  %p4315_p1 = scmp.lt.s32.totalorder %s4313_s14, %s4311_s12 }
 0x998   :  { %p4316_p2 = por %p4315_p1, %p4314_p0 }
 0x99a   :  { %p4317_p3 = pnand %p4316_p2, %p4312_p13 }
 0x9c6   :  { %v3041_v21 = vpop.xlane.xlu2 %3040 }
 0x9c7   :  { %4320 = shalt.err (!%p4317_p3)
}
 0x9c8   :  { %3432 = dma.vmem_to_hbm [thread:$0]  %s3425_s29, 2048, %s3427_s5, [#allocation19], %s4515_s22, %s4515_s22, %s4516_s23   ;;  %v3075_v12 = vpop.xlane.xlu1 %3074  ;;  %v3058_v6 = vpop.xlane.xlu0 %3057  ;;  %v3042_v11 = vrot.slane %v3041_v21, 4  ;;  %vm6310_vm6 = vcmp.lt.s32.totalorder %v391_v19, 256 }
 0x9c9   :  { %v3076_v60 = vrot.slane %v3075_v12, 4  ;;  %v3059_v55 = vrot.slane %v3058_v6, 4  ;;  %s6560_s22 = sld [smem:[#allocation50_spill]]  ;;  %s4532_s19 = smov [#allocation21]   ;;  %395 = vst.msk [vmem:[#allocation21] sm:$0x3] %vm6310_vm6, %v5742_v59 }
 0x9ca   :  { %v3043_v22 = vadd.f32 %v3042_v11, %v3041_v21  ;;  %s6561_s23 = sld [smem:[#allocation51_spill]]  ;;  %s6293_s6 = sshll.u32 %s4532_s19, 4  ;;  %s3439_s6 = int_to_ptr.vmem [resolvable:$true] %s6293_s6 }
 0x9cb   :  { %v3077_v37 = vadd.f32 %v3076_v60, %v3075_v12  ;;  %v3060_v7 = vadd.f32 %v3059_v55, %v3058_v6  ;;  %s4533_s11 = smov [#allocation27]   ;;  %s3486_s30 = sshll.u32 %s4686_s27, 4  ;;  %s6307_s30 = int_to_ptr.hbm [resolvable:$true] %s3486_s30 }
 0x9cc   :  { %v3044_v18 = vrot.slane %v3043_v22, 2  ;;  %s6297_s24 = sshll.u32 %s4533_s11, 4  ;;  %s4534_s16 = smov [#allocation23]   ;;  %s3485_s24 = int_to_ptr.vmem [resolvable:$true] %s6297_s24 }
 0x9cd   :  { %v3078_v14 = vrot.slane %v3077_v37, 2  ;;  %v3061_v32 = vrot.slane %v3060_v7, 2  ;;  %s6300_s8 = sshll.u32 %s4534_s16, 4  ;;  %s4535_s17 = smov [#allocation26]   ;;  %s3450_s8 = int_to_ptr.vmem [resolvable:$true] %s6300_s8 }
 0x9ce   :  { %v3090_v5 = vpop.xlane.xlu2 %3089  ;;  %v3045_v26 = vadd.f32 %v3044_v18, %v3043_v22  ;;  %s6303_s7 = sshll.u32 %s4535_s17, 4  ;;  %s3475_s26 = sshll.u32 %s4681_s20, 4  ;;  %s3474_s7 = int_to_ptr.vmem [resolvable:$true] %s6303_s7  ;;  %s6319_s26 = int_to_ptr.hbm [resolvable:$true] %s3475_s26 }
 0x9cf   :  { %v3091_v23 = vrot.slane %v3090_v5, 4  ;;  %v3062_v28 = vadd.f32 %v3061_v32, %v3060_v7  ;;  %v3079_v43 = vadd.f32 %v3078_v14, %v3077_v37  ;;  %s3440_s28 = sshll.u32 %s6560_s22, 4  ;;  %s4337_s25 = scalar_lea.hbm %s6560_s22, 2  ;;  %s3441_s28 = int_to_ptr.hbm [resolvable:$true] %s3440_s28 }
 0x9d0   :  { %v3046_v52 = vrot.slane %v3045_v26, 1  ;;  %s3451_s18 = sshll.u32 %s6561_s23, 4  ;;  %s4333_s15 = sshra.s32 %s3441_s28, 4  ;;  %s3452_s18 = int_to_ptr.hbm [resolvable:$true] %s3451_s18  ;;  %s4334_s15 = int_to_ptr.hbm [resolvable:$true] %s4333_s15 }
 0x9d1   :  { %v3092_v47 = vadd.f32 %v3091_v23, %v3090_v5  ;;  %v3063_v15 = vrot.slane %v3062_v28, 1  ;;  %v3080_v45 = vrot.slane %v3079_v43, 1  ;;  %s4335_s21 = scalar_lea.hbm %s4334_s15, 2  ;;  %p4338_p5 = scmp.lt.s32.totalorder %s4334_s15, %s6560_s22 }
 0x9d2   :  { %v3047_v12 = vadd.f32 %v3046_v52, %v3045_v26  ;;  %p4336_p4 = scmp.ne.s32.totalorder %s4334_s15, %s4335_s21  ;;  %p4339_p6 = scmp.lt.s32.totalorder %s4337_s25, %s4335_s21 }
 0x9d3   :  { %v3093_v50 = vrot.slane %v3092_v47, 2  ;;  %v3064_v5 = vadd.f32 %v3063_v15, %v3062_v28 }
 0x9d4   :  { %p4340_p7 = por %p4339_p6, %p4338_p5 }
 0x9d5   :  { %v3094_v48 = vadd.f32 %v3093_v50, %v3092_v47 }
 0x9d6   :  { %v3307_v27 = vpop.xlane.xlu2 %3306  ;;  %p4341_p8 = pnand %p4340_p7, %p4336_p4 }
 0x9d7   :  { %v3308_v56 = vrot.slane %v3307_v27, 4  ;;  %v3095_v54 = vrot.slane %v3094_v48, 1 }
 0x9d8   :  { %v3024_v10 = vpop.xlane.xlu1 %3023 }
 0x9d9   :  { %v3025_v9 = vrot.slane %v3024_v10, 4  ;;  %v3309_v0 = vadd.f32 %v3308_v56, %v3307_v27  ;;  %v3096_v11 = vadd.f32 %v3095_v54, %v3094_v48 }
 0x9db   :  { %v3026_v33 = vadd.f32 %v3025_v9, %v3024_v10  ;;  %v3310_v36 = vrot.slane %v3309_v0, 2  ;;  %v3081_v9 = vadd.f32 %v3080_v45, %v3079_v43 }
 0x9dd   :  { %v3027_v53 = vrot.slane %v3026_v33, 2  ;;  %v3311_v21 = vadd.f32 %v3310_v36, %v3309_v0 }
 0x9de   :  { %v3356_v25 = vpop.xlane.xlu2 %3355 }
 0x9df   :  { %v3028_v38 = vadd.f32 %v3027_v53, %v3026_v33  ;;  %v3357_v35 = vrot.slane %v3356_v25, 4  ;;  %v3312_v22 = vrot.slane %v3311_v21, 1 }
 0x9e0   :  { %v3290_v29 = vpop.xlane.xlu1 %3289 }
 0x9e1   :  { %v3291_v20 = vrot.slane %v3290_v29, 4  ;;  %v3029_v34 = vrot.slane %v3028_v38, 1  ;;  %v3358_v62 = vadd.f32 %v3357_v35, %v3356_v25 }
 0x9e2   :  { %v2956_v49 = vpop.xlane.xlu0 %2955 }
 0x9e3   :  { %v2957_v46 = vrot.slane %v2956_v49, 4  ;;  %v3292_v13 = vadd.f32 %v3291_v20, %v3290_v29  ;;  %v3030_v40 = vadd.f32 %v3029_v34, %v3028_v38  ;;  %v3359_v23 = vrot.slane %v3358_v62, 2 }
 0x9e4   :  { %v3313_v20 = vadd.f32 %v3312_v22, %v3311_v21 }
 0x9e5   :  { %v2958_v39 = vadd.f32 %v2957_v46, %v2956_v49  ;;  %v3293_v24 = vrot.slane %v3292_v13, 2  ;;  %v3360_v47 = vadd.f32 %v3359_v23, %v3358_v62 }
 0x9e7   :  { %v2959_v63 = vrot.slane %v2958_v39, 2  ;;  %v3294_v8 = vadd.f32 %v3293_v24, %v3292_v13  ;;  %v3361_v18 = vrot.slane %v3360_v47, 1 }
 0x9e8   :  { %v3341_v57 = vpop.xlane.xlu1 %3340 }
 0x9e9   :  { %v2960_v17 = vadd.f32 %v2959_v63, %v2958_v39  ;;  %v3342_v42 = vrot.slane %v3341_v57, 4  ;;  %v3295_v55 = vrot.slane %v3294_v8, 1  ;;  %v3362_v39 = vadd.f32 %v3361_v18, %v3360_v47 }
 0x9ea   :  { %v3222_v58 = vpop.xlane.xlu0 %3221 }
 0x9eb   :  { %v3223_v4 = vrot.slane %v3222_v58, 4  ;;  %v2961_v31 = vrot.slane %v2960_v17, 1  ;;  %v3343_v2 = vadd.f32 %v3342_v42, %v3341_v57  ;;  %v3296_v7 = vadd.f32 %v3295_v55, %v3294_v8 }
 0x9ed   :  { %v3224_v51 = vadd.f32 %v3223_v4, %v3222_v58  ;;  %v2962_v41 = vadd.f32 %v2961_v31, %v2960_v17  ;;  %v3344_v6 = vrot.slane %v3343_v2, 2 }
 0x9ef   :  { %v3225_v3 = vrot.slane %v3224_v51, 2  ;;  %3750 = vpush %v2962_v41 }
 0x9f0   :  { %3752 = vpush %v6525_v44  ;;  %v3345_v44 = vadd.f32 %v3344_v6, %v3343_v2 }
 0x9f1   :  { %3754 = vpush %v3030_v40  ;;  %v3226_v10 = vadd.f32 %v3225_v3, %v3224_v51 }
 0x9f2   :  { %3756 = vpush %v3047_v12  ;;  %v3324_v60 = vpop.xlane.xlu0 %3323  ;;  %v3346_v53 = vrot.slane %v3345_v44, 1 }
 0x9f3   :  { %3758 = vpush %v3064_v5  ;;  %v3325_v27 = vrot.slane %v3324_v60, 4  ;;  %v3227_v33 = vrot.slane %v3226_v10, 1 }
 0x9f4   :  { %3760 = vpush %v3081_v9  ;;  %v3347_v32 = vadd.f32 %v3346_v53, %v3345_v44 }
 0x9f5   :  { %3762 = vpush %v3096_v11  ;;  %v3326_v29 = vadd.f32 %v3325_v27, %v3324_v60  ;;  %v3228_v37 = vadd.f32 %v3227_v33, %v3226_v10 }
 0x9f7   :  { %v3327_v56 = vrot.slane %v3326_v29, 2  ;;  %3764 = vpush %v3228_v37 }
 0x9f8   :  { %3766 = vpush %v3296_v7 }
 0x9f9   :  { %v3328_v49 = vadd.f32 %v3327_v56, %v3326_v29  ;;  %3768 = vpush %v3313_v20 }
 0x9fb   :  { %v3329_v46 = vrot.slane %v3328_v49, 1 }
 0x9fd   :  { %v3330_v14 = vadd.f32 %v3329_v46, %v3328_v49 }
 0x9ff   :  { %3770 = vpush %v3330_v14 }
 0xa00   :  { %3772 = vpush %v3347_v32 }
 0xa01   :  { %3774 = vpush %v3362_v39 }
 0xa02   :  { %4344 = shalt.err (!%p4341_p8)
}
 0xa03   :  { %3443 = dma.vmem_to_hbm [thread:$0]  %s3439_s6, 32, %s3441_s28, [#allocation22]   ;;  %401 = vst.msk [vmem:[#allocation23] sm:$0x3] %vm6310_vm6, %v5749_v1 }
 0xa04   :  { %855 = vst.msk [vmem:[#allocation26] sm:$0x3] %vm6310_vm6, %v5970_v16  ;;  %s4357_s13 = sshra.s32 %s3452_s18, 4  ;;  %s4361_s9 = scalar_lea.hbm %s6561_s23, 2  ;;  %s4358_s13 = int_to_ptr.hbm [resolvable:$true] %s4357_s13 }
 0xa05   :  { %s4359_s0 = scalar_lea.hbm %s4358_s13, 2  ;;  %p4362_p10 = scmp.lt.s32.totalorder %s4358_s13, %s6561_s23 }
 0xa06   :  { %p4360_p9 = scmp.ne.s32.totalorder %s4358_s13, %s4359_s0  ;;  %p4363_p11 = scmp.lt.s32.totalorder %s4361_s9, %s4359_s0 }
 0xa08   :  { %p4364_p12 = por %p4363_p11, %p4362_p10 }
 0xa0a   :  { %p4365_p13 = pnand %p4364_p12, %p4360_p9 }
 0xa0c   :  { %4368 = shalt.err (!%p4365_p13)
}
 0xa0d   :  { %3454 = dma.vmem_to_hbm [thread:$0]  %s3450_s8, 32, %s3452_s18, [#allocation22]   ;;  %861 = vst.msk [vmem:[#allocation27] sm:$0x3] %vm6310_vm6, %v5973_v61 }
 0xa0e   :  { %s4381_s2 = sshra.s32 %s6319_s26, 4  ;;  %s4385_s5 = scalar_lea.hbm %s4681_s20, 2  ;;  %s4382_s2 = int_to_ptr.hbm [resolvable:$true] %s4381_s2 }
 0xa0f   :  { %s4383_s29 = scalar_lea.hbm %s4382_s2, 2  ;;  %p4386_p1 = scmp.lt.s32.totalorder %s4382_s2, %s4681_s20 }
 0xa10   :  { %p4384_p0 = scmp.ne.s32.totalorder %s4382_s2, %s4383_s29  ;;  %p4387_p2 = scmp.lt.s32.totalorder %s4385_s5, %s4383_s29 }
 0xa12   :  { %p4388_p3 = por %p4387_p2, %p4386_p1 }
 0xa14   :  { %p4389_p4 = pnand %p4388_p3, %p4384_p0 }
 0xa16   :  { %4392 = shalt.err (!%p4389_p4)
}
 0xa17   :  { %3478 = dma.vmem_to_hbm [thread:$0]  %s3474_s7, 32, %s6319_s26, [#allocation25]  }
 0xa18   :  { %s4405_s3 = sshra.s32 %s6307_s30, 4  ;;  %s4409_s14 = scalar_lea.hbm %s4686_s27, 2  ;;  %s4406_s3 = int_to_ptr.hbm [resolvable:$true] %s4405_s3 }
 0xa19   :  { %s4407_s12 = scalar_lea.hbm %s4406_s3, 2  ;;  %p4410_p6 = scmp.lt.s32.totalorder %s4406_s3, %s4686_s27 }
 0xa1a   :  { %p4408_p5 = scmp.ne.s32.totalorder %s4406_s3, %s4407_s12  ;;  %p4411_p7 = scmp.lt.s32.totalorder %s4409_s14, %s4407_s12 }
 0xa1c   :  { %p4412_p8 = por %p4411_p7, %p4410_p6 }
 0xa1e   :  { %p4413_p9 = pnand %p4412_p8, %p4408_p5 }
 0xa20   :  { %4416 = shalt.err (!%p4413_p9)
}
 0xa21   :  { %s6564_s20 = sld [smem:[#allocation47_spill]]  ;;  %s3751_s22 = spop %3750  ;;  %vm3376_vm5 = vcmp.eq.s32.totalorder %v6085_v30, 0  ;;  %vm3379_vm7 = vcmp.eq.s32.totalorder %v6085_v30, 1  ;;  %vm3382_vm8 = vcmp.eq.s32.totalorder %v6085_v30, 2  ;;  %vm3385_vm9 = vcmp.eq.s32.totalorder %v6085_v30, 3 }
 0xa22   :  { %3489 = dma.vmem_to_hbm [thread:$0]  %s3485_s24, 32, %s6307_s30, [#allocation28]   ;;  %vm3388_vm10 = vcmp.eq.s32.totalorder %v6085_v30, 4  ;;  %vm3391_vm11 = vcmp.eq.s32.totalorder %v6085_v30, 5  ;;  %vm3394_vm12 = vcmask 57344  }
 0xa23   :  { %s3753_s23 = spop %3752  ;;  %s4536_s17 = smov [#allocation17]  }
 0xa24   :  { %s2972_s19 = smul.f32 %s3753_s23, %s3751_s22  ;;  %s3755_s6 = spop %3754 }
 0xa25   :  { %s3757_s28 = spop %3756  ;;  %s3032_s8 = smul.f32 0.0625, %s3755_s6 }
 0xa26   :  { %s6348_s11 = spop %3758  ;;  %s2973_s18 = smul.f32 0.14, %s2972_s19 }
 0xa27   :  { %s3403_s16 = sshll.u32 %s6564_s20, 4  ;;  %s6351_s27 = spop %3760  ;;  %s3404_s16 = int_to_ptr.hbm [resolvable:$true] %s3403_s16 }
 0xa28   :  { %s6353_s7 = sshll.u32 %s4536_s17, 4  ;;  %s3049_s26 = smul.f32 6.25, %s3757_s28  ;;  %s3402_s7 = int_to_ptr.vmem [resolvable:$true] %s6353_s7 }
 0xa29   :  { %s6355_s15 = spop %3762  ;;  %s3066_s24 = smul.f32 6.25, %s6348_s11 }
 0xa2a   :  { %s3765_s30 = spop %3764  ;;  %s3083_s5 = smul.f32 6.25, %s6351_s27 }
 0xa2b   :  { %s3238_s21 = smul.f32 %s3765_s30, %s3753_s23  ;;  %s3767_s25 = spop %3766 }
 0xa2c   :  { %s3298_s13 = smul.f32 0.0625, %s3767_s25  ;;  %s3769_s0 = spop %3768 }
 0xa2d   :  { %s3239_s9 = smul.f32 0.14, %s3238_s21  ;;  %s3496_s19 = sshll.u32 %s4691_s4, 4  ;;  %s3497_s19 = int_to_ptr.hbm [resolvable:$true] %s3496_s19 }
 0xa2e   :  { %s3366_s2 = sadd.f32 %s3298_s13, %s3032_s8  ;;  %s3315_s29 = smul.f32 6.25, %s3769_s0 }
 0xa2f   :  { %s3365_s3 = sadd.f32 %s3239_s9, %s2973_s18  ;;  %s3098_s22 = smul.f32 6.25, %s6355_s15 }
 0xa30   :  { %s3367_s12 = smul.f32 0.5, %s3366_s2  ;;  %s3368_s14 = sadd.f32 %s3315_s29, %s3049_s26 }
 0xa31   :  { %v3377_v59 = vstv %s3365_s3  ;;  %s3771_s28 = spop %3770  ;;  %s4537_s26 = smov [#allocation29]  }
 0xa32   :  { %s3369_s6 = smul.f32 0.5, %s3368_s14  ;;  %v3378_v1 = vsel %vm3376_vm5, %v3377_v59, 0.0  ;;  %v3380_v16 = vstv %s3367_s12  ;;  %s3773_s11 = spop %3772 }
 0xa33   :  { %s3332_s23 = smul.f32 6.25, %s3771_s28  ;;  %s3775_s8 = spop %3774  ;;  %v3381_v61 = vsel %vm3379_vm7, %v3380_v16, %v3378_v1 }
 0xa34   :  { %s3349_s17 = smul.f32 6.25, %s3773_s11  ;;  %s6364_s15 = sshll.u32 %s4537_s26, 4  ;;  %v3383_v19 = vstv %s3369_s6  ;;  %s3495_s15 = int_to_ptr.vmem [resolvable:$true] %s6364_s15 }
 0xa35   :  { %s3370_s30 = sadd.f32 %s3332_s23, %s3066_s24  ;;  %s3364_s27 = smul.f32 6.25, %s3775_s8  ;;  %v3384_v0 = vsel %vm3382_vm8, %v3383_v19, %v3381_v61 }
 0xa36   :  { %s3372_s18 = sadd.f32 %s3349_s17, %s3083_s5  ;;  %s4429_s0 = sshra.s32 %s3497_s19, 4  ;;  %s4430_s0 = int_to_ptr.hbm [resolvable:$true] %s4429_s0 }
 0xa37   :  { %s3371_s21 = smul.f32 0.5, %s3370_s30  ;;  %s3374_s25 = sadd.f32 %s3364_s27, %s3098_s22 }
 0xa38   :  { %s3373_s13 = smul.f32 0.5, %s3372_s18  ;;  %s4431_s9 = scalar_lea.hbm %s4430_s0, 256 }
 0xa39   :  { %v3386_v13 = vstv %s3371_s21  ;;  %s3375_s24 = smul.f32 0.5, %s3374_s25  ;;  %p4432_p10 = scmp.ne.s32.totalorder %s4430_s0, %s4431_s9 }
 0xa3a   :  { %v3387_v63 = vsel %vm3385_vm9, %v3386_v13, %v3384_v0  ;;  %v3389_v38 = vstv %s3373_s13  ;;  %s4433_s2 = scalar_lea.hbm %s4691_s4, 256  ;;  %p4434_p11 = scmp.lt.s32.totalorder %s4430_s0, %s4691_s4 }
 0xa3b   :  { %v3390_v25 = vsel %vm3388_vm10, %v3389_v38, %v3387_v63  ;;  %v3392_v57 = vstv %s3375_s24  ;;  %p4435_p12 = scmp.lt.s32.totalorder %s4433_s2, %s4431_s9 }
 0xa3c   :  { %v3393_v26 = vsel %vm3391_vm11, %v3392_v57, %v3390_v25 }
 0xa3d   :  { %p4436_p13 = por %p4435_p12, %p4434_p11 }
 0xa3f   :  { %p4437_p0 = pnand %p4436_p13, %p4432_p10 }
 0xa41   :  { %4440 = shalt.err (!%p4437_p0)
}
 0xa42   :  { %3502 = dma.vmem_to_hbm [thread:$0]  %s3495_s15, 4096, %s3497_s19, [#allocation28], %s4520_s1, %s4520_s1, %s4521_s10   ;;  %3395 = vst.msk [vmem:[#allocation17] sm:$0x1] %vm3394_vm12, %v3393_v26 }
 0xa43   :  { %s4453_s29 = sshra.s32 %s3404_s16, 4  ;;  %s4457_s3 = scalar_lea.hbm %s6564_s20, 1  ;;  %s4454_s29 = int_to_ptr.hbm [resolvable:$true] %s4453_s29 }
 0xa44   :  { %s4455_s5 = scalar_lea.hbm %s4454_s29, 1  ;;  %p4458_p2 = scmp.lt.s32.totalorder %s4454_s29, %s6564_s20 }
 0xa45   :  { %p4456_p1 = scmp.ne.s32.totalorder %s4454_s29, %s4455_s5  ;;  %p4459_p3 = scmp.lt.s32.totalorder %s4457_s3, %s4455_s5 }
 0xa47   :  { %p4460_p4 = por %p4459_p3, %p4458_p2 }
 0xa49   :  { %p4461_p5 = pnand %p4460_p4, %p4456_p1 }
 0xa4b   :  { %4464 = shalt.err (!%p4461_p5)
}
 0xa4c   :  { %3406 = dma.vmem_to_hbm [thread:$0]  %s3402_s7, 16, %s3404_s16, [#allocation4]  }
 0xa4d   :  { %4475 = dma.done.wait [#allocation4], 16  }
 0xa4e   :  { %4476 = vsyncadd [#allocation4], 4294967280 }
 0xa4f   :  { %4477 = dma.done.wait [#allocation19], 2560  }
 0xa50   :  { %4478 = vsyncadd [#allocation19], 4294964736 }
 0xa51   :  { %4479 = dma.done.wait [#allocation22], 64  }
 0xa52   :  { %4480 = vsyncadd [#allocation22], 4294967232 }
 0xa53   :  { %4481 = dma.done.wait [#allocation25], 8224  }
 0xa54   :  { %4482 = vsyncadd [#allocation25], 4294959072 }
 0xa55   :  { %4483 = dma.done.wait [#allocation28], 4128  }
 0xa56   :  { %4484 = vsyncadd [#allocation28], 4294963168 }
 0xa57   :  { %3539 = vsyncpa [#allocation3], 1 }
 0xa58   :  { %3540 = vsyncpa [#allocation6], 1 }
 0xa59   :  { %3541 = vsyncpa [#allocation9], 1 }
 0xa5a   :  { %3542 = vsyncpa [#allocation12], 1 }
 0xa5b   :  { %3543 = vsyncpa [#allocation15], 1 }
 0xa5c   :  { %3544 = vsyncpa [#allocation4], 1 }
 0xa5d   :  { %3545 = vsyncpa [#allocation19], 1 }
 0xa5e   :  { %3546 = vsyncpa [#allocation22], 1 }
 0xa5f   :  { %3547 = vsyncpa [#allocation25], 1 }
 0xa60   :  { %3548 = vsyncpa [#allocation28], 1 }

</bundles_post_ra>
